<compile_context>
chip_gen: v7x
topology: tpu7x:2x2x1
jax: 0.10.0
libtpu: 0.0.40
codegen_flags: <defaults>
</compile_context>

<pallas_src>
import functools
import math

import jax
import jax.numpy as jnp
from jax import lax
from jax.experimental import pallas as pl
from jax.experimental.pallas import tpu as pltpu


# ----------------------------------------------------------------------------
# Pass 1: depthwise 3x3 + LayerNorm (channels_last, eps=1e-6) + pwconv1 + GELU.
# Writes h to HBM and accumulates sum(h^2) over spatial tiles (GRN statistics).
# ----------------------------------------------------------------------------
def _pass1_kernel(xslab_ref, expand_ref, wtap_ref, bdw_ref, w1_ref, b1_ref,
                  h_ref, ssq_ref):
    i = pl.program_id(1)                      # spatial-tile index (reduction axis)
    th2, wp2, c = xslab_ref.shape             # (tile_h+2, W+2, C) padded slab
    th, w = th2 - 2, wp2 - 2
    dim = w1_ref.shape[0]

    slab = xslab_ref[...]                                            # f32

    # Channel expansion x_exp[..., oc] = x[..., oc // ffn] via a tiny one-hot matmul.
    xe = jnp.dot(slab.reshape(th2 * wp2, c), expand_ref[...],
                 preferred_element_type=jnp.float32).reshape(th2, wp2, dim)

    # Depthwise 3x3 = 9 shifted broadcast multiply-adds on the VPU (no MXU waste).
    y = xe[0:th, 0:w, :] * wtap_ref[0] + bdw_ref[...]
    for t in range(1, 9):
        kh, kw = divmod(t, 3)
        y = y + xe[kh:kh + th, kw:kw + w, :] * wtap_ref[t]

    # LayerNorm_GRN semantics: channels_last LayerNorm, eps = 1e-6.
    # (The affine ln_w/ln_b is folded into w1/b1 in the wrapper.)
    mu = jnp.mean(y, axis=-1, keepdims=True)
    yc = y - mu
    var = jnp.mean(yc * yc, axis=-1, keepdims=True)
    yhat = yc * lax.rsqrt(var + 1e-6)

    # pwconv1 (MXU, f32 accumulation) + exact-erf GELU (matches torch.nn.GELU()).
    yb = yhat.reshape(th * w, dim).astype(w1_ref.dtype)
    pre = jnp.dot(yb, w1_ref[...], preferred_element_type=jnp.float32) + b1_ref[...]
    hh = 0.5 * pre * (1.0 + lax.erf(pre * (1.0 / math.sqrt(2.0))))

    # GRN pass 1: accumulate sum(h^2) over the spatial tiles (output-resident acc).
    @pl.when(i == 0)
    def _init():
        ssq_ref[...] = jnp.zeros_like(ssq_ref)
    ssq_ref[...] += jnp.sum(hh * hh, axis=0, keepdims=True)

    h_ref[...] = hh.astype(h_ref.dtype)


# ----------------------------------------------------------------------------
# Pass 2: GRN apply (h * (gamma*nx + 1) + beta) + pwconv2 + residual.
# ----------------------------------------------------------------------------
def _pass2_kernel(h_ref, xres_ref, scale_ref, beta_ref, w2_ref, b2_ref, out_ref):
    hh = h_ref[...].astype(jnp.float32)                              # (P, dim)
    hg = hh * scale_ref[...] + beta_ref[...]                         # GRN (scale precomputed)
    o = jnp.dot(hg.astype(w2_ref.dtype), w2_ref[...],
                preferred_element_type=jnp.float32) + b2_ref[...]    # (P, C)
    out_ref[...] = (o + xres_ref[...]).astype(out_ref.dtype)


# ----------------------------------------------------------------------------
# Wrapper
# ----------------------------------------------------------------------------
def convnextv2_forward(x_nchw, params, ffn_factor, *, tile_rows=None,
                       use_bf16=True, vmem_limit_bytes=None):
    N, C, H, W = x_nchw.shape
    dim = C * ffn_factor
    f32 = jnp.float32
    cdt = jnp.bfloat16 if use_bf16 else jnp.float32   # MXU operand / h-storage dtype

    # ---- spatial row tile (divisor of H). Bigger tiles amortize grid overhead; keep
    # ---- the per-tile f32 intermediates well inside the default scoped VMEM limit.
    if tile_rows is None:
        target = max(1, 2048 // W)
        tile_rows = 1
        for d in range(1, H + 1):
            if H % d == 0 and d <= target:
                tile_rows = d
    assert H % tile_rows == 0, "tile_rows must divide H"
    th = tile_rows
    nH = H // th
    P = th * W

    # ---- layout / parameter glue (no heavy compute) -------------------------------
    x_nhwc = jnp.transpose(x_nchw, (0, 2, 3, 1))                     # (N,H,W,C)
    xpad = jnp.pad(x_nhwc, ((0, 0), (1, 1), (1, 1), (0, 0)))
    # overlapping (halo=1) row slabs so the 3x3 taps are built inside the kernel
    xslabs = jnp.stack([xpad[:, i * th:i * th + th + 2] for i in range(nH)], axis=1)
    x_res = x_nhwc.reshape(N, nH, P, C)

    # one-hot channel expansion (C, dim): x_exp[..., oc] = x[..., oc // ffn]
    group = jnp.arange(dim) // ffn_factor
    expand = (jnp.arange(C)[:, None] == group[None, :]).astype(f32)

    w_taps = jnp.transpose(params['w_dw'], (1, 2, 0)).reshape(9, 1, dim).astype(f32)
    b_dw = params['b_dw'].reshape(1, dim).astype(f32)

    # fold LayerNorm affine into pwconv1 (removes two full-width VPU passes)
    w1f = (params['ln_w'][:, None] * params['w1']).astype(cdt)
    b1f = (params['ln_b'] @ params['w1'] + params['b1']).reshape(1, dim).astype(f32)

    w2 = params['w2'].astype(cdt)
    b2 = params['b2'].reshape(1, C).astype(f32)

    def _full(a):
        return pl.BlockSpec(a.shape, lambda n, i, _nd=a.ndim: (0,) * _nd)

    cp1 = pltpu.CompilerParams(dimension_semantics=("parallel", "arbitrary"),
                               vmem_limit_bytes=vmem_limit_bytes)
    cp2 = pltpu.CompilerParams(dimension_semantics=("parallel", "parallel"),
                               vmem_limit_bytes=vmem_limit_bytes)

    # ---------------- pass 1 ----------------
    h_buf, ssq = pl.pallas_call(
        _pass1_kernel,
        grid=(N, nH),
        in_specs=[
            pl.BlockSpec((None, None, th + 2, W + 2, C),
                         lambda n, i: (n, i, 0, 0, 0)),
            _full(expand), _full(w_taps), _full(b_dw), _full(w1f), _full(b1f),
        ],
        out_specs=[
            pl.BlockSpec((None, None, P, dim), lambda n, i: (n, i, 0, 0)),
            pl.BlockSpec((None, 1, dim), lambda n, i: (n, 0, 0)),
        ],
        out_shape=[
            jax.ShapeDtypeStruct((N, nH, P, dim), cdt),      # h intermediate
            jax.ShapeDtypeStruct((N, 1, dim), f32),          # sum(h^2) per (n, channel)
        ],
        compiler_params=cp1,
    )(xslabs, expand, w_taps, b_dw, w1f, b1f)

    # ---- GRN global statistics: tiny O(N*dim) glue between the two passes ----
    gx = jnp.sqrt(ssq)                                                # (N,1,dim)
    nx = gx / (jnp.mean(gx, axis=-1, keepdims=True) + 1e-6)
    scale = (params['gamma'].reshape(1, 1, dim) * nx + 1.0).astype(f32)
    beta = params['beta'].reshape(1, dim).astype(f32)

    # ---------------- pass 2 ----------------
    out = pl.pallas_call(
        _pass2_kernel,
        grid=(N, nH),
        in_specs=[
            pl.BlockSpec((None, None, P, dim), lambda n, i: (n, i, 0, 0)),
            pl.BlockSpec((None, None, P, C), lambda n, i: (n, i, 0, 0)),
            pl.BlockSpec((None, 1, dim), lambda n, i: (n, 0, 0)),
            _full(beta), _full(w2), _full(b2),
        ],
        out_specs=pl.BlockSpec((None, None, P, C), lambda n, i: (n, i, 0, 0)),
        out_shape=jax.ShapeDtypeStruct((N, nH, P, C), x_nchw.dtype),
        compiler_params=cp2,
    )(h_buf, x_res, scale, beta, w2, b2)

    return jnp.transpose(out.reshape(N, H, W, C), (0, 3, 1, 2))


# ----------------------------------------------------------------------------
# Pure-JAX reference mirroring the PyTorch module (all f32).
# ----------------------------------------------------------------------------
def convnextv2_reference(x, params, ffn_factor):
    N, C, H, W = x.shape
    dim = C * ffn_factor
    w = params['w_dw'].reshape(dim, 1, 3, 3)
    y = lax.conv_general_dilated(
        x, w, (1, 1), ((1, 1), (1, 1)),
        feature_group_count=C, dimension_numbers=('NCHW', 'OIHW', 'NCHW'))
    y = y + params['b_dw'][None, :, None, None]
    y = jnp.transpose(y, (0, 2, 3, 1))                      # NHWC
    mu = y.mean(-1, keepdims=True)
    var = ((y - mu) ** 2).mean(-1, keepdims=True)
    y = (y - mu) / jnp.sqrt(var + 1e-6)
    y = y * params['ln_w'] + params['ln_b']                 # LayerNorm_GRN (channels_last)
    h = y @ params['w1'] + params['b1']
    h = jax.nn.gelu(h, approximate=False)
    gx = jnp.sqrt(jnp.sum(h * h, axis=(1, 2), keepdims=True))
    nx = gx / (gx.mean(-1, keepdims=True) + 1e-6)
    h = params['gamma'] * (h * nx) + params['beta'] + h
    o = h @ params['w2'] + params['b2']
    return x + jnp.transpose(o, (0, 3, 1, 2))


if __name__ == "__main__":
    in_c, ffn_factor = 4, 4
    dim = in_c * ffn_factor
    N, H, W = 2, 16, 16

    key = jax.random.PRNGKey(0)
    ks = jax.random.split(key, 11)
    f32 = jnp.float32
    params = {
        'w_dw': 0.1 * jax.random.normal(ks[0], (dim, 3, 3), f32),
        'b_dw': 0.1 * jax.random.normal(ks[1], (dim,), f32),
        'ln_w': 1.0 + 0.1 * jax.random.normal(ks[2], (dim,), f32),
        'ln_b': 0.1 * jax.random.normal(ks[3], (dim,), f32),
        'w1': 0.1 * jax.random.normal(ks[4], (dim, dim), f32),
        'b1': 0.1 * jax.random.normal(ks[5], (dim,), f32),
        'gamma': 0.1 * jax.random.normal(ks[6], (dim,), f32),
        'beta': 0.1 * jax.random.normal(ks[7], (dim,), f32),
        'w2': 0.1 * jax.random.normal(ks[8], (dim, in_c), f32),
        'b2': 0.1 * jax.random.normal(ks[9], (in_c,), f32),
    }
    x = jax.random.normal(ks[10], (N, in_c, H, W), f32)

    ref = jax.block_until_ready(convnextv2_reference(x, params, ffn_factor))

    # Performance configuration (bf16 MXU operands); tile_rows=8 -> 2 spatial tiles
    # so the cross-tile (two-pass) GRN accumulation is exercised.
    fwd_bf16 = jax.jit(functools.partial(convnextv2_forward, ffn_factor=ffn_factor,
                                         tile_rows=8, use_bf16=True))
    out = jax.block_until_ready(fwd_bf16(x, params))
    assert out.shape == x.shape and out.dtype == x.dtype
    # bf16 matmul operands bound deviation by ~dim * 2^-9 * |activation| at these scales.
    assert jnp.allclose(out, ref, rtol=1e-2, atol=1e-2), float(jnp.max(jnp.abs(out - ref)))

    # Full-f32 configuration must match the reference tightly.
    fwd_f32 = jax.jit(functools.partial(convnextv2_forward, ffn_factor=ffn_factor,
                                        tile_rows=8, use_bf16=False))
    out32 = jax.block_until_ready(fwd_f32(x, params))
    assert jnp.allclose(out32, ref, rtol=2e-3, atol=2e-3), float(jnp.max(jnp.abs(out32 - ref)))

    print("KERNEL_OK")
</pallas_src>

<mosaic_0001>
module attributes {stable_mosaic.version = 11 : i64} {
  func.func @_pass1_kernel(%arg0: i32, %arg1: i32, %arg2: memref<1x1x10x18x4xf32, #tpu.memory_space<vmem>>, %arg3: memref<4x16xf32, #tpu.memory_space<vmem>>, %arg4: memref<9x1x16xf32, #tpu.memory_space<vmem>>, %arg5: memref<1x16xf32, #tpu.memory_space<vmem>>, %arg6: memref<16x16xbf16, #tpu.memory_space<vmem>>, %arg7: memref<1x16xf32, #tpu.memory_space<vmem>>, %arg8: memref<1x1x128x16xbf16, #tpu.memory_space<vmem>>, %arg9: memref<1x1x16xf32, #tpu.memory_space<vmem>>) attributes {dimension_semantics = [#tpu.dimension_semantics<parallel>, #tpu.dimension_semantics<arbitrary>], iteration_bounds = array<i64: 2, 2>, scalar_prefetch = 0 : i64, scratch_operands = 0 : i64, tpu.core_type = #tpu.core_type<tc>, window_params = [{transform_indices = @transform_0, window_bounds = array<i64: 1, 1, 10, 18, 4>}, {pipeline_mode = #tpu.pipeline_mode<synchronous>, transform_indices = @transform_1, window_bounds = array<i64: 4, 16>}, {pipeline_mode = #tpu.pipeline_mode<synchronous>, transform_indices = @transform_2, window_bounds = array<i64: 9, 1, 16>}, {pipeline_mode = #tpu.pipeline_mode<synchronous>, transform_indices = @transform_3, window_bounds = array<i64: 1, 16>}, {pipeline_mode = #tpu.pipeline_mode<synchronous>, transform_indices = @transform_4, window_bounds = array<i64: 16, 16>}, {pipeline_mode = #tpu.pipeline_mode<synchronous>, transform_indices = @transform_5, window_bounds = array<i64: 1, 16>}, {transform_indices = @transform_6, window_bounds = array<i64: 1, 1, 128, 16>}, {transform_indices = @transform_7, window_bounds = array<i64: 1, 1, 16>}]} {
    %c0 = arith.constant 0 : index
    %c0_0 = arith.constant 0 : index
    %c0_1 = arith.constant 0 : index
    %c0_2 = arith.constant 0 : index
    %c0_3 = arith.constant 0 : index
    %0 = vector.load %arg2[%c0, %c0_0, %c0_1, %c0_2, %c0_3] : memref<1x1x10x18x4xf32, #tpu.memory_space<vmem>>, vector<1x1x10x18x4xf32>
    %1 = vector.shape_cast %0 : vector<1x1x10x18x4xf32> to vector<10x18x4xf32>
    %2 = vector.shape_cast %1 : vector<10x18x4xf32> to vector<180x4xf32>
    %c0_4 = arith.constant 0 : index
    %c0_5 = arith.constant 0 : index
    %3 = vector.load %arg3[%c0_4, %c0_5] : memref<4x16xf32, #tpu.memory_space<vmem>>, vector<4x16xf32>
    %cst = arith.constant dense<0.000000e+00> : vector<180x16xf32>
    %4 = tpu.matmul %2, %3, %cst {dimension_numbers = #tpu.dot_dimension_numbers<[1], [0], [0], [1], [0, 0, 1, 1], [], []>} : vector<180x4xf32>, vector<4x16xf32>, vector<180x16xf32> -> vector<180x16xf32>
    %5 = vector.shape_cast %4 : vector<180x16xf32> to vector<10x18x16xf32>
    %6 = vector.extract_strided_slice %5 {offsets = [0, 0, 0], sizes = [8, 16, 16], strides = [1, 1, 1]} : vector<10x18x16xf32> to vector<8x16x16xf32>
    %c0_6 = arith.constant 0 : index
    %c0_7 = arith.constant 0 : index
    %c0_8 = arith.constant 0 : index
    %7 = vector.load %arg4[%c0_6, %c0_7, %c0_8] : memref<9x1x16xf32, #tpu.memory_space<vmem>>, vector<1x1x16xf32>
    %8 = vector.shape_cast %7 : vector<1x1x16xf32> to vector<1x16xf32>
    %9 = vector.shape_cast %8 : vector<1x16xf32> to vector<1x1x16xf32>
    %10 = vector.broadcast %9 : vector<1x1x16xf32> to vector<8x16x16xf32>
    %11 = arith.mulf %6, %10 : vector<8x16x16xf32>
    %c0_9 = arith.constant 0 : index
    %c0_10 = arith.constant 0 : index
    %12 = vector.load %arg5[%c0_9, %c0_10] : memref<1x16xf32, #tpu.memory_space<vmem>>, vector<1x16xf32>
    %13 = vector.shape_cast %12 : vector<1x16xf32> to vector<1x1x16xf32>
    %14 = vector.broadcast %13 : vector<1x1x16xf32> to vector<8x16x16xf32>
    %15 = arith.addf %11, %14 : vector<8x16x16xf32>
    %16 = vector.extract_strided_slice %5 {offsets = [0, 1, 0], sizes = [8, 16, 16], strides = [1, 1, 1]} : vector<10x18x16xf32> to vector<8x16x16xf32>
    %c1 = arith.constant 1 : index
    %c0_11 = arith.constant 0 : index
    %c0_12 = arith.constant 0 : index
    %17 = vector.load %arg4[%c1, %c0_11, %c0_12] : memref<9x1x16xf32, #tpu.memory_space<vmem>>, vector<1x1x16xf32>
    %18 = vector.shape_cast %17 : vector<1x1x16xf32> to vector<1x16xf32>
    %19 = vector.shape_cast %18 : vector<1x16xf32> to vector<1x1x16xf32>
    %20 = vector.broadcast %19 : vector<1x1x16xf32> to vector<8x16x16xf32>
    %21 = arith.mulf %16, %20 : vector<8x16x16xf32>
    %22 = arith.addf %15, %21 : vector<8x16x16xf32>
    %23 = vector.extract_strided_slice %5 {offsets = [0, 2, 0], sizes = [8, 16, 16], strides = [1, 1, 1]} : vector<10x18x16xf32> to vector<8x16x16xf32>
    %c2 = arith.constant 2 : index
    %c0_13 = arith.constant 0 : index
    %c0_14 = arith.constant 0 : index
    %24 = vector.load %arg4[%c2, %c0_13, %c0_14] : memref<9x1x16xf32, #tpu.memory_space<vmem>>, vector<1x1x16xf32>
    %25 = vector.shape_cast %24 : vector<1x1x16xf32> to vector<1x16xf32>
    %26 = vector.shape_cast %25 : vector<1x16xf32> to vector<1x1x16xf32>
    %27 = vector.broadcast %26 : vector<1x1x16xf32> to vector<8x16x16xf32>
    %28 = arith.mulf %23, %27 : vector<8x16x16xf32>
    %29 = arith.addf %22, %28 : vector<8x16x16xf32>
    %30 = vector.extract_strided_slice %5 {offsets = [1, 0, 0], sizes = [8, 16, 16], strides = [1, 1, 1]} : vector<10x18x16xf32> to vector<8x16x16xf32>
    %c3 = arith.constant 3 : index
    %c0_15 = arith.constant 0 : index
    %c0_16 = arith.constant 0 : index
    %31 = vector.load %arg4[%c3, %c0_15, %c0_16] : memref<9x1x16xf32, #tpu.memory_space<vmem>>, vector<1x1x16xf32>
    %32 = vector.shape_cast %31 : vector<1x1x16xf32> to vector<1x16xf32>
    %33 = vector.shape_cast %32 : vector<1x16xf32> to vector<1x1x16xf32>
    %34 = vector.broadcast %33 : vector<1x1x16xf32> to vector<8x16x16xf32>
    %35 = arith.mulf %30, %34 : vector<8x16x16xf32>
    %36 = arith.addf %29, %35 : vector<8x16x16xf32>
    %37 = vector.extract_strided_slice %5 {offsets = [1, 1, 0], sizes = [8, 16, 16], strides = [1, 1, 1]} : vector<10x18x16xf32> to vector<8x16x16xf32>
    %c4 = arith.constant 4 : index
    %c0_17 = arith.constant 0 : index
    %c0_18 = arith.constant 0 : index
    %38 = vector.load %arg4[%c4, %c0_17, %c0_18] : memref<9x1x16xf32, #tpu.memory_space<vmem>>, vector<1x1x16xf32>
    %39 = vector.shape_cast %38 : vector<1x1x16xf32> to vector<1x16xf32>
    %40 = vector.shape_cast %39 : vector<1x16xf32> to vector<1x1x16xf32>
    %41 = vector.broadcast %40 : vector<1x1x16xf32> to vector<8x16x16xf32>
    %42 = arith.mulf %37, %41 : vector<8x16x16xf32>
    %43 = arith.addf %36, %42 : vector<8x16x16xf32>
    %44 = vector.extract_strided_slice %5 {offsets = [1, 2, 0], sizes = [8, 16, 16], strides = [1, 1, 1]} : vector<10x18x16xf32> to vector<8x16x16xf32>
    %c5 = arith.constant 5 : index
    %c0_19 = arith.constant 0 : index
    %c0_20 = arith.constant 0 : index
    %45 = vector.load %arg4[%c5, %c0_19, %c0_20] : memref<9x1x16xf32, #tpu.memory_space<vmem>>, vector<1x1x16xf32>
    %46 = vector.shape_cast %45 : vector<1x1x16xf32> to vector<1x16xf32>
    %47 = vector.shape_cast %46 : vector<1x16xf32> to vector<1x1x16xf32>
    %48 = vector.broadcast %47 : vector<1x1x16xf32> to vector<8x16x16xf32>
    %49 = arith.mulf %44, %48 : vector<8x16x16xf32>
    %50 = arith.addf %43, %49 : vector<8x16x16xf32>
    %51 = vector.extract_strided_slice %5 {offsets = [2, 0, 0], sizes = [8, 16, 16], strides = [1, 1, 1]} : vector<10x18x16xf32> to vector<8x16x16xf32>
    %c6 = arith.constant 6 : index
    %c0_21 = arith.constant 0 : index
    %c0_22 = arith.constant 0 : index
    %52 = vector.load %arg4[%c6, %c0_21, %c0_22] : memref<9x1x16xf32, #tpu.memory_space<vmem>>, vector<1x1x16xf32>
    %53 = vector.shape_cast %52 : vector<1x1x16xf32> to vector<1x16xf32>
    %54 = vector.shape_cast %53 : vector<1x16xf32> to vector<1x1x16xf32>
    %55 = vector.broadcast %54 : vector<1x1x16xf32> to vector<8x16x16xf32>
    %56 = arith.mulf %51, %55 : vector<8x16x16xf32>
    %57 = arith.addf %50, %56 : vector<8x16x16xf32>
    %58 = vector.extract_strided_slice %5 {offsets = [2, 1, 0], sizes = [8, 16, 16], strides = [1, 1, 1]} : vector<10x18x16xf32> to vector<8x16x16xf32>
    %c7 = arith.constant 7 : index
    %c0_23 = arith.constant 0 : index
    %c0_24 = arith.constant 0 : index
    %59 = vector.load %arg4[%c7, %c0_23, %c0_24] : memref<9x1x16xf32, #tpu.memory_space<vmem>>, vector<1x1x16xf32>
    %60 = vector.shape_cast %59 : vector<1x1x16xf32> to vector<1x16xf32>
    %61 = vector.shape_cast %60 : vector<1x16xf32> to vector<1x1x16xf32>
    %62 = vector.broadcast %61 : vector<1x1x16xf32> to vector<8x16x16xf32>
    %63 = arith.mulf %58, %62 : vector<8x16x16xf32>
    %64 = arith.addf %57, %63 : vector<8x16x16xf32>
    %65 = vector.extract_strided_slice %5 {offsets = [2, 2, 0], sizes = [8, 16, 16], strides = [1, 1, 1]} : vector<10x18x16xf32> to vector<8x16x16xf32>
    %c8 = arith.constant 8 : index
    %c0_25 = arith.constant 0 : index
    %c0_26 = arith.constant 0 : index
    %66 = vector.load %arg4[%c8, %c0_25, %c0_26] : memref<9x1x16xf32, #tpu.memory_space<vmem>>, vector<1x1x16xf32>
    %67 = vector.shape_cast %66 : vector<1x1x16xf32> to vector<1x16xf32>
    %68 = vector.shape_cast %67 : vector<1x16xf32> to vector<1x1x16xf32>
    %69 = vector.broadcast %68 : vector<1x1x16xf32> to vector<8x16x16xf32>
    %70 = arith.mulf %65, %69 : vector<8x16x16xf32>
    %71 = arith.addf %64, %70 : vector<8x16x16xf32>
    %cst_27 = arith.constant dense<0.000000e+00> : vector<8x16xf32>
    %72 = vector.multi_reduction <add>, %71, %cst_27 [2] : vector<8x16x16xf32> to vector<8x16xf32>
    %73 = vector.shape_cast %72 : vector<8x16xf32> to vector<8x16x1xf32>
    %cst_28 = arith.constant 1.600000e+01 : f32
    %74 = vector.broadcast %cst_28 : f32 to vector<8x16x1xf32>
    %75 = arith.divf %73, %74 : vector<8x16x1xf32>
    %76 = vector.broadcast %75 : vector<8x16x1xf32> to vector<8x16x16xf32>
    %77 = arith.subf %71, %76 : vector<8x16x16xf32>
    %78 = arith.mulf %77, %77 : vector<8x16x16xf32>
    %cst_29 = arith.constant dense<0.000000e+00> : vector<8x16xf32>
    %79 = vector.multi_reduction <add>, %78, %cst_29 [2] : vector<8x16x16xf32> to vector<8x16xf32>
    %80 = vector.shape_cast %79 : vector<8x16xf32> to vector<8x16x1xf32>
    %cst_30 = arith.constant 1.600000e+01 : f32
    %81 = vector.broadcast %cst_30 : f32 to vector<8x16x1xf32>
    %82 = arith.divf %80, %81 : vector<8x16x1xf32>
    %cst_31 = arith.constant 9.99999997E-7 : f32
    %83 = vector.broadcast %cst_31 : f32 to vector<8x16x1xf32>
    %84 = arith.addf %82, %83 : vector<8x16x1xf32>
    %85 = math.rsqrt %84 : vector<8x16x1xf32>
    %86 = vector.broadcast %85 : vector<8x16x1xf32> to vector<8x16x16xf32>
    %87 = arith.mulf %77, %86 : vector<8x16x16xf32>
    %88 = vector.shape_cast %87 : vector<8x16x16xf32> to vector<128x16xf32>
    %89 = arith.truncf %88 : vector<128x16xf32> to vector<128x16xbf16>
    %c0_32 = arith.constant 0 : index
    %c0_33 = arith.constant 0 : index
    %90 = vector.load %arg6[%c0_32, %c0_33] : memref<16x16xbf16, #tpu.memory_space<vmem>>, vector<16x16xbf16>
    %cst_34 = arith.constant dense<0.000000e+00> : vector<128x16xf32>
    %91 = tpu.matmul %89, %90, %cst_34 {dimension_numbers = #tpu.dot_dimension_numbers<[1], [0], [0], [1], [0, 0, 1, 1], [], []>} : vector<128x16xbf16>, vector<16x16xbf16>, vector<128x16xf32> -> vector<128x16xf32>
    %c0_35 = arith.constant 0 : index
    %c0_36 = arith.constant 0 : index
    %92 = vector.load %arg7[%c0_35, %c0_36] : memref<1x16xf32, #tpu.memory_space<vmem>>, vector<1x16xf32>
    %93 = vector.broadcast %92 : vector<1x16xf32> to vector<128x16xf32>
    %94 = arith.addf %91, %93 : vector<128x16xf32>
    %cst_37 = arith.constant 5.000000e-01 : f32
    %95 = vector.broadcast %cst_37 : f32 to vector<128x16xf32>
    %96 = arith.mulf %95, %94 : vector<128x16xf32>
    %cst_38 = arith.constant 0.707106769 : f32
    %97 = vector.broadcast %cst_38 : f32 to vector<128x16xf32>
    %98 = arith.mulf %94, %97 : vector<128x16xf32>
    %99 = math.erf %98 : vector<128x16xf32>
    %cst_39 = arith.constant 1.000000e+00 : f32
    %100 = vector.broadcast %cst_39 : f32 to vector<128x16xf32>
    %101 = arith.addf %100, %99 : vector<128x16xf32>
    %102 = arith.mulf %96, %101 : vector<128x16xf32>
    %c0_i32 = arith.constant 0 : i32
    %103 = arith.cmpi eq, %arg1, %c0_i32 : i32
    %104 = arith.extui %103 : i1 to i32
    %c0_i32_40 = arith.constant 0 : i32
    %105 = arith.cmpi ne, %104, %c0_i32_40 : i32
    scf.if %105 {
      %cst_52 = arith.constant 0.000000e+00 : f32
      %119 = vector.broadcast %cst_52 : f32 to vector<1x16xf32>
      %c0_53 = arith.constant 0 : index
      %c0_54 = arith.constant 0 : index
      %c0_55 = arith.constant 0 : index
      %120 = vector.load %arg9[%c0_53, %c0_54, %c0_55] : memref<1x1x16xf32, #tpu.memory_space<vmem>>, vector<1x1x16xf32>
      %121 = vector.shape_cast %120 : vector<1x1x16xf32> to vector<1x16xf32>
      %122 = vector.shape_cast %119 : vector<1x16xf32> to vector<1x1x16xf32>
      tpu.vector_store %arg9[%c0_53, %c0_54, %c0_55], %122 {strides = array<i32>} : memref<1x1x16xf32, #tpu.memory_space<vmem>>, vector<1x1x16xf32>,
    } else {
    }
    %c0_41 = arith.constant 0 : index
    %c0_42 = arith.constant 0 : index
    %c0_43 = arith.constant 0 : index
    %106 = vector.load %arg9[%c0_41, %c0_42, %c0_43] : memref<1x1x16xf32, #tpu.memory_space<vmem>>, vector<1x1x16xf32>
    %107 = vector.shape_cast %106 : vector<1x1x16xf32> to vector<1x16xf32>
    %108 = arith.mulf %102, %102 : vector<128x16xf32>
    %cst_44 = arith.constant dense<0.000000e+00> : vector<16xf32>
    %109 = vector.multi_reduction <add>, %108, %cst_44 [0] : vector<128x16xf32> to vector<16xf32>
    %110 = vector.shape_cast %109 : vector<16xf32> to vector<1x16xf32>
    %111 = arith.addf %107, %110 : vector<1x16xf32>
    %c0_45 = arith.constant 0 : index
    %c0_46 = arith.constant 0 : index
    %c0_47 = arith.constant 0 : index
    %112 = vector.load %arg9[%c0_45, %c0_46, %c0_47] : memref<1x1x16xf32, #tpu.memory_space<vmem>>, vector<1x1x16xf32>
    %113 = vector.shape_cast %112 : vector<1x1x16xf32> to vector<1x16xf32>
    %114 = vector.shape_cast %111 : vector<1x16xf32> to vector<1x1x16xf32>
    tpu.vector_store %arg9[%c0_45, %c0_46, %c0_47], %114 {strides = array<i32>} : memref<1x1x16xf32, #tpu.memory_space<vmem>>, vector<1x1x16xf32>,
    %115 = arith.truncf %102 : vector<128x16xf32> to vector<128x16xbf16>
    %c0_48 = arith.constant 0 : index
    %c0_49 = arith.constant 0 : index
    %c0_50 = arith.constant 0 : index
    %c0_51 = arith.constant 0 : index
    %116 = vector.load %arg8[%c0_48, %c0_49, %c0_50, %c0_51] : memref<1x1x128x16xbf16, #tpu.memory_space<vmem>>, vector<1x1x128x16xbf16>
    %117 = vector.shape_cast %116 : vector<1x1x128x16xbf16> to vector<128x16xbf16>
    %118 = vector.shape_cast %115 : vector<128x16xbf16> to vector<1x1x128x16xbf16>
    tpu.vector_store %arg8[%c0_48, %c0_49, %c0_50, %c0_51], %118 {strides = array<i32>} : memref<1x1x128x16xbf16, #tpu.memory_space<vmem>>, vector<1x1x128x16xbf16>,
    return
  }
  func.func @transform_0(%arg0: i32, %arg1: i32) -> (i32, i32, i32, i32, i32) {
    %c0_i32 = arith.constant 0 : i32
    %c0_i32_0 = arith.constant 0 : i32
    %c0_i32_1 = arith.constant 0 : i32
    %c0_i32_2 = arith.constant 0 : i32
    return %arg0, %arg1, %c0_i32, %c0_i32_0, %c0_i32_1 : i32, i32, i32, i32, i32
  }
  func.func @transform_1(%arg0: i32, %arg1: i32) -> (i32, i32) {
    %c0_i32 = arith.constant 0 : i32
    %c0_i32_0 = arith.constant 0 : i32
    %c0_i32_1 = arith.constant 0 : i32
    return %c0_i32, %c0_i32_0 : i32, i32
  }
  func.func @transform_2(%arg0: i32, %arg1: i32) -> (i32, i32, i32) {
    %c0_i32 = arith.constant 0 : i32
    %c0_i32_0 = arith.constant 0 : i32
    %c0_i32_1 = arith.constant 0 : i32
    %c0_i32_2 = arith.constant 0 : i32
    return %c0_i32, %c0_i32_0, %c0_i32_1 : i32, i32, i32
  }
  func.func @transform_3(%arg0: i32, %arg1: i32) -> (i32, i32) {
    %c0_i32 = arith.constant 0 : i32
    %c0_i32_0 = arith.constant 0 : i32
    %c0_i32_1 = arith.constant 0 : i32
    return %c0_i32, %c0_i32_0 : i32, i32
  }
  func.func @transform_4(%arg0: i32, %arg1: i32) -> (i32, i32) {
    %c0_i32 = arith.constant 0 : i32
    %c0_i32_0 = arith.constant 0 : i32
    %c0_i32_1 = arith.constant 0 : i32
    return %c0_i32, %c0_i32_0 : i32, i32
  }
  func.func @transform_5(%arg0: i32, %arg1: i32) -> (i32, i32) {
    %c0_i32 = arith.constant 0 : i32
    %c0_i32_0 = arith.constant 0 : i32
    %c0_i32_1 = arith.constant 0 : i32
    return %c0_i32, %c0_i32_0 : i32, i32
  }
  func.func @transform_6(%arg0: i32, %arg1: i32) -> (i32, i32, i32, i32) {
    %c0_i32 = arith.constant 0 : i32
    %c0_i32_0 = arith.constant 0 : i32
    %c0_i32_1 = arith.constant 0 : i32
    return %arg0, %arg1, %c0_i32, %c0_i32_0 : i32, i32, i32, i32
  }
  func.func @transform_7(%arg0: i32, %arg1: i32) -> (i32, i32, i32) {
    %c0_i32 = arith.constant 0 : i32
    %c0_i32_0 = arith.constant 0 : i32
    %c0_i32_1 = arith.constant 0 : i32
    return %arg0, %c0_i32, %c0_i32_0 : i32, i32, i32
  }
}

module attributes {stable_mosaic.version = 11 : i64} {
  func.func @_pass2_kernel(%arg0: i32, %arg1: i32, %arg2: memref<1x1x128x16xbf16, #tpu.memory_space<vmem>>, %arg3: memref<1x1x128x4xf32, #tpu.memory_space<vmem>>, %arg4: memref<1x1x16xf32, #tpu.memory_space<vmem>>, %arg5: memref<1x16xf32, #tpu.memory_space<vmem>>, %arg6: memref<16x4xbf16, #tpu.memory_space<vmem>>, %arg7: memref<1x4xf32, #tpu.memory_space<vmem>>, %arg8: memref<1x1x128x4xf32, #tpu.memory_space<vmem>>) attributes {dimension_semantics = [#tpu.dimension_semantics<parallel>, #tpu.dimension_semantics<parallel>], iteration_bounds = array<i64: 2, 2>, scalar_prefetch = 0 : i64, scratch_operands = 0 : i64, tpu.core_type = #tpu.core_type<tc>, window_params = [{transform_indices = @transform_0, window_bounds = array<i64: 1, 1, 128, 16>}, {transform_indices = @transform_1, window_bounds = array<i64: 1, 1, 128, 4>}, {transform_indices = @transform_2, window_bounds = array<i64: 1, 1, 16>}, {pipeline_mode = #tpu.pipeline_mode<synchronous>, transform_indices = @transform_3, window_bounds = array<i64: 1, 16>}, {pipeline_mode = #tpu.pipeline_mode<synchronous>, transform_indices = @transform_4, window_bounds = array<i64: 16, 4>}, {pipeline_mode = #tpu.pipeline_mode<synchronous>, transform_indices = @transform_5, window_bounds = array<i64: 1, 4>}, {transform_indices = @transform_6, window_bounds = array<i64: 1, 1, 128, 4>}]} {
    %c0 = arith.constant 0 : index
    %c0_0 = arith.constant 0 : index
    %c0_1 = arith.constant 0 : index
    %c0_2 = arith.constant 0 : index
    %0 = vector.load %arg2[%c0, %c0_0, %c0_1, %c0_2] : memref<1x1x128x16xbf16, #tpu.memory_space<vmem>>, vector<1x1x128x16xbf16>
    %1 = vector.shape_cast %0 : vector<1x1x128x16xbf16> to vector<128x16xbf16>
    %2 = arith.extf %1 : vector<128x16xbf16> to vector<128x16xf32>
    %c0_3 = arith.constant 0 : index
    %c0_4 = arith.constant 0 : index
    %c0_5 = arith.constant 0 : index
    %3 = vector.load %arg4[%c0_3, %c0_4, %c0_5] : memref<1x1x16xf32, #tpu.memory_space<vmem>>, vector<1x1x16xf32>
    %4 = vector.shape_cast %3 : vector<1x1x16xf32> to vector<1x16xf32>
    %5 = vector.broadcast %4 : vector<1x16xf32> to vector<128x16xf32>
    %6 = arith.mulf %2, %5 : vector<128x16xf32>
    %c0_6 = arith.constant 0 : index
    %c0_7 = arith.constant 0 : index
    %7 = vector.load %arg5[%c0_6, %c0_7] : memref<1x16xf32, #tpu.memory_space<vmem>>, vector<1x16xf32>
    %8 = vector.broadcast %7 : vector<1x16xf32> to vector<128x16xf32>
    %9 = arith.addf %6, %8 : vector<128x16xf32>
    %10 = arith.truncf %9 : vector<128x16xf32> to vector<128x16xbf16>
    %c0_8 = arith.constant 0 : index
    %c0_9 = arith.constant 0 : index
    %11 = vector.load %arg6[%c0_8, %c0_9] : memref<16x4xbf16, #tpu.memory_space<vmem>>, vector<16x4xbf16>
    %cst = arith.constant dense<0.000000e+00> : vector<128x4xf32>
    %12 = tpu.matmul %10, %11, %cst {dimension_numbers = #tpu.dot_dimension_numbers<[1], [0], [0], [1], [0, 0, 1, 1], [], []>} : vector<128x16xbf16>, vector<16x4xbf16>, vector<128x4xf32> -> vector<128x4xf32>
    %c0_10 = arith.constant 0 : index
    %c0_11 = arith.constant 0 : index
    %13 = vector.load %arg7[%c0_10, %c0_11] : memref<1x4xf32, #tpu.memory_space<vmem>>, vector<1x4xf32>
    %14 = vector.broadcast %13 : vector<1x4xf32> to vector<128x4xf32>
    %15 = arith.addf %12, %14 : vector<128x4xf32>
    %c0_12 = arith.constant 0 : index
    %c0_13 = arith.constant 0 : index
    %c0_14 = arith.constant 0 : index
    %c0_15 = arith.constant 0 : index
    %16 = vector.load %arg3[%c0_12, %c0_13, %c0_14, %c0_15] : memref<1x1x128x4xf32, #tpu.memory_space<vmem>>, vector<1x1x128x4xf32>
    %17 = vector.shape_cast %16 : vector<1x1x128x4xf32> to vector<128x4xf32>
    %18 = arith.addf %15, %17 : vector<128x4xf32>
    %c0_16 = arith.constant 0 : index
    %c0_17 = arith.constant 0 : index
    %c0_18 = arith.constant 0 : index
    %c0_19 = arith.constant 0 : index
    %19 = vector.load %arg8[%c0_16, %c0_17, %c0_18, %c0_19] : memref<1x1x128x4xf32, #tpu.memory_space<vmem>>, vector<1x1x128x4xf32>
    %20 = vector.shape_cast %19 : vector<1x1x128x4xf32> to vector<128x4xf32>
    %21 = vector.shape_cast %18 : vector<128x4xf32> to vector<1x1x128x4xf32>
    tpu.vector_store %arg8[%c0_16, %c0_17, %c0_18, %c0_19], %21 {strides = array<i32>} : memref<1x1x128x4xf32, #tpu.memory_space<vmem>>, vector<1x1x128x4xf32>,
    return
  }
  func.func @transform_0(%arg0: i32, %arg1: i32) -> (i32, i32, i32, i32) {
    %c0_i32 = arith.constant 0 : i32
    %c0_i32_0 = arith.constant 0 : i32
    %c0_i32_1 = arith.constant 0 : i32
    return %arg0, %arg1, %c0_i32, %c0_i32_0 : i32, i32, i32, i32
  }
  func.func @transform_1(%arg0: i32, %arg1: i32) -> (i32, i32, i32, i32) {
    %c0_i32 = arith.constant 0 : i32
    %c0_i32_0 = arith.constant 0 : i32
    %c0_i32_1 = arith.constant 0 : i32
    return %arg0, %arg1, %c0_i32, %c0_i32_0 : i32, i32, i32, i32
  }
  func.func @transform_2(%arg0: i32, %arg1: i32) -> (i32, i32, i32) {
    %c0_i32 = arith.constant 0 : i32
    %c0_i32_0 = arith.constant 0 : i32
    %c0_i32_1 = arith.constant 0 : i32
    return %arg0, %c0_i32, %c0_i32_0 : i32, i32, i32
  }
  func.func @transform_3(%arg0: i32, %arg1: i32) -> (i32, i32) {
    %c0_i32 = arith.constant 0 : i32
    %c0_i32_0 = arith.constant 0 : i32
    %c0_i32_1 = arith.constant 0 : i32
    return %c0_i32, %c0_i32_0 : i32, i32
  }
  func.func @transform_4(%arg0: i32, %arg1: i32) -> (i32, i32) {
    %c0_i32 = arith.constant 0 : i32
    %c0_i32_0 = arith.constant 0 : i32
    %c0_i32_1 = arith.constant 0 : i32
    return %c0_i32, %c0_i32_0 : i32, i32
  }
  func.func @transform_5(%arg0: i32, %arg1: i32) -> (i32, i32) {
    %c0_i32 = arith.constant 0 : i32
    %c0_i32_0 = arith.constant 0 : i32
    %c0_i32_1 = arith.constant 0 : i32
    return %c0_i32, %c0_i32_0 : i32, i32
  }
  func.func @transform_6(%arg0: i32, %arg1: i32) -> (i32, i32, i32, i32) {
    %c0_i32 = arith.constant 0 : i32
    %c0_i32_0 = arith.constant 0 : i32
    %c0_i32_1 = arith.constant 0 : i32
    return %arg0, %arg1, %c0_i32, %c0_i32_0 : i32, i32, i32, i32
  }
}

</mosaic_0001>

<bundles_post_ra>
// kernel: convnextv2_forward.3
= control target key start
LH: loop header
LB: loop body
LE: loop exit
PB: predicated region body
PF: predicated region fallthrough
CT: control target
= control target key end

     0   :  { %s946_s21 = smov 0   ;;  %s948_s22 = smov 0   ;;  %s1104_s0 = inlined_call_operand.vmem [shape: bf16[2,2,128,16], index: 0, kind: input, shape index: {}]   ;;  %s1105_s1 = inlined_call_operand.vmem [shape: f32[2,2,128,4], index: 1, kind: input, shape index: {}]   ;;  %s1106_s2 = inlined_call_operand.vmem [shape: f32[2,1,16], index: 2, kind: input, shape index: {}]   ;;  %s1107_s3 = inlined_call_operand.vmem [shape: f32[1,16], index: 3, kind: input, shape index: {}]   ;;  %s1108_s4 = inlined_call_operand.vmem [shape: bf16[16,4], index: 4, kind: input, shape index: {}]   ;;  %s1109_s5 = inlined_call_operand.vmem [shape: f32[1,4], index: 5, kind: input, shape index: {}]   ;;  %s1110_s6 = inlined_call_operand.vmem [shape: f32[2,2,128,4], index: 6, kind: output, shape index: {}]  }
   0x1   :  { %s950_s23 = smov 0   ;;  %s952_s24 = smov 0  }
   0x2   :  { %s954_s25 = smov 0  }
   0x3 LB: > { %s25_s26 = sadd.s32 1, %s901_s23  ;;  %s28_s27 = sadd.s32 1, %s905_s24  ;;  %s909_s25 = sphi %s954_s25, %s16_s25   ;;  %s905_s24 = sphi %s952_s24, %s1114_s24   ;;  %s901_s23 = sphi %s950_s23, %s1113_s23   ;;  %s897_s22 = sphi %s948_s22, %s1112_s22   ;;  %s893_s21 = sphi %s946_s21, %s1111_s21  }
   0x4   : > { %p26_p0 = scmp.ge.s32.totalorder %s25_s26, 2  ;;  %p738_p1 = scmp.ge.s32.totalorder %s909_s25, 1 }
   0x5   : > { %p256_p2 = scmp.lt.s32.totalorder %s909_s25, 5 }
   0x6   : > { %s1116_s26 = smov (%p26_p0, %s25_s26), 0  ;;  %s1118_s27 = smov (!%p26_p0, %s28_s27), %s905_s24 }
   0x7   : > { %p257_p3 = pnand %p738_p1, %p256_p2  ;;  %p30_p4 = scmp.ge.s32.totalorder %s1118_s27, 2 }
   0x8   : > { %v870_v0 = vld [vmem:[%s1108_s4] sm:$0xff] (!%p257_p3)   ;;  %p306_p5 = scmp.lt.s32.totalorder (!%p257_p3), %s897_s22, 1  ;;  %p308_p6 = scmp.lt.s32.totalorder (!%p257_p3), %s893_s21, 1  ;;  %vm438_vm0 = vcmask (!%p257_p3), 130048   ;;  %vm592_vm1 = vcmask (!%p257_p3), 31744  }
   0x9   : > { %s1120_s27 = smov (%p30_p4, %s1118_s27), 0  ;;  %260 = sbr.rel (%p257_p3) target bundleno = 260 (0x104), region = 44 }
   0xa   : > { %810 = vmatprep.subr.bf16.mxu0 (!%p257_p3), %v870_v0  ;;  %828 = vmatprep.subr.bf16.mxu1 (!%p257_p3), %v870_v0  ;;  %v749_v10 = vld [vmem:[%s1107_s3] ss:$0 sm:$0xff] (!%p257_p3) }
   0xb   : > { %811 = vmatpush3.bf16.msra.mxu0 (!%p257_p3), %v870_v0  ;;  %829 = vmatpush3.bf16.msra.mxu1 (!%p257_p3), %v870_v0 }
  0x10   : > { %s1122_s22 = smov (!%p306_p5, %s897_s22), 1  ;;  %s1124_s21 = smov (!%p308_p6, %s893_s21), 1 }
  0x11   : > { %s740_s30 = sshll.u32 %s1122_s22, 5  ;;  %s739_s7 = sshll.u32 %s1124_s21, 4 }
  0x12   : > { %s326_s10 = scalar_lea.vmem %s1106_s2, %s1122_s22  ;;  %s982_s11 = sadd.s32 %s740_s30, %s739_s7 }
  0x13   : > { %s741_s12 = sshll.u32 %s982_s11, 2  ;;  %v748_v1 = vld [vmem:[%s326_s10] ss:$0 sm:$0xff]  ;;  %s744_s18 = sshll.u32 %s982_s11, 3 }
  0x14   : > { %s988_s15 = scalar_lea.vmem %s1104_s0, %s741_s12  ;;  %s1013_s21 = scalar_lea.vmem %s1105_s1, %s744_s18 }
  0x15   : > { %v763_v2 = vld [vmem:[%s988_s15] sm:$0xff]   ;;  %v794_v4 = vld [vmem:[%s988_s15 + $0x8] sm:$0xff]   ;;  %v795_v23 = vld [vmem:[%s988_s15 + $0x10] sm:$0xff]   ;;  %s1029_s7 = scalar_lea.vmem %s1110_s6, %s744_s18 }
  0x16   : > { %v797_v3 = vld [vmem:[%s988_s15 + $0x20] sm:$0xff]   ;;  %v764_v5 = vunpack.c.l.bf16 %v763_v2  ;;  %v765_v6 = vunpack.c.h.bf16 %v763_v2  ;;  %v798_v9 = vld [vmem:[%s988_s15 + $0x28] sm:$0xff]   ;;  %v768_v11 = vunpack.c.l.bf16 %v794_v4  ;;  %v769_v12 = vunpack.c.h.bf16 %v794_v4  ;;  %v799_v28 = vld [vmem:[%s988_s15 + $0x30] sm:$0xff]  }
  0x17   : > { %v780_v7 = vunpack.c.l.bf16 %v797_v3  ;;  %v781_v8 = vunpack.c.h.bf16 %v797_v3  ;;  %v784_v13 = vunpack.c.l.bf16 %v798_v9  ;;  %v785_v14 = vunpack.c.h.bf16 %v798_v9  ;;  %v796_v33 = vld [vmem:[%s988_s15 + $0x18] sm:$0xff]  }
  0x18   : > { %v376_v15 = vmul.f32 %v764_v5, %v748_v1  ;;  %v377_v16 = vmul.f32 %v765_v6, %v748_v1  ;;  %v378_v19 = vmul.f32 %v768_v11, %v748_v1  ;;  %v379_v20 = vmul.f32 %v769_v12, %v748_v1  ;;  %v800_v38 = vld [vmem:[%s988_s15 + $0x38] sm:$0xff]   ;;  %v562_v5 = vld [vmem:[%s1013_s21 + $0x10] sm:$0xff]  ;;  %v560_v11 = vld [vmem:[%s1013_s21] sm:$0xff] }
  0x19   : > { %v384_v17 = vmul.f32 %v780_v7, %v748_v1  ;;  %v385_v18 = vmul.f32 %v781_v8, %v748_v1  ;;  %v386_v21 = vmul.f32 %v784_v13, %v748_v1  ;;  %v387_v22 = vmul.f32 %v785_v14, %v748_v1  ;;  %v570_v7 = vld [vmem:[%s1013_s21 + $0x50] sm:$0xff]  ;;  %v568_v13 = vld [vmem:[%s1013_s21 + $0x40] sm:$0xff] }
  0x1a   : > { %v399_v24 = vadd.f32 %v749_v10, %v376_v15  ;;  %v400_v25 = vadd.f32 %v749_v10, %v377_v16  ;;  %v401_v29 = vadd.f32 %v749_v10, %v378_v19  ;;  %v402_v30 = vadd.f32 %v749_v10, %v379_v20  ;;  %v571_v19 = vld [vmem:[%s1013_s21 + $0x58] sm:$0xff] }
  0x1b   : > { %v407_v26 = vadd.f32 %v749_v10, %v384_v17  ;;  %v408_v27 = vadd.f32 %v749_v10, %v385_v18  ;;  %v409_v31 = vadd.f32 %v749_v10, %v386_v21  ;;  %v410_v32 = vadd.f32 %v749_v10, %v387_v22  ;;  %v563_v17 = vld [vmem:[%s1013_s21 + $0x18] sm:$0xff] }
  0x1c   : > { %v415_v34 = vpack.c.bf16 %v400_v25, %v399_v24  ;;  %v772_v36 = vunpack.c.l.bf16 %v795_v23  ;;  %v773_v37 = vunpack.c.h.bf16 %v795_v23  ;;  %v416_v39 = vpack.c.bf16 %v402_v30, %v401_v29  ;;  %v561_v25 = vld [vmem:[%s1013_s21 + $0x8] sm:$0xff] }
  0x1d   : > { %v419_v35 = vpack.c.bf16 %v408_v27, %v407_v26  ;;  %v420_v40 = vpack.c.bf16 %v410_v32, %v409_v31  ;;  %v788_v41 = vunpack.c.l.bf16 %v799_v28  ;;  %v789_v42 = vunpack.c.h.bf16 %v799_v28  ;;  %v569_v27 = vld [vmem:[%s1013_s21 + $0x48] sm:$0xff] }
  0x1e   : > { %812 = vmatprep.mubr.msk.bf16.mxu0 %vm438_vm0, %v415_v34  ;;  %v380_v43 = vmul.f32 %v772_v36, %v748_v1  ;;  %v381_v44 = vmul.f32 %v773_v37, %v748_v1  ;;  %v776_v45 = vunpack.c.l.bf16 %v796_v33  ;;  %v777_v46 = vunpack.c.h.bf16 %v796_v33  ;;  %v566_v37 = vld [vmem:[%s1013_s21 + $0x30] sm:$0xff] }
  0x1f   : > { %820 = vmatprep.mubr.msk.bf16.mxu1 %vm438_vm0, %v419_v35  ;;  %813 = vmatmul.mubr.msk.bf16.vlgmr.msra.gmra.mrb[0].mxu0 %vm438_vm0, %v416_v39  ;;  %v388_v47 = vmul.f32 %v788_v41, %v748_v1  ;;  %v389_v48 = vmul.f32 %v789_v42, %v748_v1  ;;  %v792_v49 = vunpack.c.l.bf16 %v800_v38  ;;  %v793_v50 = vunpack.c.h.bf16 %v800_v38  ;;  %v574_v39 = vld [vmem:[%s1013_s21 + $0x70] sm:$0xff] }
  0x20   : > { %821 = vmatmul.mubr.msk.bf16.vlgmr.msra.gmra.mrb[0].mxu1 %vm438_vm0, %v420_v40  ;;  %v403_v51 = vadd.f32 %v749_v10, %v380_v43  ;;  %v404_v52 = vadd.f32 %v749_v10, %v381_v44  ;;  %v382_v53 = vmul.f32 %v776_v45, %v748_v1  ;;  %v383_v54 = vmul.f32 %v777_v46, %v748_v1  ;;  %v564_v43 = vld [vmem:[%s1013_s21 + $0x20] sm:$0xff] }
  0x21   : > { %v411_v55 = vadd.f32 %v749_v10, %v388_v47  ;;  %v412_v56 = vadd.f32 %v749_v10, %v389_v48  ;;  %v390_v57 = vmul.f32 %v792_v49, %v748_v1  ;;  %v391_v58 = vmul.f32 %v793_v50, %v748_v1  ;;  %v1018_v1 = vld [vmem:[%s1109_s5] ss:$0 sm:$0xff]  ;;  %v567_v49 = vld [vmem:[%s1013_s21 + $0x38] sm:$0xff] }
  0x22   : > { %v417_v59 = vpack.c.bf16 %v404_v52, %v403_v51  ;;  %v405_v60 = vadd.f32 %v749_v10, %v382_v53  ;;  %v406_v61 = vadd.f32 %v749_v10, %v383_v54  ;;  %v572_v45 = vld [vmem:[%s1013_s21 + $0x60] sm:$0xff]  ;;  %v575_v51 = vld [vmem:[%s1013_s21 + $0x78] sm:$0xff] }
  0x23   : > { %v421_v62 = vpack.c.bf16 %v412_v56, %v411_v55  ;;  %v413_v63 = vadd.f32 %v749_v10, %v390_v57  ;;  %v414_v0 = vadd.f32 %v749_v10, %v391_v58  ;;  %v565_v57 = vld [vmem:[%s1013_s21 + $0x28] sm:$0xff] }
  0x24   : > { %816 = vmatprep.mubr.msk.bf16.mxu0 %vm438_vm0, %v417_v59  ;;  %v418_v2 = vpack.c.bf16 %v406_v61, %v405_v60  ;;  %v573_v59 = vld [vmem:[%s1013_s21 + $0x68] sm:$0xff] }
  0x25   : > { %824 = vmatprep.mubr.msk.bf16.mxu1 %vm438_vm0, %v421_v62  ;;  %v422_v3 = vpack.c.bf16 %v414_v0, %v413_v63 }
  0x27   : > { %817 = vmatmul.mubr.msk.bf16.gmra.mrb[4].mxu0 %vm438_vm0, %v418_v2 }
  0x28   : > { %825 = vmatmul.mubr.msk.bf16.gmra.mrb[4].mxu1 %vm438_vm0, %v422_v3 }
  0xf2   : > { %v814_v4 = vpop.f32.mrb[0].mxu0 }
  0xf3   : > { %v822_v6 = vpop.f32.mrb[0].mxu1  ;;  %v506_v8 = vadd.f32 %v814_v4, %v1018_v1  ;;  %v497_v10 = vpop.f32.mrb[1].mxu0 }
  0xf4   : > { %v538_v9 = vadd.f32 %v822_v6, %v1018_v1  ;;  %v529_v12 = vpop.f32.mrb[1].mxu1  ;;  %v498_v14 = vadd.f32 %v1018_v1, %v497_v10  ;;  %v815_v16 = vpop.f32.mrb[2].mxu0 }
  0xf5   : > { %v530_v15 = vadd.f32 %v1018_v1, %v529_v12  ;;  %v823_v18 = vpop.f32.mrb[2].mxu1  ;;  %v578_v20 = vadd.f32 %v562_v5, %v506_v8  ;;  %v509_v22 = vadd.f32 %v815_v16, %v1018_v1  ;;  %v500_v24 = vpop.f32.mrb[3].mxu0 }
  0xf6   : > { %v586_v21 = vadd.f32 %v570_v7, %v538_v9  ;;  %v541_v23 = vadd.f32 %v823_v18, %v1018_v1  ;;  %v532_v26 = vpop.f32.mrb[3].mxu1  ;;  %v576_v28 = vadd.f32 %v560_v11, %v498_v14  ;;  %v501_v30 = vadd.f32 %v1018_v1, %v500_v24 }
  0xf7   : > { %v584_v29 = vadd.f32 %v568_v13, %v530_v15  ;;  %v533_v31 = vadd.f32 %v1018_v1, %v532_v26  ;;  %595 = vst.msk [vmem:[%s1029_s7 + $0x10] sm:$0xff] %vm592_vm1, %v578_v20  ;;  %v579_v32 = vadd.f32 %v563_v17, %v509_v22 }
  0xf8   : > { %603 = vst.msk [vmem:[%s1029_s7 + $0x50] sm:$0xff] %vm592_vm1, %v586_v21  ;;  %v587_v33 = vadd.f32 %v571_v19, %v541_v23  ;;  %593 = vst.msk [vmem:[%s1029_s7] sm:$0xff] %vm592_vm1, %v576_v28  ;;  %v577_v34 = vadd.f32 %v561_v25, %v501_v30 }
  0xf9   : > { %601 = vst.msk [vmem:[%s1029_s7 + $0x40] sm:$0xff] %vm592_vm1, %v584_v29  ;;  %v585_v35 = vadd.f32 %v569_v27, %v533_v31  ;;  %596 = vst.msk [vmem:[%s1029_s7 + $0x18] sm:$0xff] %vm592_vm1, %v579_v32 }
  0xfa   : > { %604 = vst.msk [vmem:[%s1029_s7 + $0x58] sm:$0xff] %vm592_vm1, %v587_v33  ;;  %594 = vst.msk [vmem:[%s1029_s7 + $0x8] sm:$0xff] %vm592_vm1, %v577_v34  ;;  %v818_v36 = vpop.f32.mrb[4].mxu0 }
  0xfb   : > { %602 = vst.msk [vmem:[%s1029_s7 + $0x48] sm:$0xff] %vm592_vm1, %v585_v35  ;;  %v826_v38 = vpop.f32.mrb[4].mxu1  ;;  %v522_v40 = vadd.f32 %v818_v36, %v1018_v1  ;;  %v513_v42 = vpop.f32.mrb[5].mxu0 }
  0xfc   : > { %v554_v41 = vadd.f32 %v826_v38, %v1018_v1  ;;  %v545_v44 = vpop.f32.mrb[5].mxu1  ;;  %v514_v46 = vadd.f32 %v1018_v1, %v513_v42  ;;  %v819_v48 = vpop.f32.mrb[6].mxu0 }
  0xfd   : > { %v546_v47 = vadd.f32 %v1018_v1, %v545_v44  ;;  %v827_v50 = vpop.f32.mrb[6].mxu1  ;;  %v582_v52 = vadd.f32 %v566_v37, %v522_v40  ;;  %v525_v54 = vadd.f32 %v819_v48, %v1018_v1  ;;  %v516_v56 = vpop.f32.mrb[7].mxu0 }
  0xfe   : > { %v590_v53 = vadd.f32 %v574_v39, %v554_v41  ;;  %v557_v55 = vadd.f32 %v827_v50, %v1018_v1  ;;  %v548_v58 = vpop.f32.mrb[7].mxu1  ;;  %v580_v60 = vadd.f32 %v564_v43, %v514_v46  ;;  %v517_v62 = vadd.f32 %v1018_v1, %v516_v56 }
  0xff   : > { %v588_v61 = vadd.f32 %v572_v45, %v546_v47  ;;  %v549_v63 = vadd.f32 %v1018_v1, %v548_v58  ;;  %599 = vst.msk [vmem:[%s1029_s7 + $0x30] sm:$0xff] %vm592_vm1, %v582_v52  ;;  %v583_v0 = vadd.f32 %v567_v49, %v525_v54 }
 0x100   : > { %607 = vst.msk [vmem:[%s1029_s7 + $0x70] sm:$0xff] %vm592_vm1, %v590_v53  ;;  %v591_v2 = vadd.f32 %v575_v51, %v557_v55  ;;  %597 = vst.msk [vmem:[%s1029_s7 + $0x20] sm:$0xff] %vm592_vm1, %v580_v60  ;;  %v581_v3 = vadd.f32 %v565_v57, %v517_v62 }
 0x101   : > { %605 = vst.msk [vmem:[%s1029_s7 + $0x60] sm:$0xff] %vm592_vm1, %v588_v61  ;;  %v589_v4 = vadd.f32 %v573_v59, %v549_v63  ;;  %600 = vst.msk [vmem:[%s1029_s7 + $0x38] sm:$0xff] %vm592_vm1, %v583_v0 }
 0x102   : > { %608 = vst.msk [vmem:[%s1029_s7 + $0x78] sm:$0xff] %vm592_vm1, %v591_v2  ;;  %598 = vst.msk [vmem:[%s1029_s7 + $0x28] sm:$0xff] %vm592_vm1, %v581_v3 }
 0x103   : > { %606 = vst.msk [vmem:[%s1029_s7 + $0x68] sm:$0xff] %vm592_vm1, %v589_v4 }
 0x104 PF: > { %s16_s25 = sadd.s32 1, %s909_s25   ;;  %s1111_s21 = smov %s901_s23 }
 0x105   : > { %p13_p7 = scmp.ge.s32.totalorder %s16_s25, 6   ;;  %s1112_s22 = smov %s905_s24 }
 0x106   : > { %s1113_s23 = smov %s1116_s26  ;;  %s1114_s24 = smov %s1120_s27 }
 0x107   :  { %15 = sbr.rel (!%p13_p7) target bundleno = 3 (0x3), region = 80 }

// kernel: convnextv2_forward.2
= control target key start
LH: loop header
LB: loop body
LE: loop exit
PB: predicated region body
PF: predicated region fallthrough
CT: control target
= control target key end

     0   :  { %s7846_s24 = smov 0   ;;  %s7848_s25 = smov 0   ;;  %s11746_s0 = inlined_call_operand.vmem [shape: f32[2,2,10,18,4], index: 0, kind: input, shape index: {}]   ;;  %s11747_s1 = inlined_call_operand.vmem [shape: f32[4,16], index: 1, kind: input, shape index: {}]   ;;  %s11748_s2 = inlined_call_operand.vmem [shape: f32[9,1,16], index: 2, kind: input, shape index: {}]   ;;  %s11749_s3 = inlined_call_operand.vmem [shape: f32[1,16], index: 3, kind: input, shape index: {}]   ;;  %s11750_s4 = inlined_call_operand.vmem [shape: bf16[16,16], index: 4, kind: input, shape index: {}]   ;;  %s11751_s5 = inlined_call_operand.vmem [shape: f32[1,16], index: 5, kind: input, shape index: {}]   ;;  %s11752_s6 = inlined_call_operand.vmem [shape: bf16[2,2,128,16], index: 6, kind: output, shape index: {0}]   ;;  %s11753_s7 = inlined_call_operand.vmem [shape: f32[2,1,16], index: 7, kind: output, shape index: {1}]  }
   0x1   :  { %12193 = sst [smem:[#allocation155_spill]] %s11747_s1  ;;  %s7850_s26 = smov 0  }
   0x2   :  { %s7852_s27 = smov 0   ;;  %s7854_s28 = smov 0  }
   0x3 LB: > { %s27_s29 = sadd.s32 1, %s7788_s26  ;;  %s30_s30 = sadd.s32 1, %s7792_s27  ;;  %s7796_s28 = sphi %s7854_s28, %s18_s28   ;;  %s7792_s27 = sphi %s7852_s27, %s13000_s27   ;;  %s7788_s26 = sphi %s7850_s26, %s12999_s26   ;;  %s7784_s25 = sphi %s7848_s25, %s12998_s25   ;;  %s7780_s24 = sphi %s7846_s24, %s12997_s24  }
   0x4   : > { %p28_p0 = scmp.ge.s32.totalorder %s27_s29, 2  ;;  %p7373_p1 = scmp.ge.s32.totalorder %s7796_s28, 1 }
   0x5   : > { %p260_p2 = scmp.lt.s32.totalorder %s7796_s28, 5 }
   0x6   : > { %s13002_s29 = smov (%p28_p0, %s27_s29), 0  ;;  %s13004_s30 = smov (!%p28_p0, %s30_s30), %s7792_s27 }
   0x7   : > { %p261_p3 = pnand %p7373_p1, %p260_p2  ;;  %p32_p4 = scmp.ge.s32.totalorder %s13004_s30, 2 }
   0x9   : > { %s13006_s30 = smov (%p32_p4, %s13004_s30), 0  ;;  %264 = sbr.rel (%p261_p3) target bundleno = 1380 (0x564), region = 44 }
  0x10   : > { %s12194_s1 = sld [smem:[#allocation155_spill]]  ;;  %vm1225_vm0 = vcmask 1043456   ;;  %p303_p5 = scmp.lt.s32.totalorder %s7784_s25, 1  ;;  %v389_v1 = vlaneseq  ;;  %v7798_v2 = vmov 0.0   ;;  %vm7799_vm1 = vmmov 0  }
  0x11   : > { %7532 = vmatprep.subr.mxu0 %v7798_v2  ;;  %7534 = vmatprep.mubr.msk.f32.mxu0 %vm7799_vm1, %v7798_v2  ;;  %p305_p6 = scmp.lt.s32.totalorder %s7780_s24, 1  ;;  %v7800_v3 = vmov 1983009808   ;;  %vm1178_vm2 = vcmask 31744   ;;  %vm2110_vm3 = vcmask 1040384   ;;  %vm2111_vm4 = vcmask 1042434  }
  0x12   : > { %s13008_s25 = smov (!%p303_p5, %s7784_s25), 1  ;;  %v387_v4 = vunpack.c.l.s4 %v7800_v3  ;;  %7621 = vmatprep.subr.mxu1 %v7798_v2  ;;  %v7887_v5 = vshrl.u32 %v389_v1, 7  ;;  %7582 = vmatprep.mubr.msk.f32.mxu1 %vm7799_vm1, %v7798_v2  ;;  %vm2112_vm5 = vmor %vm2110_vm3, %vm2111_vm4  ;;  %vm2113_vm6 = vcmask 1044484   ;;  %vm2115_vm8 = vcmask 1046534   ;;  %p7464_p7 = scmp.ne.s32.totalorder %s7780_s24, 0 }
  0x13   : > { %s306_s10 = scalar_select %p305_p6, %s7780_s24, 1  ;;  %vm2114_vm7 = vmor %vm2112_vm5, %vm2113_vm6  ;;  %vm4767_vm10 = vcmask 130048  }
  0x14   : > { %12195 = vst [vmem:[#allocation2_spill] sm:$0xff] %v7887_v5  ;;  %s7624_s11 = smul.u32 60, %s13008_s25  ;;  %s7376_s12 = sshll.u32 %s13008_s25, 5  ;;  %v388_v6 = vunpack.c.0.s8 %v387_v4  ;;  %vm8136_vm9 = vmor %vm2114_vm7, %vm2115_vm8  ;;  %vm7109_vm11 = vcmask (!%p7464_p7), 122880  }
  0x15   : > { %s7623_s13 = smul.u32 30, %s306_s10  ;;  %s7375_s14 = sshll.u32 %s306_s10, 4 }
  0x16   : > { %v795_v0 = vld [vmem:[%s12194_s1] sm:$0xf]  ;;  %s318_s15 = sadd.s32 %s7376_s12, %s7375_s14  ;;  %s7894_s18 = scalar_lea.vmem %s11753_s7, %s13008_s25  ;;  %v7897_v7 = vsub.s32 %v388_v6, %v7887_v5 }
  0x17   : > { %7533 = vmatpush3.msk.msra.mxu0 %vm1225_vm0, %v795_v0  ;;  %7622 = vmatpush3.msk.msra.mxu1 %vm1225_vm0, %v795_v0  ;;  %s309_s19 = sadd.s32 %s7624_s11, %s7623_s13  ;;  %s7377_s20 = sshll.u32 %s318_s15, 2 }
  0x18   : > { %12196 = vst [vmem:[#allocation3_spill] sm:$0xff] %v7897_v7  ;;  %s7374_s21 = sshll.u32 %s309_s19, 3  ;;  %s7902_s8 = scalar_lea.vmem %s11752_s6, %s7377_s20 }
  0x19   : > { %s7907_s10 = scalar_lea.vmem %s11746_s0, %s7374_s21 }
  0x1a   : > { %v325_v8 = vld [vmem:[%s7907_s10] sm:$0xff]  ;;  %v326_v9 = vld [vmem:[%s7907_s10 + $0x8] sm:$0xff]  ;;  %v328_v14 = vld [vmem:[%s7907_s10 + $0x18] sm:$0xff] }
  0x1b   : > { %v385_v10 = vcombine.high %v325_v8, %v325_v8  ;;  %v392_v11 = vrot.slane %v325_v8, %v7897_v7  ;;  %v402_v12 = vcombine.high %v326_v9, %v326_v9  ;;  %v409_v13 = vrot.slane %v326_v9, %v7897_v7  ;;  %v329_v15 = vld [vmem:[%s7907_s10 + $0x20] sm:$0xff]  ;;  %v7378_v23 = vld.sshfl [vmem:[%s7907_s10 + $0x10] sm:$0x3 pattern:$0x76325410]  ;;  %v332_v45 = vld [vmem:[%s7907_s10 + $0x38] sm:$0xff] }
  0x1c   : > { %v426_v16 = vcombine.high %v328_v14, %v328_v14  ;;  %v433_v17 = vrot.slane %v328_v14, %v7897_v7  ;;  %v443_v18 = vcombine.high %v329_v15, %v329_v15  ;;  %v450_v26 = vrot.slane %v329_v15, %v7897_v7  ;;  %v331_v33 = vld [vmem:[%s7907_s10 + $0x30] sm:$0xff]  ;;  %v7379_v48 = vld.sshfl [vmem:[%s7907_s10 + $0x28] sm:$0x3 pattern:$0x76325410] }
  0x1d   : > { %v399_v19 = vrot.slane %v385_v10, %v7897_v7  ;;  %v400_v20 = vcombine.high %v392_v11, %v392_v11  ;;  %v416_v21 = vrot.slane %v402_v12, %v7897_v7  ;;  %v417_v22 = vcombine.high %v409_v13, %v409_v13  ;;  %v334_v49 = vld [vmem:[%s7907_s10 + $0x48] sm:$0xff]  ;;  %v335_v58 = vld [vmem:[%s7907_s10 + $0x50] sm:$0xff]  ;;  %v7380_v4 = vld.sshfl [vmem:[%s7907_s10 + $0x40] sm:$0x3 pattern:$0x76325410] }
  0x1e   : > { %v440_v24 = vrot.slane %v426_v16, %v7897_v7  ;;  %v441_v25 = vcombine.high %v433_v17, %v433_v17  ;;  %v830_v31 = vcombine.low %v7378_v23, %v433_v17  ;;  %v457_v32 = vrot.slane %v443_v18, %v7897_v7 }
  0x1f   : > { %v401_v27 = vcombine.high %v399_v19, %v399_v19  ;;  %v796_v28 = vcombine.low %v392_v11, %v400_v20  ;;  %v418_v29 = vcombine.high %v416_v21, %v416_v21  ;;  %v813_v30 = vcombine.low %v409_v13, %v417_v22  ;;  %v337_v13 = vld [vmem:[%s7907_s10 + $0x60] sm:$0xff] }
  0x20   : > { %v831_v37 = vcombine.low %v441_v25, %v440_v24  ;;  %v442_v39 = vcombine.high %v440_v24, %v440_v24  ;;  %v458_v40 = vcombine.high %v450_v26, %v450_v26  ;;  %v459_v41 = vcombine.high %v457_v32, %v457_v32  ;;  %v346_v24 = vld [vmem:[%s7907_s10 + $0xa8] sm:$0xff] }
  0x21   : > { %v797_v34 = vcombine.low %v399_v19, %v401_v27  ;;  %v804_v35 = vrot.slane %v796_v28, %v7897_v7  ;;  %v814_v36 = vcombine.low %v416_v21, %v418_v29  ;;  %v821_v38 = vrot.slane %v813_v30, %v7897_v7 }
  0x22   : > { %v474_v44 = vrot.slane %v331_v33, %v7897_v7  ;;  %v467_v46 = vcombine.high %v331_v33, %v331_v33  ;;  %v838_v47 = vrot.slane %v830_v31, %v7897_v7  ;;  %v845_v51 = vrot.slane %v831_v37, %v7897_v7 }
  0x23   : > { %v811_v42 = vrot.slane %v797_v34, %v7897_v7  ;;  %v828_v43 = vrot.slane %v814_v36, %v7897_v7  ;;  %v847_v54 = vcombine.low %v442_v39, %v450_v26  ;;  %v848_v55 = vcombine.low %v458_v40, %v457_v32  ;;  %v347_v32 = vld [vmem:[%s7907_s10 + $0xb0] sm:$0xff]  ;;  %v338_v40 = vld [vmem:[%s7907_s10 + $0x68] sm:$0xff] }
  0x24   : > { %v482_v52 = vcombine.high %v474_v44, %v474_v44  ;;  %v481_v53 = vrot.slane %v467_v46, %v7897_v7  ;;  %v491_v56 = vrot.slane %v332_v45, %v7897_v7  ;;  %v484_v57 = vcombine.high %v332_v45, %v332_v45 }
  0x25   : > { %v812_v50 = vcombine.low %v804_v35, %v811_v42  ;;  %v829_v59 = vcombine.low %v821_v38, %v828_v43  ;;  %v864_v60 = vcombine.low %v459_v41, %v7379_v48  ;;  %v508_v62 = vcombine.high %v334_v49, %v334_v49  ;;  %v7381_v42 = vld.sshfl [vmem:[%s7907_s10 + $0x58] sm:$0x3 pattern:$0x76325410] }
  0x26   : > { %v483_v61 = vcombine.high %v481_v53, %v481_v53  ;;  %v865_v63 = vcombine.low %v474_v44, %v482_v52  ;;  %v499_v0 = vcombine.high %v491_v56, %v491_v56  ;;  %v498_v1 = vrot.slane %v484_v57, %v7897_v7 }
  0x27   : > { %7535 = vmatmul.mubr.msk.f32.vlgmr.msra.gmra.mrb[0].mxu0 %vm1178_vm2, %v812_v50  ;;  %v515_v3 = vrot.slane %v334_v49, %v7897_v7  ;;  %v522_v6 = vrot.slane %v508_v62, %v7897_v7  ;;  %v525_v8 = vcombine.high %v335_v58, %v335_v58  ;;  %v855_v9 = vrot.slane %v847_v54, %v7897_v7  ;;  %v340_v62 = vld [vmem:[%s7907_s10 + $0x78] sm:$0xff] }
  0x28   : > { %7537 = vmatprep.mubr.msk.f32.mxu0 %vm7799_vm1, %v7798_v2  ;;  %v862_v10 = vrot.slane %v848_v55, %v7897_v7  ;;  %v881_v11 = vcombine.low %v481_v53, %v483_v61  ;;  %v882_v12 = vcombine.low %v491_v56, %v499_v0  ;;  %v846_v14 = vcombine.low %v838_v47, %v845_v51 }
  0x29   : > { %v500_v15 = vcombine.high %v498_v1, %v498_v1  ;;  %v872_v16 = vrot.slane %v864_v60, %v7897_v7  ;;  %v879_v17 = vrot.slane %v865_v63, %v7897_v7  ;;  %v899_v18 = vcombine.low %v7380_v4, %v515_v3  ;;  %v349_v63 = vld [vmem:[%s7907_s10 + $0xc0] sm:$0xff] }
  0x2a   : > { %v532_v19 = vrot.slane %v335_v58, %v7897_v7  ;;  %v523_v20 = vcombine.high %v515_v3, %v515_v3  ;;  %v524_v21 = vcombine.high %v522_v6, %v522_v6  ;;  %v539_v22 = vrot.slane %v525_v8, %v7897_v7 }
  0x2b   : > { %7538 = vmatmul.mubr.msk.f32.gmra.mrb[2].mxu0 %vm1178_vm2, %v829_v59  ;;  %v549_v23 = vcombine.high %v337_v13, %v337_v13  ;;  %v863_v25 = vcombine.low %v855_v9, %v862_v10  ;;  %v889_v26 = vrot.slane %v881_v11, %v7897_v7  ;;  %v896_v27 = vrot.slane %v882_v12, %v7897_v7 }
  0x2c   : > { %7540 = vmatprep.mubr.msk.f32.mxu0 %vm7799_vm1, %v7798_v2  ;;  %v898_v28 = vcombine.low %v498_v1, %v500_v15  ;;  %v540_v29 = vcombine.high %v532_v19, %v532_v19  ;;  %v556_v30 = vrot.slane %v337_v13, %v7897_v7  ;;  %v880_v33 = vcombine.low %v872_v16, %v879_v17 }
  0x2d   : > { %v563_v31 = vrot.slane %v549_v23, %v7897_v7  ;;  %v672_v34 = vcombine.high %v346_v24, %v346_v24  ;;  %v7963_v35 = vrot.slane %v346_v24, %v7897_v7  ;;  %v913_v36 = vrot.slane %v899_v18, %v7897_v7  ;;  %v350_v24 = vld [vmem:[%s7907_s10 + $0xc8] sm:$0xff] }
  0x2e   : > { %v915_v37 = vcombine.low %v523_v20, %v522_v6  ;;  %v916_v38 = vcombine.low %v524_v21, %v532_v19  ;;  %v541_v39 = vcombine.high %v539_v22, %v539_v22  ;;  %v897_v41 = vcombine.low %v889_v26, %v896_v27  ;;  %v7385_v6 = vld.sshfl [vmem:[%s7907_s10 + $0xb8] sm:$0x3 pattern:$0x76325410] }
  0x2f   : > { %7541 = vmatmul.mubr.msk.f32.gmra.mrb[4].mxu0 %vm1178_vm2, %v846_v14  ;;  %v686_v43 = vrot.slane %v672_v34, %v7897_v7  ;;  %v687_v44 = vcombine.high %v7963_v35, %v7963_v35  ;;  %v696_v45 = vrot.slane %v347_v32, %v7897_v7  ;;  %v906_v46 = vrot.slane %v898_v28, %v7897_v7 }
  0x30   : > { %7543 = vmatprep.mubr.msk.f32.mxu0 %vm7799_vm1, %v7798_v2  ;;  %v932_v47 = vcombine.low %v540_v29, %v539_v22  ;;  %v564_v48 = vcombine.high %v556_v30, %v556_v30  ;;  %v565_v49 = vcombine.high %v563_v31, %v563_v31  ;;  %v566_v52 = vcombine.high %v338_v40, %v338_v40 }
  0x31   : > { %v688_v50 = vcombine.high %v686_v43, %v686_v43  ;;  %v1068_v51 = vcombine.low %v687_v44, %v686_v43  ;;  %v689_v53 = vcombine.high %v347_v32, %v347_v32  ;;  %v923_v54 = vrot.slane %v915_v37, %v7897_v7  ;;  %v341_v32 = vld [vmem:[%s7907_s10 + $0x80] sm:$0xff] }
  0x32   : > { %v933_v55 = vcombine.low %v541_v39, %v7381_v42  ;;  %v573_v56 = vrot.slane %v338_v40, %v7897_v7  ;;  %v704_v57 = vcombine.high %v696_v45, %v696_v45  ;;  %v930_v58 = vrot.slane %v916_v38, %v7897_v7  ;;  %v7382_v40 = vld.sshfl [vmem:[%s7907_s10 + $0x70] sm:$0x3 pattern:$0x76325410] }
  0x33   : > { %7544 = vmatmul.mubr.msk.f32.gmra.mrb[6].mxu0 %vm1178_vm2, %v863_v25  ;;  %v1069_v59 = vcombine.low %v688_v50, %v696_v45  ;;  %v1076_v60 = vrot.slane %v1068_v51, %v7897_v7  ;;  %v703_v61 = vrot.slane %v689_v53, %v7897_v7  ;;  %v914_v0 = vcombine.low %v906_v46, %v913_v36  ;;  %v352_v46 = vld [vmem:[%s7907_s10 + $0xd8] sm:$0xff] }
  0x34   : > { %7546 = vmatprep.mubr.msk.f32.mxu0 %vm7799_vm1, %v7798_v2  ;;  %v940_v1 = vrot.slane %v932_v47, %v7897_v7  ;;  %v949_v3 = vcombine.low %v556_v30, %v564_v48  ;;  %v950_v4 = vcombine.low %v563_v31, %v565_v49  ;;  %v580_v9 = vrot.slane %v566_v52, %v7897_v7 }
  0x35   : > { %v1083_v8 = vrot.slane %v1069_v59, %v7897_v7  ;;  %v705_v10 = vcombine.high %v703_v61, %v703_v61  ;;  %v1085_v11 = vcombine.low %v704_v57, %v703_v61  ;;  %v947_v12 = vrot.slane %v933_v55, %v7897_v7  ;;  %v343_v55 = vld [vmem:[%s7907_s10 + $0x90] sm:$0xff] }
  0x36   : > { %v581_v13 = vcombine.high %v573_v56, %v573_v56  ;;  %v590_v14 = vcombine.high %v340_v62, %v340_v62  ;;  %v713_v15 = vcombine.high %v349_v63, %v349_v63  ;;  %v597_v19 = vrot.slane %v340_v62, %v7897_v7 }
  0x37   : > { %7547 = vmatmul.mubr.msk.f32.gmra.mrb[8].mxu0 %vm1178_vm2, %v880_v33  ;;  %v1084_v16 = vcombine.low %v1076_v60, %v1083_v8  ;;  %v1086_v17 = vcombine.low %v705_v10, %v7385_v6  ;;  %v1093_v18 = vrot.slane %v1085_v11, %v7897_v7  ;;  %v957_v20 = vrot.slane %v949_v3, %v7897_v7  ;;  %v353_v8 = vld [vmem:[%s7907_s10 + $0xe0] sm:$0xff] }
  0x38   : > { %7549 = vmatprep.mubr.msk.f32.mxu0 %vm7799_vm1, %v7798_v2  ;;  %v964_v21 = vrot.slane %v950_v4, %v7897_v7  ;;  %v720_v22 = vrot.slane %v349_v63, %v7897_v7  ;;  %v727_v23 = vrot.slane %v713_v15, %v7897_v7  ;;  %v931_v25 = vcombine.low %v923_v54, %v930_v58  ;;  %v7386_v63 = vld.sshfl [vmem:[%s7907_s10 + $0xd0] sm:$0x3 pattern:$0x76325410] }
  0x39   : > { %7583 = vmatmul.mubr.msk.f32.vlgmr.msra.gmra.mrb[0].mxu1 %vm1178_vm2, %v1084_v16  ;;  %v582_v26 = vcombine.high %v580_v9, %v580_v9  ;;  %v1100_v27 = vrot.slane %v1086_v17, %v7897_v7  ;;  %v8003_v28 = vcombine.low %v573_v56, %v581_v13  ;;  %v604_v29 = vrot.slane %v590_v14, %v7897_v7  ;;  %v344_v17 = vld [vmem:[%s7907_s10 + $0x98] sm:$0xff] }
  0x3a   : > { %7585 = vmatprep.mubr.msk.f32.mxu1 %vm7799_vm1, %v7798_v2  ;;  %v728_v30 = vcombine.high %v720_v22, %v720_v22  ;;  %v729_v31 = vcombine.high %v727_v23, %v727_v23  ;;  %v605_v34 = vcombine.high %v597_v19, %v597_v19  ;;  %v730_v36 = vcombine.high %v350_v24, %v350_v24 }
  0x3b   : > { %7550 = vmatmul.mubr.msk.f32.gmra.mrb[10].mxu0 %vm1178_vm2, %v897_v41  ;;  %v1101_v33 = vcombine.low %v1093_v18, %v1100_v27  ;;  %v737_v37 = vrot.slane %v350_v24, %v7897_v7  ;;  %v948_v38 = vcombine.low %v940_v1, %v947_v12  ;;  %v8011_v39 = vcombine.low %v957_v20, %v964_v21 }
  0x3c   : > { %7552 = vmatprep.mubr.msk.f32.mxu0 %vm7799_vm1, %v7798_v2  ;;  %v1102_v41 = vcombine.low %v720_v22, %v728_v30  ;;  %v1103_v42 = vcombine.low %v727_v23, %v729_v31  ;;  %v967_v43 = vcombine.low %v580_v9, %v582_v26  ;;  %v607_v44 = vcombine.high %v341_v32, %v341_v32  ;;  %v7383_v26 = vld.sshfl [vmem:[%s7907_s10 + $0x88] sm:$0x3 pattern:$0x76325410] }
  0x3d   : > { %7586 = vmatmul.mubr.msk.f32.gmra.mrb[2].mxu1 %vm1178_vm2, %v1101_v33  ;;  %v744_v45 = vrot.slane %v730_v36, %v7897_v7  ;;  %v614_v49 = vrot.slane %v341_v32, %v7897_v7  ;;  %v745_v50 = vcombine.high %v737_v37, %v737_v37  ;;  %v974_v51 = vrot.slane %v8003_v28, %v7897_v7 }
  0x3e   : > { %7588 = vmatprep.mubr.msk.f32.mxu1 %vm7799_vm1, %v7798_v2  ;;  %v1110_v47 = vrot.slane %v1102_v41, %v7897_v7  ;;  %v1117_v48 = vrot.slane %v1103_v42, %v7897_v7  ;;  %v983_v52 = vcombine.low %v7382_v40, %v597_v19  ;;  %v984_v53 = vcombine.low %v605_v34, %v604_v29  ;;  %v7387_v40 = vld.sshfl [vmem:[%s7907_s10 + $0xe8] sm:$0x3 pattern:$0x76325410] }
  0x3f   : > { %7553 = vmatmul.mubr.msk.f32.gmra.mrb[12].mxu0 %vm1178_vm2, %v914_v0  ;;  %v746_v54 = vcombine.high %v744_v45, %v744_v45  ;;  %v606_v57 = vcombine.high %v604_v29, %v604_v29  ;;  %v1119_v58 = vcombine.low %v737_v37, %v745_v50  ;;  %v754_v59 = vcombine.high %v352_v46, %v352_v46 }
  0x40   : > { %7555 = vmatprep.mubr.msk.f32.mxu0 %vm7799_vm1, %v7798_v2  ;;  %v1118_v56 = vcombine.low %v1110_v47, %v1117_v48  ;;  %v981_v60 = vrot.slane %v967_v43, %v7897_v7  ;;  %v621_v61 = vrot.slane %v607_v44, %v7897_v7  ;;  %v761_v0 = vrot.slane %v352_v46, %v7897_v7 }
  0x41   : > { %v1120_v62 = vcombine.low %v744_v45, %v746_v54  ;;  %v622_v1 = vcombine.high %v614_v49, %v614_v49  ;;  %v1127_v3 = vrot.slane %v1119_v58, %v7897_v7  ;;  %v638_v4 = vrot.slane %v343_v55, %v7897_v7 }
  0x42   : > { %7589 = vmatmul.mubr.msk.f32.gmra.mrb[4].mxu1 %vm1178_vm2, %v1118_v56  ;;  %v768_v6 = vrot.slane %v754_v59, %v7897_v7  ;;  %v991_v9 = vrot.slane %v983_v52, %v7897_v7  ;;  %v769_v11 = vcombine.high %v761_v0, %v761_v0  ;;  %v631_v12 = vcombine.high %v343_v55, %v343_v55 }
  0x43   : > { %7556 = vmatmul.mubr.msk.f32.gmra.mrb[14].mxu0 %vm1178_vm2, %v931_v25  ;;  %7591 = vmatprep.mubr.msk.f32.mxu1 %vm7799_vm1, %v7798_v2  ;;  %v1134_v10 = vrot.slane %v1120_v62, %v7897_v7  ;;  %v998_v13 = vrot.slane %v984_v53, %v7897_v7  ;;  %v1000_v14 = vcombine.low %v606_v57, %v614_v49  ;;  %v7384_v57 = vld.sshfl [vmem:[%s7907_s10 + $0xa0] sm:$0x3 pattern:$0x76325410] }
  0x44   : > { %7558 = vmatprep.mubr.msk.f32.mxu0 %vm7799_vm1, %v7798_v2  ;;  %v623_v15 = vcombine.high %v621_v61, %v621_v61  ;;  %v1136_v16 = vcombine.low %v7386_v63, %v761_v0  ;;  %v1137_v19 = vcombine.low %v769_v11, %v768_v6  ;;  %v770_v20 = vcombine.high %v768_v6, %v768_v6  ;;  %v7415_v6 = vld [vmem:[%s11748_s2 + $0x1] ss:$0 sm:$0xff] }
  0x45   : > { %v1135_v18 = vcombine.low %v1127_v3, %v1134_v10  ;;  %v771_v21 = vcombine.high %v353_v8, %v353_v8  ;;  %v1001_v22 = vcombine.low %v622_v1, %v621_v61  ;;  %v646_v23 = vcombine.high %v638_v4, %v638_v4  ;;  %v7429_v10 = vld [vmem:[%s11748_s2 + $0x4] ss:$0 sm:$0xff] }
  0x46   : > { %v1144_v24 = vrot.slane %v1136_v16, %v7897_v7  ;;  %v778_v25 = vrot.slane %v353_v8, %v7897_v7  ;;  %v1151_v27 = vrot.slane %v1137_v19, %v7897_v7  ;;  %v645_v28 = vrot.slane %v631_v12, %v7897_v7  ;;  %v7413_v19 = vld [vmem:[%s11749_s3] ss:$0 sm:$0xff] }
  0x47   : > { %7559 = vmatmul.mubr.msk.f32.gmra.mrb[16].mxu0 %vm1178_vm2, %v948_v38  ;;  %7592 = vmatmul.mubr.msk.f32.gmra.mrb[6].mxu1 %vm1178_vm2, %v1135_v18  ;;  %v655_v29 = vrot.slane %v344_v17, %v7897_v7  ;;  %v785_v30 = vrot.slane %v771_v21, %v7897_v7  ;;  %v982_v31 = vcombine.low %v974_v51, %v981_v60 }
  0x48   : > { %7561 = vmatprep.mubr.msk.f32.mxu0 %vm7799_vm1, %v7798_v2  ;;  %7594 = vmatprep.mubr.msk.f32.mxu1 %vm7799_vm1, %v7798_v2  ;;  %v786_v32 = vcombine.high %v778_v25, %v778_v25  ;;  %v648_v33 = vcombine.high %v344_v17, %v344_v17  ;;  %v999_v34 = vcombine.low %v991_v9, %v998_v13  ;;  %v7443_v17 = vld [vmem:[%s11748_s2 + $0x7] ss:$0 sm:$0xff] }
  0x49   : > { %v1008_v36 = vrot.slane %v1000_v14, %v7897_v7  ;;  %v1152_v37 = vcombine.low %v1144_v24, %v1151_v27  ;;  %v1153_v38 = vcombine.low %v770_v20, %v778_v25  ;;  %v1015_v41 = vrot.slane %v1001_v22, %v7897_v7  ;;  %v7425_v20 = vld [vmem:[%s11748_s2 + $0x2] ss:$0 sm:$0xff] }
  0x4a   : > { %v1017_v42 = vcombine.low %v623_v15, %v7383_v26  ;;  %v1154_v43 = vcombine.low %v786_v32, %v785_v30  ;;  %v1018_v44 = vcombine.low %v638_v4, %v646_v23  ;;  %v647_v45 = vcombine.high %v645_v28, %v645_v28 }
  0x4b   : > { %7562 = vmatmul.mubr.msk.f32.gmra.mrb[18].mxu0 %vm1178_vm2, %v8011_v39  ;;  %v787_v39 = vcombine.high %v785_v30, %v785_v30  ;;  %7595 = vmatmul.mubr.msk.f32.gmra.mrb[8].mxu1 %vm1178_vm2, %v1152_v37  ;;  %v663_v46 = vcombine.high %v655_v29, %v655_v29  ;;  %v1161_v47 = vrot.slane %v1153_v38, %v7897_v7 }
  0x4c   : > { %7564 = vmatprep.mubr.msk.f32.mxu0 %vm7799_vm1, %v7798_v2  ;;  %7597 = vmatprep.mubr.msk.f32.mxu1 %vm7799_vm1, %v7798_v2  ;;  %v1168_v48 = vrot.slane %v1154_v43, %v7897_v7  ;;  %v662_v49 = vrot.slane %v648_v33, %v7897_v7  ;;  %v1016_v52 = vcombine.low %v1008_v36, %v1015_v41 }
  0x4d   : > { %v1170_v50 = vcombine.low %v787_v39, %v7387_v40  ;;  %v1025_v53 = vrot.slane %v1017_v42, %v7897_v7  ;;  %v1032_v54 = vrot.slane %v1018_v44, %v7897_v7  ;;  %v1034_v55 = vcombine.low %v645_v28, %v647_v45  ;;  %v7427_v42 = vld [vmem:[%s11748_s2 + $0x3] ss:$0 sm:$0xff] }
  0x4e   : > { %v1169_v51 = vcombine.low %v1161_v47, %v1168_v48  ;;  %v1035_v56 = vcombine.low %v655_v29, %v663_v46  ;;  %v664_v58 = vcombine.high %v662_v49, %v662_v49  ;;  %v1052_v61 = vcombine.low %v7384_v57, %v7963_v35 }
  0x4f   : > { %7565 = vmatmul.mubr.msk.f32.gmra.mrb[20].mxu0 %vm1178_vm2, %v982_v31  ;;  %v1177_v59 = vrot.slane %v1170_v50, %v7897_v7  ;;  %v1033_v60 = vcombine.low %v1025_v53, %v1032_v54  ;;  %v1042_v62 = vrot.slane %v1034_v55, %v7897_v7  ;;  %v2093_v8 = vcombine.high %v7415_v6, %v7415_v6  ;;  %v7439_v50 = vld [vmem:[%s11748_s2 + $0x5] ss:$0 sm:$0xff] }
  0x50   : > { %7567 = vmatprep.mubr.msk.f32.mxu0 %vm7799_vm1, %v7798_v2  ;;  %7598 = vmatmul.mubr.msk.f32.gmra.mrb[10].mxu1 %vm1178_vm2, %v1169_v51  ;;  %v1049_v63 = vrot.slane %v1035_v56, %v7897_v7  ;;  %v1051_v0 = vcombine.low %v662_v49, %v664_v58  ;;  %v1066_v4 = vrot.slane %v1052_v61, %v7897_v7 }
  0x51   : > { %7600 = vmatprep.mubr.msk.f32.mxu1 %vm7799_vm1, %v7798_v2  ;;  %v2100_v9 = vrot.slane %v7415_v6, %v7897_v7  ;;  %v2107_v11 = vrot.slane %v2093_v8, %v7897_v7  ;;  %v2926_v12 = vcombine.high %v7429_v10, %v7429_v10  ;;  %v2933_v21 = vrot.slane %v7429_v10, %v7897_v7 }
  0x52   : > { %v1050_v1 = vcombine.low %v1042_v62, %v1049_v63  ;;  %v1059_v3 = vrot.slane %v1051_v0, %v7897_v7  ;;  %v3752_v25 = vcombine.high %v7443_v17, %v7443_v17  ;;  %v2001_v29 = vcombine.high %v7413_v19, %v7413_v19  ;;  %v7441_v0 = vld [vmem:[%s11748_s2 + $0x6] ss:$0 sm:$0xff] }
  0x53   : > { %7568 = vmatmul.mubr.msk.f32.gmra.mrb[22].mxu0 %vm1178_vm2, %v999_v34  ;;  %v2108_v13 = vcombine.high %v2100_v9, %v2100_v9  ;;  %v2109_v15 = vcombine.high %v2107_v11, %v2107_v11  ;;  %v8111_v16 = vrot.slane %v2100_v9, 7  ;;  %v8127_v22 = vrot.slane %v2926_v12, %v7897_v7 }
  0x54   : > { %7570 = vmatprep.mubr.msk.f32.mxu0 %vm7799_vm1, %v7798_v2  ;;  %7601 = vmatmul.mubr.msk.f32.gmra.mrb[12].mxu1 %vm1178_vm2, %v1177_v59  ;;  %v1067_v35 = vcombine.low %v1059_v3, %v1066_v4  ;;  %v2122_v24 = vrot.slane %v2107_v11, 7  ;;  %v8134_v30 = vrot.slane %v7413_v19, %v7897_v7  ;;  %v2614_v32 = vcombine.high %v7425_v20, %v7425_v20 }
  0x55   : > { %12197 = vst [vmem:[#allocation4_spill] sm:$0xff] %v8111_v16  ;;  %v2119_v23 = vrot.slane %v2108_v13, 7  ;;  %v2118_v27 = vrot.slane %v8111_v16, 2  ;;  %v2125_v28 = vrot.slane %v2109_v15, 7  ;;  %v3759_v33 = vrot.slane %v7443_v17, %v7897_v7 }
  0x56   : > { %12200 = vst [vmem:[#allocation7_spill] sm:$0xff] %v8134_v30  ;;  %v2941_v36 = vcombine.high %v2933_v21, %v2933_v21  ;;  %v2942_v37 = vcombine.high %v8127_v22, %v8127_v22  ;;  %v2124_v40 = vrot.slane %v2122_v24, 2  ;;  %v8148_v41 = vrot.slane %v7425_v20, %v7897_v7 }
  0x57   : > { %7571 = vmatmul.mubr.msk.f32.gmra.mrb[24].mxu0 %vm1178_vm2, %v1016_v52  ;;  %v2121_v38 = vrot.slane %v2119_v23, 2  ;;  %v3766_v43 = vrot.slane %v3752_v25, %v7897_v7  ;;  %v8160_v44 = vsel %vm8136_vm9, %v2118_v27, %v2119_v23  ;;  %v8162_v45 = vrot.slane %v2125_v28, 2 }
  0x58   : > { %7573 = vmatprep.mubr.msk.f32.mxu0 %vm7799_vm1, %v7798_v2  ;;  %12204 = vst [vmem:[#allocation9_spill] sm:$0xff] %v8148_v41  ;;  %12206 = vst [vmem:[#allocation11_spill] sm:$0xff] %v8160_v44  ;;  %v8164_v46 = vrot.slane %v2933_v21, 7  ;;  %v8167_v47 = vrot.slane %v2001_v29, %v7897_v7  ;;  %v8171_v48 = vcombine.high %v8134_v30, %v8134_v30  ;;  %v2945_v53 = vrot.slane %v2941_v36, 7 }
  0x59   : > { %12207 = vst [vmem:[#allocation12_spill] sm:$0xff] %v8162_v45  ;;  %v8174_v49 = vrot.slane %v2614_v32, %v7897_v7  ;;  %v3767_v51 = vcombine.high %v3759_v33, %v3759_v33  ;;  %v2770_v52 = vcombine.high %v7427_v42, %v7427_v42  ;;  %v2948_v54 = vrot.slane %v8127_v22, 7 }
  0x5a   : > { %12208 = vst [vmem:[#allocation13_spill] sm:$0xff] %v8164_v46  ;;  %12209 = vst [vmem:[#allocation14_spill] sm:$0xff] %v8167_v47  ;;  %v2951_v55 = vrot.slane %v2942_v37, 7  ;;  %v8182_v56 = vsel %vm8136_vm9, %v2121_v38, %v2122_v24  ;;  %v8186_v57 = vsel %vm8136_vm9, %v2124_v40, %v2125_v28  ;;  %v8190_v58 = vcombine.high %v8148_v41, %v8148_v41 }
  0x5b   : > { %7574 = vmatmul.mubr.msk.f32.gmra.mrb[26].mxu0 %vm1178_vm2, %v1033_v60  ;;  %12210 = vst [vmem:[#allocation15_spill] sm:$0xff] %v8171_v48  ;;  %12211 = vst [vmem:[#allocation16_spill] sm:$0xff] %v8174_v49  ;;  %v3768_v59 = vcombine.high %v3766_v43, %v3766_v43  ;;  %v8196_v60 = vsel %vm8136_vm9, %v8162_v45, %v8111_v16  ;;  %v8199_v61 = vrot.slane %v7427_v42, %v7897_v7 }
  0x5c   : > { %7576 = vmatprep.mubr.msk.f32.mxu0 %vm7799_vm1, %v7798_v2  ;;  %12212 = vst [vmem:[#allocation17_spill] sm:$0xff] %v8182_v56  ;;  %12213 = vst [vmem:[#allocation18_spill] sm:$0xff] %v8186_v57  ;;  %v2944_v62 = vrot.slane %v8164_v46, 2  ;;  %v3440_v63 = vcombine.high %v7439_v50, %v7439_v50  ;;  %v8210_v3 = vcombine.high %v8167_v47, %v8167_v47  ;;  %v3771_v6 = vrot.slane %v3767_v51, 7 }
  0x5d   : > { %12214 = vst [vmem:[#allocation19_spill] sm:$0xff] %v8190_v58  ;;  %12215 = vst [vmem:[#allocation20_spill] sm:$0xff] %v8196_v60  ;;  %v8214_v4 = vcombine.high %v8174_v49, %v8174_v49  ;;  %v8219_v8 = vrot.slane %v2770_v52, %v7897_v7  ;;  %v2947_v9 = vrot.slane %v2945_v53, 2  ;;  %v2950_v10 = vrot.slane %v2948_v54, 2 }
  0x5e   : > { %12216 = vst [vmem:[#allocation21_spill] sm:$0xff] %v8199_v61  ;;  %12217 = vst [vmem:[#allocation22_spill] sm:$0xff] %v8210_v3  ;;  %v8221_v11 = vrot.slane %v2951_v55, 2  ;;  %v3774_v12 = vrot.slane %v3766_v43, 7  ;;  %v3777_v13 = vrot.slane %v3768_v59, 7  ;;  %v8225_v15 = vsel %vm8136_vm9, %v2944_v62, %v2945_v53 }
  0x5f   : > { %7577 = vmatmul.mubr.msk.f32.gmra.mrb[28].mxu0 %vm1178_vm2, %v1050_v1  ;;  %v7453_v1 = vld [vmem:[%s11748_s2 + $0x8] ss:$0 sm:$0xff]  ;;  %12218 = vst [vmem:[#allocation23_spill] sm:$0xff] %v8214_v4  ;;  %12220 = vst [vmem:[#allocation25_spill] sm:$0xff] %v8219_v8  ;;  %v8229_v17 = vcombine.high %v8199_v61, %v8199_v61  ;;  %v8232_v19 = vrot.slane %v7439_v50, %v7897_v7  ;;  %v8235_v20 = vrot.slane %v3440_v63, %v7897_v7 }
  0x60   : > { %7579 = vmatprep.mubr.msk.f32.mxu0 %vm7799_vm1, %v7798_v2  ;;  %v7412_v2 = vld [vmem:[%s11748_s2] ss:$0 sm:$0xff]  ;;  %12221 = vst [vmem:[#allocation26_spill] sm:$0xff] %v8221_v11  ;;  %12222 = vst [vmem:[#allocation27_spill] sm:$0xff] %v8225_v15  ;;  %v8238_v21 = vrot.slane %v7441_v0, %v7897_v7  ;;  %v3773_v23 = vrot.slane %v3771_v6, 2  ;;  %v8242_v24 = vrot.slane %v7453_v1, %v7897_v7  ;;  %v3776_v36 = vrot.slane %v3774_v12, 2 }
  0x61   : > { %v1910_v14 = vcombine.high %v7412_v2, %v7412_v2  ;;  %v8117_v18 = vrot.slane %v7412_v2, %v7897_v7  ;;  %v3596_v2 = vcombine.high %v7441_v0, %v7441_v0  ;;  %12223 = vst [vmem:[#allocation28_spill] sm:$0xff] %v8229_v17  ;;  %12224 = vst [vmem:[#allocation29_spill] sm:$0xff] %v8235_v20  ;;  %v8265_v37 = vrot.slane %v3777_v13, 2 }
  0x62   : > { %12225 = vst [vmem:[#allocation30_spill] sm:$0xff] %v8238_v21  ;;  %12226 = vst [vmem:[#allocation31_spill] sm:$0xff] %v8242_v24  ;;  %v8246_v25 = vsel %vm8136_vm9, %v2947_v9, %v2948_v54  ;;  %v8250_v27 = vsel %vm8136_vm9, %v2950_v10, %v2951_v55  ;;  %v8254_v28 = vcombine.high %v8219_v8, %v8219_v8 }
  0x63   : > { %7580 = vmatmul.mubr.msk.f32.gmra.mrb[30].mxu0 %vm1178_vm2, %v1067_v35  ;;  %12198 = vst [vmem:[#allocation5_spill] sm:$0xff] %v8117_v18  ;;  %v8130_v26 = vrot.slane %v1910_v14, %v7897_v7  ;;  %v8143_v34 = vcombine.high %v8117_v18, %v8117_v18  ;;  %v8216_v35 = vrot.slane %v3759_v33, 7  ;;  %v4266_v14 = vcombine.high %v7453_v1, %v7453_v1 }
  0x64   : > { %12227 = vst [vmem:[#allocation32_spill] sm:$0xff] %v8246_v25  ;;  %12228 = vst [vmem:[#allocation33_spill] sm:$0xff] %v8250_v27  ;;  %v8260_v29 = vsel %vm8136_vm9, %v8221_v11, %v8164_v46  ;;  %v8263_v33 = vrot.slane %v3596_v2, %v7897_v7  ;;  %v8273_v50 = vcombine.high %v8232_v19, %v8232_v19 }
  0x65   : > { %12199 = vst [vmem:[#allocation6_spill] sm:$0xff] %v8130_v26  ;;  %12203 = vst [vmem:[#allocation8_spill] sm:$0xff] %v8143_v34  ;;  %v8156_v39 = vcombine.high %v8130_v26, %v8130_v26  ;;  %v3770_v22 = vrot.slane %v8216_v35, 2  ;;  %v8268_v38 = vrot.slane %v4266_v14, %v7897_v7  ;;  %v8277_v51 = vcombine.high %v8235_v20, %v8235_v20 }
  0x66   : > { %12219 = vst [vmem:[#allocation24_spill] sm:$0xff] %v8216_v35  ;;  %12229 = vst [vmem:[#allocation34_spill] sm:$0xff] %v8254_v28  ;;  %v8281_v52 = vcombine.high %v8238_v21, %v8238_v21  ;;  %v8289_v54 = vsel %vm8136_vm9, %v3773_v23, %v3774_v12  ;;  %v8293_v55 = vcombine.high %v8242_v24, %v8242_v24 }
  0x67   : > { %12205 = vst [vmem:[#allocation10_spill] sm:$0xff] %v8156_v39  ;;  %12230 = vst [vmem:[#allocation35_spill] sm:$0xff] %v8260_v29  ;;  %v8285_v53 = vsel %vm8136_vm9, %v3770_v22, %v3771_v6  ;;  %v8300_v6 = vcombine.high %v8263_v33, %v8263_v33  ;;  %v8304_v9 = vsel %vm8136_vm9, %v3776_v36, %v3777_v13 }
  0x68   : > { %12231 = vst [vmem:[#allocation36_spill] sm:$0xff] %v8263_v33  ;;  %12232 = vst [vmem:[#allocation37_spill] sm:$0xff] %v8265_v37  ;;  %v8310_v10 = vsel %vm8136_vm9, %v8265_v37, %v8216_v35  ;;  %v8314_v2 = vcombine.high %v8268_v38, %v8268_v38 }
  0x69   : > { %12233 = vst [vmem:[#allocation38_spill] sm:$0xff] %v8268_v38  ;;  %12234 = vst [vmem:[#allocation39_spill] sm:$0xff] %v8273_v50 }
  0x6a   : > { %12235 = vst [vmem:[#allocation40_spill] sm:$0xff] %v8277_v51  ;;  %12236 = vst [vmem:[#allocation41_spill] sm:$0xff] %v8281_v52 }
  0x6b   : > { %12237 = vst [vmem:[#allocation42_spill] sm:$0xff] %v8285_v53  ;;  %12238 = vst [vmem:[#allocation43_spill] sm:$0xff] %v8289_v54 }
  0x6c   : > { %12239 = vst [vmem:[#allocation44_spill] sm:$0xff] %v8293_v55  ;;  %12240 = vst [vmem:[#allocation45_spill] sm:$0xff] %v8300_v6 }
  0x6d   : > { %12241 = vst [vmem:[#allocation46_spill] sm:$0xff] %v8304_v9  ;;  %12242 = vst [vmem:[#allocation47_spill] sm:$0xff] %v8310_v10 }
  0x6e   : > { %12243 = vst [vmem:[#allocation48_spill] sm:$0xff] %v8314_v2 }
  0xfa   : > { %v1295_v32 = vpop.f32.mrb[0].mxu0 }
  0xfb   : > { %v1432_v40 = vcombine.high %v1295_v32, %v1295_v32  ;;  %v1439_v42 = vrot.slane %v1295_v32, %v7897_v7  ;;  %v7536_v43 = vpop.f32.mrb[1].mxu0 }
  0xfd   : > { %v1446_v59 = vrot.slane %v1432_v40, %v7897_v7  ;;  %v1447_v62 = vcombine.high %v1439_v42, %v1439_v42  ;;  %v1931_v63 = vmul.f32 %v8117_v18, %v1439_v42  ;;  %v2135_v0 = vmul.f32 %v8111_v16, %v1439_v42 }
  0xfe   : > { %v1300_v1 = vpop.f32.mrb[2].mxu0 }
  0xff   : > { %v1448_v12 = vcombine.high %v1446_v59, %v1446_v59  ;;  %v1932_v14 = vmul.f32 %v8143_v34, %v1447_v62  ;;  %v1933_v22 = vmul.f32 %v8130_v26, %v1446_v59  ;;  %v2022_v23 = vadd.f32 %v8134_v30, %v1931_v63  ;;  %v7539_v32 = vpop.f32.mrb[3].mxu0 }
 0x100   : > { %v2136_v13 = vmul.f32 %v8160_v44, %v1447_v62  ;;  %v2137_v36 = vmul.f32 %v8182_v56, %v1446_v59  ;;  %v7416_v40 = vrot.slane %v2135_v0, 9  ;;  %v2635_v42 = vmul.f32 %v8148_v41, %v1447_v62 }
 0x101   : > { %v1934_v43 = vmul.f32 %v8156_v39, %v1448_v12  ;;  %v2023_v5 = vadd.f32 %v8171_v48, %v1932_v14  ;;  %v2024_v37 = vadd.f32 %v8167_v47, %v1933_v22  ;;  %v2138_v11 = vmul.f32 %v8186_v57, %v1448_v12 }
 0x102   : > { %v2281_v2 = vrot.slane %v2136_v13, 7  ;;  %v2284_v38 = vrot.slane %v2137_v36, 7  ;;  %v2636_v63 = vmul.f32 %v8190_v58, %v1446_v59  ;;  %v2637_v32 = vmul.f32 %v8174_v49, %v1448_v12  ;;  %v1305_v55 = vpop.f32.mrb[4].mxu0 }
 0x103   : > { %v2287_v24 = vrot.slane %v2138_v11, 7  ;;  %v1449_v10 = vcombine.high %v1300_v1, %v1300_v1  ;;  %v1456_v0 = vrot.slane %v1300_v1, %v7897_v7  ;;  %v2025_v62 = vadd.f32 %v8210_v3, %v1934_v43  ;;  %v7542_v9 = vpop.f32.mrb[5].mxu0 }
 0x104   : > { %v2282_v14 = vsel %vm8136_vm9, %v7416_v40, %v2281_v2  ;;  %v2283_v22 = vrot.slane %v2281_v2, 2  ;;  %v2286_v54 = vrot.slane %v2284_v38, 2  ;;  %v1466_v53 = vcombine.high %v1305_v55, %v1305_v55 }
 0x105   : > { %v2289_v13 = vrot.slane %v2287_v24, 2  ;;  %v2543_v36 = vadd.f32 %v2282_v14, %v2022_v23  ;;  %v1463_v59 = vrot.slane %v1449_v10, %v7897_v7  ;;  %v1464_v35 = vcombine.high %v1456_v0, %v1456_v0 }
 0x106   : > { %v2285_v11 = vsel %vm8136_vm9, %v2283_v22, %v2284_v38  ;;  %v2288_v1 = vsel %vm8136_vm9, %v2286_v54, %v2287_v24  ;;  %v1935_v12 = vmul.f32 %v8117_v18, %v1456_v0  ;;  %v2139_v9 = vmul.f32 %v8196_v60, %v1456_v0  ;;  %v8339_v43 = vpop.f32.mrb[6].mxu0 }
 0x107   : > { %v2544_v2 = vadd.f32 %v2285_v11, %v2023_v5  ;;  %v2545_v40 = vadd.f32 %v2288_v1, %v2024_v37  ;;  %v8341_v6 = vadd.f32 %v2635_v42, %v2543_v36  ;;  %v1465_v23 = vcombine.high %v1463_v59, %v1463_v59  ;;  %v7545_v14 = vpop.f32.mrb[7].mxu0 }
 0x108   : > { %v1936_v10 = vmul.f32 %v8143_v34, %v1464_v35  ;;  %v1937_v33 = vmul.f32 %v8130_v26, %v1463_v59  ;;  %v2026_v38 = vadd.f32 %v8134_v30, %v1935_v12  ;;  %v2140_v24 = vmul.f32 %v8160_v44, %v1464_v35 }
 0x109   : > { %v8347_v54 = vadd.f32 %v2636_v63, %v2544_v2  ;;  %v8349_v22 = vadd.f32 %v2637_v32, %v2545_v40  ;;  %v2141_v60 = vmul.f32 %v8182_v56, %v1463_v59  ;;  %v2142_v5 = vmul.f32 %v8186_v57, %v1465_v23 }
 0x10a   : > { %v2027_v37 = vadd.f32 %v8171_v48, %v1936_v10  ;;  %v2028_v42 = vadd.f32 %v8167_v47, %v1937_v33  ;;  %v2290_v36 = vrot.slane %v2139_v9, 7  ;;  %v2293_v11 = vrot.slane %v2140_v24, 7  ;;  %v8355_v1 = vpop.f32.mrb[8].mxu0 }
 0x10b   : > { %v2296_v14 = vrot.slane %v2141_v60, 7  ;;  %v2299_v12 = vrot.slane %v2142_v5, 7  ;;  %v2638_v26 = vmul.f32 %v8214_v4, %v1456_v0  ;;  %v2639_v63 = vmul.f32 %v8148_v41, %v1464_v35  ;;  %v7548_v32 = vpop.f32.mrb[9].mxu0 }
 0x10c   : > { %v2291_v2 = vsel %vm8136_vm9, %v2289_v13, %v2290_v36  ;;  %v2292_v40 = vrot.slane %v2290_v36, 2  ;;  %v2295_v56 = vrot.slane %v2293_v11, 2  ;;  %v2640_v10 = vmul.f32 %v8190_v58, %v1463_v59 }
 0x10d   : > { %v2298_v48 = vrot.slane %v2296_v14, 2  ;;  %v2546_v33 = vadd.f32 %v2291_v2, %v2025_v62  ;;  %v2641_v9 = vmul.f32 %v8174_v49, %v1465_v23  ;;  %v1473_v24 = vrot.slane %v1305_v55, %v7897_v7  ;;  %v8378_v2 = vpop.f32.mrb[0].mxu1 }
 0x10e   : > { %v2294_v60 = vsel %vm8136_vm9, %v2292_v40, %v2293_v11  ;;  %v2297_v35 = vsel %vm8136_vm9, %v2295_v56, %v2296_v14  ;;  %v8369_v0 = vrot.slane %v1466_v53, %v7897_v7  ;;  %v1938_v13 = vmul.f32 %v8156_v39, %v1465_v23  ;;  %v8372_v5 = vpop.f32.mrb[10].mxu0  ;;  %v7584_v23 = vpop.f32.mrb[1].mxu1 }
 0x10f   : > { %v2300_v62 = vsel %vm8136_vm9, %v2298_v48, %v2299_v12  ;;  %v2547_v59 = vadd.f32 %v2294_v60, %v2026_v38  ;;  %v2548_v36 = vadd.f32 %v2297_v35, %v2027_v37  ;;  %v8376_v32 = vadd.f32 %v2638_v26, %v2546_v33  ;;  %v7551_v55 = vpop.f32.mrb[11].mxu0 }
 0x110   : > { %12244 = vst [vmem:[#allocation49_spill] sm:$0xff] %v8369_v0  ;;  %v2549_v11 = vadd.f32 %v2300_v62, %v2028_v42  ;;  %v1481_v40 = vcombine.high %v1473_v24, %v1473_v24  ;;  %v8382_v56 = vcombine.high %v8369_v0, %v8369_v0  ;;  %v2029_v53 = vadd.f32 %v8210_v3, %v1938_v13 }
 0x111   : > { %v8385_v14 = vadd.f32 %v2639_v63, %v2547_v59  ;;  %v8387_v49 = vadd.f32 %v2640_v10, %v2548_v36  ;;  %v2143_v48 = vmul.f32 %v8162_v45, %v1473_v24  ;;  %v2145_v26 = vmul.f32 %v8160_v44, %v8369_v0  ;;  %v8398_v59 = vpop.f32.mrb[2].mxu1 }
 0x112   : > { %12245 = vst [vmem:[#allocation50_spill] sm:$0xff] %v8382_v56  ;;  %v8392_v38 = vadd.f32 %v2641_v9, %v2549_v11  ;;  %v1939_v37 = vmul.f32 %v8117_v18, %v1481_v40  ;;  %v2144_v42 = vmul.f32 %v8111_v16, %v1481_v40  ;;  %v2301_v33 = vrot.slane %v2299_v12, 2  ;;  %v1325_v60 = vpop.f32.mrb[12].mxu0  ;;  %12246 = vst [vmem:[#allocation51_spill] sm:$0xff] %v8398_v59  ;;  %v7587_v12 = vpop.f32.mrb[3].mxu1 }
 0x113   : > { %v2302_v35 = vrot.slane %v2143_v48, 7  ;;  %v2306_v13 = vrot.slane %v2145_v26, 7  ;;  %v2642_v63 = vmul.f32 %v8214_v4, %v1473_v24  ;;  %v2791_v10 = vmul.f32 %v8199_v61, %v1481_v40  ;;  %v7554_v62 = vpop.f32.mrb[13].mxu0 }
 0x114   : > { %v2030_v36 = vadd.f32 %v8134_v30, %v1939_v37  ;;  %v7417_v55 = vrot.slane %v2144_v42, 9  ;;  %v8402_v9 = vmul.f32 %v8164_v46, %v1481_v40  ;;  %v1483_v11 = vcombine.high %v8339_v43, %v8339_v43  ;;  %v12289_v46 = vld [vmem:[#allocation31_spill] sm:$0xff] }
 0x115   : > { %v2303_v23 = vsel %vm8136_vm9, %v2301_v33, %v2302_v35  ;;  %v8408_v48 = vrot.slane %v2306_v13, 2  ;;  %v8411_v24 = vadd.f32 %v2791_v10, %v8341_v6  ;;  %v8415_v26 = vrot.slane %v8339_v43, %v7897_v7 }
 0x116   : > { %v2307_v40 = vsel %vm8136_vm9, %v7417_v55, %v2306_v13  ;;  %v2550_v37 = vadd.f32 %v2303_v23, %v2029_v53  ;;  %v8421_v62 = vrot.slane %v1483_v11, %v7897_v7  ;;  %v1330_v12 = vpop.f32.mrb[14].mxu0  ;;  %v1500_v35 = vcombine.high %v8355_v1, %v8355_v1  ;;  %v8449_v11 = vpop.f32.mrb[4].mxu1 }
 0x117   : > { %12247 = vst [vmem:[#allocation52_spill] sm:$0xff] %v8408_v48  ;;  %12248 = vst [vmem:[#allocation53_spill] sm:$0xff] %v8415_v26  ;;  %v8423_v33 = vadd.f32 %v2307_v40, %v2030_v36  ;;  %v8427_v6 = vcombine.high %v8415_v26, %v8415_v26  ;;  %v8431_v43 = vmul.f32 %v8186_v57, %v8415_v26  ;;  %v7557_v53 = vpop.f32.mrb[15].mxu0 }
 0x118   : > { %v8435_v13 = vadd.f32 %v2642_v63, %v2550_v37  ;;  %v8439_v10 = vcombine.high %v8421_v62, %v8421_v62  ;;  %v8443_v36 = vmul.f32 %v8160_v44, %v8421_v62  ;;  %v8447_v55 = vrot.slane %v8355_v1, %v7897_v7  ;;  %12253 = vst [vmem:[#allocation58_spill] sm:$0xff] %v8449_v11  ;;  %v7590_v53 = vpop.f32.mrb[5].mxu1 }
 0x119   : > { %12249 = vst [vmem:[#allocation54_spill] sm:$0xff] %v8423_v33  ;;  %12250 = vst [vmem:[#allocation55_spill] sm:$0xff] %v8431_v43  ;;  %v8453_v40 = vrot.slane %v1500_v35, %v7897_v7  ;;  %v1517_v63 = vcombine.high %v8372_v5, %v8372_v5  ;;  %v8459_v37 = vrot.slane %v8372_v5, %v7897_v7 }
 0x11a   : > { %12251 = vst [vmem:[#allocation56_spill] sm:$0xff] %v8443_v36  ;;  %12252 = vst [vmem:[#allocation57_spill] sm:$0xff] %v8447_v55  ;;  %v8463_v42 = vmul.f32 %v8156_v39, %v8447_v55  ;;  %v8467_v1 = vmul.f32 %v8186_v57, %v8447_v55  ;;  %v1534_v23 = vcombine.high %v1325_v60, %v1325_v60  ;;  %v1335_v44 = vpop.f32.mrb[16].mxu0  ;;  %v8502_v57 = vpop.f32.mrb[6].mxu1 }
 0x11b   : > { %12254 = vst [vmem:[#allocation59_spill] sm:$0xff] %v8453_v40  ;;  %12255 = vst [vmem:[#allocation60_spill] sm:$0xff] %v8459_v37  ;;  %v8470_v35 = vrot.slane %v1325_v60, %v7897_v7  ;;  %v8474_v36 = vcombine.high %v8453_v40, %v8453_v40  ;;  %v8478_v5 = vmul.f32 %v8111_v16, %v8453_v40 }
 0x11c   : > { %12256 = vst [vmem:[#allocation61_spill] sm:$0xff] %v8463_v42  ;;  %12257 = vst [vmem:[#allocation62_spill] sm:$0xff] %v8467_v1  ;;  %v8481_v53 = vrot.slane %v1517_v63, %v7897_v7  ;;  %v1551_v30 = vcombine.high %v1330_v12, %v1330_v12  ;;  %v7560_v42 = vpop.f32.mrb[17].mxu0  ;;  %v8485_v33 = vrot.slane %v1534_v23, %v7897_v7  ;;  %v7593_v1 = vpop.f32.mrb[7].mxu1 }
 0x11d   : > { %12258 = vst [vmem:[#allocation63_spill] sm:$0xff] %v8470_v35  ;;  %12259 = vst [vmem:[#allocation64_spill] sm:$0xff] %v8474_v36  ;;  %v8488_v60 = vrot.slane %v1330_v12, %v7897_v7  ;;  %v1568_v4 = vcombine.high %v1335_v44, %v1335_v44  ;;  %v8494_v58 = vrot.slane %v1335_v44, %v7897_v7 }
 0x11e   : > { %12260 = vst [vmem:[#allocation65_spill] sm:$0xff] %v8478_v5  ;;  %12261 = vst [vmem:[#allocation66_spill] sm:$0xff] %v8481_v53  ;;  %v8491_v48 = vrot.slane %v1551_v30, %v7897_v7  ;;  %v8498_v63 = vcombine.high %v8459_v37, %v8459_v37  ;;  %v2792_v42 = vmul.f32 %v8229_v17, %v8369_v0  ;;  %v1340_v23 = vpop.f32.mrb[18].mxu0 }
 0x11f   : > { %12262 = vst [vmem:[#allocation67_spill] sm:$0xff] %v8485_v33  ;;  %12263 = vst [vmem:[#allocation68_spill] sm:$0xff] %v8488_v60  ;;  %v8506_v12 = vcombine.high %v8485_v33, %v8485_v33  ;;  %v8510_v30 = vmul.f32 %v8162_v45, %v8485_v33  ;;  %v8513_v44 = vrot.slane %v1568_v4, %v7897_v7 }
 0x120   : > { %12264 = vst [vmem:[#allocation69_spill] sm:$0xff] %v8491_v48  ;;  %12265 = vst [vmem:[#allocation70_spill] sm:$0xff] %v8494_v58  ;;  %v2793_v5 = vmul.f32 %v8219_v8, %v8382_v56  ;;  %v1585_v58 = vcombine.high %v1340_v23, %v1340_v23  ;;  %v8518_v41 = vrot.slane %v1340_v23, %v7897_v7 }
 0x121   : > { %12266 = vst [vmem:[#allocation71_spill] sm:$0xff] %v8498_v63  ;;  %12267 = vst [vmem:[#allocation72_spill] sm:$0xff] %v8502_v57  ;;  %v7563_v57 = vpop.f32.mrb[19].mxu0  ;;  %v2856_v3 = vadd.f32 %v2792_v42, %v8347_v54  ;;  %v2962_v4 = vmul.f32 %v8225_v15, %v8369_v0  ;;  %v2964_v1 = vmul.f32 %v8250_v27, %v8415_v26 }
 0x122   : > { %12268 = vst [vmem:[#allocation73_spill] sm:$0xff] %v8506_v12  ;;  %12269 = vst [vmem:[#allocation74_spill] sm:$0xff] %v8510_v30  ;;  %v2794_v12 = vmul.f32 %v8254_v28, %v8415_v26  ;;  %v2857_v30 = vadd.f32 %v2793_v5, %v8349_v22  ;;  %v8531_v23 = vrot.slane %v1585_v58, %v7897_v7  ;;  %v8545_v5 = vpop.f32.mrb[8].mxu1  ;;  %v1345_v42 = vpop.f32.mrb[20].mxu0 }
 0x123   : > { %12270 = vst [vmem:[#allocation75_spill] sm:$0xff] %v8513_v44  ;;  %12271 = vst [vmem:[#allocation76_spill] sm:$0xff] %v8518_v41  ;;  %v2963_v44 = vmul.f32 %v8246_v25, %v8382_v56  ;;  %v8535_v57 = vcombine.high %v8518_v41, %v8518_v41  ;;  %v8539_v54 = vmul.f32 %v8117_v18, %v8518_v41 }
 0x124   : > { %12272 = vst [vmem:[#allocation77_spill] sm:$0xff] %v8531_v23  ;;  %v8543_v22 = vmul.f32 %v8111_v16, %v8518_v41  ;;  %12276 = vst [vmem:[#allocation81_spill] sm:$0xff] %v8545_v5  ;;  %v2858_v47 = vadd.f32 %v2794_v12, %v8376_v32  ;;  %v8550_v58 = vmul.f32 %v8260_v29, %v8427_v6  ;;  %v3107_v23 = vrot.slane %v2962_v4, 7  ;;  %v7566_v41 = vpop.f32.mrb[21].mxu0 }
 0x125   : > { %12273 = vst [vmem:[#allocation78_spill] sm:$0xff] %v8535_v57  ;;  %12274 = vst [vmem:[#allocation79_spill] sm:$0xff] %v8539_v54  ;;  %v3110_v43 = vrot.slane %v2963_v44, 7  ;;  %v7596_v57 = vpop.f32.mrb[9].mxu1  ;;  %v1602_v18 = vcombine.high %v1345_v42, %v1345_v42  ;;  %v8554_v54 = vrot.slane %v1345_v42, %v7897_v7  ;;  %v3113_v16 = vrot.slane %v2964_v1, 7 }
 0x126   : > { %12275 = vst [vmem:[#allocation80_spill] sm:$0xff] %v8543_v22  ;;  %v12278_v5 = vrot.slane %v8402_v9, 9  ;;  %v3109_v12 = vrot.slane %v3107_v23, 2  ;;  %v11832_v29 = vrot.slane %v8550_v58, 7  ;;  %v3461_v42 = vmul.f32 %v8232_v19, %v8369_v0 }
 0x127   : > { %12277 = vst [vmem:[#allocation82_spill] sm:$0xff] %v8554_v54  ;;  %v3112_v34 = vrot.slane %v3110_v43, 2  ;;  %v8562_v44 = vrot.slane %v1602_v18, %v7897_v7  ;;  %v3115_v4 = vrot.slane %v3113_v16, 2  ;;  %v3462_v1 = vmul.f32 %v8273_v50, %v8382_v56  ;;  %v1350_v18 = vpop.f32.mrb[22].mxu0  ;;  %v12281_v56 = vld [vmem:[#allocation36_spill] sm:$0xff] }
 0x128   : > { %v3108_v32 = vsel %vm8136_vm9, %v12278_v5, %v3107_v23  ;;  %v3111_v41 = vsel %vm8136_vm9, %v3109_v12, %v3110_v43  ;;  %v3463_v23 = vmul.f32 %v8235_v20, %v8415_v26  ;;  %v8575_v5 = vpop.f32.mrb[10].mxu1  ;;  %v3464_v43 = vmul.f32 %v8277_v51, %v8427_v6 }
 0x129   : > { %12279 = vst [vmem:[#allocation83_spill] sm:$0xff] %v8562_v44  ;;  %v3369_v57 = vadd.f32 %v3108_v32, %v8411_v24  ;;  %v3114_v9 = vsel %vm8136_vm9, %v3112_v34, %v3113_v16  ;;  %12280 = vst [vmem:[#allocation84_spill] sm:$0xff] %v8575_v5  ;;  %v3117_v24 = vsel %vm8136_vm9, %v3115_v4, %v11832_v29  ;;  %v7569_v16 = vpop.f32.mrb[23].mxu0  ;;  %v7599_v34 = vpop.f32.mrb[11].mxu1 }
 0x12a   : > { %v3370_v32 = vadd.f32 %v3111_v41, %v2856_v3  ;;  %v3371_v39 = vadd.f32 %v3114_v9, %v2857_v30  ;;  %v3372_v12 = vadd.f32 %v3117_v24, %v2858_v47  ;;  %v3617_v44 = vmul.f32 %v8238_v21, %v8453_v40  ;;  %v12282_v3 = vld [vmem:[#allocation45_spill] sm:$0xff]  ;;  %v12283_v16 = vld [vmem:[#allocation24_spill] sm:$0xff]  ;;  %v8595_v24 = vpop.f32.mrb[24].mxu0 }
 0x12b   : > { %v3525_v22 = vadd.f32 %v3461_v42, %v3369_v57  ;;  %v3618_v54 = vmul.f32 %v8281_v52, %v8474_v36  ;;  %v3619_v4 = vmul.f32 %v12281_v56, %v8459_v37  ;;  %v3620_v30 = vmul.f32 %v12282_v3, %v8498_v63  ;;  %v12284_v57 = vld [vmem:[#allocation42_spill] sm:$0xff]  ;;  %12285 = vst [vmem:[#allocation85_spill] sm:$0xff] %v8595_v24  ;;  %v7572_v0 = vpop.f32.mrb[25].mxu0 }
 0x12c   : > { %v3526_v5 = vadd.f32 %v3462_v1, %v3370_v32  ;;  %v3527_v26 = vadd.f32 %v3463_v23, %v3371_v39  ;;  %v3528_v41 = vadd.f32 %v3464_v43, %v3372_v12  ;;  %v3787_v47 = vmul.f32 %v12283_v16, %v8453_v40  ;;  %v12286_v39 = vld [vmem:[#allocation43_spill] sm:$0xff]  ;;  %v12287_v23 = vld [vmem:[#allocation46_spill] sm:$0xff] }
 0x12d   : > { %v3681_v9 = vadd.f32 %v3617_v44, %v3525_v22  ;;  %v3788_v42 = vmul.f32 %v12284_v57, %v8474_v36  ;;  %v3789_v1 = vmul.f32 %v12286_v39, %v8459_v37  ;;  %v3790_v32 = vmul.f32 %v12287_v23, %v8498_v63  ;;  %v12288_v22 = vld [vmem:[#allocation47_spill] sm:$0xff] }
 0x12e   : > { %v3682_v34 = vadd.f32 %v3618_v54, %v3526_v5  ;;  %v3683_v29 = vadd.f32 %v3619_v4, %v3527_v26  ;;  %v3684_v48 = vadd.f32 %v3620_v30, %v3528_v41  ;;  %v8603_v44 = vmul.f32 %v12288_v22, %v8481_v53  ;;  %v12290_v26 = vld [vmem:[#allocation44_spill] sm:$0xff]  ;;  %v12291_v30 = vld [vmem:[#allocation38_spill] sm:$0xff]  ;;  %v8614_v22 = vpop.f32.mrb[26].mxu0 }
 0x12f   : > { %v7444_v43 = vrot.slane %v3787_v47, 9  ;;  %v3933_v12 = vrot.slane %v3788_v42, 7  ;;  %v3936_v40 = vrot.slane %v3789_v1, 7  ;;  %v3939_v16 = vrot.slane %v3790_v32, 7  ;;  %12292 = vst [vmem:[#allocation31_spill] sm:$0xff] %v8614_v22  ;;  %v12293_v32 = vld [vmem:[#allocation48_spill] sm:$0xff] }
 0x130   : > { %v4287_v54 = vmul.f32 %v12289_v46, %v8474_v36  ;;  %v4288_v5 = vmul.f32 %v12290_v26, %v8459_v37  ;;  %v4289_v41 = vmul.f32 %v12291_v30, %v8498_v63  ;;  %v4290_v36 = vmul.f32 %v12293_v32, %v8481_v53  ;;  %v7575_v11 = vpop.f32.mrb[27].mxu0 }
 0x131   : > { %v3934_v4 = vsel %vm8136_vm9, %v7444_v43, %v3933_v12  ;;  %v3935_v60 = vrot.slane %v3933_v12, 2  ;;  %v3938_v47 = vrot.slane %v3936_v40, 2  ;;  %v3941_v42 = vrot.slane %v3939_v16, 2 }
 0x132   : > { %v4195_v1 = vadd.f32 %v3934_v4, %v3681_v9  ;;  %v1619_v59 = vcombine.high %v1350_v18, %v1350_v18  ;;  %v8621_v43 = vrot.slane %v1350_v18, %v7897_v7  ;;  %v1704_v12 = vcombine.high %v8378_v2, %v8378_v2  ;;  %v8640_v24 = vpop.f32.mrb[28].mxu0 }
 0x133   : > { %v3937_v37 = vsel %vm8136_vm9, %v3935_v60, %v3936_v40  ;;  %v3940_v0 = vsel %vm8136_vm9, %v3938_v47, %v3939_v16  ;;  %v12295_v22 = vrot.slane %v8603_v44, 7  ;;  %12299 = vst [vmem:[#allocation87_spill] sm:$0xff] %v8640_v24 }
 0x134   : > { %12294 = vst [vmem:[#allocation44_spill] sm:$0xff] %v8621_v43  ;;  %v4196_v4 = vadd.f32 %v3937_v37, %v3682_v34  ;;  %v8631_v11 = vadd.f32 %v4287_v54, %v4195_v1  ;;  %v4197_v40 = vadd.f32 %v3940_v0, %v3683_v29  ;;  %v8634_v18 = vrot.slane %v1619_v59, %v7897_v7  ;;  %v7578_v59 = vpop.f32.mrb[29].mxu0 }
 0x135   : > { %v3943_v9 = vsel %vm8136_vm9, %v3941_v42, %v12295_v22  ;;  %v8638_v63 = vcombine.high %v8621_v43, %v8621_v43  ;;  %v8646_v22 = vmul.f32 %v8162_v45, %v8621_v43  ;;  %v8650_v37 = vrot.slane %v8378_v2, %v7897_v7  ;;  %v12361_v45 = vld [vmem:[#allocation60_spill] sm:$0xff] }
 0x136   : > { %12296 = vst [vmem:[#allocation38_spill] sm:$0xff] %v8631_v11  ;;  %v4198_v60 = vadd.f32 %v3943_v9, %v3684_v48  ;;  %12297 = vst [vmem:[#allocation48_spill] sm:$0xff] %v8634_v18  ;;  %v8642_v16 = vadd.f32 %v4288_v5, %v4196_v4  ;;  %v8653_v29 = vrot.slane %v1704_v12, %v7897_v7  ;;  %v8686_v9 = vpop.f32.mrb[30].mxu0  ;;  %v12311_v18 = vrot.slane %v8550_v58, 7 }
 0x137   : > { %12298 = vst [vmem:[#allocation86_spill] sm:$0xff] %v8638_v63  ;;  %12301 = vst [vmem:[#allocation89_spill] sm:$0xff] %v8646_v22  ;;  %v8655_v48 = vadd.f32 %v4289_v41, %v4197_v40  ;;  %v8661_v54 = vcombine.high %v8447_v55, %v8447_v55  ;;  %v8665_v5 = vcombine.high %v8481_v53, %v8481_v53  ;;  %v7581_v0 = vpop.f32.mrb[31].mxu0  ;;  %v12310_v22 = vld [vmem:[#allocation26_spill] sm:$0xff] }
 0x138   : > { %12300 = vst [vmem:[#allocation88_spill] sm:$0xff] %v8642_v16  ;;  %12302 = vst [vmem:[#allocation90_spill] sm:$0xff] %v8650_v37  ;;  %v8657_v34 = vadd.f32 %v4290_v36, %v4198_v60  ;;  %v4479_v2 = vcombine.low %v8631_v11, %v8642_v16  ;;  %v8672_v47 = vcombine.high %v8653_v29, %v8653_v29  ;;  %v3118_v43 = vrot.slane %v12311_v18, 2 }
 0x139   : > { %12303 = vst [vmem:[#allocation91_spill] sm:$0xff] %v8653_v29  ;;  %12304 = vst [vmem:[#allocation92_spill] sm:$0xff] %v8655_v48  ;;  %v8676_v36 = vcombine.high %v8470_v35, %v8470_v35  ;;  %v2795_v42 = vmul.f32 %v8199_v61, %v8427_v6  ;;  %v2796_v1 = vmul.f32 %v8229_v17, %v8421_v62 }
 0x13a   : > { %12305 = vst [vmem:[#allocation93_spill] sm:$0xff] %v8657_v34  ;;  %12306 = vst [vmem:[#allocation94_spill] sm:$0xff] %v8665_v5  ;;  %v4480_v41 = vcombine.low %v8655_v48, %v8657_v34  ;;  %v2797_v12 = vmul.f32 %v8219_v8, %v8439_v10  ;;  %v4487_v4 = vrot.slane %v4479_v2, %v7897_v7 }
 0x13b   : > { %12307 = vst [vmem:[#allocation95_spill] sm:$0xff] %v8672_v47  ;;  %12308 = vst [vmem:[#allocation96_spill] sm:$0xff] %v8676_v36  ;;  %v2798_v40 = vmul.f32 %v8254_v28, %v8447_v55  ;;  %v2966_v60 = vmul.f32 %v8225_v15, %v8421_v62  ;;  %v2967_v59 = vmul.f32 %v8246_v25, %v8439_v10 }
 0x13c   : > { %12309 = vst [vmem:[#allocation97_spill] sm:$0xff] %v8686_v9  ;;  %v4494_v34 = vrot.slane %v4480_v41, %v7897_v7  ;;  %v2859_v48 = vadd.f32 %v2795_v42, %v8385_v14  ;;  %v2860_v16 = vadd.f32 %v2796_v1, %v8387_v49  ;;  %v2861_v11 = vadd.f32 %v2797_v12, %v8392_v38 }
 0x13d   : > { %v2862_v2 = vadd.f32 %v2798_v40, %v8435_v13  ;;  %v2968_v37 = vmul.f32 %v8250_v27, %v8447_v55  ;;  %v2969_v63 = vmul.f32 %v12310_v22, %v8661_v54  ;;  %v3119_v9 = vrot.slane %v2966_v60, 7 }
 0x13e   : > { %v4495_v0 = vcombine.low %v4487_v4, %v4494_v34  ;;  %v3122_v41 = vrot.slane %v2967_v59, 7  ;;  %v3465_v14 = vmul.f32 %v8232_v19, %v8421_v62  ;;  %v3466_v38 = vmul.f32 %v8273_v50, %v8439_v10 }
 0x13f   : > { %v3125_v49 = vrot.slane %v2968_v37, 7  ;;  %v3128_v42 = vrot.slane %v2969_v63, 7  ;;  %v3467_v13 = vmul.f32 %v8235_v20, %v8447_v55  ;;  %v3120_v58 = vsel %vm8136_vm9, %v3118_v43, %v3119_v9 }
 0x140   : > { %v4768_v1 = vsel %vm4767_vm10, %v4495_v0, 0.0  ;;  %v3121_v18 = vrot.slane %v3119_v9, 2  ;;  %v3124_v34 = vrot.slane %v3122_v41, 2  ;;  %v3373_v4 = vadd.f32 %v3120_v58, %v2859_v48  ;;  %v8729_v58 = vpop.f32.mrb[12].mxu1 }
 0x141   : > { %4769 = vadd.xlane.f32.xlu0 %v4768_v1  ;;  %v3127_v12 = vrot.slane %v3125_v49, 2  ;;  %v3468_v37 = vmul.f32 %v8277_v51, %v8661_v54  ;;  %v3621_v63 = vmul.f32 %v8238_v21, %v8481_v53  ;;  %v3622_v43 = vmul.f32 %v8281_v52, %v8665_v5  ;;  %12312 = vst [vmem:[#allocation98_spill] sm:$0xff] %v8729_v58 }
 0x142   : > { %v3123_v40 = vsel %vm8136_vm9, %v3121_v18, %v3122_v41  ;;  %v3126_v60 = vsel %vm8136_vm9, %v3124_v34, %v3125_v49  ;;  %v3623_v9 = vmul.f32 %v12281_v56, %v8470_v35  ;;  %v3529_v1 = vadd.f32 %v3465_v14, %v3373_v4  ;;  %v7602_v34 = vpop.f32.mrb[13].mxu1  ;;  %v12313_v14 = vld [vmem:[#allocation37_spill] sm:$0xff] }
 0x143   : > { %v3129_v48 = vsel %vm8136_vm9, %v3127_v12, %v3128_v42  ;;  %v3374_v59 = vadd.f32 %v3123_v40, %v2860_v16  ;;  %v3375_v0 = vadd.f32 %v3126_v60, %v2861_v11  ;;  %v3624_v41 = vmul.f32 %v12282_v3, %v8676_v36  ;;  %v12316_v34 = vld [vmem:[#allocation85_spill] sm:$0xff] }
 0x144   : > { %v3376_v47 = vadd.f32 %v3129_v48, %v2862_v2  ;;  %v3792_v49 = vmul.f32 %v12284_v57, %v8665_v5  ;;  %v3793_v18 = vmul.f32 %v12286_v39, %v8470_v35  ;;  %v3685_v22 = vadd.f32 %v3621_v63, %v3529_v1 }
 0x145   : > { %v3530_v29 = vadd.f32 %v3466_v38, %v3374_v59  ;;  %v3531_v24 = vadd.f32 %v3467_v13, %v3375_v0  ;;  %v3794_v11 = vmul.f32 %v12287_v23, %v8676_v36  ;;  %v3795_v2 = vmul.f32 %v12313_v14, %v8485_v33  ;;  %v12351_v14 = vld [vmem:[#allocation22_spill] sm:$0xff] }
 0x146   : > { %v3532_v16 = vadd.f32 %v3468_v37, %v3376_v47  ;;  %v12314_v42 = vrot.slane %v8603_v44, 7  ;;  %v3945_v4 = vrot.slane %v3792_v49, 7  ;;  %v3948_v48 = vrot.slane %v3793_v18, 7 }
 0x147   : > { %v3686_v40 = vadd.f32 %v3622_v43, %v3530_v29  ;;  %v3687_v60 = vadd.f32 %v3623_v9, %v3531_v24  ;;  %v3951_v58 = vrot.slane %v3794_v11, 7  ;;  %v3954_v63 = vrot.slane %v3795_v2, 7 }
 0x148   : > { %v3944_v12 = vrot.slane %v12314_v42, 2  ;;  %v3688_v55 = vadd.f32 %v3624_v41, %v3532_v16  ;;  %v3947_v13 = vrot.slane %v3945_v4, 2  ;;  %v3950_v59 = vrot.slane %v3948_v48, 2  ;;  %v12319_v42 = vld [vmem:[#allocation51_spill] sm:$0xff] }
 0x149   : > { %v3953_v0 = vrot.slane %v3951_v58, 2  ;;  %v4291_v37 = vmul.f32 %v12289_v46, %v8665_v5  ;;  %v4292_v24 = vmul.f32 %v12290_v26, %v8470_v35  ;;  %v4293_v29 = vmul.f32 %v12291_v30, %v8676_v36 }
 0x14a   : > { %v3946_v38 = vsel %vm8136_vm9, %v3944_v12, %v3945_v4  ;;  %v3949_v44 = vsel %vm8136_vm9, %v3947_v13, %v3948_v48  ;;  %v4294_v43 = vmul.f32 %v12293_v32, %v8485_v33  ;;  %v3952_v9 = vsel %vm8136_vm9, %v3950_v59, %v3951_v58  ;;  %v12321_v4 = vld [vmem:[#allocation58_spill] sm:$0xff] }
 0x14b   : > { %v4199_v47 = vadd.f32 %v3946_v38, %v3685_v22  ;;  %v3955_v22 = vsel %vm8136_vm9, %v3953_v0, %v3954_v63  ;;  %v4200_v1 = vadd.f32 %v3949_v44, %v3686_v40  ;;  %v4201_v49 = vadd.f32 %v3952_v9, %v3687_v60  ;;  %v12327_v0 = vld [vmem:[#allocation68_spill] sm:$0xff] }
 0x14c   : > { %v4202_v18 = vadd.f32 %v3955_v22, %v3688_v55  ;;  %v1636_v11 = vcombine.high %v12316_v34, %v12316_v34  ;;  %v8765_v16 = vrot.slane %v12316_v34, %v7897_v7  ;;  %v1721_v58 = vcombine.high %v12319_v42, %v12319_v42 }
 0x14d   : > { %v8759_v41 = vadd.f32 %v4291_v37, %v4199_v47  ;;  %v8767_v2 = vadd.f32 %v4292_v24, %v4200_v1  ;;  %v8773_v12 = vrot.slane %v12319_v42, %v7897_v7  ;;  %v1738_v40 = vcombine.high %v12321_v4, %v12321_v4  ;;  %v12337_v42 = vld [vmem:[#allocation69_spill] sm:$0xff] }
 0x14e   : > { %12317 = vst [vmem:[#allocation85_spill] sm:$0xff] %v8765_v16  ;;  %v8777_v55 = vadd.f32 %v4293_v29, %v4201_v49  ;;  %v8779_v60 = vadd.f32 %v4294_v43, %v4202_v18  ;;  %v8782_v48 = vrot.slane %v1636_v11, %v7897_v7  ;;  %v1745_v38 = vrot.slane %v12321_v4, %v7897_v7  ;;  %v12331_v29 = vld [vmem:[#allocation13_spill] sm:$0xff]  ;;  %v12335_v49 = vld [vmem:[#allocation24_spill] sm:$0xff]  ;;  %v12345_v11 = vld [vmem:[#allocation15_spill] sm:$0xff] }
 0x14f   : > { %12315 = vst [vmem:[#allocation99_spill] sm:$0xff] %v8759_v41  ;;  %12318 = vst [vmem:[#allocation100_spill] sm:$0xff] %v8767_v2  ;;  %v4496_v13 = vcombine.low %v8759_v41, %v8767_v2  ;;  %v8789_v63 = vrot.slane %v1721_v58, %v7897_v7  ;;  %v8792_v59 = vrot.slane %v1738_v40, %v7897_v7  ;;  %v12338_v4 = vld [vmem:[#allocation49_spill] sm:$0xff]  ;;  %v12339_v40 = vld [vmem:[#allocation8_spill] sm:$0xff] }
 0x150   : > { %12320 = vst [vmem:[#allocation51_spill] sm:$0xff] %v8773_v12  ;;  %12322 = vst [vmem:[#allocation58_spill] sm:$0xff] %v8777_v55  ;;  %v8796_v47 = vcombine.high %v12327_v0, %v12327_v0  ;;  %v4497_v37 = vcombine.low %v8777_v55, %v8779_v60  ;;  %v8800_v44 = vcombine.high %v1745_v38, %v1745_v38  ;;  %v12340_v55 = vld [vmem:[#allocation50_spill] sm:$0xff]  ;;  %v12346_v12 = vld [vmem:[#allocation20_spill] sm:$0xff] }
 0x151   : > { %12323 = vst [vmem:[#allocation101_spill] sm:$0xff] %v8779_v60  ;;  %12324 = vst [vmem:[#allocation102_spill] sm:$0xff] %v8782_v48  ;;  %v8803_v24 = vmul.f32 %v8199_v61, %v1745_v38  ;;  %v8806_v43 = vmul.f32 %v12331_v29, %v1745_v38  ;;  %v4504_v9 = vrot.slane %v4496_v13, %v7897_v7  ;;  %v12341_v2 = vld [vmem:[#allocation6_spill] sm:$0xff]  ;;  %v12348_v16 = vld [vmem:[#allocation55_spill] sm:$0xff] }
 0x152   : > { %12325 = vst [vmem:[#allocation103_spill] sm:$0xff] %v8789_v63  ;;  %12326 = vst [vmem:[#allocation104_spill] sm:$0xff] %v8792_v59  ;;  %v8811_v22 = vcombine.high %v8792_v59, %v8792_v59  ;;  %v8814_v1 = vmul.f32 %v8238_v21, %v1745_v38  ;;  %v8817_v18 = vmul.f32 %v12335_v49, %v1745_v38  ;;  %v12344_v59 = vld [vmem:[#allocation17_spill] sm:$0xff]  ;;  %v12349_v63 = vrot.slane %v12348_v16, 7  ;;  %v12350_v60 = vld [vmem:[#allocation14_spill] sm:$0xff] }
 0x153   : > { %12328 = vst [vmem:[#allocation105_spill] sm:$0xff] %v8796_v47  ;;  %12329 = vst [vmem:[#allocation106_spill] sm:$0xff] %v8800_v44  ;;  %v4511_v34 = vrot.slane %v4497_v37, %v7897_v7  ;;  %v8823_v58 = vcombine.high %v12337_v42, %v12337_v42  ;;  %v1940_v13 = vmul.f32 %v12339_v40, %v12338_v4 }
 0x154   : > { %12330 = vst [vmem:[#allocation107_spill] sm:$0xff] %v8803_v24  ;;  %12332 = vst [vmem:[#allocation108_spill] sm:$0xff] %v8806_v43  ;;  %v1941_v41 = vmul.f32 %v12341_v2, %v12340_v55  ;;  %v12342_v24 = vld [vmem:[#allocation53_spill] sm:$0xff]  ;;  %v2146_v37 = vmul.f32 %v12344_v59, %v12340_v55  ;;  %v8837_v48 = vmul.f32 %v12346_v12, %v8427_v6  ;;  %v12354_v12 = vld [vmem:[#allocation16_spill] sm:$0xff] }
 0x155   : > { %12333 = vst [vmem:[#allocation109_spill] sm:$0xff] %v8811_v22  ;;  %12334 = vst [vmem:[#allocation110_spill] sm:$0xff] %v8814_v1  ;;  %v12343_v1 = vld [vmem:[#allocation10_spill] sm:$0xff]  ;;  %v4512_v44 = vcombine.low %v4504_v9, %v4511_v34  ;;  %v2031_v43 = vadd.f32 %v12345_v11, %v1940_v13  ;;  %v2314_v22 = vrot.slane %v12349_v63, 2  ;;  %v12353_v34 = vld [vmem:[#allocation19_spill] sm:$0xff]  ;;  %v2645_v11 = vmul.f32 %v12354_v12, %v12342_v24 }
 0x156   : > { %12336 = vst [vmem:[#allocation111_spill] sm:$0xff] %v8817_v18  ;;  %v1942_v38 = vmul.f32 %v12343_v1, %v12342_v24  ;;  %12347 = vst [vmem:[#allocation49_spill] sm:$0xff] %v8837_v48  ;;  %v2032_v18 = vadd.f32 %v12350_v60, %v1941_v41  ;;  %v2309_v36 = vrot.slane %v2146_v37, 7  ;;  %v12352_v1 = vld [vmem:[#allocation9_spill] sm:$0xff]  ;;  %v11892_v9 = vrot.slane %v8837_v48, 7  ;;  %v12355_v63 = vld [vmem:[#allocation52_spill] sm:$0xff] }
 0x157   : > { %v2643_v35 = vmul.f32 %v12352_v1, %v12338_v4  ;;  %v4771_v5 = vsel %vm4767_vm10, %v4512_v44, 0.0  ;;  %v2644_v13 = vmul.f32 %v12353_v34, %v12340_v55  ;;  %v12356_v37 = vld [vmem:[#allocation23_spill] sm:$0xff]  ;;  %v12357_v4 = vld [vmem:[#allocation54_spill] sm:$0xff] }
 0x158   : > { %v2033_v33 = vadd.f32 %v12351_v14, %v1942_v38  ;;  %4772 = vadd.xlane.f32.xlu0 %v4771_v5  ;;  %v2310_v41 = vsel %vm8136_vm9, %v12355_v63, %v2309_v36  ;;  %v2311_v38 = vrot.slane %v2309_v36, 2  ;;  %v2646_v60 = vmul.f32 %v12356_v37, %v8427_v6  ;;  %v12358_v34 = vld [vmem:[#allocation59_spill] sm:$0xff]  ;;  %v12359_v5 = vld [vmem:[#allocation64_spill] sm:$0xff] }
 0x159   : > { %v2707_v1 = vadd.f32 %v2643_v35, %v12357_v4  ;;  %v2316_v44 = vsel %vm8136_vm9, %v2314_v22, %v11892_v9  ;;  %v2552_v55 = vadd.f32 %v2310_v41, %v2031_v43  ;;  %v2799_v24 = vmul.f32 %v8199_v61, %v12358_v34  ;;  %v12362_v4 = vld [vmem:[#allocation71_spill] sm:$0xff] }
 0x15a   : > { %v2800_v12 = vmul.f32 %v8229_v17, %v12359_v5  ;;  %v12360_v63 = vrot.slane %v12348_v16, 7  ;;  %v2554_v37 = vadd.f32 %v2316_v44, %v2033_v33  ;;  %v2801_v35 = vmul.f32 %v8219_v8, %v12361_v45 }
 0x15b   : > { %v2802_v48 = vmul.f32 %v8254_v28, %v12362_v4  ;;  %v2708_v43 = vadd.f32 %v2644_v13, %v2552_v55  ;;  %v2863_v41 = vadd.f32 %v2799_v24, %v2707_v1  ;;  %v2970_v9 = vmul.f32 %v12331_v29, %v12358_v34  ;;  %v12363_v28 = vld [vmem:[#allocation35_spill] sm:$0xff] }
 0x15c   : > { %v2313_v36 = vsel %vm8136_vm9, %v2311_v38, %v12360_v63  ;;  %v2710_v61 = vadd.f32 %v2646_v60, %v2554_v37  ;;  %v2971_v16 = vmul.f32 %v8225_v15, %v12359_v5  ;;  %v2972_v38 = vmul.f32 %v8246_v25, %v12361_v45 }
 0x15d   : > { %v2553_v22 = vadd.f32 %v2313_v36, %v2032_v18  ;;  %v2973_v33 = vmul.f32 %v8250_v27, %v12362_v4  ;;  %v2864_v63 = vadd.f32 %v2800_v12, %v2708_v43  ;;  %v8883_v18 = vmul.f32 %v12363_v28, %v8481_v53 }
 0x15e   : > { %v7431_v1 = vrot.slane %v2970_v9, 9  ;;  %v2866_v13 = vadd.f32 %v2802_v48, %v2710_v61  ;;  %v3132_v55 = vrot.slane %v2971_v16, 7  ;;  %v3135_v24 = vrot.slane %v2972_v38, 7 }
 0x15f   : > { %v2709_v44 = vadd.f32 %v2645_v11, %v2553_v22  ;;  %v3138_v60 = vrot.slane %v2973_v33, 7  ;;  %v11901_v36 = vrot.slane %v8883_v18, 7  ;;  %v3469_v29 = vmul.f32 %v8232_v19, %v12359_v5 }
 0x160   : > { %v3470_v34 = vmul.f32 %v8273_v50, %v12361_v45  ;;  %v3133_v12 = vsel %vm8136_vm9, %v7431_v1, %v3132_v55  ;;  %v3134_v11 = vrot.slane %v3132_v55, 2  ;;  %v3137_v22 = vrot.slane %v3135_v24, 2 }
 0x161   : > { %v2865_v37 = vadd.f32 %v2801_v35, %v2709_v44  ;;  %v3140_v43 = vrot.slane %v3138_v60, 2  ;;  %v3377_v9 = vadd.f32 %v3133_v12, %v2863_v41  ;;  %v3471_v61 = vmul.f32 %v8235_v20, %v12362_v4  ;;  %v12364_v35 = vld [vmem:[#allocation73_spill] sm:$0xff] }
 0x162   : > { %v3472_v48 = vmul.f32 %v8277_v51, %v8481_v53  ;;  %v3625_v16 = vmul.f32 %v8238_v21, %v12364_v35  ;;  %v3136_v38 = vsel %vm8136_vm9, %v3134_v11, %v3135_v24  ;;  %v3139_v33 = vsel %vm8136_vm9, %v3137_v22, %v3138_v60 }
 0x163   : > { %v3142_v41 = vsel %vm8136_vm9, %v3140_v43, %v11901_v36  ;;  %v3626_v44 = vmul.f32 %v8281_v52, %v12327_v0  ;;  %v3378_v1 = vadd.f32 %v3136_v38, %v2864_v63  ;;  %v3379_v55 = vadd.f32 %v3139_v33, %v2865_v37 }
 0x164   : > { %v3380_v12 = vadd.f32 %v3142_v41, %v2866_v13  ;;  %v3533_v4 = vadd.f32 %v3469_v29, %v3377_v9  ;;  %v3627_v45 = vmul.f32 %v12281_v56, %v8796_v47  ;;  %v3628_v24 = vmul.f32 %v12282_v3, %v12337_v42  ;;  %v12365_v13 = vld [vmem:[#allocation47_spill] sm:$0xff] }
 0x165   : > { %v3796_v60 = vmul.f32 %v12335_v49, %v12364_v35  ;;  %v3797_v11 = vmul.f32 %v12284_v57, %v12327_v0  ;;  %v3534_v22 = vadd.f32 %v3470_v34, %v3378_v1  ;;  %v3535_v43 = vadd.f32 %v3471_v61, %v3379_v55 }
 0x166   : > { %v3536_v36 = vadd.f32 %v3472_v48, %v3380_v12  ;;  %v3689_v5 = vadd.f32 %v3625_v16, %v3533_v4  ;;  %v3798_v63 = vmul.f32 %v12286_v39, %v8796_v47  ;;  %v3799_v29 = vmul.f32 %v12287_v23, %v12337_v42 }
 0x167   : > { %v8922_v37 = vmul.f32 %v12365_v13, %v8823_v58  ;;  %v7445_v9 = vrot.slane %v3796_v60, 9  ;;  %v3690_v38 = vadd.f32 %v3626_v44, %v3534_v22  ;;  %v3691_v33 = vadd.f32 %v3627_v45, %v3535_v43  ;;  %v12366_v60 = vld [vmem:[#allocation31_spill] sm:$0xff]  ;;  %v12368_v22 = vld [vmem:[#allocation72_spill] sm:$0xff] }
 0x168   : > { %v3692_v41 = vadd.f32 %v3628_v24, %v3536_v36  ;;  %v3958_v35 = vrot.slane %v3797_v11, 7  ;;  %v3961_v28 = vrot.slane %v3798_v63, 7  ;;  %v3964_v34 = vrot.slane %v3799_v29, 7 }
 0x169   : > { %v11905_v61 = vrot.slane %v8922_v37, 7  ;;  %v4295_v4 = vmul.f32 %v12289_v46, %v12327_v0  ;;  %v4296_v1 = vmul.f32 %v12290_v26, %v8796_v47  ;;  %v4297_v44 = vmul.f32 %v12291_v30, %v12337_v42  ;;  %v12394_v0 = vld [vmem:[#allocation62_spill] sm:$0xff] }
 0x16a   : > { %v3959_v48 = vsel %vm8136_vm9, %v7445_v9, %v3958_v35  ;;  %v3960_v16 = vrot.slane %v3958_v35, 2  ;;  %v3963_v45 = vrot.slane %v3961_v28, 2  ;;  %v3966_v36 = vrot.slane %v3964_v34, 2 }
 0x16b   : > { %v4203_v55 = vadd.f32 %v3959_v48, %v3689_v5  ;;  %v4298_v12 = vmul.f32 %v12293_v32, %v8823_v58  ;;  %v1653_v11 = vcombine.high %v12366_v60, %v12366_v60  ;;  %v8941_v35 = vrot.slane %v12366_v60, %v7897_v7 }
 0x16c   : > { %v3962_v24 = vsel %vm8136_vm9, %v3960_v16, %v3961_v28  ;;  %v1755_v43 = vcombine.high %v12368_v22, %v12368_v22  ;;  %v3965_v63 = vsel %vm8136_vm9, %v3963_v45, %v3964_v34  ;;  %v3968_v5 = vsel %vm8136_vm9, %v3966_v36, %v11905_v61  ;;  %v12374_v45 = vld [vmem:[#allocation70_spill] sm:$0xff] }
 0x16d   : > { %12367 = vst [vmem:[#allocation50_spill] sm:$0xff] %v8941_v35  ;;  %v4204_v29 = vadd.f32 %v3962_v24, %v3690_v38  ;;  %v8951_v28 = vadd.f32 %v4295_v4, %v4203_v55  ;;  %v4205_v9 = vadd.f32 %v3965_v63, %v3691_v33  ;;  %v4206_v48 = vadd.f32 %v3968_v5, %v3692_v41  ;;  %v12376_v38 = vld [vmem:[#allocation75_spill] sm:$0xff] }
 0x16e   : > { %v8954_v16 = vrot.slane %v1653_v11, %v7897_v7  ;;  %v8958_v60 = vrot.slane %v12368_v22, %v7897_v7  ;;  %v8963_v34 = vrot.slane %v1755_v43, %v7897_v7  ;;  %v8967_v36 = vcombine.high %v12374_v45, %v12374_v45 }
 0x16f   : > { %12369 = vst [vmem:[#allocation53_spill] sm:$0xff] %v8951_v28  ;;  %v8960_v35 = vadd.f32 %v4296_v1, %v4204_v29  ;;  %v8971_v33 = vcombine.high %v12376_v38, %v12376_v38  ;;  %v8973_v41 = vadd.f32 %v4297_v44, %v4205_v9  ;;  %v8975_v4 = vadd.f32 %v4298_v12, %v4206_v48  ;;  %v12381_v1 = vld [vmem:[#allocation4_spill] sm:$0xff]  ;;  %v12385_v12 = vld [vmem:[#allocation5_spill] sm:$0xff] }
 0x170   : > { %12370 = vst [vmem:[#allocation55_spill] sm:$0xff] %v8954_v16  ;;  %12371 = vst [vmem:[#allocation52_spill] sm:$0xff] %v8958_v60  ;;  %v8979_v55 = vcombine.high %v8954_v16, %v8954_v16  ;;  %v8983_v24 = vmul.f32 %v12381_v1, %v8954_v16  ;;  %v8989_v22 = vcombine.high %v8958_v60, %v8958_v60  ;;  %v12386_v9 = vld [vmem:[#allocation61_spill] sm:$0xff] }
 0x171   : > { %12372 = vst [vmem:[#allocation54_spill] sm:$0xff] %v8960_v35  ;;  %12373 = vst [vmem:[#allocation31_spill] sm:$0xff] %v8963_v34  ;;  %v4513_v11 = vcombine.low %v8951_v28, %v8960_v35  ;;  %v8993_v44 = vcombine.high %v8963_v34, %v8963_v34  ;;  %v1943_v43 = vmul.f32 %v12385_v12, %v8427_v6  ;;  %v12387_v35 = vld [vmem:[#allocation7_spill] sm:$0xff]  ;;  %v12388_v6 = vld [vmem:[#allocation12_spill] sm:$0xff] }
 0x172   : > { %12375 = vst [vmem:[#allocation72_spill] sm:$0xff] %v8967_v36  ;;  %12377 = vst [vmem:[#allocation112_spill] sm:$0xff] %v8971_v33  ;;  %v4514_v63 = vcombine.low %v8973_v41, %v8975_v4  ;;  %v1944_v5 = vmul.f32 %v12339_v40, %v8421_v62  ;;  %v1945_v29 = vmul.f32 %v12341_v2, %v8439_v10  ;;  %v12391_v1 = vld [vmem:[#allocation49_spill] sm:$0xff] }
 0x173   : > { %12378 = vst [vmem:[#allocation113_spill] sm:$0xff] %v8973_v41  ;;  %12379 = vst [vmem:[#allocation114_spill] sm:$0xff] %v8975_v4  ;;  %v2037_v48 = vadd.f32 %v12351_v14, %v12386_v9  ;;  %v4521_v61 = vrot.slane %v4513_v11, %v7897_v7  ;;  %v2034_v28 = vadd.f32 %v12387_v35, %v1943_v43  ;;  %v12389_v41 = vld [vmem:[#allocation15_spill] sm:$0xff]  ;;  %v12393_v9 = vld [vmem:[#allocation56_spill] sm:$0xff]  ;;  %v12395_v43 = vrot.slane %v12394_v0, 7 }
 0x174   : > { %12380 = vst [vmem:[#allocation115_spill] sm:$0xff] %v8979_v55  ;;  %12382 = vst [vmem:[#allocation116_spill] sm:$0xff] %v8983_v24  ;;  %v2150_v34 = vmul.f32 %v12344_v59, %v8439_v10  ;;  %v4528_v4 = vrot.slane %v4514_v63, %v7897_v7  ;;  %v2035_v24 = vadd.f32 %v12389_v41, %v1944_v5  ;;  %v12390_v55 = vld [vmem:[#allocation14_spill] sm:$0xff]  ;;  %v2318_v47 = vrot.slane %v12393_v9, 7  ;;  %v12396_v40 = vld [vmem:[#allocation9_spill] sm:$0xff] }
 0x175   : > { %12383 = vst [vmem:[#allocation117_spill] sm:$0xff] %v8989_v22  ;;  %12384 = vst [vmem:[#allocation118_spill] sm:$0xff] %v8993_v44  ;;  %v2152_v22 = vmul.f32 %v12388_v6, %v8661_v54  ;;  %v2036_v16 = vadd.f32 %v12390_v55, %v1945_v29  ;;  %v12392_v44 = vrot.slane %v12391_v1, 7  ;;  %v2326_v35 = vrot.slane %v12395_v43, 2  ;;  %v12397_v63 = vld [vmem:[#allocation19_spill] sm:$0xff]  ;;  %v12398_v5 = vld [vmem:[#allocation57_spill] sm:$0xff] }
 0x176   : > { %v2321_v11 = vrot.slane %v2150_v34, 7  ;;  %v4529_v59 = vcombine.low %v4521_v61, %v4528_v4  ;;  %v2647_v6 = vmul.f32 %v12396_v40, %v8421_v62  ;;  %v2648_v12 = vmul.f32 %v12397_v63, %v8439_v10  ;;  %v12399_v41 = vld [vmem:[#allocation16_spill] sm:$0xff]  ;;  %v12400_v62 = vld [vmem:[#allocation23_spill] sm:$0xff] }
 0x177   : > { %v2317_v42 = vrot.slane %v12392_v44, 2  ;;  %v2327_v2 = vrot.slane %v2152_v22, 7  ;;  %v2649_v29 = vmul.f32 %v12399_v41, %v12398_v5  ;;  %v2320_v44 = vrot.slane %v2318_v47, 2 }
 0x178   : > { %v2323_v9 = vrot.slane %v2321_v11, 2  ;;  %v4774_v22 = vsel %vm4767_vm10, %v4529_v59, 0.0  ;;  %v2650_v43 = vmul.f32 %v12400_v62, %v8661_v54  ;;  %v12401_v5 = vrot.slane %v12394_v0, 7  ;;  %v12404_v54 = vld [vmem:[#allocation63_spill] sm:$0xff] }
 0x179   : > { %v2319_v1 = vsel %vm8136_vm9, %v2317_v42, %v2318_v47  ;;  %v2328_v34 = vsel %vm8136_vm9, %v2326_v35, %v2327_v2  ;;  %4775 = vadd.xlane.f32.xlu1 %v4774_v22  ;;  %v2322_v10 = vsel %vm8136_vm9, %v2320_v44, %v2321_v11  ;;  %v12402_v42 = vld [vmem:[#allocation21_spill] sm:$0xff]  ;;  %v12403_v2 = vld [vmem:[#allocation94_spill] sm:$0xff]  ;;  %v12405_v22 = vld [vmem:[#allocation96_spill] sm:$0xff] }
 0x17a   : > { %v2555_v61 = vadd.f32 %v2319_v1, %v2034_v28  ;;  %v2558_v4 = vadd.f32 %v2328_v34, %v2037_v48  ;;  %v2325_v47 = vsel %vm8136_vm9, %v2323_v9, %v12401_v5  ;;  %v2803_v41 = vmul.f32 %v12402_v42, %v8481_v53  ;;  %v12406_v11 = vld [vmem:[#allocation34_spill] sm:$0xff] }
 0x17b   : > { %v2804_v59 = vmul.f32 %v8229_v17, %v12403_v2  ;;  %v2556_v35 = vadd.f32 %v2322_v10, %v2035_v24  ;;  %v2557_v28 = vadd.f32 %v2325_v47, %v2036_v16  ;;  %v2805_v34 = vmul.f32 %v8219_v8, %v12404_v54 }
 0x17c   : > { %v2711_v48 = vadd.f32 %v2647_v6, %v2555_v61  ;;  %v2714_v1 = vadd.f32 %v2650_v43, %v2558_v4  ;;  %v2806_v44 = vmul.f32 %v12406_v11, %v12405_v22  ;;  %v2975_v0 = vmul.f32 %v8225_v15, %v12403_v2  ;;  %v12407_v6 = vld [vmem:[#allocation67_spill] sm:$0xff]  ;;  %v12408_v61 = vld [vmem:[#allocation26_spill] sm:$0xff] }
 0x17d   : > { %v2976_v9 = vmul.f32 %v8246_v25, %v12404_v54  ;;  %v2712_v5 = vadd.f32 %v2648_v12, %v2556_v35  ;;  %v2713_v42 = vadd.f32 %v2649_v29, %v2557_v28  ;;  %v2977_v16 = vmul.f32 %v8250_v27, %v12405_v22 }
 0x17e   : > { %v2867_v63 = vadd.f32 %v2803_v41, %v2711_v48  ;;  %v2870_v24 = vadd.f32 %v2806_v44, %v2714_v1  ;;  %v2978_v4 = vmul.f32 %v12408_v61, %v12407_v6  ;;  %v12409_v43 = vrot.slane %v8883_v18, 7 }
 0x17f   : > { %v3144_v47 = vrot.slane %v2975_v0, 7  ;;  %v2868_v8 = vadd.f32 %v2804_v59, %v2712_v5  ;;  %v2869_v17 = vadd.f32 %v2805_v34, %v2713_v42  ;;  %v3147_v15 = vrot.slane %v2976_v9, 7 }
 0x180   : > { %v3143_v10 = vrot.slane %v12409_v43, 2  ;;  %v3150_v40 = vrot.slane %v2977_v16, 7  ;;  %v3153_v41 = vrot.slane %v2978_v4, 7  ;;  %v3473_v35 = vmul.f32 %v8232_v19, %v12403_v2 }
 0x181   : > { %v3146_v29 = vrot.slane %v3144_v47, 2  ;;  %v3149_v28 = vrot.slane %v3147_v15, 2  ;;  %v3474_v18 = vmul.f32 %v8273_v50, %v12404_v54  ;;  %v3475_v42 = vmul.f32 %v8235_v20, %v12405_v22 }
 0x182   : > { %v3145_v12 = vsel %vm8136_vm9, %v3143_v10, %v3144_v47  ;;  %v3152_v48 = vrot.slane %v3150_v40, 2  ;;  %v3476_v34 = vmul.f32 %v8277_v51, %v12407_v6  ;;  %v3629_v44 = vmul.f32 %v8238_v21, %v8823_v58 }
 0x183   : > { %v3381_v1 = vadd.f32 %v3145_v12, %v2867_v63  ;;  %v3148_v59 = vsel %vm8136_vm9, %v3146_v29, %v3147_v15  ;;  %v3151_v0 = vsel %vm8136_vm9, %v3149_v28, %v3150_v40  ;;  %v3630_v15 = vmul.f32 %v8281_v52, %v12374_v45 }
 0x184   : > { %v3154_v63 = vsel %vm8136_vm9, %v3152_v48, %v3153_v41  ;;  %v3382_v9 = vadd.f32 %v3148_v59, %v2868_v8  ;;  %v3383_v16 = vadd.f32 %v3151_v0, %v2869_v17  ;;  %v3631_v43 = vmul.f32 %v12281_v56, %v8967_v36 }
 0x185   : > { %v3537_v5 = vadd.f32 %v3473_v35, %v3381_v1  ;;  %v3384_v4 = vadd.f32 %v3154_v63, %v2870_v24  ;;  %v3632_v47 = vmul.f32 %v12282_v3, %v12376_v38  ;;  %v3801_v40 = vmul.f32 %v12284_v57, %v12374_v45  ;;  %v12410_v35 = vld [vmem:[#allocation37_spill] sm:$0xff] }
 0x186   : > { %v3538_v10 = vadd.f32 %v3474_v18, %v3382_v9  ;;  %v3539_v29 = vadd.f32 %v3475_v42, %v3383_v16  ;;  %v3802_v8 = vmul.f32 %v12286_v39, %v8967_v36  ;;  %v3803_v17 = vmul.f32 %v12287_v23, %v12376_v38 }
 0x187   : > { %v3693_v12 = vadd.f32 %v3629_v44, %v3537_v5  ;;  %v3540_v41 = vadd.f32 %v3476_v34, %v3384_v4  ;;  %v3804_v28 = vmul.f32 %v12410_v35, %v8971_v33  ;;  %v12411_v48 = vrot.slane %v8922_v37, 7 }
 0x188   : > { %v3694_v24 = vadd.f32 %v3630_v15, %v3538_v10  ;;  %v3970_v18 = vrot.slane %v3801_v40, 7  ;;  %v3695_v59 = vadd.f32 %v3631_v43, %v3539_v29  ;;  %v3973_v0 = vrot.slane %v3802_v8, 7  ;;  %v12412_v40 = vld [vmem:[#allocation87_spill] sm:$0xff] }
 0x189   : > { %v3969_v1 = vrot.slane %v12411_v48, 2  ;;  %v3696_v44 = vadd.f32 %v3632_v47, %v3540_v41  ;;  %v3976_v63 = vrot.slane %v3803_v17, 7  ;;  %v3979_v9 = vrot.slane %v3804_v28, 7 }
 0x18a   : > { %v3972_v34 = vrot.slane %v3970_v18, 2  ;;  %v4299_v5 = vmul.f32 %v12289_v46, %v12374_v45  ;;  %v3975_v16 = vrot.slane %v3973_v0, 2  ;;  %v4300_v37 = vmul.f32 %v12290_v26, %v8967_v36  ;;  %v12475_v36 = vld [vmem:[#allocation15_spill] sm:$0xff] }
 0x18b   : > { %v3971_v42 = vsel %vm8136_vm9, %v3969_v1, %v3970_v18  ;;  %v3978_v4 = vrot.slane %v3976_v63, 2  ;;  %v4301_v10 = vmul.f32 %v12291_v30, %v12376_v38  ;;  %v4302_v47 = vmul.f32 %v12293_v32, %v8971_v33  ;;  %v12474_v38 = vld [vmem:[#allocation7_spill] sm:$0xff] }
 0x18c   : > { %v4207_v15 = vadd.f32 %v3971_v42, %v3693_v12  ;;  %v3974_v43 = vsel %vm8136_vm9, %v3972_v34, %v3973_v0  ;;  %v1670_v29 = vcombine.high %v12412_v40, %v12412_v40  ;;  %v3977_v41 = vsel %vm8136_vm9, %v3975_v16, %v3976_v63  ;;  %v12417_v42 = vld [vmem:[#allocation81_spill] sm:$0xff]  ;;  %v12422_v16 = vld [vmem:[#allocation91_spill] sm:$0xff] }
 0x18d   : > { %v3980_v12 = vsel %vm8136_vm9, %v3978_v4, %v3979_v9  ;;  %v4208_v8 = vadd.f32 %v3974_v43, %v3694_v24  ;;  %v4209_v28 = vadd.f32 %v3977_v41, %v3695_v59  ;;  %v9112_v1 = vrot.slane %v12412_v40, %v7897_v7  ;;  %v12419_v24 = vld [vmem:[#allocation84_spill] sm:$0xff]  ;;  %v12423_v4 = vld [vmem:[#allocation10_spill] sm:$0xff] }
 0x18e   : > { %v9108_v17 = vadd.f32 %v4299_v5, %v4207_v15  ;;  %v4210_v48 = vadd.f32 %v3980_v12, %v3696_v44  ;;  %v9115_v18 = vrot.slane %v1670_v29, %v7897_v7  ;;  %v1772_v63 = vcombine.high %v12417_v42, %v12417_v42 }
 0x18f   : > { %12414 = vst [vmem:[#allocation49_spill] sm:$0xff] %v9112_v1  ;;  %v9117_v0 = vadd.f32 %v4300_v37, %v4208_v8  ;;  %v9123_v34 = vrot.slane %v12417_v42, %v7897_v7  ;;  %v1789_v59 = vcombine.high %v12419_v24, %v12419_v24  ;;  %v9127_v44 = vadd.f32 %v4301_v10, %v4209_v28 }
 0x190   : > { %12413 = vst [vmem:[#allocation61_spill] sm:$0xff] %v9108_v17  ;;  %12415 = vst [vmem:[#allocation56_spill] sm:$0xff] %v9115_v18  ;;  %v9129_v9 = vadd.f32 %v4302_v47, %v4210_v48  ;;  %v1796_v5 = vrot.slane %v12419_v24, %v7897_v7  ;;  %v1990_v15 = vmul.f32 %v12423_v4, %v12422_v16 }
 0x191   : > { %12416 = vst [vmem:[#allocation62_spill] sm:$0xff] %v9117_v0  ;;  %12418 = vst [vmem:[#allocation57_spill] sm:$0xff] %v9123_v34  ;;  %v4530_v37 = vcombine.low %v9108_v17, %v9117_v0  ;;  %v9138_v43 = vrot.slane %v1772_v63, %v7897_v7  ;;  %v9142_v40 = vcombine.high %v9123_v34, %v9123_v34 }
 0x192   : > { %12420 = vst [vmem:[#allocation34_spill] sm:$0xff] %v9127_v44  ;;  %12421 = vst [vmem:[#allocation87_spill] sm:$0xff] %v9129_v9  ;;  %v9146_v10 = vmul.f32 %v12408_v61, %v9123_v34  ;;  %v4531_v47 = vcombine.low %v9127_v44, %v9129_v9  ;;  %v9152_v29 = vmul.f32 %v8277_v51, %v9123_v34 }
 0x193   : > { %12424 = vst [vmem:[#allocation81_spill] sm:$0xff] %v9138_v43  ;;  %12425 = vst [vmem:[#allocation84_spill] sm:$0xff] %v9142_v40  ;;  %v9156_v41 = vmul.f32 %v12410_v35, %v9123_v34  ;;  %v9159_v12 = vrot.slane %v1789_v59, %v7897_v7  ;;  %v4538_v8 = vrot.slane %v4530_v37, %v7897_v7  ;;  %v12439_v37 = vld [vmem:[#allocation95_spill] sm:$0xff] }
 0x194   : > { %12426 = vst [vmem:[#allocation119_spill] sm:$0xff] %v9146_v10  ;;  %12427 = vst [vmem:[#allocation120_spill] sm:$0xff] %v9152_v29  ;;  %v9164_v28 = vcombine.high %v9138_v43, %v9138_v43  ;;  %v9169_v42 = vmul.f32 %v8281_v52, %v9138_v43  ;;  %v4545_v63 = vrot.slane %v4531_v47, %v7897_v7  ;;  %v12476_v29 = vld [vmem:[#allocation11_spill] sm:$0xff] }
 0x195   : > { %12428 = vst [vmem:[#allocation121_spill] sm:$0xff] %v9156_v41  ;;  %12429 = vst [vmem:[#allocation122_spill] sm:$0xff] %v9159_v12  ;;  %v9174_v24 = vmul.f32 %v12335_v49, %v9142_v40  ;;  %v9178_v59 = vmul.f32 %v12284_v57, %v9138_v43  ;;  %v9185_v48 = vcombine.high %v1796_v5, %v1796_v5 }
 0x196   : > { %12430 = vst [vmem:[#allocation123_spill] sm:$0xff] %v9164_v28  ;;  %12431 = vst [vmem:[#allocation124_spill] sm:$0xff] %v9169_v42  ;;  %v9183_v9 = vmul.f32 %v12286_v39, %v9164_v28  ;;  %v9189_v44 = vcombine.high %v9159_v12, %v9159_v12  ;;  %v2081_v47 = vadd.f32 %v12351_v14, %v1990_v15  ;;  %v12437_v42 = vld [vmem:[#allocation18_spill] sm:$0xff]  ;;  %v12442_v28 = vld [vmem:[#allocation109_spill] sm:$0xff] }
 0x197   : > { %12432 = vst [vmem:[#allocation125_spill] sm:$0xff] %v9174_v24  ;;  %12433 = vst [vmem:[#allocation126_spill] sm:$0xff] %v9178_v59  ;;  %v4546_v0 = vcombine.low %v4538_v8, %v4545_v63  ;;  %v9195_v43 = vmul.f32 %v12437_v42, %v12422_v16  ;;  %v12440_v24 = vld [vmem:[#allocation20_spill] sm:$0xff]  ;;  %v2850_v41 = vmul.f32 %v12406_v11, %v12442_v28  ;;  %v12444_v8 = vld [vmem:[#allocation35_spill] sm:$0xff]  ;;  %v12446_v34 = vrot.slane %v9178_v59, 7 }
 0x198   : > { %12434 = vst [vmem:[#allocation127_spill] sm:$0xff] %v9183_v9  ;;  %12435 = vst [vmem:[#allocation128_spill] sm:$0xff] %v9185_v48  ;;  %v9199_v40 = vmul.f32 %v12440_v24, %v12439_v37  ;;  %v2694_v9 = vmul.f32 %v12400_v62, %v12439_v37  ;;  %v9207_v15 = vmul.f32 %v8250_v27, %v12442_v28 }
 0x199   : > { %12436 = vst [vmem:[#allocation129_spill] sm:$0xff] %v9189_v44  ;;  %12438 = vst [vmem:[#allocation130_spill] sm:$0xff] %v9195_v43  ;;  %v9211_v63 = vmul.f32 %v12444_v8, %v8958_v60  ;;  %v4777_v17 = vsel %vm4767_vm10, %v4546_v0, 0.0  ;;  %v9216_v16 = vrot.slane %v12446_v34, 2  ;;  %v11948_v18 = vrot.slane %v9195_v43, 7 }
 0x19a   : > { %12441 = vst [vmem:[#allocation131_spill] sm:$0xff] %v9199_v40  ;;  %12443 = vst [vmem:[#allocation132_spill] sm:$0xff] %v9207_v15  ;;  %4778 = vadd.xlane.f32.xlu1 %v4777_v17  ;;  %v11951_v1 = vrot.slane %v9207_v15, 7  ;;  %v3520_v61 = vmul.f32 %v8277_v51, %v8958_v60  ;;  %v3676_v33 = vmul.f32 %v12282_v3, %v1796_v5 }
 0x19b   : > { %12445 = vst [vmem:[#allocation133_spill] sm:$0xff] %v9211_v63  ;;  %12447 = vst [vmem:[#allocation134_spill] sm:$0xff] %v9216_v16  ;;  %v2464_v0 = vrot.slane %v11948_v18, 2  ;;  %v9229_v34 = vmul.f32 %v8238_v21, %v9185_v48  ;;  %v9233_v37 = vmul.f32 %v8281_v52, %v9159_v12  ;;  %v9236_v17 = vmul.f32 %v12287_v23, %v1796_v5 }
 0x19c   : > { %v3290_v28 = vrot.slane %v11951_v1, 2  ;;  %v9242_v16 = vmul.f32 %v12365_v13, %v9185_v48  ;;  %v9246_v18 = vmul.f32 %v12284_v57, %v9159_v12  ;;  %v9258_v1 = vmul.f32 %v12291_v30, %v1796_v5  ;;  %v12456_v48 = vld [vmem:[#allocation97_spill] sm:$0xff] }
 0x19d   : > { %12448 = vst [vmem:[#allocation135_spill] sm:$0xff] %v9229_v34  ;;  %12449 = vst [vmem:[#allocation136_spill] sm:$0xff] %v9233_v37  ;;  %v9250_v34 = vmul.f32 %v12286_v39, %v9189_v44  ;;  %v12454_v37 = vrot.slane %v9199_v40, 7  ;;  %v11961_v15 = vrot.slane %v9236_v17, 7  ;;  %v1687_v43 = vcombine.high %v12456_v48, %v12456_v48 }
 0x19e   : > { %12450 = vst [vmem:[#allocation137_spill] sm:$0xff] %v9236_v17  ;;  %12451 = vst [vmem:[#allocation138_spill] sm:$0xff] %v9242_v16  ;;  %v12457_v12 = vrot.slane %v9211_v63, 7  ;;  %v11967_v40 = vrot.slane %v9246_v18, 7  ;;  %v9274_v5 = vrot.slane %v12456_v48, %v7897_v7  ;;  %v12465_v63 = vld [vmem:[#allocation5_spill] sm:$0xff]  ;;  %v12467_v17 = vld [vmem:[#allocation8_spill] sm:$0xff] }
 0x19f   : > { %12452 = vst [vmem:[#allocation139_spill] sm:$0xff] %v9246_v18  ;;  %12453 = vst [vmem:[#allocation140_spill] sm:$0xff] %v9250_v34  ;;  %v2466_v59 = vsel %vm8136_vm9, %v2464_v0, %v12454_v37  ;;  %v9270_v37 = vrot.slane %v11961_v15, 2  ;;  %v9277_v0 = vrot.slane %v1687_v43, %v7897_v7  ;;  %v12464_v34 = vld [vmem:[#allocation59_spill] sm:$0xff]  ;;  %v12469_v43 = vld [vmem:[#allocation12_spill] sm:$0xff] }
 0x1a0   : > { %12455 = vst [vmem:[#allocation141_spill] sm:$0xff] %v9258_v1  ;;  %v2602_v60 = vadd.f32 %v2466_v59, %v2081_v47  ;;  %v3292_v44 = vsel %vm8136_vm9, %v3290_v28, %v12457_v12  ;;  %12459 = vst [vmem:[#allocation142_spill] sm:$0xff] %v9274_v5  ;;  %v12461_v59 = vld [vmem:[#allocation77_spill] sm:$0xff]  ;;  %v9285_v28 = vrot.slane %v11967_v40, 2  ;;  %v1947_v15 = vmul.f32 %v12465_v63, %v12464_v34  ;;  %v12466_v1 = vld [vmem:[#allocation64_spill] sm:$0xff] }
 0x1a1   : > { %12458 = vst [vmem:[#allocation97_spill] sm:$0xff] %v9270_v37  ;;  %12460 = vst [vmem:[#allocation143_spill] sm:$0xff] %v9277_v0  ;;  %v9281_v47 = vcombine.high %v12461_v59, %v12461_v59  ;;  %v1948_v37 = vmul.f32 %v12467_v17, %v12466_v1  ;;  %v9293_v48 = vcombine.high %v9277_v0, %v9277_v0  ;;  %v12471_v5 = vld [vmem:[#allocation60_spill] sm:$0xff]  ;;  %v12473_v18 = vld [vmem:[#allocation71_spill] sm:$0xff] }
 0x1a2   : > { %v2758_v12 = vadd.f32 %v2694_v9, %v2602_v60  ;;  %12463 = vst [vmem:[#allocation145_spill] sm:$0xff] %v9285_v28  ;;  %v9297_v16 = vmul.f32 %v12469_v43, %v9277_v0  ;;  %v12472_v60 = vld [vmem:[#allocation6_spill] sm:$0xff]  ;;  %v1950_v40 = vmul.f32 %v12423_v4, %v12473_v18  ;;  %v2038_v34 = vadd.f32 %v12474_v38, %v1947_v15  ;;  %v12479_v15 = vld [vmem:[#allocation65_spill] sm:$0xff] }
 0x1a3   : > { %12462 = vst [vmem:[#allocation144_spill] sm:$0xff] %v9281_v47  ;;  %12468 = vst [vmem:[#allocation59_spill] sm:$0xff] %v9293_v48  ;;  %v1949_v9 = vmul.f32 %v12472_v60, %v12471_v5  ;;  %v2039_v45 = vadd.f32 %v12475_v36, %v1948_v37  ;;  %v2154_v6 = vmul.f32 %v12476_v29, %v12466_v1  ;;  %v7418_v37 = vrot.slane %v12479_v15, 9 }
 0x1a4   : > { %12470 = vst [vmem:[#allocation64_spill] sm:$0xff] %v9297_v16  ;;  %v2914_v28 = vadd.f32 %v2850_v41, %v2758_v12  ;;  %v2041_v22 = vadd.f32 %v12351_v14, %v1950_v40  ;;  %v12477_v16 = vld [vmem:[#allocation17_spill] sm:$0xff]  ;;  %v2156_v10 = vmul.f32 %v12437_v42, %v12473_v18  ;;  %v9315_v41 = vmul.f32 %v12440_v24, %v8481_v53  ;;  %v12481_v40 = vld [vmem:[#allocation19_spill] sm:$0xff] }
 0x1a5   : > { %v2040_v48 = vadd.f32 %v12390_v55, %v1949_v9  ;;  %v2155_v0 = vmul.f32 %v12477_v16, %v12471_v5  ;;  %v2331_v12 = vrot.slane %v2154_v6, 7  ;;  %v12480_v9 = vld [vmem:[#allocation9_spill] sm:$0xff]  ;;  %v2652_v38 = vmul.f32 %v12481_v40, %v12471_v5  ;;  %v12482_v6 = vld [vmem:[#allocation16_spill] sm:$0xff] }
 0x1a6   : > { %v3428_v60 = vadd.f32 %v3292_v44, %v2914_v28  ;;  %12478 = vst [vmem:[#allocation60_spill] sm:$0xff] %v9315_v41  ;;  %v2337_v29 = vrot.slane %v2156_v10, 7  ;;  %v2651_v55 = vmul.f32 %v12480_v9, %v12466_v1  ;;  %v11984_v28 = vrot.slane %v9315_v41, 7  ;;  %v12484_v5 = vld [vmem:[#allocation73_spill] sm:$0xff] }
 0x1a7   : > { %v2334_v36 = vrot.slane %v2155_v0, 7  ;;  %v2332_v54 = vsel %vm8136_vm9, %v7418_v37, %v2331_v12  ;;  %v2333_v44 = vrot.slane %v2331_v12, 2  ;;  %v2653_v0 = vmul.f32 %v12482_v6, %v12473_v18  ;;  %v12486_v12 = vld [vmem:[#allocation68_spill] sm:$0xff]  ;;  %v12489_v6 = vld [vmem:[#allocation25_spill] sm:$0xff] }
 0x1a8   : > { %v3584_v16 = vadd.f32 %v3520_v61, %v3428_v60  ;;  %v2339_v17 = vrot.slane %v2337_v29, 2  ;;  %v2559_v2 = vadd.f32 %v2332_v54, %v2038_v34  ;;  %v2654_v61 = vmul.f32 %v12400_v62, %v8481_v53  ;;  %v12485_v60 = vld [vmem:[#allocation21_spill] sm:$0xff] }
 0x1a9   : > { %v2336_v24 = vrot.slane %v2334_v36, 2  ;;  %v2335_v1 = vsel %vm8136_vm9, %v2333_v44, %v2334_v36  ;;  %v2807_v15 = vmul.f32 %v12485_v60, %v12484_v5  ;;  %v12487_v36 = vld [vmem:[#allocation28_spill] sm:$0xff]  ;;  %v12490_v60 = vld [vmem:[#allocation69_spill] sm:$0xff] }
 0x1aa   : > { %v9327_v10 = vadd.f32 %v3676_v33, %v3584_v16  ;;  %v2341_v54 = vsel %vm8136_vm9, %v2339_v17, %v11984_v28  ;;  %v2560_v18 = vadd.f32 %v2335_v1, %v2039_v45  ;;  %v2715_v33 = vadd.f32 %v2651_v55, %v2559_v2  ;;  %v12492_v45 = vld [vmem:[#allocation27_spill] sm:$0xff] }
 0x1ab   : > { %v2338_v37 = vsel %vm8136_vm9, %v2336_v24, %v2337_v29  ;;  %v2562_v34 = vadd.f32 %v2341_v54, %v2041_v22  ;;  %v2808_v44 = vmul.f32 %v12487_v36, %v12486_v12  ;;  %v2810_v63 = vmul.f32 %v12406_v11, %v12490_v60  ;;  %v12491_v24 = vld [vmem:[#allocation13_spill] sm:$0xff] }
 0x1ac   : > { %12483 = vst [vmem:[#allocation71_spill] sm:$0xff] %v9327_v10  ;;  %v2561_v16 = vadd.f32 %v2338_v37, %v2040_v48  ;;  %v12488_v10 = vld [vmem:[#allocation105_spill] sm:$0xff]  ;;  %v2716_v9 = vadd.f32 %v2652_v38, %v2560_v18  ;;  %v2871_v29 = vadd.f32 %v2807_v15, %v2715_v33  ;;  %v2979_v41 = vmul.f32 %v12491_v24, %v12484_v5 }
 0x1ad   : > { %v2809_v40 = vmul.f32 %v12489_v6, %v12488_v10  ;;  %v2718_v17 = vadd.f32 %v2654_v61, %v2562_v34  ;;  %v2980_v55 = vmul.f32 %v12492_v45, %v12486_v12  ;;  %v2981_v2 = vmul.f32 %v8246_v25, %v12488_v10 }
 0x1ae   : > { %v2717_v53 = vadd.f32 %v2653_v0, %v2561_v16  ;;  %v2872_v22 = vadd.f32 %v2808_v44, %v2716_v9  ;;  %v2982_v48 = vmul.f32 %v8250_v27, %v12490_v60  ;;  %v9357_v38 = vmul.f32 %v12444_v8, %v8823_v58 }
 0x1af   : > { %v7432_v1 = vrot.slane %v2979_v41, 9  ;;  %v2874_v37 = vadd.f32 %v2810_v63, %v2718_v17  ;;  %v3157_v54 = vrot.slane %v2980_v55, 7  ;;  %v3160_v0 = vrot.slane %v2981_v2, 7  ;;  %v12493_v17 = vld [vmem:[#allocation76_spill] sm:$0xff] }
 0x1b0   : > { %v2873_v15 = vadd.f32 %v2809_v40, %v2717_v53  ;;  %v3163_v61 = vrot.slane %v2982_v48, 7  ;;  %v11990_v18 = vrot.slane %v9357_v38, 7  ;;  %v3477_v33 = vmul.f32 %v8232_v19, %v12486_v12 }
 0x1b1   : > { %v3478_v9 = vmul.f32 %v8273_v50, %v12488_v10  ;;  %v3158_v16 = vsel %vm8136_vm9, %v7432_v1, %v3157_v54  ;;  %v3159_v34 = vrot.slane %v3157_v54, 2  ;;  %v3162_v44 = vrot.slane %v3160_v0, 2  ;;  %v12494_v1 = vld [vmem:[#allocation78_spill] sm:$0xff] }
 0x1b2   : > { %v3479_v53 = vmul.f32 %v8235_v20, %v12490_v60  ;;  %v3165_v63 = vrot.slane %v3163_v61, 2  ;;  %v3385_v41 = vadd.f32 %v3158_v16, %v2871_v29  ;;  %v3480_v40 = vmul.f32 %v8277_v51, %v8823_v58 }
 0x1b3   : > { %v3633_v55 = vmul.f32 %v8238_v21, %v12493_v17  ;;  %v3161_v2 = vsel %vm8136_vm9, %v3159_v34, %v3160_v0  ;;  %v3164_v48 = vsel %vm8136_vm9, %v3162_v44, %v3163_v61  ;;  %v3634_v54 = vmul.f32 %v8281_v52, %v12494_v1 }
 0x1b4   : > { %v3635_v28 = vmul.f32 %v12281_v56, %v12461_v59  ;;  %v3167_v29 = vsel %vm8136_vm9, %v3165_v63, %v11990_v18  ;;  %v3386_v16 = vadd.f32 %v3161_v2, %v2872_v22  ;;  %v3387_v8 = vadd.f32 %v3164_v48, %v2873_v15  ;;  %v12495_v15 = vld [vmem:[#allocation82_spill] sm:$0xff] }
 0x1b5   : > { %v3541_v24 = vadd.f32 %v3477_v33, %v3385_v41  ;;  %v3388_v60 = vadd.f32 %v3167_v29, %v2874_v37  ;;  %v3636_v0 = vmul.f32 %v12282_v3, %v9281_v47  ;;  %v3805_v61 = vmul.f32 %v12335_v49, %v12493_v17  ;;  %v12522_v49 = vld [vmem:[#allocation96_spill] sm:$0xff] }
 0x1b6   : > { %v3806_v34 = vmul.f32 %v12284_v57, %v12494_v1  ;;  %v3542_v44 = vadd.f32 %v3478_v9, %v3386_v16  ;;  %v3543_v10 = vadd.f32 %v3479_v53, %v3387_v8  ;;  %v3807_v5 = vmul.f32 %v12286_v39, %v12461_v59 }
 0x1b7   : > { %v3697_v12 = vadd.f32 %v3633_v55, %v3541_v24  ;;  %v3544_v63 = vadd.f32 %v3480_v40, %v3388_v60  ;;  %v3808_v22 = vmul.f32 %v12287_v23, %v9281_v47  ;;  %v9396_v37 = vmul.f32 %v12365_v13, %v12495_v15 }
 0x1b8   : > { %v7446_v33 = vrot.slane %v3805_v61, 9  ;;  %v3698_v41 = vadd.f32 %v3634_v54, %v3542_v44  ;;  %v3699_v2 = vadd.f32 %v3635_v28, %v3543_v10  ;;  %v3983_v48 = vrot.slane %v3806_v34, 7  ;;  %v12496_v61 = vld [vmem:[#allocation103_spill] sm:$0xff]  ;;  %v12498_v44 = vld [vmem:[#allocation98_spill] sm:$0xff] }
 0x1b9   : > { %v3986_v29 = vrot.slane %v3807_v5, 7  ;;  %v3700_v18 = vadd.f32 %v3636_v0, %v3544_v63  ;;  %v3989_v9 = vrot.slane %v3808_v22, 7  ;;  %v11991_v8 = vrot.slane %v9396_v37, 7 }
 0x1ba   : > { %v4303_v24 = vmul.f32 %v12289_v46, %v12494_v1  ;;  %v3984_v60 = vsel %vm8136_vm9, %v7446_v33, %v3983_v48  ;;  %v3985_v53 = vrot.slane %v3983_v48, 2  ;;  %v4304_v55 = vmul.f32 %v12290_v26, %v12461_v59  ;;  %v12526_v1 = vld [vmem:[#allocation11_spill] sm:$0xff] }
 0x1bb   : > { %v3988_v40 = vrot.slane %v3986_v29, 2  ;;  %v3991_v16 = vrot.slane %v3989_v9, 2  ;;  %v4211_v54 = vadd.f32 %v3984_v60, %v3697_v12  ;;  %v4305_v28 = vmul.f32 %v12291_v30, %v9281_v47  ;;  %v12525_v47 = vld [vmem:[#allocation14_spill] sm:$0xff] }
 0x1bc   : > { %v4306_v10 = vmul.f32 %v12293_v32, %v12495_v15  ;;  %v3987_v5 = vsel %vm8136_vm9, %v3985_v53, %v3986_v29  ;;  %v9415_v34 = vcombine.high %v12496_v61, %v12496_v61  ;;  %v1812_v63 = vrot.slane %v12498_v44, %v7897_v7 }
 0x1bd   : > { %v3990_v0 = vsel %vm8136_vm9, %v3988_v40, %v3989_v9  ;;  %v3993_v12 = vsel %vm8136_vm9, %v3991_v16, %v11991_v8  ;;  %v4212_v22 = vadd.f32 %v3987_v5, %v3698_v41  ;;  %v9423_v48 = vadd.f32 %v4303_v24, %v4211_v54  ;;  %v12505_v54 = vld [vmem:[#allocation118_spill] sm:$0xff] }
 0x1be   : > { %12497 = vst [vmem:[#allocation65_spill] sm:$0xff] %v9415_v34  ;;  %v4213_v33 = vadd.f32 %v3990_v0, %v3699_v2  ;;  %v4214_v29 = vadd.f32 %v3993_v12, %v3700_v18  ;;  %v9425_v60 = vcombine.high %v1812_v63, %v1812_v63  ;;  %v1994_v9 = vmul.f32 %v12423_v4, %v12496_v61 }
 0x1bf   : > { %12499 = vst [vmem:[#allocation27_spill] sm:$0xff] %v9423_v48  ;;  %v9431_v53 = vmul.f32 %v12437_v42, %v12496_v61  ;;  %v9433_v40 = vadd.f32 %v4304_v55, %v4212_v22  ;;  %v2206_v41 = vmul.f32 %v12469_v43, %v9415_v34  ;;  %v2698_v2 = vmul.f32 %v12400_v62, %v9415_v34 }
 0x1c0   : > { %12500 = vst [vmem:[#allocation82_spill] sm:$0xff] %v9425_v60  ;;  %v9435_v44 = vadd.f32 %v4305_v28, %v4213_v33  ;;  %v9441_v18 = vadd.f32 %v4306_v10, %v4214_v29  ;;  %v2085_v24 = vadd.f32 %v12351_v14, %v1994_v9  ;;  %v2854_v5 = vmul.f32 %v12406_v11, %v12505_v54 }
 0x1c1   : > { %12501 = vst [vmem:[#allocation98_spill] sm:$0xff] %v9431_v53  ;;  %12502 = vst [vmem:[#allocation146_spill] sm:$0xff] %v9433_v40  ;;  %v11993_v16 = vrot.slane %v9431_v53, 7  ;;  %v4547_v55 = vcombine.low %v9423_v48, %v9433_v40  ;;  %v2477_v28 = vrot.slane %v2206_v41, 7  ;;  %v9451_v0 = vmul.f32 %v8250_v27, %v12505_v54  ;;  %v12511_v53 = vld [vmem:[#allocation83_spill] sm:$0xff]  ;;  %v12514_v54 = vld [vmem:[#allocation5_spill] sm:$0xff] }
 0x1c2   : > { %12503 = vst [vmem:[#allocation147_spill] sm:$0xff] %v9435_v44  ;;  %12504 = vst [vmem:[#allocation148_spill] sm:$0xff] %v9441_v18  ;;  %v3680_v12 = vmul.f32 %v12282_v3, %v1812_v63  ;;  %v4548_v10 = vcombine.low %v9435_v44, %v9441_v18  ;;  %v9459_v33 = vmul.f32 %v12287_v23, %v1812_v63  ;;  %v12518_v48 = vld [vmem:[#allocation63_spill] sm:$0xff] }
 0x1c3   : > { %12506 = vst [vmem:[#allocation149_spill] sm:$0xff] %v9451_v0  ;;  %v2476_v22 = vrot.slane %v11993_v16, 2  ;;  %v9463_v29 = vmul.f32 %v12410_v35, %v9425_v60  ;;  %v4555_v9 = vrot.slane %v4547_v55, %v7897_v7  ;;  %v12005_v41 = vrot.slane %v9451_v0, 7 }
 0x1c4   : > { %12507 = vst [vmem:[#allocation150_spill] sm:$0xff] %v9459_v33  ;;  %v9468_v8 = vmul.f32 %v12291_v30, %v1812_v63  ;;  %v9472_v18 = vcombine.high %v12495_v15, %v12495_v15  ;;  %v4562_v16 = vrot.slane %v4548_v10, %v7897_v7  ;;  %v12009_v40 = vrot.slane %v9459_v33, 7  ;;  %v12524_v33 = vld [vmem:[#allocation15_spill] sm:$0xff] }
 0x1c5   : > { %12508 = vst [vmem:[#allocation151_spill] sm:$0xff] %v9463_v29  ;;  %v2478_v44 = vsel %vm8136_vm9, %v2476_v22, %v2477_v28  ;;  %v3302_v55 = vrot.slane %v12005_v41, 2  ;;  %v9483_v63 = vcombine.high %v12511_v53, %v12511_v53  ;;  %v12516_v28 = vld [vmem:[#allocation94_spill] sm:$0xff]  ;;  %v12517_v22 = vld [vmem:[#allocation8_spill] sm:$0xff]  ;;  %v12520_v41 = vld [vmem:[#allocation119_spill] sm:$0xff] }
 0x1c6   : > { %12509 = vst [vmem:[#allocation152_spill] sm:$0xff] %v9468_v8  ;;  %12510 = vst [vmem:[#allocation153_spill] sm:$0xff] %v9472_v18  ;;  %v2606_v60 = vadd.f32 %v2478_v44, %v2085_v24  ;;  %v12513_v8 = vld [vmem:[#allocation66_spill] sm:$0xff]  ;;  %v4563_v61 = vcombine.low %v4555_v9, %v4562_v16  ;;  %v9489_v10 = vrot.slane %v12009_v40, 2  ;;  %v1952_v43 = vmul.f32 %v12517_v22, %v12516_v28  ;;  %v12523_v16 = vld [vmem:[#allocation7_spill] sm:$0xff] }
 0x1c7   : > { %12512 = vst [vmem:[#allocation154_spill] sm:$0xff] %v9483_v63  ;;  %v1951_v34 = vmul.f32 %v12514_v54, %v12513_v8  ;;  %v12519_v44 = vld [vmem:[#allocation6_spill] sm:$0xff]  ;;  %v12521_v0 = vrot.slane %v12520_v41, 7  ;;  %v1954_v8 = vmul.f32 %v12423_v4, %v12522_v49  ;;  %v2158_v17 = vmul.f32 %v12526_v1, %v12516_v28 }
 0x1c8   : > { %12515 = vst [vmem:[#allocation66_spill] sm:$0xff] %v9489_v10  ;;  %v1953_v24 = vmul.f32 %v12519_v44, %v12518_v48  ;;  %v2762_v29 = vadd.f32 %v2698_v2, %v2606_v60  ;;  %v4780_v40 = vsel %vm4767_vm10, %v4563_v61, 0.0  ;;  %v2043_v10 = vadd.f32 %v12524_v33, %v1952_v43  ;;  %v12530_v43 = vld [vmem:[#allocation74_spill] sm:$0xff] }
 0x1c9   : > { %v3304_v13 = vsel %vm8136_vm9, %v3302_v55, %v12521_v0  ;;  %v2042_v9 = vadd.f32 %v12523_v16, %v1951_v34  ;;  %4781 = vadd.xlane.f32.xlu0 %v4780_v40  ;;  %v2045_v2 = vadd.f32 %v12351_v14, %v1954_v8  ;;  %v12527_v0 = vld [vmem:[#allocation17_spill] sm:$0xff]  ;;  %v2160_v55 = vmul.f32 %v12437_v42, %v12522_v49  ;;  %v12528_v34 = vld [vmem:[#allocation60_spill] sm:$0xff] }
 0x1ca   : > { %v2044_v59 = vadd.f32 %v12525_v47, %v1953_v24  ;;  %v2918_v60 = vadd.f32 %v2854_v5, %v2762_v29  ;;  %v2159_v41 = vmul.f32 %v12527_v0, %v12518_v48  ;;  %v12529_v7 = vrot.slane %v12528_v34, 7  ;;  %v12531_v24 = vld [vmem:[#allocation9_spill] sm:$0xff]  ;;  %v12532_v29 = vld [vmem:[#allocation19_spill] sm:$0xff]  ;;  %v12533_v42 = vld [vmem:[#allocation16_spill] sm:$0xff] }
 0x1cb   : > { %v2343_v16 = vrot.slane %v2158_v17, 7  ;;  %v2352_v33 = vrot.slane %v12530_v43, 7  ;;  %v2655_v47 = vmul.f32 %v12531_v24, %v12516_v28  ;;  %v2349_v5 = vrot.slane %v2160_v55, 7  ;;  %v12535_v43 = vld [vmem:[#allocation120_spill] sm:$0xff]  ;;  %v12537_v55 = vld [vmem:[#allocation70_spill] sm:$0xff] }
 0x1cc   : > { %v2342_v61 = vrot.slane %v12529_v7, 2  ;;  %v3432_v1 = vadd.f32 %v3304_v13, %v2918_v60  ;;  %v2346_v40 = vrot.slane %v2159_v41, 7  ;;  %v2656_v8 = vmul.f32 %v12532_v29, %v12518_v48  ;;  %v12534_v7 = vld [vmem:[#allocation67_spill] sm:$0xff]  ;;  %v12536_v48 = vld [vmem:[#allocation21_spill] sm:$0xff] }
 0x1cd   : > { %v2345_v14 = vrot.slane %v2343_v16, 2  ;;  %v2657_v34 = vmul.f32 %v12533_v42, %v12522_v49  ;;  %v2658_v17 = vmul.f32 %v12400_v62, %v12534_v7  ;;  %v2351_v28 = vrot.slane %v2349_v5, 2 }
 0x1ce   : > { %v2344_v0 = vsel %vm8136_vm9, %v2342_v61, %v2343_v16  ;;  %v3588_v4 = vadd.f32 %v12535_v43, %v3432_v1  ;;  %v2348_v44 = vrot.slane %v2346_v40, 2  ;;  %v2811_v41 = vmul.f32 %v12536_v48, %v8823_v58  ;;  %v12538_v61 = vld [vmem:[#allocation72_spill] sm:$0xff]  ;;  %v12540_v43 = vld [vmem:[#allocation75_spill] sm:$0xff] }
 0x1cf   : > { %v2563_v13 = vadd.f32 %v2344_v0, %v2042_v9  ;;  %v2347_v60 = vsel %vm8136_vm9, %v2345_v14, %v2346_v40  ;;  %v2812_v16 = vmul.f32 %v12487_v36, %v12537_v55  ;;  %v2813_v49 = vmul.f32 %v12489_v6, %v12538_v61 }
 0x1d0   : > { %v9534_v42 = vadd.f32 %v3680_v12, %v3588_v4  ;;  %v2350_v1 = vsel %vm8136_vm9, %v2348_v44, %v2349_v5  ;;  %v2353_v9 = vsel %vm8136_vm9, %v2351_v28, %v2352_v33  ;;  %v2564_v0 = vadd.f32 %v2347_v60, %v2043_v10  ;;  %v12541_v10 = vld [vmem:[#allocation112_spill] sm:$0xff] }
 0x1d1   : > { %v2565_v7 = vadd.f32 %v2350_v1, %v2044_v59  ;;  %v2566_v14 = vadd.f32 %v2353_v9, %v2045_v2  ;;  %v2719_v40 = vadd.f32 %v2655_v47, %v2563_v13  ;;  %v2814_v48 = vmul.f32 %v12406_v11, %v12540_v43  ;;  %v12542_v59 = vld [vmem:[#allocation26_spill] sm:$0xff] }
 0x1d2   : > { %12539 = vst [vmem:[#allocation94_spill] sm:$0xff] %v9534_v42  ;;  %v2720_v62 = vadd.f32 %v2656_v8, %v2564_v0  ;;  %v2984_v36 = vmul.f32 %v12492_v45, %v12537_v55  ;;  %v2985_v4 = vmul.f32 %v8246_v25, %v12538_v61  ;;  %v2986_v12 = vmul.f32 %v8250_v27, %v12540_v43 }
 0x1d3   : > { %v2721_v44 = vadd.f32 %v2657_v34, %v2565_v7  ;;  %v2722_v5 = vadd.f32 %v2658_v17, %v2566_v14  ;;  %v2875_v33 = vadd.f32 %v2811_v41, %v2719_v40  ;;  %v2987_v2 = vmul.f32 %v12542_v59, %v12541_v10 }
 0x1d4   : > { %v2876_v47 = vadd.f32 %v2812_v16, %v2720_v62  ;;  %v12543_v28 = vrot.slane %v9357_v38, 7  ;;  %v3169_v8 = vrot.slane %v2984_v36, 7  ;;  %v3172_v60 = vrot.slane %v2985_v4, 7 }
 0x1d5   : > { %v2877_v1 = vadd.f32 %v2813_v49, %v2721_v44  ;;  %v2878_v9 = vadd.f32 %v2814_v48, %v2722_v5  ;;  %v3175_v0 = vrot.slane %v2986_v12, 7  ;;  %v3178_v42 = vrot.slane %v2987_v2, 7 }
 0x1d6   : > { %v3168_v13 = vrot.slane %v12543_v28, 2  ;;  %v3171_v27 = vrot.slane %v3169_v8, 2  ;;  %v3174_v34 = vrot.slane %v3172_v60, 2  ;;  %v3481_v17 = vmul.f32 %v8232_v19, %v12537_v55 }
 0x1d7   : > { %v3177_v41 = vrot.slane %v3175_v0, 2  ;;  %v3482_v62 = vmul.f32 %v8273_v50, %v12538_v61  ;;  %v3483_v36 = vmul.f32 %v8235_v20, %v12540_v43  ;;  %v3484_v16 = vmul.f32 %v8277_v51, %v12541_v10 }
 0x1d8   : > { %v3170_v25 = vsel %vm8136_vm9, %v3168_v13, %v3169_v8  ;;  %v3173_v38 = vsel %vm8136_vm9, %v3171_v27, %v3172_v60  ;;  %v3176_v48 = vsel %vm8136_vm9, %v3174_v34, %v3175_v0  ;;  %v3637_v49 = vmul.f32 %v8238_v21, %v12495_v15  ;;  %v12544_v60 = vld [vmem:[#allocation44_spill] sm:$0xff] }
 0x1d9   : > { %v3389_v7 = vadd.f32 %v3170_v25, %v2875_v33  ;;  %v3179_v25 = vsel %vm8136_vm9, %v3177_v41, %v3178_v42  ;;  %v3390_v14 = vadd.f32 %v3173_v38, %v2876_v47  ;;  %v3391_v40 = vadd.f32 %v3176_v48, %v2877_v1 }
 0x1da   : > { %v3392_v12 = vadd.f32 %v3179_v25, %v2878_v9  ;;  %v3638_v44 = vmul.f32 %v8281_v52, %v9472_v18  ;;  %v3639_v27 = vmul.f32 %v12281_v56, %v12511_v53  ;;  %v3640_v5 = vmul.f32 %v12282_v3, %v9483_v63 }
 0x1db   : > { %v3545_v4 = vadd.f32 %v3481_v17, %v3389_v7  ;;  %v3546_v33 = vadd.f32 %v3482_v62, %v3390_v14  ;;  %v3547_v2 = vadd.f32 %v3483_v36, %v3391_v40  ;;  %v3810_v13 = vmul.f32 %v12284_v57, %v9472_v18 }
 0x1dc   : > { %v3548_v42 = vadd.f32 %v3484_v16, %v3392_v12  ;;  %v3811_v47 = vmul.f32 %v12286_v39, %v12511_v53  ;;  %v3812_v8 = vmul.f32 %v12287_v23, %v9483_v63  ;;  %v3813_v1 = vmul.f32 %v12410_v35, %v12544_v60  ;;  %v12554_v35 = vld [vmem:[#allocation6_spill] sm:$0xff] }
 0x1dd   : > { %v3701_v28 = vadd.f32 %v3637_v49, %v3545_v4  ;;  %v3702_v9 = vadd.f32 %v3638_v44, %v3546_v33  ;;  %v3703_v0 = vadd.f32 %v3639_v27, %v3547_v2  ;;  %v12545_v34 = vrot.slane %v9396_v37, 7  ;;  %v12546_v27 = vld [vmem:[#allocation48_spill] sm:$0xff]  ;;  %v12548_v33 = vld [vmem:[#allocation85_spill] sm:$0xff] }
 0x1de   : > { %v3995_v41 = vrot.slane %v3810_v13, 7  ;;  %v3704_v7 = vadd.f32 %v3640_v5, %v3548_v42  ;;  %v3998_v62 = vrot.slane %v3811_v47, 7  ;;  %v4001_v36 = vrot.slane %v3812_v8, 7 }
 0x1df   : > { %v3994_v17 = vrot.slane %v12545_v34, 2  ;;  %v4004_v38 = vrot.slane %v3813_v1, 7  ;;  %v4307_v49 = vmul.f32 %v12289_v46, %v9472_v18  ;;  %v4308_v25 = vmul.f32 %v12290_v26, %v12511_v53  ;;  %v12550_v34 = vld [vmem:[#allocation73_spill] sm:$0xff]  ;;  %v12564_v53 = vld [vmem:[#allocation11_spill] sm:$0xff] }
 0x1e0   : > { %v3997_v16 = vrot.slane %v3995_v41, 2  ;;  %v4000_v14 = vrot.slane %v3998_v62, 2  ;;  %v4003_v40 = vrot.slane %v4001_v36, 2  ;;  %v4309_v37 = vmul.f32 %v12291_v30, %v9483_v63 }
 0x1e1   : > { %v3996_v48 = vsel %vm8136_vm9, %v3994_v17, %v3995_v41  ;;  %v4310_v44 = vmul.f32 %v12293_v32, %v12544_v60  ;;  %v9600_v5 = vcombine.high %v12546_v27, %v12546_v27  ;;  %v9604_v2 = vcombine.high %v12548_v33, %v12548_v33  ;;  %v12551_v41 = vld [vmem:[#allocation68_spill] sm:$0xff] }
 0x1e2   : > { %v4215_v4 = vadd.f32 %v3996_v48, %v3701_v28  ;;  %v3999_v12 = vsel %vm8136_vm9, %v3997_v16, %v3998_v62  ;;  %v4002_v28 = vsel %vm8136_vm9, %v4000_v14, %v4001_v36  ;;  %v4005_v13 = vsel %vm8136_vm9, %v4003_v40, %v4004_v38  ;;  %v12553_v16 = vld [vmem:[#allocation105_spill] sm:$0xff]  ;;  %v12556_v14 = vld [vmem:[#allocation10_spill] sm:$0xff] }
 0x1e3   : > { %12547 = vst [vmem:[#allocation8_spill] sm:$0xff] %v9600_v5  ;;  %v4216_v42 = vadd.f32 %v3999_v12, %v3702_v9  ;;  %v4217_v8 = vadd.f32 %v4002_v28, %v3703_v0  ;;  %v4218_v1 = vadd.f32 %v4005_v13, %v3704_v7  ;;  %v1955_v17 = vmul.f32 %v12514_v54, %v12550_v34  ;;  %v12555_v36 = vld [vmem:[#allocation69_spill] sm:$0xff]  ;;  %v12557_v9 = vld [vmem:[#allocation4_spill] sm:$0xff]  ;;  %v12560_v7 = vld [vmem:[#allocation7_spill] sm:$0xff] }
 0x1e4   : > { %v9610_v47 = vadd.f32 %v4307_v49, %v4215_v4  ;;  %v1956_v62 = vmul.f32 %v12517_v22, %v12551_v41  ;;  %v1957_v59 = vmul.f32 %v12554_v35, %v12553_v16  ;;  %v1958_v60 = vmul.f32 %v12556_v14, %v12555_v36  ;;  %v12561_v4 = vld [vmem:[#allocation15_spill] sm:$0xff]  ;;  %v12562_v28 = vld [vmem:[#allocation14_spill] sm:$0xff] }
 0x1e5   : > { %v9616_v48 = vadd.f32 %v4308_v25, %v4216_v42  ;;  %v2162_v38 = vmul.f32 %v12557_v9, %v12550_v34  ;;  %v9624_v49 = vadd.f32 %v4309_v37, %v4217_v8  ;;  %v9626_v0 = vadd.f32 %v4310_v44, %v4218_v1  ;;  %v12563_v42 = vld [vmem:[#allocation22_spill] sm:$0xff]  ;;  %v12565_v44 = vld [vmem:[#allocation17_spill] sm:$0xff] }
 0x1e6   : > { %12549 = vst [vmem:[#allocation63_spill] sm:$0xff] %v9610_v47  ;;  %v2046_v40 = vadd.f32 %v12560_v7, %v1955_v17  ;;  %v2047_v12 = vadd.f32 %v12561_v4, %v1956_v62  ;;  %v2048_v13 = vadd.f32 %v12562_v28, %v1957_v59  ;;  %v2049_v63 = vadd.f32 %v12563_v42, %v1958_v60  ;;  %v12566_v1 = vld [vmem:[#allocation18_spill] sm:$0xff]  ;;  %v12567_v17 = vld [vmem:[#allocation20_spill] sm:$0xff] }
 0x1e7   : > { %12552 = vst [vmem:[#allocation119_spill] sm:$0xff] %v9616_v48  ;;  %12558 = vst [vmem:[#allocation96_spill] sm:$0xff] %v9624_v49  ;;  %v4564_v25 = vcombine.low %v9610_v47, %v9616_v48  ;;  %v2163_v18 = vmul.f32 %v12564_v53, %v12551_v41  ;;  %v4565_v37 = vcombine.low %v9624_v49, %v9626_v0  ;;  %v12569_v48 = vld [vmem:[#allocation3_spill] sm:$0xff]  ;;  %v7419_v47 = vrot.slane %v2162_v38, 9 }
 0x1e8   : > { %12559 = vst [vmem:[#allocation60_spill] sm:$0xff] %v9626_v0  ;;  %v2164_v8 = vmul.f32 %v12565_v44, %v12553_v16  ;;  %v2165_v34 = vmul.f32 %v12566_v1, %v12555_v36  ;;  %v9644_v62 = vmul.f32 %v12567_v17, %v8823_v58  ;;  %v2659_v9 = vmul.f32 %v12531_v24, %v12551_v41  ;;  %v12572_v44 = vld [vmem:[#allocation76_spill] sm:$0xff]  ;;  %v12573_v24 = vld [vmem:[#allocation21_spill] sm:$0xff] }
 0x1e9   : > { %v4572_v59 = vrot.slane %v4564_v25, %v12569_v48  ;;  %v2356_v60 = vrot.slane %v2163_v18, 7  ;;  %v4579_v10 = vrot.slane %v4565_v37, %v12569_v48  ;;  %v2660_v17 = vmul.f32 %v12532_v29, %v12553_v16  ;;  %v12570_v25 = vld [vmem:[#allocation16_spill] sm:$0xff]  ;;  %v12579_v29 = vld [vmem:[#allocation13_spill] sm:$0xff] }
 0x1ea   : > { %12568 = vst [vmem:[#allocation74_spill] sm:$0xff] %v9644_v62  ;;  %v2359_v0 = vrot.slane %v2164_v8, 7  ;;  %v2362_v49 = vrot.slane %v2165_v34, 7  ;;  %v2661_v38 = vmul.f32 %v12570_v25, %v12555_v36  ;;  %v12571_v8 = vld [vmem:[#allocation23_spill] sm:$0xff]  ;;  %v12575_v48 = vld [vmem:[#allocation28_spill] sm:$0xff]  ;;  %v12576_v36 = vrot.slane %v9644_v62, 7 }
 0x1eb   : > { %v2357_v1 = vsel %vm8136_vm9, %v7419_v47, %v2356_v60  ;;  %v2358_v42 = vrot.slane %v2356_v60, 2  ;;  %v4580_v18 = vcombine.low %v4572_v59, %v4579_v10  ;;  %v2662_v34 = vmul.f32 %v12571_v8, %v8823_v58  ;;  %v12574_v60 = vld [vmem:[#allocation78_spill] sm:$0xff]  ;;  %v12577_v8 = vld [vmem:[#allocation77_spill] sm:$0xff] }
 0x1ec   : > { %v2361_v28 = vrot.slane %v2359_v0, 2  ;;  %v2364_v4 = vrot.slane %v2362_v49, 2  ;;  %v2567_v41 = vadd.f32 %v2357_v1, %v2046_v40  ;;  %v2815_v47 = vmul.f32 %v12573_v24, %v12572_v44 }
 0x1ed   : > { %v2360_v37 = vsel %vm8136_vm9, %v2358_v42, %v2359_v0  ;;  %v2816_v7 = vmul.f32 %v12575_v48, %v12574_v60  ;;  %v4783_v16 = vsel %vm4767_vm10, %v4580_v18, 0.0  ;;  %v2817_v24 = vmul.f32 %v12489_v6, %v12577_v8  ;;  %v12578_v48 = vld [vmem:[#allocation144_spill] sm:$0xff] }
 0x1ee   : > { %v2363_v10 = vsel %vm8136_vm9, %v2361_v28, %v2362_v49  ;;  %v2366_v40 = vsel %vm8136_vm9, %v2364_v4, %v12576_v36  ;;  %v2568_v0 = vadd.f32 %v2360_v37, %v2047_v12  ;;  %4784 = vadd.xlane.f32.xlu1 %v4783_v16  ;;  %v2723_v59 = vadd.f32 %v2659_v9, %v2567_v41  ;;  %v12581_v41 = vld [vmem:[#allocation33_spill] sm:$0xff] }
 0x1ef   : > { %v2569_v42 = vadd.f32 %v2363_v10, %v2048_v13  ;;  %v2570_v1 = vadd.f32 %v2366_v40, %v2049_v63  ;;  %v2818_v18 = vmul.f32 %v12406_v11, %v12578_v48  ;;  %v2988_v49 = vmul.f32 %v12579_v29, %v12572_v44  ;;  %v12580_v13 = vld [vmem:[#allocation32_spill] sm:$0xff] }
 0x1f0   : > { %v2724_v25 = vadd.f32 %v2660_v17, %v2568_v0  ;;  %v2989_v28 = vmul.f32 %v12492_v45, %v12574_v60  ;;  %v2879_v12 = vadd.f32 %v2815_v47, %v2723_v59  ;;  %v2990_v63 = vmul.f32 %v12580_v13, %v12577_v8  ;;  %v12582_v17 = vld [vmem:[#allocation35_spill] sm:$0xff] }
 0x1f1   : > { %v2725_v62 = vadd.f32 %v2661_v38, %v2569_v42  ;;  %v2726_v4 = vadd.f32 %v2662_v34, %v2570_v1  ;;  %v2991_v37 = vmul.f32 %v12581_v41, %v12578_v48  ;;  %v9686_v16 = vmul.f32 %v12582_v17, %v12495_v15 }
 0x1f2   : > { %v2880_v9 = vadd.f32 %v2816_v7, %v2724_v25  ;;  %v7433_v10 = vrot.slane %v2988_v49, 9  ;;  %v3182_v40 = vrot.slane %v2989_v28, 7  ;;  %v3185_v0 = vrot.slane %v2990_v63, 7 }
 0x1f3   : > { %v2881_v36 = vadd.f32 %v2817_v24, %v2725_v62  ;;  %v2882_v44 = vadd.f32 %v2818_v18, %v2726_v4  ;;  %v3188_v29 = vrot.slane %v2991_v37, 7  ;;  %v12047_v38 = vrot.slane %v9686_v16, 7  ;;  %v12583_v18 = vld [vmem:[#allocation86_spill] sm:$0xff] }
 0x1f4   : > { %v3485_v34 = vmul.f32 %v8232_v19, %v12574_v60  ;;  %v3486_v7 = vmul.f32 %v8273_v50, %v12577_v8  ;;  %v3183_v25 = vsel %vm8136_vm9, %v7433_v10, %v3182_v40  ;;  %v3184_v47 = vrot.slane %v3182_v40, 2 }
 0x1f5   : > { %v3187_v42 = vrot.slane %v3185_v0, 2  ;;  %v3487_v24 = vmul.f32 %v8235_v20, %v12578_v48  ;;  %v3190_v62 = vrot.slane %v3188_v29, 2  ;;  %v3393_v1 = vadd.f32 %v3183_v25, %v2879_v12 }
 0x1f6   : > { %v3488_v59 = vmul.f32 %v8277_v51, %v12495_v15  ;;  %v3641_v49 = vmul.f32 %v8238_v21, %v12583_v18  ;;  %v3186_v28 = vsel %vm8136_vm9, %v3184_v47, %v3185_v0  ;;  %v3642_v63 = vmul.f32 %v8281_v52, %v12546_v27 }
 0x1f7   : > { %v3189_v4 = vsel %vm8136_vm9, %v3187_v42, %v3188_v29  ;;  %v3643_v37 = vmul.f32 %v12281_v56, %v9600_v5  ;;  %v3192_v12 = vsel %vm8136_vm9, %v3190_v62, %v12047_v38  ;;  %v3394_v10 = vadd.f32 %v3186_v28, %v2880_v9  ;;  %v12584_v29 = vld [vmem:[#allocation24_spill] sm:$0xff] }
 0x1f8   : > { %v3395_v40 = vadd.f32 %v3189_v4, %v2881_v36  ;;  %v3549_v25 = vadd.f32 %v3485_v34, %v3393_v1  ;;  %v3396_v17 = vadd.f32 %v3192_v12, %v2882_v44  ;;  %v3644_v0 = vmul.f32 %v12282_v3, %v12548_v33  ;;  %v12585_v36 = vld [vmem:[#allocation47_spill] sm:$0xff] }
 0x1f9   : > { %v3814_v47 = vmul.f32 %v12584_v29, %v12583_v18  ;;  %v3815_v42 = vmul.f32 %v12284_v57, %v12546_v27  ;;  %v3550_v48 = vadd.f32 %v3486_v7, %v3394_v10  ;;  %v3816_v56 = vmul.f32 %v12286_v39, %v9600_v5  ;;  %v12605_v18 = vld [vmem:[#allocation9_spill] sm:$0xff] }
 0x1fa   : > { %v3551_v8 = vadd.f32 %v3487_v24, %v3395_v40  ;;  %v3705_v60 = vadd.f32 %v3641_v49, %v3549_v25  ;;  %v3552_v62 = vadd.f32 %v3488_v59, %v3396_v17  ;;  %v3817_v9 = vmul.f32 %v12287_v23, %v12548_v33 }
 0x1fb   : > { %v9725_v44 = vmul.f32 %v12585_v36, %v9604_v2  ;;  %v7447_v34 = vrot.slane %v3814_v47, 9  ;;  %v3706_v1 = vadd.f32 %v3642_v63, %v3550_v48  ;;  %v4008_v4 = vrot.slane %v3815_v42, 7  ;;  %v12588_v42 = vld [vmem:[#allocation50_spill] sm:$0xff] }
 0x1fc   : > { %v3707_v28 = vadd.f32 %v3643_v37, %v3551_v8  ;;  %v4011_v12 = vrot.slane %v3816_v56, 7  ;;  %v3708_v38 = vadd.f32 %v3644_v0, %v3552_v62  ;;  %v4014_v7 = vrot.slane %v3817_v9, 7  ;;  %v12586_v0 = vld [vmem:[#allocation102_spill] sm:$0xff] }
 0x1fd   : > { %v12048_v24 = vrot.slane %v9725_v44, 7  ;;  %v4311_v49 = vmul.f32 %v12289_v46, %v12546_v27  ;;  %v4009_v17 = vsel %vm8136_vm9, %v7447_v34, %v4008_v4  ;;  %v4010_v59 = vrot.slane %v4008_v4, 2  ;;  %v12604_v27 = vld [vmem:[#allocation3_spill] sm:$0xff] }
 0x1fe   : > { %v4013_v10 = vrot.slane %v4011_v12, 2  ;;  %v4312_v40 = vmul.f32 %v12290_v26, %v9600_v5  ;;  %v4016_v25 = vrot.slane %v4014_v7, 2  ;;  %v4219_v48 = vadd.f32 %v4009_v17, %v3705_v60 }
 0x1ff   : > { %v4313_v56 = vmul.f32 %v12291_v30, %v12548_v33  ;;  %v4314_v8 = vmul.f32 %v12293_v32, %v9604_v2  ;;  %v4012_v63 = vsel %vm8136_vm9, %v4010_v59, %v4011_v12  ;;  %v9744_v47 = vcombine.high %v12586_v0, %v12586_v0 }
 0x200   : > { %v4015_v37 = vsel %vm8136_vm9, %v4013_v10, %v4014_v7  ;;  %v9748_v62 = vcombine.high %v12588_v42, %v12588_v42  ;;  %v4018_v60 = vsel %vm8136_vm9, %v4016_v25, %v12048_v24  ;;  %v4220_v9 = vadd.f32 %v4012_v63, %v3706_v1  ;;  %v12595_v25 = vld [vmem:[#allocation15_spill] sm:$0xff]  ;;  %v12596_v63 = vld [vmem:[#allocation14_spill] sm:$0xff] }
 0x201   : > { %12587 = vst [vmem:[#allocation67_spill] sm:$0xff] %v9744_v47  ;;  %v4221_v34 = vadd.f32 %v4015_v37, %v3707_v28  ;;  %v9754_v4 = vadd.f32 %v4311_v49, %v4219_v48  ;;  %v4222_v12 = vadd.f32 %v4018_v60, %v3708_v38  ;;  %v1959_v7 = vmul.f32 %v12514_v54, %v8823_v58  ;;  %v12594_v49 = vld [vmem:[#allocation7_spill] sm:$0xff]  ;;  %v12597_v60 = vld [vmem:[#allocation22_spill] sm:$0xff] }
 0x202   : > { %12589 = vst [vmem:[#allocation120_spill] sm:$0xff] %v9748_v62  ;;  %v1960_v17 = vmul.f32 %v12517_v22, %v12537_v55  ;;  %v1961_v59 = vmul.f32 %v12554_v35, %v12538_v61  ;;  %v9762_v10 = vadd.f32 %v4312_v40, %v4220_v9  ;;  %v1962_v1 = vmul.f32 %v12556_v14, %v12540_v43  ;;  %v12598_v9 = vld [vmem:[#allocation17_spill] sm:$0xff]  ;;  %v12599_v24 = vld [vmem:[#allocation18_spill] sm:$0xff] }
 0x203   : > { %12590 = vst [vmem:[#allocation70_spill] sm:$0xff] %v9754_v4  ;;  %v9764_v36 = vadd.f32 %v4313_v56, %v4221_v34  ;;  %v2167_v28 = vmul.f32 %v12564_v53, %v12537_v55  ;;  %v9770_v38 = vadd.f32 %v4314_v8, %v4222_v12  ;;  %v2050_v58 = vadd.f32 %v12594_v49, %v1959_v7  ;;  %v12600_v12 = vld [vmem:[#allocation112_spill] sm:$0xff] }
 0x204   : > { %12591 = vst [vmem:[#allocation72_spill] sm:$0xff] %v9762_v10  ;;  %v2051_v48 = vadd.f32 %v12595_v25, %v1960_v17  ;;  %v2052_v37 = vadd.f32 %v12596_v63, %v1961_v59  ;;  %v4581_v40 = vcombine.low %v9754_v4, %v9762_v10  ;;  %v2053_v56 = vadd.f32 %v12597_v60, %v1962_v1  ;;  %v12601_v7 = vld [vmem:[#allocation12_spill] sm:$0xff]  ;;  %v12602_v17 = vld [vmem:[#allocation74_spill] sm:$0xff] }
 0x205   : > { %12592 = vst [vmem:[#allocation75_spill] sm:$0xff] %v9764_v36  ;;  %12593 = vst [vmem:[#allocation73_spill] sm:$0xff] %v9770_v38  ;;  %v2168_v34 = vmul.f32 %v12598_v9, %v12538_v61  ;;  %v2169_v54 = vmul.f32 %v12599_v24, %v12540_v43  ;;  %v4582_v8 = vcombine.low %v9764_v36, %v9770_v38  ;;  %v12603_v33 = vrot.slane %v12602_v17, 7 }
 0x206   : > { %v2170_v29 = vmul.f32 %v12601_v7, %v12600_v12  ;;  %v2368_v5 = vrot.slane %v2167_v28, 7  ;;  %v4589_v10 = vrot.slane %v4581_v40, %v12604_v27  ;;  %v2663_v9 = vmul.f32 %v12605_v18, %v12537_v55  ;;  %v12607_v40 = vld [vmem:[#allocation16_spill] sm:$0xff] }
 0x207   : > { %v2367_v59 = vrot.slane %v12603_v33, 2  ;;  %v2371_v4 = vrot.slane %v2168_v34, 7  ;;  %v2374_v1 = vrot.slane %v2169_v54, 7  ;;  %v4596_v60 = vrot.slane %v4582_v8, %v12604_v27  ;;  %v12606_v33 = vld [vmem:[#allocation19_spill] sm:$0xff] }
 0x208   : > { %v2370_v38 = vrot.slane %v2368_v5, 2  ;;  %v2377_v36 = vrot.slane %v2170_v29, 7  ;;  %v2664_v28 = vmul.f32 %v12606_v33, %v12538_v61  ;;  %v2665_v55 = vmul.f32 %v12607_v40, %v12540_v43  ;;  %v12608_v34 = vld [vmem:[#allocation23_spill] sm:$0xff]  ;;  %v12611_v40 = vld [vmem:[#allocation28_spill] sm:$0xff] }
 0x209   : > { %v2369_v24 = vsel %vm8136_vm9, %v2367_v59, %v2368_v5  ;;  %v2373_v63 = vrot.slane %v2371_v4, 2  ;;  %v2376_v7 = vrot.slane %v2374_v1, 2  ;;  %v4597_v17 = vcombine.low %v4589_v10, %v4596_v60  ;;  %v12610_v59 = vld [vmem:[#allocation153_spill] sm:$0xff] }
 0x20a   : > { %v2571_v25 = vadd.f32 %v2369_v24, %v2050_v58  ;;  %v2372_v54 = vsel %vm8136_vm9, %v2370_v38, %v2371_v4  ;;  %v2666_v8 = vmul.f32 %v12608_v34, %v12600_v12  ;;  %v12609_v4 = vld [vmem:[#allocation21_spill] sm:$0xff]  ;;  %v2820_v12 = vmul.f32 %v12611_v40, %v12610_v59  ;;  %v12612_v34 = vld [vmem:[#allocation83_spill] sm:$0xff] }
 0x20b   : > { %v2375_v5 = vsel %vm8136_vm9, %v2373_v63, %v2374_v1  ;;  %v2378_v29 = vsel %vm8136_vm9, %v2376_v7, %v2377_v36  ;;  %v2572_v24 = vadd.f32 %v2372_v54, %v2051_v48  ;;  %v4786_v61 = vsel %vm4767_vm10, %v4597_v17, 0.0  ;;  %v12613_v1 = vld [vmem:[#allocation154_spill] sm:$0xff]  ;;  %v12614_v17 = vld [vmem:[#allocation44_spill] sm:$0xff] }
 0x20c   : > { %v2727_v58 = vadd.f32 %v2663_v9, %v2571_v25  ;;  %v2573_v10 = vadd.f32 %v2375_v5, %v2052_v37  ;;  %v2574_v60 = vadd.f32 %v2378_v29, %v2053_v56  ;;  %v2819_v38 = vmul.f32 %v12609_v4, %v12495_v15  ;;  %4787 = vadd.xlane.f32.xlu0 %v4786_v61  ;;  %v12615_v54 = vld [vmem:[#allocation26_spill] sm:$0xff] }
 0x20d   : > { %v2728_v43 = vadd.f32 %v2664_v28, %v2572_v24  ;;  %v2821_v63 = vmul.f32 %v12489_v6, %v12612_v34  ;;  %v2822_v36 = vmul.f32 %v12406_v11, %v12613_v1  ;;  %v2993_v37 = vmul.f32 %v12492_v45, %v12610_v59 }
 0x20e   : > { %v2729_v48 = vadd.f32 %v2665_v55, %v2573_v10  ;;  %v2730_v25 = vadd.f32 %v2666_v8, %v2574_v60  ;;  %v2883_v9 = vadd.f32 %v2819_v38, %v2727_v58  ;;  %v2994_v7 = vmul.f32 %v12580_v13, %v12612_v34 }
 0x20f   : > { %v2884_v56 = vadd.f32 %v2820_v12, %v2728_v43  ;;  %v2995_v28 = vmul.f32 %v12581_v41, %v12613_v1  ;;  %v2996_v5 = vmul.f32 %v12615_v54, %v12614_v17  ;;  %v12616_v61 = vrot.slane %v9686_v16, 7 }
 0x210   : > { %v2885_v29 = vadd.f32 %v2821_v63, %v2729_v48  ;;  %v2886_v24 = vadd.f32 %v2822_v36, %v2730_v25  ;;  %v3194_v8 = vrot.slane %v2993_v37, 7  ;;  %v3197_v58 = vrot.slane %v2994_v7, 7 }
 0x211   : > { %v3193_v55 = vrot.slane %v12616_v61, 2  ;;  %v3200_v10 = vrot.slane %v2995_v28, 7  ;;  %v3203_v60 = vrot.slane %v2996_v5, 7  ;;  %v3489_v38 = vmul.f32 %v8232_v19, %v12610_v59  ;;  %v12617_v5 = vld [vmem:[#allocation36_spill] sm:$0xff] }
 0x212   : > { %v3196_v12 = vrot.slane %v3194_v8, 2  ;;  %v3490_v41 = vmul.f32 %v8273_v50, %v12612_v34  ;;  %v3491_v63 = vmul.f32 %v8235_v20, %v12613_v1  ;;  %v3199_v36 = vrot.slane %v3197_v58, 2 }
 0x213   : > { %v3195_v43 = vsel %vm8136_vm9, %v3193_v55, %v3194_v8  ;;  %v3202_v16 = vrot.slane %v3200_v10, 2  ;;  %v3492_v25 = vmul.f32 %v8277_v51, %v12614_v17  ;;  %v3645_v7 = vmul.f32 %v8238_v21, %v9604_v2 }
 0x214   : > { %v3397_v48 = vadd.f32 %v3195_v43, %v2883_v9  ;;  %v3198_v37 = vsel %vm8136_vm9, %v3196_v12, %v3197_v58  ;;  %v3646_v28 = vmul.f32 %v8281_v52, %v12586_v0  ;;  %v3647_v61 = vmul.f32 %v12617_v5, %v9744_v47 }
 0x215   : > { %v3201_v55 = vsel %vm8136_vm9, %v3199_v36, %v3200_v10  ;;  %v3204_v9 = vsel %vm8136_vm9, %v3202_v16, %v3203_v60  ;;  %v3398_v8 = vadd.f32 %v3198_v37, %v2884_v56  ;;  %v3648_v58 = vmul.f32 %v12282_v3, %v12588_v42  ;;  %v12618_v56 = vld [vmem:[#allocation37_spill] sm:$0xff] }
 0x216   : > { %v3553_v43 = vadd.f32 %v3489_v38, %v3397_v48  ;;  %v3399_v54 = vadd.f32 %v3201_v55, %v2885_v29  ;;  %v3400_v17 = vadd.f32 %v3204_v9, %v2886_v24  ;;  %v3819_v12 = vmul.f32 %v12284_v57, %v12586_v0 }
 0x217   : > { %v3554_v1 = vadd.f32 %v3490_v41, %v3398_v8  ;;  %v3820_v59 = vmul.f32 %v12286_v39, %v9744_v47  ;;  %v3821_v10 = vmul.f32 %v12287_v23, %v12588_v42  ;;  %v3822_v29 = vmul.f32 %v12618_v56, %v9748_v62  ;;  %v12633_v56 = vld [vmem:[#allocation17_spill] sm:$0xff] }
 0x218   : > { %v3709_v34 = vadd.f32 %v3645_v7, %v3553_v43  ;;  %v3555_v36 = vadd.f32 %v3491_v63, %v3399_v54  ;;  %v3556_v60 = vadd.f32 %v3492_v25, %v3400_v17  ;;  %v12619_v24 = vrot.slane %v9725_v44, 7 }
 0x219   : > { %v3710_v16 = vadd.f32 %v3646_v28, %v3554_v1  ;;  %v4020_v48 = vrot.slane %v3819_v12, 7  ;;  %v4023_v37 = vrot.slane %v3820_v59, 7  ;;  %v4026_v55 = vrot.slane %v3821_v10, 7  ;;  %v12620_v12 = vld [vmem:[#allocation49_spill] sm:$0xff] }
 0x21a   : > { %v4019_v38 = vrot.slane %v12619_v24, 2  ;;  %v3711_v41 = vadd.f32 %v3647_v61, %v3555_v36  ;;  %v3712_v7 = vadd.f32 %v3648_v58, %v3556_v60  ;;  %v4029_v9 = vrot.slane %v3822_v29, 7  ;;  %v12623_v24 = vld [vmem:[#allocation78_spill] sm:$0xff] }
 0x21b   : > { %v4315_v8 = vmul.f32 %v12289_v46, %v12586_v0  ;;  %v4022_v17 = vrot.slane %v4020_v48, 2  ;;  %v4025_v63 = vrot.slane %v4023_v37, 2  ;;  %v4028_v25 = vrot.slane %v4026_v55, 2  ;;  %v12639_v0 = vld [vmem:[#allocation16_spill] sm:$0xff] }
 0x21c   : > { %v4021_v54 = vsel %vm8136_vm9, %v4019_v38, %v4020_v48  ;;  %v4316_v44 = vmul.f32 %v12290_v26, %v9744_v47  ;;  %v4317_v59 = vmul.f32 %v12291_v30, %v12588_v42  ;;  %v4318_v1 = vmul.f32 %v12293_v32, %v9748_v62  ;;  %v12624_v48 = vld [vmem:[#allocation77_spill] sm:$0xff]  ;;  %v12637_v42 = vld [vmem:[#allocation80_spill] sm:$0xff] }
 0x21d   : > { %v4223_v43 = vadd.f32 %v4021_v54, %v3709_v34  ;;  %v4024_v28 = vsel %vm8136_vm9, %v4022_v17, %v4023_v37  ;;  %v4027_v61 = vsel %vm8136_vm9, %v4025_v63, %v4026_v55  ;;  %v4030_v58 = vsel %vm8136_vm9, %v4028_v25, %v4029_v9  ;;  %v12625_v54 = vld [vmem:[#allocation144_spill] sm:$0xff]  ;;  %v12626_v17 = vld [vmem:[#allocation79_spill] sm:$0xff] }
 0x21e   : > { %v9877_v34 = vcombine.high %v12620_v12, %v12620_v12  ;;  %v4224_v10 = vadd.f32 %v4024_v28, %v3710_v16  ;;  %v4225_v36 = vadd.f32 %v4027_v61, %v3711_v41  ;;  %v4226_v60 = vadd.f32 %v4030_v58, %v3712_v7  ;;  %v12630_v7 = vld [vmem:[#allocation15_spill] sm:$0xff]  ;;  %v12632_v61 = vld [vmem:[#allocation22_spill] sm:$0xff] }
 0x21f   : > { %v9879_v29 = vadd.f32 %v4315_v8, %v4223_v43  ;;  %v1964_v38 = vmul.f32 %v12517_v22, %v12623_v24  ;;  %v1965_v37 = vmul.f32 %v12554_v35, %v12624_v48  ;;  %v1966_v55 = vmul.f32 %v12556_v14, %v12625_v54  ;;  %v12631_v43 = vld [vmem:[#allocation14_spill] sm:$0xff] }
 0x220   : > { %12621 = vst [vmem:[#allocation68_spill] sm:$0xff] %v9877_v34  ;;  %v2054_v9 = vadd.f32 %v12594_v49, %v12626_v17  ;;  %v9889_v63 = vadd.f32 %v4316_v44, %v4224_v10  ;;  %v9891_v25 = vadd.f32 %v4317_v59, %v4225_v36  ;;  %v9893_v16 = vadd.f32 %v4318_v1, %v4226_v60  ;;  %v12634_v1 = vld [vmem:[#allocation18_spill] sm:$0xff]  ;;  %v12635_v36 = vld [vmem:[#allocation20_spill] sm:$0xff] }
 0x221   : > { %12622 = vst [vmem:[#allocation105_spill] sm:$0xff] %v9879_v29  ;;  %v2172_v41 = vmul.f32 %v12564_v53, %v12623_v24  ;;  %v2055_v8 = vadd.f32 %v12630_v7, %v1964_v38  ;;  %v2056_v28 = vadd.f32 %v12631_v43, %v1965_v37  ;;  %v2057_v58 = vadd.f32 %v12632_v61, %v1966_v55 }
 0x222   : > { %12627 = vst [vmem:[#allocation6_spill] sm:$0xff] %v9889_v63  ;;  %12628 = vst [vmem:[#allocation69_spill] sm:$0xff] %v9891_v25  ;;  %v2173_v62 = vmul.f32 %v12633_v56, %v12624_v48  ;;  %v4598_v44 = vcombine.low %v9879_v29, %v9889_v63  ;;  %v4599_v59 = vcombine.low %v9891_v25, %v9893_v16  ;;  %v12638_v47 = vrot.slane %v12637_v42, 9 }
 0x223   : > { %12629 = vst [vmem:[#allocation10_spill] sm:$0xff] %v9893_v16  ;;  %v2174_v10 = vmul.f32 %v12634_v1, %v12625_v54  ;;  %v9910_v60 = vmul.f32 %v12635_v36, %v12495_v15  ;;  %v2381_v38 = vrot.slane %v2172_v41, 7  ;;  %v2667_v55 = vmul.f32 %v12605_v18, %v12623_v24 }
 0x224   : > { %v2384_v37 = vrot.slane %v2173_v62, 7  ;;  %v2668_v17 = vmul.f32 %v12606_v33, %v12624_v48  ;;  %v4606_v63 = vrot.slane %v4598_v44, %v12604_v27  ;;  %v4613_v29 = vrot.slane %v4599_v59, %v12604_v27  ;;  %v12640_v44 = vld [vmem:[#allocation23_spill] sm:$0xff] }
 0x225   : > { %12636 = vst [vmem:[#allocation76_spill] sm:$0xff] %v9910_v60  ;;  %v2387_v16 = vrot.slane %v2174_v10, 7  ;;  %v2382_v36 = vsel %vm8136_vm9, %v12638_v47, %v2381_v38  ;;  %v2383_v41 = vrot.slane %v2381_v38, 2  ;;  %v2669_v24 = vmul.f32 %v12639_v0, %v12625_v54  ;;  %v12641_v10 = vld [vmem:[#allocation86_spill] sm:$0xff]  ;;  %v12642_v38 = vld [vmem:[#allocation48_spill] sm:$0xff] }
 0x226   : > { %v2386_v62 = vrot.slane %v2384_v37, 2  ;;  %v4614_v18 = vcombine.low %v4606_v63, %v4613_v29  ;;  %v2575_v48 = vadd.f32 %v2382_v36, %v2054_v9  ;;  %v2670_v33 = vmul.f32 %v12640_v44, %v12495_v15  ;;  %v12644_v44 = vld [vmem:[#allocation8_spill] sm:$0xff] }
 0x227   : > { %v2389_v1 = vrot.slane %v2387_v16, 2  ;;  %v2385_v59 = vsel %vm8136_vm9, %v2383_v41, %v2384_v37  ;;  %v2823_v47 = vmul.f32 %v12609_v4, %v12641_v10  ;;  %v2824_v25 = vmul.f32 %v12611_v40, %v12642_v38 }
 0x228   : > { %v2388_v42 = vsel %vm8136_vm9, %v2386_v62, %v2387_v16  ;;  %v4789_v54 = vsel %vm4767_vm10, %v4614_v18, 0.0  ;;  %v12643_v29 = vrot.slane %v9910_v60, 7  ;;  %v2576_v63 = vadd.f32 %v2385_v59, %v2055_v8  ;;  %v12645_v62 = vld [vmem:[#allocation85_spill] sm:$0xff] }
 0x229   : > { %v2577_v36 = vadd.f32 %v2388_v42, %v2056_v28  ;;  %4790 = vadd.xlane.f32.xlu1 %v4789_v54  ;;  %v2731_v41 = vadd.f32 %v2667_v55, %v2575_v48  ;;  %v2825_v16 = vmul.f32 %v12489_v6, %v12644_v44  ;;  %v2826_v4 = vmul.f32 %v12406_v11, %v12645_v62  ;;  %v12646_v18 = vld [vmem:[#allocation13_spill] sm:$0xff]  ;;  %v12648_v42 = vld [vmem:[#allocation35_spill] sm:$0xff] }
 0x22a   : > { %v2391_v9 = vsel %vm8136_vm9, %v2389_v1, %v12643_v29  ;;  %v2732_v0 = vadd.f32 %v2668_v17, %v2576_v63  ;;  %v2997_v27 = vmul.f32 %v12646_v18, %v12641_v10  ;;  %v2998_v60 = vmul.f32 %v12492_v45, %v12642_v38 }
 0x22b   : > { %v2578_v37 = vadd.f32 %v2391_v9, %v2057_v58  ;;  %v2733_v40 = vadd.f32 %v2669_v24, %v2577_v36  ;;  %v2887_v8 = vadd.f32 %v2823_v47, %v2731_v41  ;;  %v2999_v28 = vmul.f32 %v12580_v13, %v12644_v44  ;;  %v12647_v58 = vld [vmem:[#allocation33_spill] sm:$0xff]  ;;  %v12649_v41 = vld [vmem:[#allocation55_spill] sm:$0xff] }
 0x22c   : > { %v3000_v55 = vmul.f32 %v12647_v58, %v12645_v62  ;;  %v2888_v48 = vadd.f32 %v2824_v25, %v2732_v0  ;;  %v9954_v17 = vmul.f32 %v12648_v42, %v9604_v2  ;;  %v7434_v24 = vrot.slane %v2997_v27, 9 }
 0x22d   : > { %v2734_v1 = vadd.f32 %v2670_v33, %v2578_v37  ;;  %v2889_v59 = vadd.f32 %v2825_v16, %v2733_v40  ;;  %v3207_v29 = vrot.slane %v2998_v60, 7  ;;  %v3210_v9 = vrot.slane %v2999_v28, 7 }
 0x22e   : > { %v3213_v63 = vrot.slane %v3000_v55, 7  ;;  %v3493_v47 = vmul.f32 %v8232_v19, %v12642_v38  ;;  %v3494_v36 = vmul.f32 %v8273_v50, %v12644_v44  ;;  %v3495_v0 = vmul.f32 %v8235_v20, %v12645_v62 }
 0x22f   : > { %v2890_v54 = vadd.f32 %v2826_v4, %v2734_v1  ;;  %v3208_v40 = vsel %vm8136_vm9, %v7434_v24, %v3207_v29  ;;  %v3209_v25 = vrot.slane %v3207_v29, 2  ;;  %v3212_v27 = vrot.slane %v3210_v9, 2  ;;  %v12650_v1 = vld [vmem:[#allocation115_spill] sm:$0xff] }
 0x230   : > { %v3215_v4 = vrot.slane %v3213_v63, 2  ;;  %v3401_v60 = vadd.f32 %v3208_v40, %v2887_v8  ;;  %v3496_v37 = vmul.f32 %v8277_v51, %v9604_v2  ;;  %v3649_v16 = vmul.f32 %v8238_v21, %v12649_v41 }
 0x231   : > { %v3650_v28 = vmul.f32 %v8281_v52, %v12650_v1  ;;  %v3211_v55 = vsel %vm8136_vm9, %v3209_v25, %v3210_v9  ;;  %v3214_v33 = vsel %vm8136_vm9, %v3212_v27, %v3213_v63  ;;  %v12651_v24 = vrot.slane %v9954_v17, 7  ;;  %v12652_v9 = vld [vmem:[#allocation24_spill] sm:$0xff] }
 0x232   : > { %v3651_v29 = vmul.f32 %v12617_v5, %v12620_v12  ;;  %v3402_v40 = vadd.f32 %v3211_v55, %v2888_v48  ;;  %v3403_v42 = vadd.f32 %v3214_v33, %v2889_v59  ;;  %v3557_v62 = vadd.f32 %v3493_v47, %v3401_v60  ;;  %v12653_v59 = vld [vmem:[#allocation56_spill] sm:$0xff] }
 0x233   : > { %v3217_v8 = vsel %vm8136_vm9, %v3215_v4, %v12651_v24  ;;  %v3652_v44 = vmul.f32 %v12282_v3, %v9877_v34  ;;  %v3823_v25 = vmul.f32 %v12652_v9, %v12649_v41  ;;  %v3824_v63 = vmul.f32 %v12284_v57, %v12650_v1 }
 0x234   : > { %v3404_v18 = vadd.f32 %v3217_v8, %v2890_v54  ;;  %v3825_v27 = vmul.f32 %v12286_v39, %v12620_v12  ;;  %v3558_v4 = vadd.f32 %v3494_v36, %v3402_v40  ;;  %v3559_v24 = vadd.f32 %v3495_v0, %v3403_v42  ;;  %v12654_v54 = vld [vmem:[#allocation47_spill] sm:$0xff] }
 0x235   : > { %v3713_v10 = vadd.f32 %v3649_v16, %v3557_v62  ;;  %v3826_v48 = vmul.f32 %v12287_v23, %v9877_v34  ;;  %v9993_v33 = vmul.f32 %v12654_v54, %v12653_v59  ;;  %v7448_v47 = vrot.slane %v3823_v25, 9 }
 0x236   : > { %v3560_v38 = vadd.f32 %v3496_v37, %v3404_v18  ;;  %v4033_v60 = vrot.slane %v3824_v63, 7  ;;  %v3714_v55 = vadd.f32 %v3650_v28, %v3558_v4  ;;  %v3715_v8 = vadd.f32 %v3651_v29, %v3559_v24  ;;  %v12659_v24 = vld [vmem:[#allocation5_spill] sm:$0xff] }
 0x237   : > { %v4036_v41 = vrot.slane %v3825_v27, 7  ;;  %v4039_v42 = vrot.slane %v3826_v48, 7  ;;  %v12086_v62 = vrot.slane %v9993_v33, 7  ;;  %v4319_v37 = vmul.f32 %v12289_v46, %v12650_v1  ;;  %v12657_v27 = vld [vmem:[#allocation142_spill] sm:$0xff] }
 0x238   : > { %v3716_v9 = vadd.f32 %v3652_v44, %v3560_v38  ;;  %v4034_v39 = vsel %vm8136_vm9, %v7448_v47, %v4033_v60  ;;  %v4035_v36 = vrot.slane %v4033_v60, 2  ;;  %v4320_v16 = vmul.f32 %v12290_v26, %v12620_v12  ;;  %v12671_v12 = vld [vmem:[#allocation19_spill] sm:$0xff] }
 0x239   : > { %v4038_v18 = vrot.slane %v4036_v41, 2  ;;  %v4227_v0 = vadd.f32 %v4034_v39, %v3713_v10  ;;  %v4041_v44 = vrot.slane %v4039_v42, 2  ;;  %v4321_v38 = vmul.f32 %v12291_v30, %v9877_v34 }
 0x23a   : > { %v4037_v28 = vsel %vm8136_vm9, %v4035_v36, %v4036_v41  ;;  %v4322_v29 = vmul.f32 %v12293_v32, %v12653_v59  ;;  %v10014_v25 = vcombine.high %v12653_v59, %v12653_v59  ;;  %v10022_v4 = vcombine.high %v12657_v27, %v12657_v27 }
 0x23b   : > { %v4040_v40 = vsel %vm8136_vm9, %v4038_v18, %v4039_v42  ;;  %v4228_v39 = vadd.f32 %v4037_v28, %v3714_v55  ;;  %v10010_v10 = vadd.f32 %v4319_v37, %v4227_v0  ;;  %v4043_v41 = vsel %vm8136_vm9, %v4041_v44, %v12086_v62  ;;  %v12661_v55 = vld [vmem:[#allocation153_spill] sm:$0xff]  ;;  %v12662_v42 = vld [vmem:[#allocation83_spill] sm:$0xff]  ;;  %v12664_v37 = vld [vmem:[#allocation154_spill] sm:$0xff] }
 0x23c   : > { %12656 = vst [vmem:[#allocation7_spill] sm:$0xff] %v10014_v25  ;;  %v4229_v63 = vadd.f32 %v4040_v40, %v3715_v8  ;;  %12658 = vst [vmem:[#allocation112_spill] sm:$0xff] %v10022_v4  ;;  %v1967_v48 = vmul.f32 %v12659_v24, %v12495_v15  ;;  %v4230_v47 = vadd.f32 %v4043_v41, %v3716_v9  ;;  %v12666_v41 = vld [vmem:[#allocation18_spill] sm:$0xff] }
 0x23d   : > { %12655 = vst [vmem:[#allocation32_spill] sm:$0xff] %v10010_v10  ;;  %v10026_v60 = vadd.f32 %v4320_v16, %v4228_v39  ;;  %v1968_v36 = vmul.f32 %v12517_v22, %v12661_v55  ;;  %v1969_v18 = vmul.f32 %v12554_v35, %v12662_v42  ;;  %v1970_v8 = vmul.f32 %v12556_v14, %v12664_v37 }
 0x23e   : > { %v10032_v0 = vadd.f32 %v4321_v38, %v4229_v63  ;;  %v2058_v28 = vadd.f32 %v12594_v49, %v1967_v48  ;;  %v2176_v44 = vmul.f32 %v12564_v53, %v12661_v55  ;;  %v10039_v15 = vadd.f32 %v4322_v29, %v4230_v47  ;;  %v12667_v48 = vld [vmem:[#allocation76_spill] sm:$0xff]  ;;  %v12669_v47 = vld [vmem:[#allocation3_spill] sm:$0xff] }
 0x23f   : > { %12660 = vst [vmem:[#allocation74_spill] sm:$0xff] %v10026_v60  ;;  %v4615_v9 = vcombine.low %v10010_v10, %v10026_v60  ;;  %v2059_v16 = vadd.f32 %v12630_v7, %v1968_v36  ;;  %v2060_v40 = vadd.f32 %v12631_v43, %v1969_v18  ;;  %v2061_v38 = vadd.f32 %v12632_v61, %v1970_v8  ;;  %v12670_v36 = vld [vmem:[#allocation9_spill] sm:$0xff] }
 0x240   : > { %12663 = vst [vmem:[#allocation78_spill] sm:$0xff] %v10032_v0  ;;  %12665 = vst [vmem:[#allocation77_spill] sm:$0xff] %v10039_v15  ;;  %v2177_v39 = vmul.f32 %v12633_v56, %v12662_v42  ;;  %v2178_v63 = vmul.f32 %v12666_v41, %v12664_v37  ;;  %v12668_v62 = vrot.slane %v12667_v48, 7  ;;  %v4616_v29 = vcombine.low %v10032_v0, %v10039_v15  ;;  %v12672_v56 = vld [vmem:[#allocation16_spill] sm:$0xff] }
 0x241   : > { %v4623_v60 = vrot.slane %v4615_v9, %v12669_v47  ;;  %v2393_v10 = vrot.slane %v2176_v44, 7  ;;  %v2671_v18 = vmul.f32 %v12670_v36, %v12661_v55  ;;  %v2672_v1 = vmul.f32 %v12671_v12, %v12662_v42  ;;  %v12673_v0 = vld [vmem:[#allocation44_spill] sm:$0xff]  ;;  %v12674_v9 = vld [vmem:[#allocation23_spill] sm:$0xff] }
 0x242   : > { %v2392_v54 = vrot.slane %v12668_v62, 2  ;;  %v2396_v34 = vrot.slane %v2177_v39, 7  ;;  %v2399_v8 = vrot.slane %v2178_v63, 7  ;;  %v2673_v41 = vmul.f32 %v12672_v56, %v12664_v37  ;;  %v12675_v39 = vld [vmem:[#allocation21_spill] sm:$0xff]  ;;  %v12676_v37 = vld [vmem:[#allocation102_spill] sm:$0xff]  ;;  %v12677_v56 = vld [vmem:[#allocation28_spill] sm:$0xff] }
 0x243   : > { %v4630_v48 = vrot.slane %v4616_v29, %v12669_v47  ;;  %v2395_v15 = vrot.slane %v2393_v10, 2  ;;  %v2674_v44 = vmul.f32 %v12674_v9, %v12673_v0  ;;  %v2827_v63 = vmul.f32 %v12675_v39, %v9604_v2  ;;  %v12678_v12 = vld [vmem:[#allocation67_spill] sm:$0xff]  ;;  %v12679_v0 = vld [vmem:[#allocation89_spill] sm:$0xff] }
 0x244   : > { %v2394_v62 = vsel %vm8136_vm9, %v2392_v54, %v2393_v10  ;;  %v2398_v53 = vrot.slane %v2396_v34, 2  ;;  %v2401_v61 = vrot.slane %v2399_v8, 2  ;;  %v2828_v29 = vmul.f32 %v12677_v56, %v12676_v37 }
 0x245   : > { %v2579_v55 = vadd.f32 %v2394_v62, %v2058_v28  ;;  %v4631_v36 = vcombine.low %v4623_v60, %v4630_v48  ;;  %v2397_v42 = vsel %vm8136_vm9, %v2395_v15, %v2396_v34  ;;  %v2829_v54 = vmul.f32 %v12489_v6, %v12678_v12  ;;  %v12681_v15 = vld [vmem:[#allocation50_spill] sm:$0xff] }
 0x246   : > { %v2400_v10 = vsel %vm8136_vm9, %v2398_v53, %v2399_v8  ;;  %v12680_v9 = vrot.slane %v12679_v0, 7  ;;  %v2580_v62 = vadd.f32 %v2397_v42, %v2059_v16  ;;  %v2830_v56 = vmul.f32 %v12406_v11, %v12681_v15 }
 0x247   : > { %v2735_v39 = vadd.f32 %v2671_v18, %v2579_v55  ;;  %v4792_v60 = vsel %vm4767_vm10, %v4631_v36, 0.0  ;;  %v2581_v48 = vadd.f32 %v2400_v10, %v2060_v40  ;;  %v3002_v53 = vmul.f32 %v12492_v45, %v12676_v37  ;;  %v12682_v36 = vld [vmem:[#allocation120_spill] sm:$0xff]  ;;  %v12683_v40 = vld [vmem:[#allocation26_spill] sm:$0xff] }
 0x248   : > { %v2403_v28 = vsel %vm8136_vm9, %v2401_v61, %v12680_v9  ;;  %4793 = vadd.xlane.f32.xlu0 %v4792_v60  ;;  %v2736_v47 = vadd.f32 %v2672_v1, %v2580_v62  ;;  %v3003_v8 = vmul.f32 %v12580_v13, %v12678_v12  ;;  %v3004_v16 = vmul.f32 %v12647_v58, %v12681_v15 }
 0x249   : > { %v2582_v34 = vadd.f32 %v2403_v28, %v2061_v38  ;;  %v2891_v6 = vadd.f32 %v2827_v63, %v2735_v39  ;;  %v2737_v0 = vadd.f32 %v2673_v41, %v2581_v48  ;;  %v3005_v38 = vmul.f32 %v12683_v40, %v12682_v36 }
 0x24a   : > { %v2892_v18 = vadd.f32 %v2828_v29, %v2736_v47  ;;  %v12684_v9 = vrot.slane %v9954_v17, 7  ;;  %v3219_v1 = vrot.slane %v3002_v53, 7  ;;  %v3222_v39 = vrot.slane %v3003_v8, 7 }
 0x24b   : > { %v2738_v61 = vadd.f32 %v2674_v44, %v2582_v34  ;;  %v2893_v63 = vadd.f32 %v2829_v54, %v2737_v0  ;;  %v3225_v10 = vrot.slane %v3004_v16, 7  ;;  %v3228_v28 = vrot.slane %v3005_v38, 7 }
 0x24c   : > { %v3218_v55 = vrot.slane %v12684_v9, 2  ;;  %v3221_v44 = vrot.slane %v3219_v1, 2  ;;  %v3224_v62 = vrot.slane %v3222_v39, 2  ;;  %v3497_v60 = vmul.f32 %v8232_v19, %v12676_v37 }
 0x24d   : > { %v2894_v42 = vadd.f32 %v2830_v56, %v2738_v61  ;;  %v3227_v48 = vrot.slane %v3225_v10, 2  ;;  %v3498_v17 = vmul.f32 %v8273_v50, %v12678_v12  ;;  %v3499_v47 = vmul.f32 %v8235_v20, %v12681_v15 }
 0x24e   : > { %v3220_v41 = vsel %vm8136_vm9, %v3218_v55, %v3219_v1  ;;  %v3223_v56 = vsel %vm8136_vm9, %v3221_v44, %v3222_v39  ;;  %v3226_v29 = vsel %vm8136_vm9, %v3224_v62, %v3225_v10  ;;  %v3500_v54 = vmul.f32 %v8277_v51, %v12682_v36  ;;  %v12686_v44 = vld [vmem:[#allocation143_spill] sm:$0xff]  ;;  %v12687_v62 = vld [vmem:[#allocation37_spill] sm:$0xff] }
 0x24f   : > { %v3405_v34 = vadd.f32 %v3220_v41, %v2891_v6  ;;  %v3653_v53 = vmul.f32 %v8238_v21, %v12653_v59  ;;  %v3229_v6 = vsel %vm8136_vm9, %v3227_v48, %v3228_v28  ;;  %v3406_v8 = vadd.f32 %v3223_v56, %v2892_v18  ;;  %v12685_v18 = vld [vmem:[#allocation43_spill] sm:$0xff] }
 0x250   : > { %v3407_v0 = vadd.f32 %v3226_v29, %v2893_v63  ;;  %v3408_v16 = vadd.f32 %v3229_v6, %v2894_v42  ;;  %v3654_v38 = vmul.f32 %v8281_v52, %v10014_v25  ;;  %v3655_v9 = vmul.f32 %v12617_v5, %v12657_v27 }
 0x251   : > { %v3561_v61 = vadd.f32 %v3497_v60, %v3405_v34  ;;  %v3656_v55 = vmul.f32 %v12282_v3, %v10022_v4  ;;  %v3562_v1 = vadd.f32 %v3498_v17, %v3406_v8  ;;  %v3828_v41 = vmul.f32 %v12284_v57, %v10014_v25 }
 0x252   : > { %v3563_v39 = vadd.f32 %v3499_v47, %v3407_v0  ;;  %v3564_v28 = vadd.f32 %v3500_v54, %v3408_v16  ;;  %v3829_v63 = vmul.f32 %v12685_v18, %v12657_v27  ;;  %v3830_v42 = vmul.f32 %v12287_v23, %v10022_v4 }
 0x253   : > { %v3717_v10 = vadd.f32 %v3653_v53, %v3561_v61  ;;  %v3831_v60 = vmul.f32 %v12687_v62, %v12686_v44  ;;  %v3718_v48 = vadd.f32 %v3654_v38, %v3562_v1  ;;  %v12688_v56 = vrot.slane %v9993_v33, 7  ;;  %v12694_v62 = vld [vmem:[#allocation8_spill] sm:$0xff] }
 0x254   : > { %v3719_v34 = vadd.f32 %v3655_v9, %v3563_v39  ;;  %v4045_v47 = vrot.slane %v3828_v41, 7  ;;  %v3720_v29 = vadd.f32 %v3656_v55, %v3564_v28  ;;  %v4048_v53 = vrot.slane %v3829_v63, 7  ;;  %v12689_v41 = vld [vmem:[#allocation90_spill] sm:$0xff] }
 0x255   : > { %v4044_v17 = vrot.slane %v12688_v56, 2  ;;  %v4051_v6 = vrot.slane %v3830_v42, 7  ;;  %v4054_v8 = vrot.slane %v3831_v60, 7  ;;  %v4323_v61 = vmul.f32 %v12289_v46, %v10014_v25  ;;  %v12691_v63 = vld [vmem:[#allocation86_spill] sm:$0xff] }
 0x256   : > { %v4047_v0 = vrot.slane %v4045_v47, 2  ;;  %v4324_v16 = vmul.f32 %v12290_v26, %v12657_v27  ;;  %v4050_v38 = vrot.slane %v4048_v53, 2  ;;  %v4325_v33 = vmul.f32 %v12291_v30, %v10022_v4  ;;  %v12696_v4 = vld [vmem:[#allocation85_spill] sm:$0xff] }
 0x257   : > { %v4046_v54 = vsel %vm8136_vm9, %v4044_v17, %v4045_v47  ;;  %v4053_v9 = vrot.slane %v4051_v6, 2  ;;  %v4326_v39 = vmul.f32 %v12293_v32, %v12686_v44  ;;  %v10141_v28 = vcombine.high %v12689_v41, %v12689_v41 }
 0x258   : > { %v4231_v1 = vadd.f32 %v4046_v54, %v3717_v10  ;;  %v4049_v55 = vsel %vm8136_vm9, %v4047_v0, %v4048_v53  ;;  %v1971_v42 = vmul.f32 %v12659_v24, %v12691_v63  ;;  %v4052_v60 = vsel %vm8136_vm9, %v4050_v38, %v4051_v6  ;;  %v12693_v54 = vld [vmem:[#allocation48_spill] sm:$0xff] }
 0x259   : > { %12690 = vst [vmem:[#allocation144_spill] sm:$0xff] %v10141_v28  ;;  %v4055_v10 = vsel %vm8136_vm9, %v4053_v9, %v4054_v8  ;;  %v4232_v56 = vadd.f32 %v4049_v55, %v3718_v48  ;;  %v4233_v47 = vadd.f32 %v4052_v60, %v3719_v34  ;;  %v1972_v0 = vmul.f32 %v12517_v22, %v12693_v54  ;;  %v12697_v8 = vld [vmem:[#allocation4_spill] sm:$0xff]  ;;  %v12700_v9 = vld [vmem:[#allocation22_spill] sm:$0xff]  ;;  %v12701_v55 = vld [vmem:[#allocation11_spill] sm:$0xff] }
 0x25a   : > { %v10149_v17 = vadd.f32 %v4323_v61, %v4231_v1  ;;  %v4234_v53 = vadd.f32 %v4055_v10, %v3720_v29  ;;  %v1973_v40 = vmul.f32 %v12554_v35, %v12694_v62  ;;  %v1974_v27 = vmul.f32 %v12556_v14, %v12696_v4 }
 0x25b   : > { %v10155_v44 = vadd.f32 %v4324_v16, %v4232_v56  ;;  %v2062_v6 = vadd.f32 %v12594_v49, %v1971_v42  ;;  %v2180_v48 = vmul.f32 %v12697_v8, %v12691_v63  ;;  %v10162_v61 = vadd.f32 %v4325_v33, %v4233_v47  ;;  %v12702_v42 = vld [vmem:[#allocation17_spill] sm:$0xff]  ;;  %v12704_v56 = vld [vmem:[#allocation20_spill] sm:$0xff] }
 0x25c   : > { %12692 = vst [vmem:[#allocation79_spill] sm:$0xff] %v10149_v17  ;;  %v10164_v34 = vadd.f32 %v4326_v39, %v4234_v53  ;;  %v2063_v29 = vadd.f32 %v12630_v7, %v1972_v0  ;;  %v2064_v38 = vadd.f32 %v12631_v43, %v1973_v40  ;;  %v2065_v1 = vadd.f32 %v12700_v9, %v1974_v27  ;;  %v12703_v39 = vld [vmem:[#allocation18_spill] sm:$0xff]  ;;  %v12706_v53 = vld [vmem:[#allocation3_spill] sm:$0xff] }
 0x25d   : > { %12695 = vst [vmem:[#allocation80_spill] sm:$0xff] %v10155_v44  ;;  %12698 = vst [vmem:[#allocation33_spill] sm:$0xff] %v10162_v61  ;;  %v4632_v16 = vcombine.low %v10149_v17, %v10155_v44  ;;  %v2181_v60 = vmul.f32 %v12701_v55, %v12693_v54  ;;  %v2182_v10 = vmul.f32 %v12702_v42, %v12694_v62  ;;  %v7421_v47 = vrot.slane %v2180_v48, 9  ;;  %v12707_v17 = vld [vmem:[#allocation9_spill] sm:$0xff] }
 0x25e   : > { %12699 = vst [vmem:[#allocation56_spill] sm:$0xff] %v10164_v34  ;;  %v4633_v33 = vcombine.low %v10162_v61, %v10164_v34  ;;  %v2183_v63 = vmul.f32 %v12703_v39, %v12696_v4  ;;  %v10181_v40 = vmul.f32 %v12704_v56, %v9604_v2  ;;  %v2675_v8 = vmul.f32 %v12707_v17, %v12693_v54  ;;  %v12708_v61 = vld [vmem:[#allocation19_spill] sm:$0xff]  ;;  %v12714_v17 = vld [vmem:[#allocation28_spill] sm:$0xff] }
 0x25f   : > { %v4640_v0 = vrot.slane %v4632_v16, %v12706_v53  ;;  %v2406_v27 = vrot.slane %v2181_v60, 7  ;;  %v2409_v44 = vrot.slane %v2182_v10, 7  ;;  %v2676_v39 = vmul.f32 %v12708_v61, %v12694_v62  ;;  %v12709_v16 = vld [vmem:[#allocation16_spill] sm:$0xff]  ;;  %v12710_v54 = vld [vmem:[#allocation23_spill] sm:$0xff]  ;;  %v12712_v61 = vld [vmem:[#allocation21_spill] sm:$0xff] }
 0x260   : > { %12705 = vst [vmem:[#allocation5_spill] sm:$0xff] %v10181_v40  ;;  %v4647_v25 = vrot.slane %v4633_v33, %v12706_v53  ;;  %v2412_v36 = vrot.slane %v2183_v63, 7  ;;  %v2677_v60 = vmul.f32 %v12709_v16, %v12696_v4  ;;  %v2678_v33 = vmul.f32 %v12710_v54, %v9604_v2  ;;  %v12711_v34 = vld [vmem:[#allocation55_spill] sm:$0xff]  ;;  %v12716_v54 = vld [vmem:[#allocation49_spill] sm:$0xff]  ;;  %v12718_v16 = vld [vmem:[#allocation68_spill] sm:$0xff] }
 0x261   : > { %v2407_v56 = vsel %vm8136_vm9, %v7421_v47, %v2406_v27  ;;  %v2408_v42 = vrot.slane %v2406_v27, 2  ;;  %v2411_v48 = vrot.slane %v2409_v44, 2  ;;  %v2831_v47 = vmul.f32 %v12712_v61, %v12711_v34  ;;  %v12713_v27 = vld [vmem:[#allocation115_spill] sm:$0xff] }
 0x262   : > { %v4648_v10 = vcombine.low %v4640_v0, %v4647_v25  ;;  %v2414_v9 = vrot.slane %v2412_v36, 2  ;;  %v2583_v43 = vadd.f32 %v2407_v56, %v2062_v6  ;;  %v2832_v53 = vmul.f32 %v12714_v17, %v12713_v27 }
 0x263   : > { %v2410_v63 = vsel %vm8136_vm9, %v2408_v42, %v2409_v44  ;;  %v2413_v62 = vsel %vm8136_vm9, %v2411_v48, %v2412_v36  ;;  %v12715_v25 = vrot.slane %v10181_v40, 7  ;;  %v12717_v36 = vld [vmem:[#allocation25_spill] sm:$0xff]  ;;  %v2834_v61 = vmul.f32 %v12406_v11, %v12718_v16 }
 0x264   : > { %v4795_v4 = vsel %vm4767_vm10, %v4648_v10, 0.0  ;;  %v2584_v56 = vadd.f32 %v2410_v63, %v2063_v29  ;;  %v2585_v0 = vadd.f32 %v2413_v62, %v2064_v38  ;;  %v2739_v42 = vadd.f32 %v2675_v8, %v2583_v43  ;;  %v12719_v10 = vld [vmem:[#allocation13_spill] sm:$0xff]  ;;  %v12720_v63 = vld [vmem:[#allocation35_spill] sm:$0xff] }
 0x265   : > { %v2416_v6 = vsel %vm8136_vm9, %v2414_v9, %v12715_v25  ;;  %4796 = vadd.xlane.f32.xlu1 %v4795_v4  ;;  %v2833_v48 = vmul.f32 %v12717_v36, %v12716_v54  ;;  %v3006_v7 = vmul.f32 %v12719_v10, %v12711_v34  ;;  %v3007_v40 = vmul.f32 %v12492_v45, %v12713_v27  ;;  %v12722_v10 = vld [vmem:[#allocation91_spill] sm:$0xff] }
 0x266   : > { %v2586_v44 = vadd.f32 %v2416_v6, %v2065_v1  ;;  %v2740_v55 = vadd.f32 %v2676_v39, %v2584_v56  ;;  %v2741_v17 = vadd.f32 %v2677_v60, %v2585_v0  ;;  %v2895_v29 = vadd.f32 %v2831_v47, %v2739_v42 }
 0x267   : > { %v3008_v38 = vmul.f32 %v12580_v13, %v12716_v54  ;;  %v3009_v43 = vmul.f32 %v12647_v58, %v12718_v16  ;;  %v10223_v39 = vmul.f32 %v12720_v63, %v12653_v59  ;;  %v7435_v60 = vrot.slane %v3006_v7, 9 }
 0x268   : > { %v2742_v9 = vadd.f32 %v2678_v33, %v2586_v44  ;;  %v2896_v8 = vadd.f32 %v2832_v53, %v2740_v55  ;;  %v2897_v1 = vadd.f32 %v2833_v48, %v2741_v17  ;;  %v3232_v4 = vrot.slane %v3007_v40, 7  ;;  %v12721_v44 = vld [vmem:[#allocation59_spill] sm:$0xff] }
 0x269   : > { %v3235_v25 = vrot.slane %v3008_v38, 7  ;;  %v3238_v6 = vrot.slane %v3009_v43, 7  ;;  %v12116_v33 = vrot.slane %v10223_v39, 7  ;;  %v3501_v47 = vmul.f32 %v8232_v19, %v12713_v27 }
 0x26a   : > { %v2898_v62 = vadd.f32 %v2834_v61, %v2742_v9  ;;  %v3502_v56 = vmul.f32 %v8273_v50, %v12716_v54  ;;  %v3503_v17 = vmul.f32 %v8235_v20, %v12718_v16  ;;  %v3233_v55 = vsel %vm8136_vm9, %v7435_v60, %v3232_v4 }
 0x26b   : > { %v3234_v53 = vrot.slane %v3232_v4, 2  ;;  %v3237_v7 = vrot.slane %v3235_v25, 2  ;;  %v3240_v61 = vrot.slane %v3238_v6, 2  ;;  %v3409_v40 = vadd.f32 %v3233_v55, %v2895_v29 }
 0x26c   : > { %v3504_v0 = vmul.f32 %v8277_v51, %v12653_v59  ;;  %v3657_v42 = vmul.f32 %v8238_v21, %v12721_v44  ;;  %v3658_v48 = vmul.f32 %v8281_v52, %v12689_v41  ;;  %v3659_v43 = vmul.f32 %v12617_v5, %v10141_v28 }
 0x26d   : > { %v3236_v9 = vsel %vm8136_vm9, %v3234_v53, %v3235_v25  ;;  %v3239_v38 = vsel %vm8136_vm9, %v3237_v7, %v3238_v6  ;;  %v3242_v29 = vsel %vm8136_vm9, %v3240_v61, %v12116_v33  ;;  %v3565_v63 = vadd.f32 %v3501_v47, %v3409_v40  ;;  %v12723_v25 = vld [vmem:[#allocation24_spill] sm:$0xff] }
 0x26e   : > { %v3410_v60 = vadd.f32 %v3236_v9, %v2896_v8  ;;  %v3411_v4 = vadd.f32 %v3239_v38, %v2897_v1  ;;  %v3412_v55 = vadd.f32 %v3242_v29, %v2898_v62  ;;  %v3660_v16 = vmul.f32 %v12282_v3, %v12722_v10  ;;  %v12724_v1 = vld [vmem:[#allocation95_spill] sm:$0xff] }
 0x26f   : > { %v3832_v53 = vmul.f32 %v12723_v25, %v12721_v44  ;;  %v3833_v6 = vmul.f32 %v12284_v57, %v12689_v41  ;;  %v3834_v7 = vmul.f32 %v12685_v18, %v10141_v28  ;;  %v3721_v27 = vadd.f32 %v3657_v42, %v3565_v63  ;;  %v12725_v62 = vld [vmem:[#allocation47_spill] sm:$0xff] }
 0x270   : > { %v3566_v61 = vadd.f32 %v3502_v56, %v3410_v60  ;;  %v3567_v33 = vadd.f32 %v3503_v17, %v3411_v4  ;;  %v3568_v54 = vadd.f32 %v3504_v0, %v3412_v55  ;;  %v3835_v8 = vmul.f32 %v12287_v23, %v12722_v10  ;;  %v12727_v55 = vld [vmem:[#allocation51_spill] sm:$0xff] }
 0x271   : > { %v10262_v47 = vmul.f32 %v12725_v62, %v12724_v1  ;;  %v7449_v40 = vrot.slane %v3832_v53, 9  ;;  %v4058_v9 = vrot.slane %v3833_v6, 7  ;;  %v4061_v44 = vrot.slane %v3834_v7, 7  ;;  %v12740_v62 = vld [vmem:[#allocation5_spill] sm:$0xff] }
 0x272   : > { %v3722_v38 = vadd.f32 %v3658_v48, %v3566_v61  ;;  %v3723_v29 = vadd.f32 %v3659_v43, %v3567_v33  ;;  %v3724_v25 = vadd.f32 %v3660_v16, %v3568_v54  ;;  %v4064_v17 = vrot.slane %v3835_v8, 7 }
 0x273   : > { %v4059_v34 = vsel %vm8136_vm9, %v7449_v40, %v4058_v9  ;;  %v4060_v56 = vrot.slane %v4058_v9, 2  ;;  %v12121_v63 = vrot.slane %v10262_v47, 7  ;;  %v4063_v0 = vrot.slane %v4061_v44, 2 }
 0x274   : > { %v4235_v42 = vadd.f32 %v4059_v34, %v3721_v27  ;;  %v4327_v60 = vmul.f32 %v12289_v46, %v12689_v41  ;;  %v4328_v4 = vmul.f32 %v12290_v26, %v10141_v28  ;;  %v4066_v16 = vrot.slane %v4064_v17, 2 }
 0x275   : > { %v4062_v33 = vsel %vm8136_vm9, %v4060_v56, %v4061_v44  ;;  %v4329_v54 = vmul.f32 %v12291_v30, %v12722_v10  ;;  %v4330_v48 = vmul.f32 %v12293_v32, %v12724_v1  ;;  %v4065_v43 = vsel %vm8136_vm9, %v4063_v0, %v4064_v17 }
 0x276   : > { %v4236_v34 = vadd.f32 %v4062_v33, %v3722_v38  ;;  %v10279_v27 = vadd.f32 %v4327_v60, %v4235_v42  ;;  %v10283_v53 = vcombine.high %v12727_v55, %v12727_v55  ;;  %v4068_v44 = vsel %vm8136_vm9, %v4066_v16, %v12121_v63  ;;  %v12735_v16 = vld [vmem:[#allocation22_spill] sm:$0xff] }
 0x277   : > { %v4237_v6 = vadd.f32 %v4065_v43, %v3723_v29  ;;  %v1975_v7 = vmul.f32 %v12659_v24, %v9604_v2  ;;  %v1976_v61 = vmul.f32 %v12517_v22, %v12676_v37  ;;  %v4238_v8 = vadd.f32 %v4068_v44, %v3724_v25  ;;  %v12731_v29 = vld [vmem:[#allocation15_spill] sm:$0xff]  ;;  %v12737_v44 = vld [vmem:[#allocation18_spill] sm:$0xff] }
 0x278   : > { %12726 = vst [vmem:[#allocation153_spill] sm:$0xff] %v10279_v27  ;;  %12728 = vst [vmem:[#allocation83_spill] sm:$0xff] %v10283_v53  ;;  %v10293_v40 = vadd.f32 %v4328_v4, %v4236_v34  ;;  %v1977_v9 = vmul.f32 %v12554_v35, %v12678_v12  ;;  %v1978_v38 = vmul.f32 %v12556_v14, %v12681_v15  ;;  %v12732_v2 = vld [vmem:[#allocation11_spill] sm:$0xff]  ;;  %v12734_v4 = vld [vmem:[#allocation14_spill] sm:$0xff]  ;;  %v12741_v10 = vrot.slane %v12740_v62, 7 }
 0x279   : > { %v10299_v56 = vadd.f32 %v4329_v54, %v4237_v6  ;;  %v2066_v17 = vadd.f32 %v12594_v49, %v1975_v7  ;;  %v2067_v0 = vadd.f32 %v12731_v29, %v1976_v61  ;;  %v2185_v42 = vmul.f32 %v12732_v2, %v12676_v37  ;;  %v12736_v34 = vld [vmem:[#allocation17_spill] sm:$0xff]  ;;  %v12738_v7 = vld [vmem:[#allocation120_spill] sm:$0xff] }
 0x27a   : > { %12729 = vst [vmem:[#allocation154_spill] sm:$0xff] %v10293_v40  ;;  %v10305_v60 = vadd.f32 %v4330_v48, %v4238_v8  ;;  %v4649_v25 = vcombine.low %v10279_v27, %v10293_v40  ;;  %v2068_v33 = vadd.f32 %v12734_v4, %v1977_v9  ;;  %v2069_v43 = vadd.f32 %v12735_v16, %v1978_v38  ;;  %v12739_v61 = vld [vmem:[#allocation12_spill] sm:$0xff]  ;;  %v12742_v40 = vld [vmem:[#allocation3_spill] sm:$0xff]  ;;  %v12743_v38 = vld [vmem:[#allocation9_spill] sm:$0xff] }
 0x27b   : > { %12730 = vst [vmem:[#allocation76_spill] sm:$0xff] %v10299_v56  ;;  %v2186_v54 = vmul.f32 %v12736_v34, %v12678_v12  ;;  %v2187_v6 = vmul.f32 %v12737_v44, %v12681_v15  ;;  %v2188_v63 = vmul.f32 %v12739_v61, %v12738_v7  ;;  %v2417_v48 = vrot.slane %v12741_v10, 2  ;;  %v12744_v44 = vld [vmem:[#allocation19_spill] sm:$0xff] }
 0x27c   : > { %12733 = vst [vmem:[#allocation44_spill] sm:$0xff] %v10305_v60  ;;  %v4650_v8 = vcombine.low %v10299_v56, %v10305_v60  ;;  %v4657_v27 = vrot.slane %v4649_v25, %v12742_v40  ;;  %v2418_v9 = vrot.slane %v2185_v42, 7  ;;  %v2679_v28 = vmul.f32 %v12743_v38, %v12676_v37  ;;  %v12745_v60 = vld [vmem:[#allocation16_spill] sm:$0xff]  ;;  %v12746_v37 = vld [vmem:[#allocation23_spill] sm:$0xff] }
 0x27d   : > { %v2421_v41 = vrot.slane %v2186_v54, 7  ;;  %v2424_v34 = vrot.slane %v2187_v6, 7  ;;  %v2427_v16 = vrot.slane %v2188_v63, 7  ;;  %v2680_v4 = vmul.f32 %v12744_v44, %v12678_v12  ;;  %v12747_v12 = vld [vmem:[#allocation21_spill] sm:$0xff]  ;;  %v12748_v44 = vld [vmem:[#allocation7_spill] sm:$0xff]  ;;  %v12749_v38 = vld [vmem:[#allocation28_spill] sm:$0xff] }
 0x27e   : > { %v4664_v61 = vrot.slane %v4650_v8, %v12742_v40  ;;  %v2419_v10 = vsel %vm8136_vm9, %v2417_v48, %v2418_v9  ;;  %v2420_v62 = vrot.slane %v2418_v9, 2  ;;  %v2681_v56 = vmul.f32 %v12745_v60, %v12681_v15 }
 0x27f   : > { %v2423_v25 = vrot.slane %v2421_v41, 2  ;;  %v2426_v42 = vrot.slane %v2424_v34, 2  ;;  %v2587_v29 = vadd.f32 %v2419_v10, %v2066_v17  ;;  %v2682_v54 = vmul.f32 %v12746_v37, %v12738_v7  ;;  %v12750_v37 = vld [vmem:[#allocation142_spill] sm:$0xff] }
 0x280   : > { %v4665_v6 = vcombine.low %v4657_v27, %v4664_v61  ;;  %v2422_v63 = vsel %vm8136_vm9, %v2420_v62, %v2421_v41  ;;  %v2835_v8 = vmul.f32 %v12747_v12, %v12653_v59  ;;  %v2836_v48 = vmul.f32 %v12749_v38, %v12748_v44  ;;  %v12751_v12 = vld [vmem:[#allocation112_spill] sm:$0xff] }
 0x281   : > { %v2425_v9 = vsel %vm8136_vm9, %v2423_v25, %v2424_v34  ;;  %v2428_v15 = vsel %vm8136_vm9, %v2426_v42, %v2427_v16  ;;  %v2588_v17 = vadd.f32 %v2422_v63, %v2067_v0  ;;  %v2743_v10 = vadd.f32 %v2679_v28, %v2587_v29 }
 0x282   : > { %v4798_v7 = vsel %vm4767_vm10, %v4665_v6, 0.0  ;;  %v2589_v27 = vadd.f32 %v2425_v9, %v2068_v33  ;;  %v2590_v61 = vadd.f32 %v2428_v15, %v2069_v43  ;;  %v2837_v41 = vmul.f32 %v12717_v36, %v12750_v37  ;;  %v12752_v33 = vld [vmem:[#allocation143_spill] sm:$0xff]  ;;  %v12753_v43 = vld [vmem:[#allocation26_spill] sm:$0xff] }
 0x283   : > { %4799 = vadd.xlane.f32.xlu0 %v4798_v7  ;;  %v2744_v62 = vadd.f32 %v2680_v4, %v2588_v17  ;;  %v2838_v38 = vmul.f32 %v12406_v11, %v12751_v12  ;;  %v2899_v60 = vadd.f32 %v2835_v8, %v2743_v10  ;;  %v3011_v34 = vmul.f32 %v12492_v45, %v12748_v44 }
 0x284   : > { %v2745_v25 = vadd.f32 %v2681_v56, %v2589_v27  ;;  %v2746_v16 = vadd.f32 %v2682_v54, %v2590_v61  ;;  %v3012_v28 = vmul.f32 %v12580_v13, %v12750_v37  ;;  %v3013_v29 = vmul.f32 %v12647_v58, %v12751_v12 }
 0x285   : > { %v2900_v0 = vadd.f32 %v2836_v48, %v2744_v62  ;;  %v3014_v42 = vmul.f32 %v12753_v43, %v12752_v33  ;;  %v12754_v4 = vrot.slane %v10223_v39, 7  ;;  %v3244_v63 = vrot.slane %v3011_v34, 7 }
 0x286   : > { %v2901_v8 = vadd.f32 %v2837_v41, %v2745_v25  ;;  %v2902_v9 = vadd.f32 %v2838_v38, %v2746_v16  ;;  %v3247_v15 = vrot.slane %v3012_v28, 7  ;;  %v3250_v17 = vrot.slane %v3013_v29, 7 }
 0x287   : > { %v3243_v6 = vrot.slane %v12754_v4, 2  ;;  %v3246_v54 = vrot.slane %v3244_v63, 2  ;;  %v3253_v10 = vrot.slane %v3014_v42, 7  ;;  %v3505_v7 = vmul.f32 %v8232_v19, %v12748_v44 }
 0x288   : > { %v3249_v48 = vrot.slane %v3247_v15, 2  ;;  %v3252_v27 = vrot.slane %v3250_v17, 2  ;;  %v3506_v39 = vmul.f32 %v8273_v50, %v12750_v37  ;;  %v3507_v38 = vmul.f32 %v8235_v20, %v12751_v12 }
 0x289   : > { %v3245_v56 = vsel %vm8136_vm9, %v3243_v6, %v3244_v63  ;;  %v3248_v41 = vsel %vm8136_vm9, %v3246_v54, %v3247_v15  ;;  %v3508_v62 = vmul.f32 %v8277_v51, %v12752_v33  ;;  %v3661_v34 = vmul.f32 %v8238_v21, %v12724_v1  ;;  %v12755_v15 = vld [vmem:[#allocation103_spill] sm:$0xff] }
 0x28a   : > { %v3413_v61 = vadd.f32 %v3245_v56, %v2899_v60  ;;  %v3251_v25 = vsel %vm8136_vm9, %v3249_v48, %v3250_v17  ;;  %v3254_v60 = vsel %vm8136_vm9, %v3252_v27, %v3253_v10  ;;  %v3414_v16 = vadd.f32 %v3248_v41, %v2900_v0  ;;  %v12757_v27 = vld [vmem:[#allocation37_spill] sm:$0xff] }
 0x28b   : > { %v3415_v29 = vadd.f32 %v3251_v25, %v2901_v8  ;;  %v3416_v42 = vadd.f32 %v3254_v60, %v2902_v9  ;;  %v3662_v4 = vmul.f32 %v8281_v52, %v12727_v55  ;;  %v3663_v6 = vmul.f32 %v12617_v5, %v10283_v53 }
 0x28c   : > { %v3569_v28 = vadd.f32 %v3505_v7, %v3413_v61  ;;  %v3570_v63 = vadd.f32 %v3506_v39, %v3414_v16  ;;  %v3664_v56 = vmul.f32 %v12282_v3, %v12755_v15  ;;  %v3837_v17 = vmul.f32 %v12284_v57, %v12727_v55  ;;  %v12756_v7 = vld [vmem:[#allocation65_spill] sm:$0xff] }
 0x28d   : > { %v3571_v48 = vadd.f32 %v3507_v38, %v3415_v29  ;;  %v3572_v10 = vadd.f32 %v3508_v62, %v3416_v42  ;;  %v3838_v0 = vmul.f32 %v12685_v18, %v10283_v53  ;;  %v3839_v8 = vmul.f32 %v12287_v23, %v12755_v15 }
 0x28e   : > { %v3725_v54 = vadd.f32 %v3661_v34, %v3569_v28  ;;  %v3726_v9 = vadd.f32 %v3662_v4, %v3570_v63  ;;  %v3840_v61 = vmul.f32 %v12757_v27, %v12756_v7  ;;  %v12758_v39 = vrot.slane %v10262_v47, 7 }
 0x28f   : > { %v4070_v25 = vrot.slane %v3837_v17, 7  ;;  %v3727_v34 = vadd.f32 %v3663_v6, %v3571_v48  ;;  %v3728_v60 = vadd.f32 %v3664_v56, %v3572_v10  ;;  %v4073_v16 = vrot.slane %v3838_v0, 7  ;;  %v12759_v48 = vld [vmem:[#allocation55_spill] sm:$0xff] }
 0x290   : > { %v4069_v41 = vrot.slane %v12758_v39, 2  ;;  %v4076_v28 = vrot.slane %v3839_v8, 7  ;;  %v4079_v29 = vrot.slane %v3840_v61, 7  ;;  %v4331_v42 = vmul.f32 %v12289_v46, %v12727_v55 }
 0x291   : > { %v4072_v62 = vrot.slane %v4070_v25, 2  ;;  %v4075_v4 = vrot.slane %v4073_v16, 2  ;;  %v4332_v47 = vmul.f32 %v12290_v26, %v10283_v53  ;;  %v4333_v56 = vmul.f32 %v12291_v30, %v12755_v15 }
 0x292   : > { %v4071_v38 = vsel %vm8136_vm9, %v4069_v41, %v4070_v25  ;;  %v4078_v63 = vrot.slane %v4076_v28, 2  ;;  %v4334_v17 = vmul.f32 %v12293_v32, %v12756_v7  ;;  %v1979_v10 = vmul.f32 %v12659_v24, %v12759_v48  ;;  %v12761_v41 = vld [vmem:[#allocation115_spill] sm:$0xff]  ;;  %v12764_v48 = vld [vmem:[#allocation68_spill] sm:$0xff]  ;;  %v12775_v7 = vld [vmem:[#allocation9_spill] sm:$0xff] }
 0x293   : > { %v4239_v21 = vadd.f32 %v4071_v38, %v3725_v54  ;;  %v4074_v6 = vsel %vm8136_vm9, %v4072_v62, %v4073_v16  ;;  %v4077_v0 = vsel %vm8136_vm9, %v4075_v4, %v4076_v28  ;;  %v1980_v25 = vmul.f32 %v12517_v22, %v12761_v41  ;;  %v12762_v16 = vld [vmem:[#allocation49_spill] sm:$0xff] }
 0x294   : > { %v4080_v54 = vsel %vm8136_vm9, %v4078_v63, %v4079_v29  ;;  %v4240_v8 = vadd.f32 %v4074_v6, %v3726_v9  ;;  %v4241_v61 = vadd.f32 %v4077_v0, %v3727_v34  ;;  %v1981_v38 = vmul.f32 %v12554_v35, %v12762_v16  ;;  %v12770_v0 = vld [vmem:[#allocation17_spill] sm:$0xff] }
 0x295   : > { %v10410_v27 = vadd.f32 %v4331_v42, %v4239_v21  ;;  %v4242_v39 = vadd.f32 %v4080_v54, %v3728_v60  ;;  %v1982_v43 = vmul.f32 %v12556_v14, %v12764_v48  ;;  %v2070_v28 = vadd.f32 %v12594_v49, %v1979_v10  ;;  %v12767_v60 = vld [vmem:[#allocation15_spill] sm:$0xff]  ;;  %v12768_v42 = vld [vmem:[#allocation14_spill] sm:$0xff] }
 0x296   : > { %v10416_v62 = vadd.f32 %v4332_v47, %v4240_v8  ;;  %v2190_v9 = vmul.f32 %v12732_v2, %v12761_v41  ;;  %v10423_v21 = vadd.f32 %v4333_v56, %v4241_v61  ;;  %v2071_v29 = vadd.f32 %v12767_v60, %v1980_v25  ;;  %v12769_v47 = vld [vmem:[#allocation22_spill] sm:$0xff] }
 0x297   : > { %12760 = vst [vmem:[#allocation102_spill] sm:$0xff] %v10410_v27  ;;  %v10425_v34 = vadd.f32 %v4334_v17, %v4242_v39  ;;  %v2072_v4 = vadd.f32 %v12768_v42, %v1981_v38  ;;  %v2073_v6 = vadd.f32 %v12769_v47, %v1982_v43  ;;  %v2191_v54 = vmul.f32 %v12770_v0, %v12762_v16  ;;  %v12771_v10 = vld [vmem:[#allocation18_spill] sm:$0xff]  ;;  %v12772_v17 = vld [vmem:[#allocation20_spill] sm:$0xff] }
 0x298   : > { %12763 = vst [vmem:[#allocation67_spill] sm:$0xff] %v10416_v62  ;;  %12765 = vst [vmem:[#allocation89_spill] sm:$0xff] %v10423_v21  ;;  %v4666_v63 = vcombine.low %v10410_v27, %v10416_v62  ;;  %v2192_v8 = vmul.f32 %v12771_v10, %v12764_v48  ;;  %v10440_v61 = vmul.f32 %v12772_v17, %v12653_v59  ;;  %v12774_v39 = vld [vmem:[#allocation116_spill] sm:$0xff]  ;;  %v2431_v38 = vrot.slane %v2190_v9, 7  ;;  %v12776_v9 = vld [vmem:[#allocation19_spill] sm:$0xff] }
 0x299   : > { %12766 = vst [vmem:[#allocation50_spill] sm:$0xff] %v10425_v34  ;;  %v4667_v56 = vcombine.low %v10423_v21, %v10425_v34  ;;  %v7422_v25 = vrot.slane %v12774_v39, 9  ;;  %v2434_v27 = vrot.slane %v2191_v54, 7  ;;  %v2683_v15 = vmul.f32 %v12775_v7, %v12761_v41  ;;  %v12777_v41 = vld [vmem:[#allocation16_spill] sm:$0xff] }
 0x29a   : > { %12773 = vst [vmem:[#allocation43_spill] sm:$0xff] %v10440_v61  ;;  %v4674_v62 = vrot.slane %v4666_v63, %v12742_v40  ;;  %v2437_v43 = vrot.slane %v2192_v8, 7  ;;  %v2433_v34 = vrot.slane %v2431_v38, 2  ;;  %v12144_v21 = vrot.slane %v10440_v61, 7  ;;  %v12784_v61 = vld [vmem:[#allocation91_spill] sm:$0xff] }
 0x29b   : > { %v4681_v53 = vrot.slane %v4667_v56, %v12742_v40  ;;  %v2432_v55 = vsel %vm8136_vm9, %v7422_v25, %v2431_v38  ;;  %v2436_v17 = vrot.slane %v2434_v27, 2  ;;  %v2684_v39 = vmul.f32 %v12776_v9, %v12762_v16  ;;  %v12778_v56 = vld [vmem:[#allocation23_spill] sm:$0xff]  ;;  %v12780_v38 = vld [vmem:[#allocation21_spill] sm:$0xff]  ;;  %v12782_v9 = vld [vmem:[#allocation28_spill] sm:$0xff] }
 0x29c   : > { %v2439_v33 = vrot.slane %v2437_v43, 2  ;;  %v2591_v10 = vadd.f32 %v2432_v55, %v2070_v28  ;;  %v2435_v54 = vsel %vm8136_vm9, %v2433_v34, %v2434_v27  ;;  %v2685_v8 = vmul.f32 %v12777_v41, %v12764_v48  ;;  %v12779_v34 = vld [vmem:[#allocation59_spill] sm:$0xff] }
 0x29d   : > { %v4682_v63 = vcombine.low %v4674_v62, %v4681_v53  ;;  %v2686_v7 = vmul.f32 %v12778_v56, %v12653_v59  ;;  %v2438_v25 = vsel %vm8136_vm9, %v2436_v17, %v2437_v43  ;;  %v2592_v28 = vadd.f32 %v2435_v54, %v2071_v29  ;;  %v12781_v56 = vld [vmem:[#allocation90_spill] sm:$0xff]  ;;  %v12783_v43 = vld [vmem:[#allocation144_spill] sm:$0xff] }
 0x29e   : > { %v2441_v55 = vsel %vm8136_vm9, %v2439_v33, %v12144_v21  ;;  %v2747_v16 = vadd.f32 %v2683_v15, %v2591_v10  ;;  %v2593_v62 = vadd.f32 %v2438_v25, %v2072_v4  ;;  %v2839_v48 = vmul.f32 %v12780_v38, %v12779_v34  ;;  %v12785_v4 = vld [vmem:[#allocation13_spill] sm:$0xff] }
 0x29f   : > { %v4801_v53 = vsel %vm4767_vm10, %v4682_v63, 0.0  ;;  %v2594_v27 = vadd.f32 %v2441_v55, %v2073_v6  ;;  %v2748_v41 = vadd.f32 %v2684_v39, %v2592_v28  ;;  %v2840_v40 = vmul.f32 %v12782_v9, %v12781_v56 }
 0x2a0   : > { %4802 = vadd.xlane.f32.xlu1 %v4801_v53  ;;  %v2841_v17 = vmul.f32 %v12717_v36, %v12783_v43  ;;  %v2842_v33 = vmul.f32 %v12406_v11, %v12784_v61  ;;  %v2749_v29 = vadd.f32 %v2685_v8, %v2593_v62  ;;  %v2903_v10 = vadd.f32 %v2839_v48, %v2747_v16  ;;  %v12786_v53 = vld [vmem:[#allocation35_spill] sm:$0xff] }
 0x2a1   : > { %v2750_v15 = vadd.f32 %v2686_v7, %v2594_v27  ;;  %v3015_v6 = vmul.f32 %v12785_v4, %v12779_v34  ;;  %v2904_v63 = vadd.f32 %v2840_v40, %v2748_v41  ;;  %v3016_v54 = vmul.f32 %v12492_v45, %v12781_v56  ;;  %v12789_v41 = vld [vmem:[#allocation109_spill] sm:$0xff] }
 0x2a2   : > { %v3017_v39 = vmul.f32 %v12580_v13, %v12783_v43  ;;  %v3018_v25 = vmul.f32 %v12647_v58, %v12784_v61  ;;  %v2905_v55 = vadd.f32 %v2841_v17, %v2749_v29  ;;  %v10483_v8 = vmul.f32 %v12786_v53, %v12724_v1  ;;  %v12788_v53 = vld [vmem:[#allocation104_spill] sm:$0xff] }
 0x2a3   : > { %v2906_v28 = vadd.f32 %v2842_v33, %v2750_v15  ;;  %v7436_v7 = vrot.slane %v3015_v6, 9  ;;  %v3257_v16 = vrot.slane %v3016_v54, 7  ;;  %v3509_v40 = vmul.f32 %v8232_v19, %v12781_v56 }
 0x2a4   : > { %v3260_v62 = vrot.slane %v3017_v39, 7  ;;  %v3263_v27 = vrot.slane %v3018_v25, 7  ;;  %v3510_v48 = vmul.f32 %v8273_v50, %v12783_v43  ;;  %v3511_v17 = vmul.f32 %v8235_v20, %v12784_v61  ;;  %v12787_v39 = vld [vmem:[#allocation106_spill] sm:$0xff] }
 0x2a5   : > { %v3512_v33 = vmul.f32 %v8277_v51, %v12724_v1  ;;  %v3258_v29 = vsel %vm8136_vm9, %v7436_v7, %v3257_v16  ;;  %v3259_v15 = vrot.slane %v3257_v16, 2  ;;  %v3666_v25 = vmul.f32 %v8281_v52, %v12787_v39  ;;  %v12793_v50 = vld [vmem:[#allocation110_spill] sm:$0xff] }
 0x2a6   : > { %v3262_v4 = vrot.slane %v3260_v62, 2  ;;  %v3265_v6 = vrot.slane %v3263_v27, 2  ;;  %v3417_v54 = vadd.f32 %v3258_v29, %v2903_v10  ;;  %v3667_v21 = vmul.f32 %v12617_v5, %v12788_v53 }
 0x2a7   : > { %v3668_v43 = vmul.f32 %v12282_v3, %v12789_v41  ;;  %v3261_v61 = vsel %vm8136_vm9, %v3259_v15, %v3260_v62  ;;  %v12790_v7 = vrot.slane %v10483_v8, 7  ;;  %v3842_v16 = vmul.f32 %v12284_v57, %v12787_v39  ;;  %v12791_v15 = vld [vmem:[#allocation52_spill] sm:$0xff] }
 0x2a8   : > { %v3264_v56 = vsel %vm8136_vm9, %v3262_v4, %v3263_v27  ;;  %v3418_v29 = vadd.f32 %v3261_v61, %v2904_v63  ;;  %v3573_v52 = vadd.f32 %v3509_v40, %v3417_v54  ;;  %v3843_v3 = vmul.f32 %v12685_v18, %v12788_v53  ;;  %v12792_v27 = vld [vmem:[#allocation47_spill] sm:$0xff] }
 0x2a9   : > { %v3267_v10 = vsel %vm8136_vm9, %v3265_v6, %v12790_v7  ;;  %v3419_v34 = vadd.f32 %v3264_v56, %v2905_v55  ;;  %v3844_v62 = vmul.f32 %v12287_v23, %v12789_v41  ;;  %v10518_v4 = vmul.f32 %v12792_v27, %v12791_v15  ;;  %v12794_v61 = vld [vmem:[#allocation111_spill] sm:$0xff] }
 0x2aa   : > { %v3420_v5 = vadd.f32 %v3267_v10, %v2906_v28  ;;  %v4083_v51 = vrot.slane %v3842_v16, 7  ;;  %v3574_v20 = vadd.f32 %v3510_v48, %v3418_v29  ;;  %v3729_v57 = vadd.f32 %v12793_v50, %v3573_v52 }
 0x2ab   : > { %v3575_v6 = vadd.f32 %v3511_v17, %v3419_v34  ;;  %v12795_v56 = vrot.slane %v12794_v61, 9  ;;  %v4086_v28 = vrot.slane %v3843_v3, 7  ;;  %v4089_v40 = vrot.slane %v3844_v62, 7 }
 0x2ac   : > { %v3576_v7 = vadd.f32 %v3512_v33, %v3420_v5  ;;  %v4085_v55 = vrot.slane %v4083_v51, 2  ;;  %v3730_v54 = vadd.f32 %v3666_v25, %v3574_v20  ;;  %v12159_v27 = vrot.slane %v10518_v4, 7 }
 0x2ad   : > { %v4084_v63 = vsel %vm8136_vm9, %v12795_v56, %v4083_v51  ;;  %v3731_v10 = vadd.f32 %v3667_v21, %v3575_v6  ;;  %v4088_v34 = vrot.slane %v4086_v28, 2  ;;  %v4091_v5 = vrot.slane %v4089_v40, 2 }
 0x2ae   : > { %v3732_v23 = vadd.f32 %v3668_v43, %v3576_v7  ;;  %v4087_v48 = vsel %vm8136_vm9, %v4085_v55, %v4086_v28  ;;  %v4243_v17 = vadd.f32 %v4084_v63, %v3729_v57  ;;  %v4335_v52 = vmul.f32 %v12289_v46, %v12787_v39 }
 0x2af   : > { %v4244_v50 = vadd.f32 %v4087_v48, %v3730_v54  ;;  %v4336_v51 = vmul.f32 %v12290_v26, %v12788_v53  ;;  %v4337_v20 = vmul.f32 %v12291_v30, %v12789_v41  ;;  %v4090_v3 = vsel %vm8136_vm9, %v4088_v34, %v4089_v40  ;;  %v12801_v34 = vld [vmem:[#allocation18_spill] sm:$0xff] }
 0x2b0   : > { %v4093_v21 = vsel %vm8136_vm9, %v4091_v5, %v12159_v27  ;;  %v4338_v57 = vmul.f32 %v12293_v32, %v12791_v15  ;;  %v1983_v43 = vmul.f32 %v12659_v24, %v12653_v59  ;;  %v4245_v33 = vadd.f32 %v4090_v3, %v3731_v10  ;;  %v12800_v10 = vld [vmem:[#allocation3_spill] sm:$0xff]  ;;  %v12804_v3 = vld [vmem:[#allocation64_spill] sm:$0xff] }
 0x2b1   : > { %v4246_v25 = vadd.f32 %v4093_v21, %v3732_v23  ;;  %v10544_v16 = vadd.f32 %v4335_v52, %v4243_v17  ;;  %v10546_v29 = vadd.f32 %v4336_v51, %v4244_v50  ;;  %v1984_v62 = vmul.f32 %v12517_v22, %v12748_v44  ;;  %v12802_v17 = vld [vmem:[#allocation43_spill] sm:$0xff] }
 0x2b2   : > { %v1985_v6 = vmul.f32 %v12554_v35, %v12750_v37  ;;  %v1986_v7 = vmul.f32 %v12556_v14, %v12751_v12  ;;  %v2074_v61 = vadd.f32 %v12594_v49, %v1983_v43  ;;  %v10555_v56 = vadd.f32 %v4337_v20, %v4245_v33 }
 0x2b3   : > { %12796 = vst [vmem:[#allocation86_spill] sm:$0xff] %v10544_v16  ;;  %12797 = vst [vmem:[#allocation48_spill] sm:$0xff] %v10546_v29  ;;  %v10557_v59 = vadd.f32 %v4338_v57, %v4246_v25  ;;  %v4683_v23 = vcombine.low %v10544_v16, %v10546_v29  ;;  %v2194_v63 = vmul.f32 %v12732_v2, %v12748_v44  ;;  %v12803_v50 = vrot.slane %v12802_v17, 7  ;;  %v12806_v25 = vld [vmem:[#allocation19_spill] sm:$0xff] }
 0x2b4   : > { %12798 = vst [vmem:[#allocation8_spill] sm:$0xff] %v10555_v56  ;;  %v2075_v55 = vadd.f32 %v12767_v60, %v1984_v62  ;;  %v2076_v28 = vadd.f32 %v12768_v42, %v1985_v6  ;;  %v2077_v40 = vadd.f32 %v12769_v47, %v1986_v7  ;;  %v2195_v14 = vmul.f32 %v12770_v0, %v12750_v37  ;;  %v12805_v47 = vld [vmem:[#allocation9_spill] sm:$0xff]  ;;  %v12807_v6 = vld [vmem:[#allocation16_spill] sm:$0xff]  ;;  %v12809_v17 = vld [vmem:[#allocation23_spill] sm:$0xff] }
 0x2b5   : > { %12799 = vst [vmem:[#allocation85_spill] sm:$0xff] %v10557_v59  ;;  %v4684_v54 = vcombine.low %v10555_v56, %v10557_v59  ;;  %v4691_v48 = vrot.slane %v4683_v23, %v12800_v10  ;;  %v2196_v5 = vmul.f32 %v12801_v34, %v12751_v12  ;;  %v2442_v52 = vrot.slane %v12803_v50, 2 }
 0x2b6   : > { %v2443_v51 = vrot.slane %v2194_v63, 7  ;;  %v2446_v20 = vrot.slane %v2195_v14, 7  ;;  %v2452_v21 = vrot.slane %v12804_v3, 7  ;;  %v2687_v57 = vmul.f32 %v12805_v47, %v12748_v44  ;;  %v12808_v14 = vld [vmem:[#allocation143_spill] sm:$0xff] }
 0x2b7   : > { %v4698_v43 = vrot.slane %v4684_v54, %v12800_v10  ;;  %v2449_v33 = vrot.slane %v2196_v5, 7  ;;  %v2688_v62 = vmul.f32 %v12806_v25, %v12750_v37  ;;  %v2689_v7 = vmul.f32 %v12807_v6, %v12751_v12  ;;  %v12810_v5 = vld [vmem:[#allocation51_spill] sm:$0xff] }
 0x2b8   : > { %v2444_v23 = vsel %vm8136_vm9, %v2442_v52, %v2443_v51  ;;  %v2445_v34 = vrot.slane %v2443_v51, 2  ;;  %v2448_v63 = vrot.slane %v2446_v20, 2  ;;  %v2690_v50 = vmul.f32 %v12809_v17, %v12808_v14  ;;  %v12811_v51 = vld [vmem:[#allocation83_spill] sm:$0xff] }
 0x2b9   : > { %v4699_v3 = vcombine.low %v4691_v48, %v4698_v43  ;;  %v2451_v27 = vrot.slane %v2449_v33, 2  ;;  %v2595_v44 = vadd.f32 %v2444_v23, %v2074_v61  ;;  %v2843_v54 = vmul.f32 %v12780_v38, %v12724_v1 }
 0x2ba   : > { %v2447_v37 = vsel %vm8136_vm9, %v2445_v34, %v2446_v20  ;;  %v2450_v12 = vsel %vm8136_vm9, %v2448_v63, %v2449_v33  ;;  %v2844_v52 = vmul.f32 %v12782_v9, %v12810_v5  ;;  %v2845_v59 = vmul.f32 %v12717_v36, %v12811_v51  ;;  %v12812_v20 = vld [vmem:[#allocation103_spill] sm:$0xff] }
 0x2bb   : > { %v4804_v14 = vsel %vm4767_vm10, %v4699_v3, 0.0  ;;  %v2453_v61 = vsel %vm8136_vm9, %v2451_v27, %v2452_v21  ;;  %v2596_v48 = vadd.f32 %v2447_v37, %v2075_v55  ;;  %v2597_v43 = vadd.f32 %v2450_v12, %v2076_v28  ;;  %v12813_v28 = vld [vmem:[#allocation65_spill] sm:$0xff]  ;;  %v12814_v21 = vld [vmem:[#allocation26_spill] sm:$0xff] }
 0x2bc   : > { %4805 = vadd.xlane.f32.xlu0 %v4804_v14  ;;  %v2598_v23 = vadd.f32 %v2453_v61, %v2077_v40  ;;  %v2751_v17 = vadd.f32 %v2687_v57, %v2595_v44  ;;  %v2846_v34 = vmul.f32 %v12406_v11, %v12812_v20  ;;  %v3020_v33 = vmul.f32 %v12492_v45, %v12810_v5 }
 0x2bd   : > { %v2752_v63 = vadd.f32 %v2688_v62, %v2596_v48  ;;  %v2753_v56 = vadd.f32 %v2689_v7, %v2597_v43  ;;  %v3021_v29 = vmul.f32 %v12580_v13, %v12811_v51  ;;  %v3022_v3 = vmul.f32 %v12647_v58, %v12812_v20  ;;  %v12816_v43 = vld [vmem:[#allocation39_spill] sm:$0xff] }
 0x2be   : > { %v2754_v27 = vadd.f32 %v2690_v50, %v2598_v23  ;;  %v2907_v55 = vadd.f32 %v2843_v54, %v2751_v17  ;;  %v3023_v40 = vmul.f32 %v12814_v21, %v12813_v28  ;;  %v12815_v57 = vrot.slane %v10483_v8, 7  ;;  %v12821_v21 = vld [vmem:[#allocation41_spill] sm:$0xff] }
 0x2bf   : > { %v2908_v11 = vadd.f32 %v2844_v52, %v2752_v63  ;;  %v2909_v37 = vadd.f32 %v2845_v59, %v2753_v56  ;;  %v3269_v12 = vrot.slane %v3020_v33, 7  ;;  %v3272_v14 = vrot.slane %v3021_v29, 7  ;;  %v12817_v56 = vld [vmem:[#allocation29_spill] sm:$0xff]  ;;  %v12818_v29 = vld [vmem:[#allocation40_spill] sm:$0xff]  ;;  %v12819_v63 = vld [vmem:[#allocation30_spill] sm:$0xff] }
 0x2c0   : > { %v3268_v44 = vrot.slane %v12815_v57, 2  ;;  %v2910_v62 = vadd.f32 %v2846_v34, %v2754_v27  ;;  %v3275_v7 = vrot.slane %v3022_v3, 7  ;;  %v3278_v61 = vrot.slane %v3023_v40, 7  ;;  %v12820_v27 = vld [vmem:[#allocation117_spill] sm:$0xff] }
 0x2c1   : > { %v3513_v48 = vmul.f32 %v8232_v19, %v12810_v5  ;;  %v3271_v50 = vrot.slane %v3269_v12, 2  ;;  %v3274_v54 = vrot.slane %v3272_v14, 2  ;;  %v3514_v23 = vmul.f32 %v12816_v43, %v12811_v51 }
 0x2c2   : > { %v3270_v58 = vsel %vm8136_vm9, %v3268_v44, %v3269_v12  ;;  %v3277_v8 = vrot.slane %v3275_v7, 2  ;;  %v3515_v59 = vmul.f32 %v12817_v56, %v12812_v20  ;;  %v3516_v52 = vmul.f32 %v12818_v29, %v12813_v28  ;;  %v12822_v28 = vld [vmem:[#allocation31_spill] sm:$0xff]  ;;  %v12823_v29 = vld [vmem:[#allocation36_spill] sm:$0xff] }
 0x2c3   : > { %v3421_v17 = vadd.f32 %v3270_v58, %v2907_v55  ;;  %v3273_v34 = vsel %vm8136_vm9, %v3271_v50, %v3272_v14  ;;  %v3276_v33 = vsel %vm8136_vm9, %v3274_v54, %v3275_v7  ;;  %v3669_v3 = vmul.f32 %v12819_v63, %v12791_v15  ;;  %v12824_v14 = vld [vmem:[#allocation118_spill] sm:$0xff]  ;;  %v12825_v50 = vld [vmem:[#allocation45_spill] sm:$0xff] }
 0x2c4   : > { %v3670_v40 = vmul.f32 %v12821_v21, %v12820_v27  ;;  %v3279_v55 = vsel %vm8136_vm9, %v3277_v8, %v3278_v61  ;;  %v3422_v57 = vadd.f32 %v3273_v34, %v2908_v11  ;;  %v3423_v44 = vadd.f32 %v3276_v33, %v2909_v37  ;;  %v12826_v7 = vld [vmem:[#allocation42_spill] sm:$0xff] }
 0x2c5   : > { %v3577_v12 = vadd.f32 %v3513_v48, %v3421_v17  ;;  %v3424_v58 = vadd.f32 %v3279_v55, %v2910_v62  ;;  %v3671_v16 = vmul.f32 %v12823_v29, %v12822_v28  ;;  %v3672_v38 = vmul.f32 %v12825_v50, %v12824_v14  ;;  %v12827_v11 = vld [vmem:[#allocation46_spill] sm:$0xff] }
 0x2c6   : > { %v3846_v54 = vmul.f32 %v12826_v7, %v12820_v27  ;;  %v3578_v15 = vadd.f32 %v3514_v23, %v3422_v57  ;;  %v3579_v20 = vadd.f32 %v3515_v59, %v3423_v44  ;;  %v3847_v21 = vmul.f32 %v12685_v18, %v12822_v28  ;;  %v12831_v7 = vld [vmem:[#allocation90_spill] sm:$0xff] }
 0x2c7   : > { %v3733_v51 = vadd.f32 %v3669_v3, %v3577_v12  ;;  %v3580_v61 = vadd.f32 %v3516_v52, %v3424_v58  ;;  %v3848_v37 = vmul.f32 %v12827_v11, %v12824_v14  ;;  %v12828_v62 = vrot.slane %v10518_v4, 7 }
 0x2c8   : > { %v4095_v8 = vrot.slane %v3846_v54, 7  ;;  %v3734_v17 = vadd.f32 %v3670_v40, %v3578_v15  ;;  %v3735_v34 = vadd.f32 %v3671_v16, %v3579_v20  ;;  %v4098_v33 = vrot.slane %v3847_v21, 7  ;;  %v12829_v20 = vld [vmem:[#allocation57_spill] sm:$0xff]  ;;  %v12830_v40 = vld [vmem:[#allocation59_spill] sm:$0xff] }
 0x2c9   : > { %v4094_v48 = vrot.slane %v12828_v62, 2  ;;  %v4339_v55 = vmul.f32 %v12289_v46, %v12820_v27  ;;  %v3736_v23 = vadd.f32 %v3672_v38, %v3580_v61  ;;  %v4101_v18 = vrot.slane %v3848_v37, 7  ;;  %v12834_v37 = vld [vmem:[#allocation144_spill] sm:$0xff] }
 0x2ca   : > { %v4097_v3 = vrot.slane %v4095_v8, 2  ;;  %v4100_v52 = vrot.slane %v4098_v33, 2  ;;  %v4340_v44 = vmul.f32 %v12290_v26, %v12822_v28  ;;  %v4341_v4 = vmul.f32 %v12291_v30, %v12824_v14  ;;  %v12832_v30 = vld [vmem:[#allocation121_spill] sm:$0xff] }
 0x2cb   : > { %v4096_v59 = vsel %vm8136_vm9, %v4094_v48, %v4095_v8  ;;  %v4103_v16 = vrot.slane %v4101_v18, 2  ;;  %v4342_v38 = vmul.f32 %v12293_v32, %v12829_v20  ;;  %v1987_v12 = vmul.f32 %v12659_v24, %v12830_v40 }
 0x2cc   : > { %v4247_v57 = vadd.f32 %v4096_v59, %v3733_v51  ;;  %v4099_v15 = vsel %vm8136_vm9, %v4097_v3, %v4098_v33  ;;  %v4102_v58 = vsel %vm8136_vm9, %v4100_v52, %v4101_v18  ;;  %v1988_v54 = vmul.f32 %v12517_v22, %v12831_v7 }
 0x2cd   : > { %v4248_v51 = vadd.f32 %v4099_v15, %v3734_v17  ;;  %v12833_v21 = vrot.slane %v12832_v30, 7  ;;  %v4249_v11 = vadd.f32 %v4102_v58, %v3735_v34  ;;  %v1989_v62 = vmul.f32 %v12554_v35, %v12834_v37 }
 0x2ce   : > { %v10660_v50 = vadd.f32 %v4339_v55, %v4247_v57  ;;  %v2078_v48 = vadd.f32 %v12594_v49, %v1987_v12  ;;  %v2079_v17 = vadd.f32 %v12767_v60, %v1988_v54  ;;  %v12835_v55 = vld [vmem:[#allocation4_spill] sm:$0xff]  ;;  %v2199_v34 = vmul.f32 %v12732_v2, %v12831_v7 }
 0x2cf   : > { %v4105_v61 = vsel %vm8136_vm9, %v4103_v16, %v12833_v21  ;;  %v10671_v33 = vadd.f32 %v4340_v44, %v4248_v51  ;;  %v2198_v59 = vmul.f32 %v12835_v55, %v12830_v40  ;;  %v10676_v3 = vadd.f32 %v4341_v4, %v4249_v11  ;;  %v12838_v40 = vld [vmem:[#allocation91_spill] sm:$0xff] }
 0x2d0   : > { %v4250_v8 = vadd.f32 %v4105_v61, %v3736_v23  ;;  %v2080_v18 = vadd.f32 %v12768_v42, %v1989_v62  ;;  %v2200_v52 = vmul.f32 %v12770_v0, %v12834_v37  ;;  %v2691_v15 = vmul.f32 %v12805_v47, %v12831_v7 }
 0x2d1   : > { %12836 = vst [vmem:[#allocation25_spill] sm:$0xff] %v10676_v3  ;;  %v4700_v23 = vcombine.low %v10660_v50, %v10671_v33  ;;  %v7423_v44 = vrot.slane %v2198_v59, 9  ;;  %v2456_v16 = vrot.slane %v2199_v34, 7  ;;  %v2692_v20 = vmul.f32 %v12806_v25, %v12834_v37  ;;  %v12839_v59 = vld [vmem:[#allocation130_spill] sm:$0xff] }
 0x2d2   : > { %v10683_v57 = vadd.f32 %v4342_v38, %v4250_v8  ;;  %v2459_v4 = vrot.slane %v2200_v52, 7  ;;  %v2693_v12 = vmul.f32 %v12807_v6, %v12838_v40  ;;  %v2848_v51 = vmul.f32 %v12782_v9, %v12787_v39 }
 0x2d3   : > { %v4708_v38 = vrot.slane %v4700_v23, %v12800_v10  ;;  %v2849_v54 = vmul.f32 %v12717_v36, %v12788_v53  ;;  %v2457_v7 = vsel %vm8136_vm9, %v7423_v44, %v2456_v16  ;;  %v2458_v30 = vrot.slane %v2456_v16, 2 }
 0x2d4   : > { %12837 = vst [vmem:[#allocation24_spill] sm:$0xff] %v10683_v57  ;;  %v4701_v58 = vcombine.low %v10676_v3, %v10683_v57  ;;  %v2461_v21 = vrot.slane %v2459_v4, 2  ;;  %v3025_v61 = vmul.f32 %v12492_v45, %v12787_v39  ;;  %v2599_v37 = vadd.f32 %v2457_v7, %v2078_v48  ;;  %v12841_v7 = vld [vmem:[#allocation108_spill] sm:$0xff] }
 0x2d5   : > { %v3026_v62 = vmul.f32 %v12580_v13, %v12788_v53  ;;  %v3517_v8 = vmul.f32 %v8232_v19, %v12787_v39  ;;  %v2460_v55 = vsel %vm8136_vm9, %v2458_v30, %v2459_v4  ;;  %v12840_v34 = vrot.slane %v12839_v59, 7 }
 0x2d6   : > { %v4715_v11 = vrot.slane %v4701_v58, %v12800_v10  ;;  %v3282_v23 = vrot.slane %v3025_v61, 7  ;;  %v3518_v44 = vmul.f32 %v12816_v43, %v12788_v53  ;;  %v2600_v48 = vadd.f32 %v2460_v55, %v2079_v17  ;;  %v12846_v55 = vld [vmem:[#allocation125_spill] sm:$0xff] }
 0x2d7   : > { %v2463_v52 = vsel %vm8136_vm9, %v2461_v21, %v12840_v34  ;;  %v2755_v58 = vadd.f32 %v2691_v15, %v2599_v37  ;;  %v12842_v57 = vrot.slane %v12841_v7, 9  ;;  %v3285_v4 = vrot.slane %v3026_v62, 7  ;;  %v12843_v34 = vld [vmem:[#allocation107_spill] sm:$0xff]  ;;  %v12844_v15 = vld [vmem:[#allocation84_spill] sm:$0xff]  ;;  %v12853_v7 = vld [vmem:[#allocation81_spill] sm:$0xff] }
 0x2d8   : > { %v4716_v16 = vcombine.low %v4708_v38, %v4715_v11  ;;  %v2601_v40 = vadd.f32 %v2463_v52, %v2080_v18  ;;  %v3284_v3 = vrot.slane %v3282_v23, 2  ;;  %v3519_v30 = vmul.f32 %v12817_v56, %v12789_v41 }
 0x2d9   : > { %v3283_v39 = vsel %vm8136_vm9, %v12842_v57, %v3282_v23  ;;  %v2756_v61 = vadd.f32 %v2692_v20, %v2600_v48  ;;  %v2911_v53 = vadd.f32 %v12843_v34, %v2755_v58  ;;  %v3287_v18 = vrot.slane %v3285_v4, 2  ;;  %v12845_v57 = vld [vmem:[#allocation123_spill] sm:$0xff]  ;;  %v12847_v20 = vld [vmem:[#allocation132_spill] sm:$0xff]  ;;  %v12852_v58 = vld [vmem:[#allocation97_spill] sm:$0xff] }
 0x2da   : > { %v4807_v21 = vsel %vm4767_vm10, %v4716_v16, 0.0  ;;  %v2757_v59 = vadd.f32 %v2693_v12, %v2601_v40  ;;  %v3286_v17 = vsel %vm8136_vm9, %v3284_v3, %v3285_v4  ;;  %v3673_v38 = vmul.f32 %v12819_v63, %v12844_v15  ;;  %v12849_v16 = vld [vmem:[#allocation127_spill] sm:$0xff]  ;;  %v12850_v3 = vld [vmem:[#allocation138_spill] sm:$0xff] }
 0x2db   : > { %4808 = vadd.xlane.f32.xlu1 %v4807_v21  ;;  %v3675_v11 = vmul.f32 %v12823_v29, %v12845_v57  ;;  %v2912_v37 = vadd.f32 %v2848_v51, %v2756_v61  ;;  %v3425_v41 = vadd.f32 %v3283_v39, %v2911_v53  ;;  %v7451_v52 = vrot.slane %v12846_v55, 9  ;;  %v12854_v21 = vld [vmem:[#allocation126_spill] sm:$0xff]  ;;  %v12857_v15 = vld [vmem:[#allocation71_spill] sm:$0xff] }
 0x2dc   : > { %v2913_v62 = vadd.f32 %v2849_v54, %v2757_v59  ;;  %v12848_v12 = vrot.slane %v12847_v20, 7  ;;  %v4111_v48 = vrot.slane %v12849_v16, 7  ;;  %v12851_v40 = vrot.slane %v12850_v3, 7  ;;  %v12856_v34 = vld [vmem:[#allocation134_spill] sm:$0xff] }
 0x2dd   : > { %v4343_v51 = vmul.f32 %v12289_v46, %v12853_v7  ;;  %v3426_v54 = vadd.f32 %v3286_v17, %v2912_v37  ;;  %v3581_v4 = vadd.f32 %v3517_v8, %v3425_v41  ;;  %v12855_v61 = vrot.slane %v12854_v21, 7  ;;  %v12858_v37 = vld [vmem:[#allocation128_spill] sm:$0xff] }
 0x2de   : > { %v3289_v23 = vsel %vm8136_vm9, %v3287_v18, %v12848_v12  ;;  %v4118_v63 = vsel %vm8136_vm9, %v12852_v58, %v12851_v40  ;;  %v4112_v53 = vsel %vm8136_vm9, %v12856_v34, %v4111_v48  ;;  %v4113_v18 = vrot.slane %v4111_v48, 2  ;;  %v12861_v40 = vld [vmem:[#allocation83_spill] sm:$0xff] }
 0x2df   : > { %v3427_v39 = vadd.f32 %v3289_v23, %v2913_v62  ;;  %v4109_v59 = vsel %vm8136_vm9, %v7451_v52, %v12855_v61  ;;  %v4254_v55 = vadd.f32 %v4118_v63, %v12857_v15  ;;  %v4344_v20 = vmul.f32 %v12290_v26, %v12845_v57  ;;  %v12859_v62 = vld [vmem:[#allocation137_spill] sm:$0xff] }
 0x2e0   : > { %v3582_v12 = vadd.f32 %v3518_v44, %v3426_v54  ;;  %v3737_v17 = vadd.f32 %v3673_v38, %v3581_v4  ;;  %v4346_v8 = vmul.f32 %v12293_v32, %v12858_v37  ;;  %v12860_v41 = vrot.slane %v12859_v62, 7  ;;  %v12862_v44 = vld [vmem:[#allocation124_spill] sm:$0xff] }
 0x2e1   : > { %v3583_v16 = vadd.f32 %v3519_v30, %v3427_v39  ;;  %v1991_v23 = vmul.f32 %v12659_v24, %v12724_v1  ;;  %v1992_v48 = vmul.f32 %v12517_v22, %v12810_v5  ;;  %v1993_v57 = vmul.f32 %v12554_v35, %v12861_v40 }
 0x2e2   : > { %v4115_v52 = vsel %vm8136_vm9, %v4113_v18, %v12860_v41  ;;  %v3738_v30 = vadd.f32 %v12862_v44, %v3582_v12  ;;  %v4251_v58 = vadd.f32 %v4109_v59, %v3737_v17  ;;  %v10767_v63 = vadd.f32 %v4346_v8, %v4254_v55  ;;  %v12867_v55 = vld [vmem:[#allocation52_spill] sm:$0xff]  ;;  %v12868_v12 = vld [vmem:[#allocation21_spill] sm:$0xff] }
 0x2e3   : > { %v3739_v38 = vadd.f32 %v3675_v11, %v3583_v16  ;;  %v2082_v7 = vadd.f32 %v12594_v49, %v1991_v23  ;;  %v2083_v54 = vadd.f32 %v12767_v60, %v1992_v48  ;;  %v2084_v39 = vadd.f32 %v12768_v42, %v1993_v57  ;;  %v12863_v11 = vld [vmem:[#allocation131_spill] sm:$0xff] }
 0x2e4   : > { %v2203_v24 = vmul.f32 %v12732_v2, %v12810_v5  ;;  %v4252_v1 = vadd.f32 %v4112_v53, %v3738_v30  ;;  %v10774_v4 = vadd.f32 %v4343_v51, %v4251_v58  ;;  %v2204_v35 = vmul.f32 %v12770_v0, %v12861_v40  ;;  %v12865_v2 = vld [vmem:[#allocation141_spill] sm:$0xff]  ;;  %v12866_v53 = vld [vmem:[#allocation103_spill] sm:$0xff] }
 0x2e5   : > { %v4253_v22 = vadd.f32 %v4115_v52, %v3739_v38  ;;  %v12864_v21 = vrot.slane %v12863_v11, 7  ;;  %v2695_v49 = vmul.f32 %v12805_v47, %v12810_v5  ;;  %v2696_v60 = vmul.f32 %v12806_v25, %v12861_v40  ;;  %v12869_v52 = vld [vmem:[#allocation98_spill] sm:$0xff]  ;;  %v12871_v30 = vld [vmem:[#allocation133_spill] sm:$0xff] }
 0x2e6   : > { %v2468_v59 = vrot.slane %v2203_v24, 7  ;;  %v10784_v42 = vadd.f32 %v4344_v20, %v4252_v1  ;;  %v2471_v51 = vrot.slane %v2204_v35, 7  ;;  %v2697_v18 = vmul.f32 %v12807_v6, %v12866_v53 }
 0x2e7   : > { %v2467_v61 = vrot.slane %v12864_v21, 2  ;;  %v10787_v34 = vadd.f32 %v12865_v2, %v4253_v22  ;;  %v2851_v16 = vmul.f32 %v12868_v12, %v12867_v55  ;;  %v2852_v47 = vmul.f32 %v12782_v9, %v12820_v27  ;;  %v12877_v12 = vld [vmem:[#allocation140_spill] sm:$0xff] }
 0x2e8   : > { %v2470_v15 = vrot.slane %v2468_v59, 2  ;;  %v4717_v25 = vcombine.low %v10774_v4, %v10784_v42  ;;  %v2473_v20 = vrot.slane %v2471_v51, 2  ;;  %v2853_v37 = vmul.f32 %v12717_v36, %v12822_v28 }
 0x2e9   : > { %v2469_v0 = vsel %vm8136_vm9, %v2467_v61, %v2468_v59  ;;  %v4718_v5 = vcombine.low %v10787_v34, %v10767_v63  ;;  %v3029_v8 = vmul.f32 %v12492_v45, %v12820_v27  ;;  %v3030_v9 = vmul.f32 %v12580_v13, %v12822_v28 }
 0x2ea   : > { %v2603_v17 = vadd.f32 %v2469_v0, %v2082_v7  ;;  %v2472_v6 = vsel %vm8136_vm9, %v2470_v15, %v2471_v51  ;;  %v4725_v62 = vrot.slane %v4717_v25, %v12800_v10  ;;  %v12870_v23 = vrot.slane %v12869_v52, 7 }
 0x2eb   : > { %v4732_v41 = vrot.slane %v4718_v5, %v12800_v10  ;;  %v2604_v40 = vadd.f32 %v2472_v6, %v2083_v54  ;;  %v12872_v36 = vrot.slane %v12871_v30, 7  ;;  %v3294_v58 = vrot.slane %v3029_v8, 7  ;;  %v12880_v5 = vld [vmem:[#allocation66_spill] sm:$0xff] }
 0x2ec   : > { %v2475_v48 = vsel %vm8136_vm9, %v2473_v20, %v12870_v23  ;;  %v2759_v44 = vadd.f32 %v2695_v49, %v2603_v17  ;;  %v3297_v24 = vrot.slane %v3030_v9, 7  ;;  %v3521_v13 = vmul.f32 %v8232_v19, %v12820_v27  ;;  %v12873_v27 = vld [vmem:[#allocation149_spill] sm:$0xff]  ;;  %v12881_v17 = vld [vmem:[#allocation139_spill] sm:$0xff]  ;;  %v12884_v8 = vld [vmem:[#allocation122_spill] sm:$0xff] }
 0x2ed   : > { %v2605_v57 = vadd.f32 %v2475_v48, %v2084_v39  ;;  %v3293_v38 = vrot.slane %v12872_v36, 2  ;;  %v4733_v45 = vcombine.low %v4725_v62, %v4732_v41  ;;  %v2760_v7 = vadd.f32 %v2696_v60, %v2604_v40  ;;  %v12885_v41 = vld [vmem:[#allocation135_spill] sm:$0xff]  ;;  %v12886_v23 = vld [vmem:[#allocation145_spill] sm:$0xff]  ;;  %v12888_v36 = vld [vmem:[#allocation82_spill] sm:$0xff] }
 0x2ee   : > { %v2915_v22 = vadd.f32 %v2851_v16, %v2759_v44  ;;  %v3296_v11 = vrot.slane %v3294_v58, 2  ;;  %v3299_v21 = vrot.slane %v3297_v24, 2  ;;  %v3522_v61 = vmul.f32 %v12816_v43, %v12822_v28 }
 0x2ef   : > { %v2761_v1 = vadd.f32 %v2697_v18, %v2605_v57  ;;  %v3295_v35 = vsel %vm8136_vm9, %v3293_v38, %v3294_v58  ;;  %v4810_v54 = vsel %vm4767_vm10, %v4733_v45, 0.0  ;;  %v2916_v39 = vadd.f32 %v2852_v47, %v2760_v7  ;;  %v12875_v18 = vld [vmem:[#allocation129_spill] sm:$0xff]  ;;  %v12878_v47 = vld [vmem:[#allocation151_spill] sm:$0xff]  ;;  %v12887_v57 = vld [vmem:[#allocation136_spill] sm:$0xff] }
 0x2f0   : > { %4811 = vadd.xlane.f32.xlu0 %v4810_v54  ;;  %v3298_v49 = vsel %vm8136_vm9, %v3296_v11, %v3297_v24  ;;  %v3429_v60 = vadd.f32 %v3295_v35, %v2915_v22  ;;  %v3523_v19 = vmul.f32 %v12817_v56, %v12824_v14  ;;  %v12874_v2 = vrot.slane %v12873_v27, 7  ;;  %v4770_v14 = vpop.xlane.xlu0 %4769  ;;  %v12889_v45 = vld [vmem:[#allocation150_spill] sm:$0xff] }
 0x2f1   : > { %v2917_v59 = vadd.f32 %v2853_v37, %v2761_v1  ;;  %v3430_v53 = vadd.f32 %v3298_v49, %v2916_v39  ;;  %v3679_v0 = vmul.f32 %v12823_v29, %v12875_v18  ;;  %v12876_v43 = vrot.slane %v12850_v3, 7  ;;  %v12883_v37 = vld [vmem:[#allocation94_spill] sm:$0xff] }
 0x2f2   : > { %v3301_v51 = vsel %vm8136_vm9, %v3299_v21, %v12874_v2  ;;  %v3585_v55 = vadd.f32 %v3521_v13, %v3429_v60  ;;  %v4123_v16 = vrot.slane %v12877_v12, 7  ;;  %v12879_v25 = vrot.slane %v12878_v47, 7  ;;  %v12892_v2 = vld [vmem:[#allocation2_spill] sm:$0xff] }
 0x2f3   : > { %v4119_v28 = vrot.slane %v12876_v43, 2  ;;  %v3431_v15 = vadd.f32 %v3301_v51, %v2917_v59  ;;  %v3586_v20 = vadd.f32 %v3522_v61, %v3430_v53  ;;  %v12882_v6 = vrot.slane %v12881_v17, 7 }
 0x2f4   : > { %v4130_v56 = vsel %vm8136_vm9, %v12880_v5, %v12879_v25  ;;  %v4347_v9 = vmul.f32 %v12289_v46, %v12884_v8  ;;  %v3741_v52 = vadd.f32 %v12885_v41, %v3585_v55  ;;  %v4124_v48 = vsel %vm8136_vm9, %v12886_v23, %v4123_v16  ;;  %v4773_v61 = vpop.xlane.xlu0 %4772 }
 0x2f5   : > { %v4121_v29 = vsel %vm8136_vm9, %v4119_v28, %v12882_v6  ;;  %v4258_v3 = vadd.f32 %v4130_v56, %v12883_v37  ;;  %v3587_v62 = vadd.f32 %v3523_v19, %v3431_v15  ;;  %v4125_v40 = vrot.slane %v4123_v16, 2  ;;  %v12891_v19 = vld [vmem:[#allocation152_spill] sm:$0xff] }
 0x2f6   : > { %v3742_v44 = vadd.f32 %v12887_v57, %v3586_v20  ;;  %v4348_v30 = vmul.f32 %v12290_v26, %v12875_v18  ;;  %v4350_v38 = vmul.f32 %v12293_v32, %v12888_v36  ;;  %v12890_v7 = vrot.slane %v12889_v45, 7  ;;  %v4776_v32 = vpop.xlane.xlu1 %4775  ;;  %v12895_v45 = vld [vmem:[#allocation92_spill] sm:$0xff] }
 0x2f7   : > { %v3743_v58 = vadd.f32 %v3679_v0, %v3587_v62  ;;  %v4255_v24 = vadd.f32 %v4121_v29, %v3741_v52  ;;  %v7801_v13 = vmov 269488144   ;;  %v7802_v26 = vmov 842150450  }
 0x2f8   : > { %v4127_v46 = vsel %vm8136_vm9, %v4125_v40, %v12890_v7  ;;  %v4850_v1 = vunpack.c.l.s4 %v7801_v13  ;;  %v4256_v22 = vadd.f32 %v4124_v48, %v3742_v44  ;;  %v10862_v35 = vadd.f32 %v4350_v38, %v4258_v3  ;;  %v4782_v52 = vpop.xlane.xlu0 %4781  ;;  %v12894_v38 = vld [vmem:[#allocation88_spill] sm:$0xff] }
 0x2f9   : > { %v4257_v11 = vadd.f32 %v4127_v46, %v3743_v58  ;;  %v10864_v54 = vadd.f32 %v4347_v9, %v4255_v24  ;;  %v4857_v21 = vunpack.c.l.s4 %v7802_v26  ;;  %v7803_v49 = vmov 1414812756   ;;  %v12896_v24 = vld [vmem:[#allocation93_spill] sm:$0xff] }
 0x2fa   : > { %v4851_v39 = vunpack.c.0.s8 %v4850_v1  ;;  %v10866_v59 = vadd.f32 %v4348_v30, %v4256_v22  ;;  %v4864_v60 = vunpack.c.l.s4 %v7803_v49  ;;  %v4817_v31 = vmul.f32 0.0625, %v4770_v14  ;;  %v4779_v3 = vpop.xlane.xlu1 %4778  ;;  %v12893_v30 = vld [vmem:[#allocation38_spill] sm:$0xff]  ;;  %v12897_v22 = vld [vmem:[#allocation99_spill] sm:$0xff] }
 0x2fb   : > { %v10869_v27 = vadd.f32 %v12891_v19, %v4257_v11  ;;  %v4858_v53 = vunpack.c.0.s8 %v4857_v21  ;;  %v7804_v18 = vmov 1987475062   ;;  %v4818_v15 = vmul.f32 0.0625, %v4773_v61 }
 0x2fc   : > { %v10872_v51 = vsub.s32 %v4851_v39, %v12892_v2  ;;  %v4871_v0 = vunpack.c.l.s4 %v7804_v18  ;;  %v4734_v43 = vcombine.low %v10864_v54, %v10866_v59  ;;  %v4865_v28 = vunpack.c.0.s8 %v4864_v60 }
 0x2fd   : > { %v10876_v55 = vmul.f32 0.0625, %v4776_v32  ;;  %v4735_v12 = vcombine.low %v10869_v27, %v10862_v35  ;;  %v10881_v16 = vsub.s32 %v4858_v53, %v12892_v2  ;;  %v10907_v44 = vmul.f32 0.0625, %v4779_v3 }
 0x2fe   : > { %v4872_v47 = vunpack.c.0.s8 %v4871_v0  ;;  %v4855_v25 = vrot.slane %v4817_v31, %v10872_v51  ;;  %v4742_v5 = vrot.slane %v4734_v43, %v12800_v10  ;;  %v10886_v56 = vsub.s32 %v4865_v28, %v12892_v2  ;;  %v4785_v19 = vpop.xlane.xlu1 %4784 }
 0x2ff   : > { %v4883_v14 = vrot.slane %v4818_v15, %v10872_v51  ;;  %v4911_v20 = vrot.slane %v10876_v55, %v10872_v51  ;;  %v4749_v17 = vrot.slane %v4735_v12, %v12800_v10  ;;  %v4862_v29 = vrot.slane %v4817_v31, %v10881_v16  ;;  %v12899_v12 = vld [vmem:[#allocation58_spill] sm:$0xff] }
 0x300   : > { %v10893_v6 = vsub.s32 %v4872_v47, %v12892_v2  ;;  %v4890_v37 = vrot.slane %v4818_v15, %v10881_v16  ;;  %v4869_v8 = vrot.slane %v4817_v31, %v10886_v56  ;;  %v4897_v9 = vrot.slane %v4818_v15, %v10886_v56 }
 0x301   : > { %v4918_v62 = vrot.slane %v10876_v55, %v10881_v16  ;;  %v4925_v41 = vrot.slane %v10876_v55, %v10886_v56  ;;  %v4750_v23 = vcombine.low %v4742_v5, %v4749_v17  ;;  %v10910_v36 = vsub.f32 %v12893_v30, %v4855_v25  ;;  %v12900_v25 = vld [vmem:[#allocation101_spill] sm:$0xff] }
 0x302   : > { %v4876_v48 = vrot.slane %v4817_v31, %v10893_v6  ;;  %v4904_v40 = vrot.slane %v4818_v15, %v10893_v6  ;;  %v4932_v57 = vrot.slane %v10876_v55, %v10893_v6  ;;  %v10913_v58 = vsub.f32 %v12894_v38, %v4862_v29  ;;  %v12898_v15 = vld [vmem:[#allocation100_spill] sm:$0xff]  ;;  %v12901_v29 = vld [vmem:[#allocation53_spill] sm:$0xff] }
 0x303   : > { %v10916_v7 = vsub.f32 %v12895_v45, %v4869_v8  ;;  %v4813_v46 = vsel %vm4767_vm10, %v4750_v23, 0.0  ;;  %v10922_v1 = vmul.f32 0.0625, %v4782_v52  ;;  %v10925_v11 = vsub.f32 %v12897_v22, %v4883_v14 }
 0x304   : > { %v10920_v13 = vsub.f32 %v12896_v24, %v4876_v48  ;;  %4814 = vadd.xlane.f32.xlu1 %v4813_v46  ;;  %v4939_v39 = vrot.slane %v10907_v44, %v10872_v51  ;;  %v4946_v26 = vrot.slane %v10907_v44, %v10881_v16  ;;  %v4953_v21 = vrot.slane %v10907_v44, %v10886_v56  ;;  %v12902_v46 = vld [vmem:[#allocation54_spill] sm:$0xff] }
 0x305   : > { %v4960_v61 = vrot.slane %v10907_v44, %v10893_v6  ;;  %v5425_v32 = vmul.f32 %v10910_v36, %v10910_v36  ;;  %v5426_v49 = vmul.f32 %v10913_v58, %v10913_v58  ;;  %v5427_v60 = vmul.f32 %v10916_v7, %v10916_v7  ;;  %v4788_v44 = vpop.xlane.xlu0 %4787 }
 0x306   : > { %v5428_v31 = vmul.f32 %v10920_v13, %v10920_v13  ;;  %v4967_v2 = vrot.slane %v10922_v1, %v10872_v51  ;;  %v4974_v53 = vrot.slane %v10922_v1, %v10881_v16  ;;  %v4981_v18 = vrot.slane %v10922_v1, %v10886_v56 }
 0x307   : > { %v4988_v0 = vrot.slane %v10922_v1, %v10893_v6  ;;  %v5553_v43 = vcombine.low %v5425_v32, %v5426_v49  ;;  %v10952_v55 = vsub.f32 %v12898_v15, %v4890_v37  ;;  %v10955_v47 = vsub.f32 %v12899_v12, %v4897_v9  ;;  %v12903_v32 = vld [vmem:[#allocation113_spill] sm:$0xff] }
 0x308   : > { %v5554_v28 = vcombine.low %v5427_v60, %v5428_v31  ;;  %v10958_v5 = vsub.f32 %v12900_v25, %v4904_v40  ;;  %v5429_v14 = vmul.f32 %v10925_v11, %v10925_v11  ;;  %v10962_v17 = vmul.f32 0.0625, %v4785_v19  ;;  %v12904_v60 = vld [vmem:[#allocation114_spill] sm:$0xff]  ;;  %v12905_v25 = vld [vmem:[#allocation61_spill] sm:$0xff] }
 0x309   : > { %v10965_v3 = vsub.f32 %v12901_v29, %v4911_v20  ;;  %v5561_v8 = vrot.slane %v5553_v43, %v12800_v10  ;;  %v5430_v37 = vmul.f32 %v10952_v55, %v10952_v55  ;;  %v5431_v9 = vmul.f32 %v10955_v47, %v10955_v47 }
 0x30a   : > { %v5568_v52 = vrot.slane %v5554_v28, %v12800_v10  ;;  %v5432_v23 = vmul.f32 %v10958_v5, %v10958_v5  ;;  %v4995_v48 = vrot.slane %v10962_v17, %v10872_v51  ;;  %v5002_v20 = vrot.slane %v10962_v17, %v10881_v16 }
 0x30b   : > { %v5009_v40 = vrot.slane %v10962_v17, %v10886_v56  ;;  %v5570_v38 = vcombine.low %v5429_v14, %v5430_v37  ;;  %v5016_v45 = vrot.slane %v10962_v17, %v10893_v6  ;;  %v10984_v24 = vsub.f32 %v12902_v46, %v4918_v62 }
 0x30c   : > { %v5569_v30 = vcombine.low %v5561_v8, %v5568_v52  ;;  %v5571_v22 = vcombine.low %v5431_v9, %v5432_v23  ;;  %v10987_v49 = vsub.f32 %v12903_v32, %v4925_v41  ;;  %v10990_v31 = vsub.f32 %v12904_v60, %v4932_v57  ;;  %v4791_v9 = vpop.xlane.xlu1 %4790  ;;  %v12908_v60 = vld [vmem:[#allocation87_spill] sm:$0xff] }
 0x30d   : > { %v5433_v19 = vmul.f32 %v10965_v3, %v10965_v3  ;;  %v5578_v28 = vrot.slane %v5570_v38, %v12800_v10  ;;  %v5434_v15 = vmul.f32 %v10984_v24, %v10984_v24  ;;  %v10998_v12 = vmul.f32 0.0625, %v4788_v44  ;;  %v12906_v38 = vld [vmem:[#allocation62_spill] sm:$0xff] }
 0x30e   : > { %v5841_v43 = vsel %vm4767_vm10, %v5569_v30, 0.0  ;;  %v5585_v62 = vrot.slane %v5571_v22, %v12800_v10  ;;  %v5435_v41 = vmul.f32 %v10987_v49, %v10987_v49  ;;  %v5436_v57 = vmul.f32 %v10990_v31, %v10990_v31  ;;  %v12907_v22 = vld [vmem:[#allocation34_spill] sm:$0xff] }
 0x30f   : > { %5842 = vadd.xlane.f32.xlu0 %v5841_v43  ;;  %v11006_v14 = vsub.f32 %v12905_v25, %v4939_v39  ;;  %v5587_v29 = vcombine.low %v5433_v19, %v5434_v15  ;;  %v11017_v46 = vsub.f32 %v12906_v38, %v4946_v26  ;;  %v11021_v32 = vsub.f32 %v12907_v22, %v4953_v21  ;;  %v12912_v25 = vld [vmem:[#allocation146_spill] sm:$0xff]  ;;  %v4794_v22 = vpop.xlane.xlu0 %4793 }
 0x310   : > { %v5586_v23 = vcombine.low %v5578_v28, %v5585_v62  ;;  %v5588_v44 = vcombine.low %v5435_v41, %v5436_v57  ;;  %v11024_v19 = vsub.f32 %v12908_v60, %v4960_v61  ;;  %v11032_v26 = vmul.f32 0.0625, %v4791_v9  ;;  %v12910_v41 = vld [vmem:[#allocation27_spill] sm:$0xff]  ;;  %v4797_v52 = vpop.xlane.xlu1 %4796 }
 0x311   : > { %v5595_v39 = vrot.slane %v5587_v29, %v12800_v10  ;;  %v5437_v43 = vmul.f32 %v11006_v14, %v11006_v14  ;;  %v5438_v62 = vmul.f32 %v11017_v46, %v11017_v46  ;;  %v5439_v21 = vmul.f32 %v11021_v32, %v11021_v32 }
 0x312   : > { %12909 = vst [vmem:[#allocation95_spill] sm:$0xff] %v11024_v19  ;;  %v5844_v28 = vsel %vm4767_vm10, %v5586_v23, 0.0  ;;  %v5602_v15 = vrot.slane %v5588_v44, %v12800_v10  ;;  %v5440_v61 = vmul.f32 %v11024_v19, %v11024_v19  ;;  %v11039_v57 = vsub.f32 %v12910_v41, %v4967_v2 }
 0x313   : > { %5845 = vadd.xlane.f32.xlu1 %v5844_v28  ;;  %v11042_v29 = vsub.f32 %v12912_v25, %v4974_v53  ;;  %v5604_v44 = vcombine.low %v5437_v43, %v5438_v62  ;;  %v5051_v38 = vrot.slane %v11032_v26, %v10872_v51  ;;  %v5058_v9 = vrot.slane %v11032_v26, %v10881_v16  ;;  %v12914_v53 = vld [vmem:[#allocation147_spill] sm:$0xff]  ;;  %v12916_v62 = vld [vmem:[#allocation148_spill] sm:$0xff] }
 0x314   : > { %12911 = vst [vmem:[#allocation11_spill] sm:$0xff] %v11039_v57  ;;  %v5603_v23 = vcombine.low %v5595_v39, %v5602_v15  ;;  %v5605_v60 = vcombine.low %v5439_v21, %v5440_v61  ;;  %v5065_v28 = vrot.slane %v11032_v26, %v10886_v56  ;;  %v5072_v2 = vrot.slane %v11032_v26, %v10893_v6 }
 0x315   : > { %12913 = vst [vmem:[#allocation120_spill] sm:$0xff] %v11042_v29  ;;  %v11056_v39 = vsub.f32 %v12914_v53, %v4981_v18  ;;  %v5612_v15 = vrot.slane %v5604_v44, %v12800_v10  ;;  %v11064_v21 = vsub.f32 %v12916_v62, %v4988_v0  ;;  %v5441_v61 = vmul.f32 %v11039_v57, %v11039_v57  ;;  %v12920_v44 = vld [vmem:[#allocation119_spill] sm:$0xff]  ;;  %v12938_v57 = vld [vmem:[#allocation6_spill] sm:$0xff] }
 0x316   : > { %v5847_v43 = vsel %vm4767_vm10, %v5603_v23, 0.0  ;;  %v5619_v26 = vrot.slane %v5605_v60, %v12800_v10  ;;  %v5442_v18 = vmul.f32 %v11042_v29, %v11042_v29  ;;  %v11073_v25 = vmul.f32 0.0625, %v4794_v22  ;;  %v12918_v23 = vld [vmem:[#allocation63_spill] sm:$0xff] }
 0x317   : > { %12915 = vst [vmem:[#allocation12_spill] sm:$0xff] %v11056_v39  ;;  %12917 = vst [vmem:[#allocation5_spill] sm:$0xff] %v11064_v21  ;;  %5848 = vadd.xlane.f32.xlu0 %v5847_v43  ;;  %v5443_v41 = vmul.f32 %v11056_v39, %v11056_v39  ;;  %v5444_v1 = vmul.f32 %v11064_v21, %v11064_v21  ;;  %v11078_v0 = vsub.f32 %v12918_v23, %v4995_v48  ;;  %v12922_v43 = vld [vmem:[#allocation96_spill] sm:$0xff] }
 0x318   : > { %v11081_v53 = vsub.f32 %v12920_v44, %v5002_v20  ;;  %v11084_v62 = vsub.f32 %v12922_v43, %v5009_v40  ;;  %v5620_v60 = vcombine.low %v5612_v15, %v5619_v26  ;;  %v5621_v30 = vcombine.low %v5441_v61, %v5442_v18  ;;  %v12924_v40 = vld [vmem:[#allocation60_spill] sm:$0xff]  ;;  %v4800_v61 = vpop.xlane.xlu0 %4799 }
 0x319   : > { %12919 = vst [vmem:[#allocation7_spill] sm:$0xff] %v11078_v0  ;;  %v5079_v37 = vrot.slane %v11073_v25, %v10872_v51  ;;  %v5086_v22 = vrot.slane %v11073_v25, %v10881_v16  ;;  %v5622_v8 = vcombine.low %v5443_v41, %v5444_v1  ;;  %v5093_v48 = vrot.slane %v11073_v25, %v10886_v56 }
 0x31a   : > { %12921 = vst [vmem:[#allocation142_spill] sm:$0xff] %v11081_v53  ;;  %12923 = vst [vmem:[#allocation112_spill] sm:$0xff] %v11084_v62  ;;  %v5100_v20 = vrot.slane %v11073_v25, %v10893_v6  ;;  %v11098_v15 = vsub.f32 %v12924_v40, %v5016_v45  ;;  %v5850_v26 = vsel %vm4767_vm10, %v5620_v60, 0.0  ;;  %v5629_v18 = vrot.slane %v5621_v30, %v12800_v10  ;;  %v12927_v60 = vld [vmem:[#allocation70_spill] sm:$0xff] }
 0x31b   : > { %v5445_v41 = vmul.f32 %v11078_v0, %v11078_v0  ;;  %v5446_v1 = vmul.f32 %v11081_v53, %v11081_v53  ;;  %5851 = vadd.xlane.f32.xlu1 %v5850_v26  ;;  %v5636_v25 = vrot.slane %v5622_v8, %v12800_v10  ;;  %v5447_v17 = vmul.f32 %v11084_v62, %v11084_v62  ;;  %v12929_v8 = vld [vmem:[#allocation72_spill] sm:$0xff] }
 0x31c   : > { %12925 = vst [vmem:[#allocation37_spill] sm:$0xff] %v11098_v15  ;;  %v5448_v45 = vmul.f32 %v11098_v15, %v11098_v15  ;;  %v4826_v23 = vmul.f32 0.0625, %v4797_v52  ;;  %v11111_v43 = vmul.f32 0.0625, %v4800_v61  ;;  %v12926_v30 = vrot.slane %v10998_v12, %v10872_v51 }
 0x31d   : > { %v5638_v44 = vcombine.low %v5445_v41, %v5446_v1  ;;  %v12928_v26 = vrot.slane %v10998_v12, %v10881_v16  ;;  %v5637_v62 = vcombine.low %v5629_v18, %v5636_v25  ;;  %v11160_v19 = vsub.f32 %v12938_v57, %v5058_v9 }
 0x31e   : > { %v11117_v40 = vsub.f32 %v12927_v60, %v12926_v30  ;;  %v5639_v0 = vcombine.low %v5447_v17, %v5448_v45  ;;  %v5107_v15 = vrot.slane %v4826_v23, %v10872_v51  ;;  %v5114_v52 = vrot.slane %v4826_v23, %v10881_v16 }
 0x31f   : > { %v11123_v53 = vsub.f32 %v12929_v8, %v12928_v26  ;;  %v5646_v61 = vrot.slane %v5638_v44, %v12800_v10  ;;  %v5121_v41 = vrot.slane %v4826_v23, %v10886_v56  ;;  %v5128_v1 = vrot.slane %v4826_v23, %v10893_v6  ;;  %v12932_v23 = vld [vmem:[#allocation75_spill] sm:$0xff] }
 0x320   : > { %v5135_v30 = vrot.slane %v11111_v43, %v10872_v51  ;;  %v5853_v60 = vsel %vm4767_vm10, %v5637_v62, 0.0  ;;  %v5653_v26 = vrot.slane %v5639_v0, %v12800_v10  ;;  %v5142_v18 = vrot.slane %v11111_v43, %v10881_v16  ;;  %v12934_v0 = vld [vmem:[#allocation73_spill] sm:$0xff] }
 0x321   : > { %12930 = vst [vmem:[#allocation55_spill] sm:$0xff] %v11123_v53  ;;  %v5149_v25 = vrot.slane %v11111_v43, %v10886_v56  ;;  %5854 = vadd.xlane.f32.xlu0 %v5853_v60  ;;  %v5156_v17 = vrot.slane %v11111_v43, %v10893_v6  ;;  %v12931_v45 = vrot.slane %v10998_v12, %v10886_v56  ;;  %v12936_v43 = vld [vmem:[#allocation105_spill] sm:$0xff] }
 0x322   : > { %v12933_v62 = vrot.slane %v10998_v12, %v10893_v6  ;;  %v5449_v21 = vmul.f32 %v11117_v40, %v11117_v40  ;;  %v5654_v39 = vcombine.low %v5646_v61, %v5653_v26  ;;  %v5450_v60 = vmul.f32 %v11123_v53, %v11123_v53 }
 0x323   : > { %v11144_v44 = vsub.f32 %v12932_v23, %v12931_v45  ;;  %v11157_v29 = vsub.f32 %v12936_v43, %v5051_v38  ;;  %v12939_v23 = vld [vmem:[#allocation69_spill] sm:$0xff]  ;;  %v5454_v57 = vmul.f32 %v11160_v19, %v11160_v19 }
 0x324   : > { %v11150_v8 = vsub.f32 %v12934_v0, %v12933_v62  ;;  %v11167_v62 = vsub.f32 %v12939_v23, %v5065_v28  ;;  %v12941_v0 = vld [vmem:[#allocation10_spill] sm:$0xff]  ;;  %v5856_v26 = vsel %vm4767_vm10, %v5654_v39, 0.0  ;;  %v5655_v53 = vcombine.low %v5449_v21, %v5450_v60  ;;  %v12943_v23 = vld [vmem:[#allocation32_spill] sm:$0xff] }
 0x325   : > { %12937 = vst [vmem:[#allocation49_spill] sm:$0xff] %v11157_v29  ;;  %v5451_v45 = vmul.f32 %v11144_v44, %v11144_v44  ;;  %v11170_v61 = vsub.f32 %v12941_v0, %v5072_v2  ;;  %v5453_v38 = vmul.f32 %v11157_v29, %v11157_v29  ;;  %5857 = vadd.xlane.f32.xlu1 %v5856_v26  ;;  %v12944_v60 = vld [vmem:[#allocation74_spill] sm:$0xff]  ;;  %v12946_v26 = vld [vmem:[#allocation77_spill] sm:$0xff] }
 0x326   : > { %12935 = vst [vmem:[#allocation115_spill] sm:$0xff] %v11150_v8  ;;  %v5452_v12 = vmul.f32 %v11150_v8, %v11150_v8  ;;  %12940 = vst [vmem:[#allocation68_spill] sm:$0xff] %v11167_v62  ;;  %v5455_v43 = vmul.f32 %v11167_v62, %v11167_v62  ;;  %v11182_v2 = vsub.f32 %v12943_v23, %v5079_v37  ;;  %v12945_v29 = vld [vmem:[#allocation78_spill] sm:$0xff]  ;;  %v12949_v23 = vld [vmem:[#allocation33_spill] sm:$0xff] }
 0x327   : > { %12942 = vst [vmem:[#allocation15_spill] sm:$0xff] %v11170_v61  ;;  %v5456_v28 = vmul.f32 %v11170_v61, %v11170_v61  ;;  %v5663_v39 = vrot.slane %v5655_v53, %v12800_v10  ;;  %v5672_v21 = vcombine.low %v5453_v38, %v5454_v57  ;;  %v11186_v0 = vsub.f32 %v12944_v60, %v5086_v22  ;;  %v12947_v38 = vld [vmem:[#allocation79_spill] sm:$0xff]  ;;  %v12950_v60 = vld [vmem:[#allocation56_spill] sm:$0xff] }
 0x328   : > { %v5656_v9 = vcombine.low %v5451_v45, %v5452_v12  ;;  %v11189_v8 = vsub.f32 %v12945_v29, %v5093_v48  ;;  %v11193_v62 = vsub.f32 %v12946_v26, %v5100_v20  ;;  %v5457_v61 = vmul.f32 %v11182_v2, %v11182_v2 }
 0x329   : > { %v5673_v12 = vcombine.low %v5455_v43, %v5456_v28  ;;  %v5680_v37 = vrot.slane %v5672_v21, %v12800_v10  ;;  %v5458_v53 = vmul.f32 %v11186_v0, %v11186_v0  ;;  %v11203_v29 = vsub.f32 %v12947_v38, %v5107_v15 }
 0x32a   : > { %v5670_v45 = vrot.slane %v5656_v9, %v12800_v10  ;;  %v5459_v22 = vmul.f32 %v11189_v8, %v11189_v8  ;;  %v5460_v20 = vmul.f32 %v11193_v62, %v11193_v62  ;;  %v12948_v9 = vld [vmem:[#allocation80_spill] sm:$0xff]  ;;  %v11212_v21 = vsub.f32 %v12949_v23, %v5121_v41 }
 0x32b   : > { %v5687_v57 = vrot.slane %v5673_v12, %v12800_v10  ;;  %v11209_v43 = vsub.f32 %v12948_v9, %v5114_v52  ;;  %v5689_v28 = vcombine.low %v5457_v61, %v5458_v53  ;;  %v11215_v26 = vsub.f32 %v12950_v60, %v5128_v1  ;;  %v12951_v61 = vld [vmem:[#allocation153_spill] sm:$0xff]  ;;  %v12954_v60 = vld [vmem:[#allocation44_spill] sm:$0xff] }
 0x32c   : > { %v5671_v48 = vcombine.low %v5663_v39, %v5670_v45  ;;  %v5461_v15 = vmul.f32 %v11203_v29, %v11203_v29  ;;  %v5690_v12 = vcombine.low %v5459_v22, %v5460_v20  ;;  %v5463_v41 = vmul.f32 %v11212_v21, %v11212_v21 }
 0x32d   : > { %v5688_v45 = vcombine.low %v5680_v37, %v5687_v57  ;;  %v5462_v38 = vmul.f32 %v11209_v43, %v11209_v43  ;;  %v5697_v52 = vrot.slane %v5689_v28, %v12800_v10  ;;  %v5464_v1 = vmul.f32 %v11215_v26, %v11215_v26  ;;  %v12953_v28 = vld [vmem:[#allocation76_spill] sm:$0xff] }
 0x32e   : > { %v5859_v39 = vsel %vm4767_vm10, %v5671_v48, 0.0  ;;  %v11228_v53 = vsub.f32 %v12951_v61, %v5135_v30  ;;  %v5704_v37 = vrot.slane %v5690_v12, %v12800_v10  ;;  %v12952_v48 = vld [vmem:[#allocation154_spill] sm:$0xff]  ;;  %v11236_v23 = vsub.f32 %v12953_v28, %v5149_v25 }
 0x32f   : > { %5860 = vadd.xlane.f32.xlu0 %v5859_v39  ;;  %v5862_v9 = vsel %vm4767_vm10, %v5688_v45, 0.0  ;;  %v5706_v22 = vcombine.low %v5461_v15, %v5462_v38  ;;  %v11233_v57 = vsub.f32 %v12952_v48, %v5142_v18  ;;  %v5707_v20 = vcombine.low %v5463_v41, %v5464_v1  ;;  %v4803_v38 = vpop.xlane.xlu1 %4802 }
 0x330   : > { %5863 = vadd.xlane.f32.xlu1 %v5862_v9  ;;  %v11239_v39 = vsub.f32 %v12954_v60, %v5156_v17  ;;  %v5465_v30 = vmul.f32 %v11228_v53, %v11228_v53  ;;  %v5705_v61 = vcombine.low %v5697_v52, %v5704_v37  ;;  %v5467_v12 = vmul.f32 %v11236_v23, %v11236_v23 }
 0x331   : > { %v5714_v45 = vrot.slane %v5706_v22, %v12800_v10  ;;  %v5466_v15 = vmul.f32 %v11233_v57, %v11233_v57  ;;  %v5721_v18 = vrot.slane %v5707_v20, %v12800_v10  ;;  %v4828_v1 = vmul.f32 0.0625, %v4803_v38 }
 0x332   : > { %12955 = vst [vmem:[#allocation14_spill] sm:$0xff] %v11239_v39  ;;  %v5468_v25 = vmul.f32 %v11239_v39, %v11239_v39  ;;  %v5865_v17 = vsel %vm4767_vm10, %v5705_v61, 0.0 }
 0x333   : > { %v5723_v41 = vcombine.low %v5465_v30, %v5466_v15  ;;  %5866 = vadd.xlane.f32.xlu0 %v5865_v17  ;;  %v5722_v52 = vcombine.low %v5714_v45, %v5721_v18  ;;  %v5163_v22 = vrot.slane %v4828_v1, %v10872_v51  ;;  %v5170_v48 = vrot.slane %v4828_v1, %v10881_v16  ;;  %v12956_v30 = vld [vmem:[#allocation102_spill] sm:$0xff]  ;;  %v12957_v45 = vld [vmem:[#allocation67_spill] sm:$0xff]  ;;  %v12958_v18 = vld [vmem:[#allocation89_spill] sm:$0xff] }
 0x334   : > { %v5724_v9 = vcombine.low %v5467_v12, %v5468_v25  ;;  %v5177_v20 = vrot.slane %v4828_v1, %v10886_v56  ;;  %v5184_v28 = vrot.slane %v4828_v1, %v10893_v6  ;;  %v12959_v25 = vld [vmem:[#allocation50_spill] sm:$0xff] }
 0x335   : > { %v5731_v37 = vrot.slane %v5723_v41, %v12800_v10  ;;  %v5868_v60 = vsel %vm4767_vm10, %v5722_v52, 0.0  ;;  %v11260_v61 = vsub.f32 %v12956_v30, %v5163_v22  ;;  %v11263_v15 = vsub.f32 %v12957_v45, %v5170_v48  ;;  %v7693_v30 = vld [vmem:[%s11750_s4] sm:$0xff]  }
 0x336   : > { %v5738_v39 = vrot.slane %v5724_v9, %v12800_v10  ;;  %5869 = vadd.xlane.f32.xlu1 %v5868_v60  ;;  %v11266_v12 = vsub.f32 %v12958_v18, %v5177_v20  ;;  %v11269_v38 = vsub.f32 %v12959_v25, %v5184_v28  ;;  %7603 = vmatprep.subr.bf16.mxu1 %v7693_v30 }
 0x337   : > { %v5469_v41 = vmul.f32 %v11260_v61, %v11260_v61  ;;  %v5470_v1 = vmul.f32 %v11263_v15, %v11263_v15  ;;  %7604 = vmatpush3.bf16.msra.mxu1 %v7693_v30 }
 0x338   : > { %v5739_v17 = vcombine.low %v5731_v37, %v5738_v39  ;;  %v5471_v52 = vmul.f32 %v11266_v12, %v11266_v12  ;;  %v5472_v9 = vmul.f32 %v11269_v38, %v11269_v38 }
 0x339   : > { %v5740_v48 = vcombine.low %v5469_v41, %v5470_v1 }
 0x33a   : > { %v5871_v22 = vsel %vm4767_vm10, %v5739_v17, 0.0  ;;  %v5741_v20 = vcombine.low %v5471_v52, %v5472_v9  ;;  %v12960_v52 = vld [vmem:[#allocation86_spill] sm:$0xff] }
 0x33b   : > { %5872 = vadd.xlane.f32.xlu0 %v5871_v22  ;;  %v5748_v28 = vrot.slane %v5740_v48, %v12800_v10  ;;  %v12962_v22 = vld [vmem:[#allocation48_spill] sm:$0xff] }
 0x33c   : > { %v5755_v39 = vrot.slane %v5741_v20, %v12800_v10  ;;  %v12964_v20 = vld [vmem:[#allocation8_spill] sm:$0xff] }
 0x33e   : > { %v5756_v37 = vcombine.low %v5748_v28, %v5755_v39  ;;  %v12966_v39 = vld [vmem:[#allocation85_spill] sm:$0xff] }
 0x340   : > { %v5874_v60 = vsel %vm4767_vm10, %v5756_v37, 0.0 }
 0x341   : > { %5875 = vadd.xlane.f32.xlu1 %v5874_v60 }
 0x349   : > { %v4806_v45 = vpop.xlane.xlu0 %4805 }
 0x34a   : > { %v4829_v18 = vmul.f32 0.0625, %v4806_v45 }
 0x34c   : > { %v5191_v25 = vrot.slane %v4829_v18, %v10872_v51  ;;  %v5198_v17 = vrot.slane %v4829_v18, %v10881_v16  ;;  %v5205_v41 = vrot.slane %v4829_v18, %v10886_v56  ;;  %v5212_v1 = vrot.slane %v4829_v18, %v10893_v6 }
 0x34e   : > { %v11291_v9 = vsub.f32 %v12960_v52, %v5191_v25  ;;  %v11294_v48 = vsub.f32 %v12962_v22, %v5198_v17  ;;  %v11297_v28 = vsub.f32 %v12964_v20, %v5205_v41  ;;  %v11300_v37 = vsub.f32 %v12966_v39, %v5212_v1 }
 0x350   : > { %12961 = vst [vmem:[#allocation22_spill] sm:$0xff] %v11291_v9  ;;  %12963 = vst [vmem:[#allocation17_spill] sm:$0xff] %v11294_v48  ;;  %v5473_v60 = vmul.f32 %v11291_v9, %v11291_v9  ;;  %v5474_v30 = vmul.f32 %v11294_v48, %v11294_v48  ;;  %v5475_v45 = vmul.f32 %v11297_v28, %v11297_v28 }
 0x351   : > { %12965 = vst [vmem:[#allocation20_spill] sm:$0xff] %v11297_v28  ;;  %12967 = vst [vmem:[#allocation116_spill] sm:$0xff] %v11300_v37  ;;  %v5476_v18 = vmul.f32 %v11300_v37, %v11300_v37 }
 0x352   : > { %v5757_v25 = vcombine.low %v5473_v60, %v5474_v30 }
 0x353   : > { %v5758_v17 = vcombine.low %v5475_v45, %v5476_v18  ;;  %v12968_v45 = vld [vmem:[#allocation25_spill] sm:$0xff] }
 0x354   : > { %v5765_v41 = vrot.slane %v5757_v25, %v12800_v10  ;;  %v12970_v25 = vld [vmem:[#allocation24_spill] sm:$0xff] }
 0x355   : > { %v5772_v52 = vrot.slane %v5758_v17, %v12800_v10 }
 0x357   : > { %v5773_v1 = vcombine.low %v5765_v41, %v5772_v52 }
 0x359   : > { %v5877_v22 = vsel %vm4767_vm10, %v5773_v1, 0.0 }
 0x35a   : > { %5878 = vadd.xlane.f32.xlu0 %v5877_v22 }
 0x368   : > { %v4809_v20 = vpop.xlane.xlu1 %4808 }
 0x369   : > { %v4830_v39 = vmul.f32 0.0625, %v4809_v20 }
 0x36b   : > { %v5219_v48 = vrot.slane %v4830_v39, %v10872_v51  ;;  %v5226_v9 = vrot.slane %v4830_v39, %v10881_v16  ;;  %v5233_v28 = vrot.slane %v4830_v39, %v10886_v56  ;;  %v5240_v37 = vrot.slane %v4830_v39, %v10893_v6 }
 0x36d   : > { %v11318_v60 = vsub.f32 %v10660_v50, %v5219_v48  ;;  %v11321_v30 = vsub.f32 %v10671_v33, %v5226_v9  ;;  %v11324_v18 = vsub.f32 %v12968_v45, %v5233_v28  ;;  %v11327_v17 = vsub.f32 %v12970_v25, %v5240_v37 }
 0x36f   : > { %12969 = vst [vmem:[#allocation28_spill] sm:$0xff] %v11324_v18  ;;  %12971 = vst [vmem:[#allocation13_spill] sm:$0xff] %v11327_v17  ;;  %v5477_v41 = vmul.f32 %v11318_v60, %v11318_v60  ;;  %v5478_v52 = vmul.f32 %v11321_v30, %v11321_v30  ;;  %v5479_v1 = vmul.f32 %v11324_v18, %v11324_v18 }
 0x370   : > { %v5480_v50 = vmul.f32 %v11327_v17, %v11327_v17 }
 0x371   : > { %v5774_v33 = vcombine.low %v5477_v41, %v5478_v52 }
 0x372   : > { %v5775_v9 = vcombine.low %v5479_v1, %v5480_v50 }
 0x373   : > { %v5782_v48 = vrot.slane %v5774_v33, %v12800_v10 }
 0x374   : > { %v5789_v28 = vrot.slane %v5775_v9, %v12800_v10 }
 0x376   : > { %v5790_v37 = vcombine.low %v5782_v48, %v5789_v28 }
 0x378   : > { %v5880_v22 = vsel %vm4767_vm10, %v5790_v37, 0.0 }
 0x379   : > { %5881 = vadd.xlane.f32.xlu1 %v5880_v22 }
 0x37d   : > { %v4812_v20 = vpop.xlane.xlu0 %4811 }
 0x37e   : > { %v4831_v39 = vmul.f32 0.0625, %v4812_v20 }
 0x380   : > { %v5247_v45 = vrot.slane %v4831_v39, %v10872_v51  ;;  %v5254_v25 = vrot.slane %v4831_v39, %v10881_v16  ;;  %v5261_v18 = vrot.slane %v4831_v39, %v10886_v56  ;;  %v5268_v17 = vrot.slane %v4831_v39, %v10893_v6 }
 0x382   : > { %v11345_v41 = vsub.f32 %v10774_v4, %v5247_v45  ;;  %v11348_v52 = vsub.f32 %v10784_v42, %v5254_v25  ;;  %v11351_v1 = vsub.f32 %v10787_v34, %v5261_v18  ;;  %v11354_v50 = vsub.f32 %v10767_v63, %v5268_v17 }
 0x384   : > { %v5481_v33 = vmul.f32 %v11345_v41, %v11345_v41  ;;  %v5482_v9 = vmul.f32 %v11348_v52, %v11348_v52  ;;  %v5483_v48 = vmul.f32 %v11351_v1, %v11351_v1  ;;  %v5484_v4 = vmul.f32 %v11354_v50, %v11354_v50 }
 0x386   : > { %v5791_v42 = vcombine.low %v5481_v33, %v5482_v9  ;;  %v5792_v28 = vcombine.low %v5483_v48, %v5484_v4 }
 0x388   : > { %v5799_v34 = vrot.slane %v5791_v42, %v12800_v10  ;;  %v5806_v18 = vrot.slane %v5792_v28, %v12800_v10 }
 0x38a   : > { %v5807_v63 = vcombine.low %v5799_v34, %v5806_v18 }
 0x38c   : > { %v5883_v17 = vsel %vm4767_vm10, %v5807_v63, 0.0 }
 0x38d   : > { %5884 = vadd.xlane.f32.xlu0 %v5883_v17 }
 0x391   : > { %v4815_v37 = vpop.xlane.xlu1 %4814 }
 0x392   : > { %v4832_v22 = vmul.f32 0.0625, %v4815_v37 }
 0x394   : > { %v5275_v20 = vrot.slane %v4832_v22, %v10872_v51  ;;  %v5282_v39 = vrot.slane %v4832_v22, %v10881_v16  ;;  %v5289_v45 = vrot.slane %v4832_v22, %v10886_v56  ;;  %v5296_v25 = vrot.slane %v4832_v22, %v10893_v6 }
 0x396   : > { %v11372_v33 = vsub.f32 %v10864_v54, %v5275_v20  ;;  %v11375_v9 = vsub.f32 %v10866_v59, %v5282_v39  ;;  %v11378_v48 = vsub.f32 %v10869_v27, %v5289_v45  ;;  %v11381_v4 = vsub.f32 %v10862_v35, %v5296_v25 }
 0x398   : > { %12972 = vst [vmem:[#allocation35_spill] sm:$0xff] %v11378_v48  ;;  %12973 = vst [vmem:[#allocation106_spill] sm:$0xff] %v11381_v4  ;;  %v5485_v42 = vmul.f32 %v11372_v33, %v11372_v33  ;;  %v5486_v28 = vmul.f32 %v11375_v9, %v11375_v9  ;;  %v5487_v34 = vmul.f32 %v11378_v48, %v11378_v48 }
 0x399   : > { %v5488_v54 = vmul.f32 %v11381_v4, %v11381_v4 }
 0x39a   : > { %v5808_v59 = vcombine.low %v5485_v42, %v5486_v28 }
 0x39b   : > { %v5809_v18 = vcombine.low %v5487_v34, %v5488_v54 }
 0x39c   : > { %v5843_v63 = vpop.xlane.xlu0 %5842  ;;  %v5816_v27 = vrot.slane %v5808_v59, %v12800_v10 }
 0x39d   : > { %v5823_v35 = vrot.slane %v5809_v18, %v12800_v10  ;;  %v5889_v17 = vmul.f32 0.0625, %v5843_v63 }
 0x39f   : > { %v5824_v37 = vcombine.low %v5816_v27, %v5823_v35  ;;  %v5905_v22 = vadd.f32 1e-06, %v5889_v17 }
 0x3a0   : > { %v5846_v39 = vpop.xlane.xlu1 %5845 }
 0x3a1   : > { %v5886_v20 = vsel %vm4767_vm10, %v5824_v37, 0.0  ;;  %7694 = vrsqrt.f32 %v5905_v22  ;;  %v5890_v45 = vmul.f32 0.0625, %v5846_v39 }
 0x3a2   : > { %5887 = vadd.xlane.f32.xlu1 %v5886_v20 }
 0x3a3   : > { %v5906_v25 = vadd.f32 1e-06, %v5890_v45 }
 0x3a4   : > { %v5849_v48 = vpop.xlane.xlu0 %5848 }
 0x3a5   : > { %7696 = vrsqrt.f32 %v5906_v25  ;;  %v5891_v4 = vmul.f32 0.0625, %v5849_v48 }
 0x3a7   : > { %v5907_v42 = vadd.f32 1e-06, %v5891_v4 }
 0x3a8   : > { %v5852_v28 = vpop.xlane.xlu1 %5851 }
 0x3a9   : > { %7698 = vrsqrt.f32 %v5907_v42  ;;  %v5892_v54 = vmul.f32 0.0625, %v5852_v28 }
 0x3ab   : > { %v7695_v34 = vpop.eup %7694  ;;  %v5908_v35 = vadd.f32 1e-06, %v5892_v54 }
 0x3ac   : > { %v5959_v59 = vrot.slane %v7695_v34, %v10872_v51  ;;  %v5966_v18 = vrot.slane %v7695_v34, %v10881_v16  ;;  %v5973_v63 = vrot.slane %v7695_v34, %v10886_v56  ;;  %v5980_v27 = vrot.slane %v7695_v34, %v10893_v6 }
 0x3ad   : > { %7700 = vrsqrt.f32 %v5908_v35 }
 0x3ae   : > { %v6465_v17 = vmul.f32 %v5959_v59, %v10910_v36  ;;  %v6466_v37 = vmul.f32 %v5966_v18, %v10913_v58  ;;  %v6467_v48 = vmul.f32 %v5973_v63, %v10916_v7  ;;  %v6468_v4 = vmul.f32 %v5980_v27, %v10920_v13  ;;  %v5855_v22 = vpop.xlane.xlu0 %5854 }
 0x3af   : > { %v7697_v20 = vpop.eup %7696  ;;  %v5893_v39 = vmul.f32 0.0625, %v5855_v22 }
 0x3b0   : > { %v6593_v45 = vcombine.low %v6465_v17, %v6466_v37  ;;  %v6594_v25 = vcombine.low %v6467_v48, %v6468_v4  ;;  %v5987_v42 = vrot.slane %v7697_v20, %v10872_v51  ;;  %v5994_v28 = vrot.slane %v7697_v20, %v10881_v16 }
 0x3b1   : > { %v6001_v34 = vrot.slane %v7697_v20, %v10886_v56  ;;  %v6008_v36 = vrot.slane %v7697_v20, %v10893_v6  ;;  %v5909_v54 = vadd.f32 1e-06, %v5893_v39 }
 0x3b2   : > { %v5858_v58 = vpop.xlane.xlu1 %5857  ;;  %v6469_v7 = vmul.f32 %v5987_v42, %v10925_v11  ;;  %v6470_v13 = vmul.f32 %v5994_v28, %v10952_v55  ;;  %v6601_v35 = vrot.slane %v6593_v45, %v12800_v10  ;;  %v6608_v17 = vrot.slane %v6594_v25, %v12800_v10 }
 0x3b3   : > { %v6471_v59 = vmul.f32 %v6001_v34, %v10955_v47  ;;  %v6472_v18 = vmul.f32 %v6008_v36, %v10958_v5  ;;  %v7699_v63 = vpop.eup %7698  ;;  %7702 = vrsqrt.f32 %v5909_v54  ;;  %v5894_v27 = vmul.f32 0.0625, %v5858_v58 }
 0x3b4   : > { %v6610_v37 = vcombine.low %v6469_v7, %v6470_v13  ;;  %v6015_v4 = vrot.slane %v7699_v63, %v10872_v51  ;;  %v6022_v22 = vrot.slane %v7699_v63, %v10881_v16  ;;  %v6029_v55 = vrot.slane %v7699_v63, %v10886_v56 }
 0x3b5   : > { %v6611_v48 = vcombine.low %v6471_v59, %v6472_v18  ;;  %v5910_v11 = vadd.f32 1e-06, %v5894_v27  ;;  %v6036_v47 = vrot.slane %v7699_v63, %v10893_v6  ;;  %v6609_v34 = vcombine.low %v6601_v35, %v6608_v17  ;;  %v12974_v17 = vld [vmem:[#allocation95_spill] sm:$0xff] }
 0x3b6   : > { %v6618_v5 = vrot.slane %v6610_v37, %v12800_v10  ;;  %v6473_v39 = vmul.f32 %v6015_v4, %v10965_v3  ;;  %v6474_v45 = vmul.f32 %v6022_v22, %v10984_v24  ;;  %v6475_v25 = vmul.f32 %v6029_v55, %v10987_v49 }
 0x3b7   : > { %v6625_v20 = vrot.slane %v6611_v48, %v12800_v10  ;;  %7704 = vrsqrt.f32 %v5910_v11  ;;  %v6476_v42 = vmul.f32 %v6036_v47, %v10990_v31  ;;  %v7701_v28 = vpop.eup %7700 }
 0x3b8   : > { %v6627_v54 = vcombine.low %v6473_v39, %v6474_v45  ;;  %v6043_v7 = vrot.slane %v7701_v28, %v10872_v51  ;;  %v6050_v13 = vrot.slane %v7701_v28, %v10881_v16  ;;  %v6057_v59 = vrot.slane %v7701_v28, %v10886_v56 }
 0x3b9   : > { %v6626_v36 = vcombine.low %v6618_v5, %v6625_v20  ;;  %v6064_v3 = vrot.slane %v7701_v28, %v10893_v6  ;;  %v6628_v63 = vcombine.low %v6475_v25, %v6476_v42 }
 0x3ba   : > { %v6477_v49 = vmul.f32 %v6043_v7, %v11006_v14  ;;  %v6478_v31 = vmul.f32 %v6050_v13, %v11017_v46  ;;  %v6479_v35 = vmul.f32 %v6057_v59, %v11021_v32  ;;  %v6635_v11 = vrot.slane %v6627_v54, %v12800_v10  ;;  %v12976_v13 = vld [vmem:[#allocation120_spill] sm:$0xff] }
 0x3bb   : > { %v6881_v24 = vpack.c.bf16 %v6626_v36, %v6609_v34  ;;  %v6480_v37 = vmul.f32 %v6064_v3, %v12974_v17  ;;  %v6642_v55 = vrot.slane %v6628_v63, %v12800_v10  ;;  %v12975_v34 = vld [vmem:[#allocation11_spill] sm:$0xff]  ;;  %v12977_v3 = vld [vmem:[#allocation12_spill] sm:$0xff] }
 0x3bc   : > { %v5861_v58 = vpop.xlane.xlu0 %5860  ;;  %v6644_v47 = vcombine.low %v6477_v49, %v6478_v31 }
 0x3bd   : > { %v5895_v18 = vmul.f32 0.0625, %v5861_v58  ;;  %v5864_v27 = vpop.xlane.xlu1 %5863  ;;  %7605 = vmatprep.mubr.msk.bf16.mxu1 %vm4767_vm10, %v6881_v24  ;;  %v7703_v22 = vpop.eup %7702  ;;  %v6645_v5 = vcombine.low %v6479_v35, %v6480_v37  ;;  %v6643_v58 = vcombine.low %v6635_v11, %v6642_v55  ;;  %v12978_v37 = vld [vmem:[#allocation5_spill] sm:$0xff]  ;;  %v12979_v11 = vld [vmem:[#allocation7_spill] sm:$0xff] }
 0x3be   : > { %v5896_v4 = vmul.f32 0.0625, %v5864_v27  ;;  %v6071_v14 = vrot.slane %v7703_v22, %v10872_v51  ;;  %v6652_v32 = vrot.slane %v6644_v47, %v12800_v10  ;;  %v6078_v45 = vrot.slane %v7703_v22, %v10881_v16  ;;  %v12980_v47 = vld [vmem:[#allocation142_spill] sm:$0xff] }
 0x3bf   : > { %v5911_v48 = vadd.f32 1e-06, %v5895_v18  ;;  %v6659_v39 = vrot.slane %v6645_v5, %v12800_v10  ;;  %v6085_v25 = vrot.slane %v7703_v22, %v10886_v56  ;;  %v6092_v28 = vrot.slane %v7703_v22, %v10893_v6 }
 0x3c0   : > { %v5912_v20 = vadd.f32 1e-06, %v5896_v4  ;;  %v5867_v46 = vpop.xlane.xlu0 %5866  ;;  %v6481_v36 = vmul.f32 %v6071_v14, %v12975_v34  ;;  %v6482_v59 = vmul.f32 %v6078_v45, %v12976_v13 }
 0x3c1   : > { %7706 = vrsqrt.f32 %v5911_v48  ;;  %v5897_v42 = vmul.f32 0.0625, %v5867_v46  ;;  %v7705_v54 = vpop.eup %7704  ;;  %v6660_v7 = vcombine.low %v6652_v32, %v6659_v39  ;;  %v6483_v18 = vmul.f32 %v6085_v25, %v12977_v3  ;;  %v12982_v46 = vld [vmem:[#allocation37_spill] sm:$0xff] }
 0x3c2   : > { %7708 = vrsqrt.f32 %v5912_v20  ;;  %v6099_v63 = vrot.slane %v7705_v54, %v10872_v51  ;;  %v6106_v27 = vrot.slane %v7705_v54, %v10881_v16  ;;  %v6113_v49 = vrot.slane %v7705_v54, %v10886_v56  ;;  %v12981_v20 = vld [vmem:[#allocation112_spill] sm:$0xff] }
 0x3c3   : > { %v5913_v24 = vadd.f32 1e-06, %v5897_v42  ;;  %v5870_v31 = vpop.xlane.xlu1 %5869  ;;  %v6882_v35 = vpack.c.bf16 %v6660_v7, %v6643_v58  ;;  %v6120_v17 = vrot.slane %v7705_v54, %v10893_v6  ;;  %v6484_v48 = vmul.f32 %v6092_v28, %v12978_v37 }
 0x3c4   : > { %v6661_v4 = vcombine.low %v6481_v36, %v6482_v59  ;;  %v5898_v22 = vmul.f32 0.0625, %v5870_v31  ;;  %v6485_v55 = vmul.f32 %v6099_v63, %v12979_v11  ;;  %v6486_v5 = vmul.f32 %v6106_v27, %v12980_v47 }
 0x3c5   : > { %7710 = vrsqrt.f32 %v5913_v24  ;;  %7606 = vmatmul.mubr.msk.bf16.vlgmr.msra.gmra.mrb[16].mxu1 %vm4767_vm10, %v6882_v35  ;;  %v6487_v14 = vmul.f32 %v6113_v49, %v12981_v20  ;;  %v6488_v32 = vmul.f32 %v6120_v17, %v12982_v46  ;;  %v6662_v39 = vcombine.low %v6483_v18, %v6484_v48 }
 0x3c6   : > { %v5914_v45 = vadd.f32 1e-06, %v5898_v22  ;;  %v6669_v25 = vrot.slane %v6661_v4, %v12800_v10  ;;  %v6678_v42 = vcombine.low %v6485_v55, %v6486_v5  ;;  %v12983_v22 = vld [vmem:[#allocation55_spill] sm:$0xff] }
 0x3c7   : > { %v6676_v28 = vrot.slane %v6662_v39, %v12800_v10  ;;  %v6679_v36 = vcombine.low %v6487_v14, %v6488_v32  ;;  %v12984_v5 = vld [vmem:[#allocation115_spill] sm:$0xff]  ;;  %v12985_v14 = vld [vmem:[#allocation49_spill] sm:$0xff] }
 0x3c8   : > { %v5873_v34 = vpop.xlane.xlu0 %5872  ;;  %7712 = vrsqrt.f32 %v5914_v45  ;;  %v6686_v7 = vrot.slane %v6678_v42, %v12800_v10 }
 0x3c9   : > { %v5899_v58 = vmul.f32 0.0625, %v5873_v34  ;;  %v6693_v13 = vrot.slane %v6679_v36, %v12800_v10  ;;  %v6677_v63 = vcombine.low %v6669_v25, %v6676_v28  ;;  %v12986_v25 = vld [vmem:[#allocation68_spill] sm:$0xff]  ;;  %v12987_v34 = vld [vmem:[#allocation15_spill] sm:$0xff] }
 0x3cb   : > { %v7707_v54 = vpop.eup %7706  ;;  %v5915_v24 = vadd.f32 1e-06, %v5899_v58  ;;  %v6694_v31 = vcombine.low %v6686_v7, %v6693_v13 }
 0x3cc   : > { %v6127_v59 = vrot.slane %v7707_v54, %v10872_v51  ;;  %v6134_v3 = vrot.slane %v7707_v54, %v10881_v16  ;;  %v7709_v18 = vpop.eup %7708  ;;  %v6141_v27 = vrot.slane %v7707_v54, %v10886_v56  ;;  %v6148_v49 = vrot.slane %v7707_v54, %v10893_v6 }
 0x3cd   : > { %v6155_v35 = vrot.slane %v7709_v18, %v10872_v51  ;;  %v6162_v17 = vrot.slane %v7709_v18, %v10881_v16  ;;  %v6169_v37 = vrot.slane %v7709_v18, %v10886_v56  ;;  %7714 = vrsqrt.f32 %v5915_v24 }
 0x3ce   : > { %v6176_v48 = vrot.slane %v7709_v18, %v10893_v6  ;;  %v6489_v4 = vmul.f32 %v6127_v59, %v11117_v40  ;;  %v6490_v11 = vmul.f32 %v6134_v3, %v12983_v22  ;;  %v6883_v55 = vpack.c.bf16 %v6694_v31, %v6677_v63  ;;  %v5876_v39 = vpop.xlane.xlu1 %5875 }
 0x3cf   : > { %v6491_v47 = vmul.f32 %v6141_v27, %v11144_v44  ;;  %v6492_v20 = vmul.f32 %v6148_v49, %v12984_v5  ;;  %v6493_v46 = vmul.f32 %v6155_v35, %v12985_v14  ;;  %v7711_v32 = vpop.eup %7710  ;;  %v6494_v45 = vmul.f32 %v6162_v17, %v11160_v19 }
 0x3d0   : > { %v6495_v42 = vmul.f32 %v6169_v37, %v12986_v25  ;;  %v6496_v28 = vmul.f32 %v6176_v48, %v12987_v34  ;;  %v6695_v36 = vcombine.low %v6489_v4, %v6490_v11  ;;  %v5900_v54 = vmul.f32 0.0625, %v5876_v39  ;;  %7609 = vmatprep.mubr.msk.bf16.mxu1 %vm4767_vm10, %v6883_v55 }
 0x3d1   : > { %v6696_v40 = vcombine.low %v6491_v47, %v6492_v20  ;;  %v6183_v58 = vrot.slane %v7711_v32, %v10872_v51  ;;  %v6190_v44 = vrot.slane %v7711_v32, %v10881_v16  ;;  %v6712_v13 = vcombine.low %v6493_v46, %v6494_v45 }
 0x3d2   : > { %v6703_v7 = vrot.slane %v6695_v36, %v12800_v10  ;;  %v6713_v59 = vcombine.low %v6495_v42, %v6496_v28  ;;  %v6197_v3 = vrot.slane %v7711_v32, %v10886_v56  ;;  %v5916_v19 = vadd.f32 1e-06, %v5900_v54  ;;  %v7713_v27 = vpop.eup %7712 }
 0x3d3   : > { %v6710_v18 = vrot.slane %v6696_v40, %v12800_v10  ;;  %v6204_v24 = vrot.slane %v7711_v32, %v10893_v6  ;;  %v6497_v63 = vmul.f32 %v6183_v58, %v11182_v2  ;;  %v6720_v49 = vrot.slane %v6712_v13, %v12800_v10  ;;  %v12988_v40 = vld [vmem:[#allocation14_spill] sm:$0xff] }
 0x3d4   : > { %v6727_v31 = vrot.slane %v6713_v59, %v12800_v10  ;;  %v6498_v35 = vmul.f32 %v6190_v44, %v11186_v0  ;;  %v6499_v17 = vmul.f32 %v6197_v3, %v11189_v8  ;;  %7716 = vrsqrt.f32 %v5916_v19 }
 0x3d5   : > { %v6711_v37 = vcombine.low %v6703_v7, %v6710_v18  ;;  %v6211_v48 = vrot.slane %v7713_v27, %v10872_v51  ;;  %v6218_v4 = vrot.slane %v7713_v27, %v10881_v16  ;;  %v6225_v11 = vrot.slane %v7713_v27, %v10886_v56 }
 0x3d6   : > { %v6728_v22 = vcombine.low %v6720_v49, %v6727_v31  ;;  %v6232_v2 = vrot.slane %v7713_v27, %v10893_v6  ;;  %v6500_v55 = vmul.f32 %v6204_v24, %v11193_v62  ;;  %v6729_v0 = vcombine.low %v6497_v63, %v6498_v35 }
 0x3d7   : > { %v6501_v47 = vmul.f32 %v6211_v48, %v11203_v29  ;;  %v6502_v5 = vmul.f32 %v6218_v4, %v11209_v43  ;;  %v7715_v20 = vpop.eup %7714  ;;  %v6503_v14 = vmul.f32 %v6225_v11, %v11212_v21 }
 0x3d8   : > { %v6884_v8 = vpack.c.bf16 %v6728_v22, %v6711_v37  ;;  %v6504_v46 = vmul.f32 %v6232_v2, %v11215_v26  ;;  %v6730_v32 = vcombine.low %v6499_v17, %v6500_v55  ;;  %v6737_v39 = vrot.slane %v6729_v0, %v12800_v10 }
 0x3d9   : > { %v6746_v45 = vcombine.low %v6501_v47, %v6502_v5  ;;  %v6239_v25 = vrot.slane %v7715_v20, %v10872_v51  ;;  %v6246_v42 = vrot.slane %v7715_v20, %v10881_v16  ;;  %v6253_v43 = vrot.slane %v7715_v20, %v10886_v56 }
 0x3da   : > { %7610 = vmatmul.mubr.msk.bf16.gmra.mrb[20].mxu1 %vm4767_vm10, %v6884_v8  ;;  %v6744_v62 = vrot.slane %v6730_v32, %v12800_v10  ;;  %v6747_v29 = vcombine.low %v6503_v14, %v6504_v46  ;;  %v6260_v34 = vrot.slane %v7715_v20, %v10893_v6  ;;  %v12989_v46 = vld [vmem:[#allocation22_spill] sm:$0xff] }
 0x3db   : > { %v6754_v21 = vrot.slane %v6746_v45, %v12800_v10  ;;  %v6505_v28 = vmul.f32 %v6239_v25, %v11228_v53  ;;  %v6506_v36 = vmul.f32 %v6246_v42, %v11233_v57  ;;  %v6507_v54 = vmul.f32 %v6253_v43, %v11236_v23  ;;  %v12991_v25 = vld [vmem:[#allocation20_spill] sm:$0xff] }
 0x3dc   : > { %v6761_v26 = vrot.slane %v6747_v29, %v12800_v10  ;;  %v6508_v58 = vmul.f32 %v6260_v34, %v12988_v40  ;;  %v6745_v44 = vcombine.low %v6737_v39, %v6744_v62  ;;  %v12990_v39 = vld [vmem:[#allocation17_spill] sm:$0xff]  ;;  %v12992_v62 = vld [vmem:[#allocation116_spill] sm:$0xff] }
 0x3dd   : > { %v6763_v63 = vcombine.low %v6505_v28, %v6506_v36 }
 0x3de   : > { %v6762_v7 = vcombine.low %v6754_v21, %v6761_v26  ;;  %v7717_v13 = vpop.eup %7716  ;;  %v6764_v53 = vcombine.low %v6507_v54, %v6508_v58 }
 0x3df   : > { %v6267_v3 = vrot.slane %v7717_v13, %v10872_v51  ;;  %v6274_v19 = vrot.slane %v7717_v13, %v10881_v16  ;;  %v6281_v18 = vrot.slane %v7717_v13, %v10886_v56  ;;  %v6288_v24 = vrot.slane %v7717_v13, %v10893_v6  ;;  %v12994_v13 = vld [vmem:[#allocation13_spill] sm:$0xff] }
 0x3e0   : > { %v6885_v59 = vpack.c.bf16 %v6762_v7, %v6745_v44  ;;  %v6771_v35 = vrot.slane %v6763_v63, %v12800_v10  ;;  %v6778_v17 = vrot.slane %v6764_v53, %v12800_v10  ;;  %v12993_v44 = vld [vmem:[#allocation28_spill] sm:$0xff] }
 0x3e1   : > { %v6509_v57 = vmul.f32 %v6267_v3, %v11260_v61  ;;  %v6510_v23 = vmul.f32 %v6274_v19, %v11263_v15  ;;  %v6511_v27 = vmul.f32 %v6281_v18, %v11266_v12  ;;  %v6512_v49 = vmul.f32 %v6288_v24, %v11269_v38 }
 0x3e2   : > { %7613 = vmatprep.mubr.msk.bf16.mxu1 %vm4767_vm10, %v6885_v59  ;;  %v6779_v22 = vcombine.low %v6771_v35, %v6778_v17 }
 0x3e3   : > { %v6780_v31 = vcombine.low %v6509_v57, %v6510_v23  ;;  %v6781_v37 = vcombine.low %v6511_v27, %v6512_v49 }
 0x3e5   : > { %v6788_v48 = vrot.slane %v6780_v31, %v12800_v10  ;;  %v6795_v4 = vrot.slane %v6781_v37, %v12800_v10 }
 0x3e7   : > { %v6796_v11 = vcombine.low %v6788_v48, %v6795_v4  ;;  %v5879_v61 = vpop.xlane.xlu0 %5878 }
 0x3e8   : > { %v5901_v15 = vmul.f32 0.0625, %v5879_v61 }
 0x3e9   : > { %v6886_v2 = vpack.c.bf16 %v6796_v11, %v6779_v22 }
 0x3ea   : > { %v5917_v12 = vadd.f32 1e-06, %v5901_v15 }
 0x3eb   : > { %7614 = vmatmul.mubr.msk.bf16.gmra.mrb[24].mxu1 %vm4767_vm10, %v6886_v2 }
 0x3ec   : > { %7718 = vrsqrt.f32 %v5917_v12 }
 0x3f6   : > { %v7719_v5 = vpop.eup %7718 }
 0x3f7   : > { %v6295_v0 = vrot.slane %v7719_v5, %v10872_v51  ;;  %v6302_v20 = vrot.slane %v7719_v5, %v10881_v16  ;;  %v6309_v8 = vrot.slane %v7719_v5, %v10886_v56  ;;  %v6316_v14 = vrot.slane %v7719_v5, %v10893_v6 }
 0x3f9   : > { %v6513_v32 = vmul.f32 %v6295_v0, %v12989_v46  ;;  %v6514_v45 = vmul.f32 %v6302_v20, %v12990_v39  ;;  %v6515_v42 = vmul.f32 %v6309_v8, %v12991_v25  ;;  %v6516_v29 = vmul.f32 %v6316_v14, %v12992_v62 }
 0x3fb   : > { %v6797_v34 = vcombine.low %v6513_v32, %v6514_v45  ;;  %v6798_v21 = vcombine.low %v6515_v42, %v6516_v29 }
 0x3fd   : > { %v6805_v3 = vrot.slane %v6797_v34, %v12800_v10  ;;  %v6812_v19 = vrot.slane %v6798_v21, %v12800_v10 }
 0x3ff   : > { %v6813_v23 = vcombine.low %v6805_v3, %v6812_v19 }
 0x406   : > { %v5882_v38 = vpop.xlane.xlu1 %5881 }
 0x407   : > { %v5902_v55 = vmul.f32 0.0625, %v5882_v38 }
 0x409   : > { %v5918_v47 = vadd.f32 1e-06, %v5902_v55 }
 0x40b   : > { %7720 = vrsqrt.f32 %v5918_v47 }
 0x415   : > { %v7721_v43 = vpop.eup %7720 }
 0x416   : > { %v6323_v26 = vrot.slane %v7721_v43, %v10872_v51  ;;  %v6330_v28 = vrot.slane %v7721_v43, %v10881_v16  ;;  %v6337_v36 = vrot.slane %v7721_v43, %v10886_v56  ;;  %v6344_v54 = vrot.slane %v7721_v43, %v10893_v6 }
 0x418   : > { %v6517_v40 = vmul.f32 %v6323_v26, %v11318_v60  ;;  %v6518_v58 = vmul.f32 %v6330_v28, %v11321_v30  ;;  %v6519_v7 = vmul.f32 %v6337_v36, %v12993_v44  ;;  %v6520_v59 = vmul.f32 %v6344_v54, %v12994_v13 }
 0x41a   : > { %v6814_v18 = vcombine.low %v6517_v40, %v6518_v58  ;;  %v6815_v24 = vcombine.low %v6519_v7, %v6520_v59  ;;  %v5885_v63 = vpop.xlane.xlu0 %5884 }
 0x41b   : > { %v5903_v60 = vmul.f32 0.0625, %v5885_v63 }
 0x41c   : > { %v6822_v53 = vrot.slane %v6814_v18, %v12800_v10  ;;  %v6829_v57 = vrot.slane %v6815_v24, %v12800_v10 }
 0x41d   : > { %v5919_v30 = vadd.f32 1e-06, %v5903_v60 }
 0x41e   : > { %v6830_v27 = vcombine.low %v6822_v53, %v6829_v57 }
 0x41f   : > { %7722 = vrsqrt.f32 %v5919_v30 }
 0x420   : > { %v6887_v49 = vpack.c.bf16 %v6830_v27, %v6813_v23 }
 0x422   : > { %7617 = vmatprep.mubr.msk.bf16.mxu1 %vm4767_vm10, %v6887_v49 }
 0x429   : > { %v7723_v37 = vpop.eup %7722 }
 0x42a   : > { %v6351_v48 = vrot.slane %v7723_v37, %v10872_v51  ;;  %v6358_v4 = vrot.slane %v7723_v37, %v10881_v16  ;;  %v6365_v22 = vrot.slane %v7723_v37, %v10886_v56  ;;  %v6372_v11 = vrot.slane %v7723_v37, %v10893_v6 }
 0x42c   : > { %v6521_v2 = vmul.f32 %v6351_v48, %v11345_v41  ;;  %v6522_v61 = vmul.f32 %v6358_v4, %v11348_v52  ;;  %v6523_v15 = vmul.f32 %v6365_v22, %v11351_v1  ;;  %v6524_v12 = vmul.f32 %v6372_v11, %v11354_v50  ;;  %v12995_v52 = vld [vmem:[#allocation35_spill] sm:$0xff]  ;;  %v12996_v1 = vld [vmem:[#allocation106_spill] sm:$0xff] }
 0x42e   : > { %v6831_v55 = vcombine.low %v6521_v2, %v6522_v61  ;;  %v6832_v47 = vcombine.low %v6523_v15, %v6524_v12 }
 0x42f   : > { %v5888_v31 = vpop.xlane.xlu1 %5887 }
 0x430   : > { %v5904_v35 = vmul.f32 0.0625, %v5888_v31  ;;  %v6839_v50 = vrot.slane %v6831_v55, %v12800_v10  ;;  %v6846_v39 = vrot.slane %v6832_v47, %v12800_v10 }
 0x432   : > { %v5920_v17 = vadd.f32 1e-06, %v5904_v35  ;;  %v6847_v25 = vcombine.low %v6839_v50, %v6846_v39 }
 0x434   : > { %7724 = vrsqrt.f32 %v5920_v17 }
 0x43e   : > { %v7725_v38 = vpop.eup %7724 }
 0x43f   : > { %v6379_v5 = vrot.slane %v7725_v38, %v10872_v51  ;;  %v6386_v0 = vrot.slane %v7725_v38, %v10881_v16  ;;  %v6393_v20 = vrot.slane %v7725_v38, %v10886_v56  ;;  %v6400_v8 = vrot.slane %v7725_v38, %v10893_v6 }
 0x441   : > { %v6525_v14 = vmul.f32 %v6379_v5, %v11372_v33  ;;  %v6526_v41 = vmul.f32 %v6386_v0, %v11375_v9  ;;  %v6527_v46 = vmul.f32 %v6393_v20, %v12995_v52  ;;  %v6528_v32 = vmul.f32 %v6400_v8, %v12996_v1  ;;  %v11565_v33 = vld [vmem:[%s11751_s5] ss:$0 sm:$0xff] }
 0x443   : > { %v6848_v45 = vcombine.low %v6525_v14, %v6526_v41  ;;  %v6849_v51 = vcombine.low %v6527_v46, %v6528_v32 }
 0x445   : > { %v6856_v16 = vrot.slane %v6848_v45, %v12800_v10  ;;  %v6863_v56 = vrot.slane %v6849_v51, %v12800_v10 }
 0x447   : > { %v6864_v6 = vcombine.low %v6856_v16, %v6863_v56 }
 0x449   : > { %v6888_v42 = vpack.c.bf16 %v6864_v6, %v6847_v25 }
 0x44b   : > { %7618 = vmatmul.mubr.msk.bf16.gmra.mrb[28].mxu1 %vm4767_vm10, %v6888_v42 }
 0x498   : > { %v7607_v9 = vpop.f32.mrb[16].mxu1 }
 0x499   : > { %v6971_v62 = vadd.f32 %v7607_v9, %v11565_v33  ;;  %v6962_v29 = vpop.f32.mrb[17].mxu1 }
 0x49a   : > { %v6963_v43 = vadd.f32 %v11565_v33, %v6962_v29  ;;  %v7608_v34 = vpop.f32.mrb[18].mxu1 }
 0x49b   : > { %v7043_v21 = vmul.f32 0.70710677, %v6971_v62  ;;  %v6974_v10 = vadd.f32 %v7608_v34, %v11565_v33  ;;  %v6965_v26 = vpop.f32.mrb[19].mxu1  ;;  %v7027_v7 = vmul.f32 0.5, %v6971_v62 }
 0x49c   : > { %v7041_v28 = vmul.f32 0.70710677, %v6963_v43  ;;  %v6966_v36 = vadd.f32 %v11565_v33, %v6965_v26  ;;  %v7025_v3 = vmul.f32 0.5, %v6963_v43 }
 0x49d   : > { %7726 = verf.f32 %v7043_v21  ;;  %v7044_v54 = vmul.f32 0.70710677, %v6974_v10  ;;  %v7028_v63 = vmul.f32 0.5, %v6974_v10 }
 0x49e   : > { %7728 = verf.f32 %v7041_v28  ;;  %v7042_v40 = vmul.f32 0.70710677, %v6966_v36  ;;  %v7026_v23 = vmul.f32 0.5, %v6966_v36 }
 0x49f   : > { %7730 = verf.f32 %v7044_v54 }
 0x4a0   : > { %7732 = verf.f32 %v7042_v40 }
 0x4a7   : > { %v7727_v58 = vpop.eup %7726 }
 0x4a8   : > { %v7729_v44 = vpop.eup %7728  ;;  %v7075_v13 = vadd.f32 1.0, %v7727_v58 }
 0x4a9   : > { %v7731_v59 = vpop.eup %7730  ;;  %v7073_v19 = vadd.f32 1.0, %v7729_v44 }
 0x4aa   : > { %v7733_v18 = vpop.eup %7732  ;;  %v11571_v24 = vmul.f32 %v7075_v13, %v7027_v7  ;;  %v7076_v53 = vadd.f32 1.0, %v7731_v59 }
 0x4ab   : > { %v11573_v57 = vmul.f32 %v7073_v19, %v7025_v3  ;;  %v7074_v27 = vadd.f32 1.0, %v7733_v18 }
 0x4ac   : > { %v11575_v49 = vmul.f32 %v7076_v53, %v7028_v63 }
 0x4ad   : > { %v7611_v60 = vpop.f32.mrb[20].mxu1  ;;  %v11578_v35 = vmul.f32 %v7074_v27, %v7026_v23 }
 0x4ae   : > { %v6987_v30 = vadd.f32 %v7611_v60, %v11565_v33  ;;  %v6978_v31 = vpop.f32.mrb[21].mxu1 }
 0x4af   : > { %v6979_v17 = vadd.f32 %v11565_v33, %v6978_v31  ;;  %v7612_v37 = vpop.f32.mrb[22].mxu1 }
 0x4b0   : > { %v7047_v48 = vmul.f32 0.70710677, %v6987_v30  ;;  %v6990_v4 = vadd.f32 %v7612_v37, %v11565_v33  ;;  %v6981_v22 = vpop.f32.mrb[23].mxu1  ;;  %v7031_v55 = vmul.f32 0.5, %v6987_v30 }
 0x4b1   : > { %v7045_v11 = vmul.f32 0.70710677, %v6979_v17  ;;  %v6982_v2 = vadd.f32 %v11565_v33, %v6981_v22  ;;  %v7029_v0 = vmul.f32 0.5, %v6979_v17 }
 0x4b2   : > { %7734 = verf.f32 %v7047_v48  ;;  %v7048_v61 = vmul.f32 0.70710677, %v6990_v4  ;;  %v7032_v41 = vmul.f32 0.5, %v6990_v4 }
 0x4b3   : > { %7736 = verf.f32 %v7045_v11  ;;  %v7046_v15 = vmul.f32 0.70710677, %v6982_v2  ;;  %v7030_v1 = vmul.f32 0.5, %v6982_v2 }
 0x4b4   : > { %7738 = verf.f32 %v7048_v61 }
 0x4b5   : > { %7740 = verf.f32 %v7046_v15 }
 0x4bc   : > { %v7735_v12 = vpop.eup %7734 }
 0x4bd   : > { %v7737_v38 = vpop.eup %7736  ;;  %v7079_v47 = vadd.f32 1.0, %v7735_v12 }
 0x4be   : > { %v7739_v5 = vpop.eup %7738  ;;  %v7077_v20 = vadd.f32 1.0, %v7737_v38  ;;  %v7615_v50 = vpop.f32.mrb[24].mxu1 }
 0x4bf   : > { %v7741_v8 = vpop.eup %7740  ;;  %v11583_v14 = vmul.f32 %v7079_v47, %v7031_v55  ;;  %v7080_v52 = vadd.f32 1.0, %v7739_v5  ;;  %v7003_v45 = vadd.f32 %v7615_v50, %v11565_v33  ;;  %v6994_v51 = vpop.f32.mrb[25].mxu1  ;;  %v7805_v50 = vmov (!%p7464_p7), 0.0  }
 0x4c0   : > { %v11585_v46 = vmul.f32 %v7077_v20, %v7029_v0  ;;  %v7078_v32 = vadd.f32 1.0, %v7741_v8  ;;  %v6995_v56 = vadd.f32 %v11565_v33, %v6994_v51  ;;  %v7616_v25 = vpop.f32.mrb[26].mxu1  ;;  %7110 = vst.msk [vmem:[%s7894_s18] sm:$0x1] (!%p7464_p7), %vm7109_vm11, %v7805_v50 }
 0x4c1   : > { %v11587_v39 = vmul.f32 %v7080_v52, %v7032_v41  ;;  %v7051_v6 = vmul.f32 0.70710677, %v7003_v45  ;;  %v7006_v42 = vadd.f32 %v7616_v25, %v11565_v33  ;;  %v6997_v9 = vpop.f32.mrb[27].mxu1  ;;  %v7035_v26 = vmul.f32 0.5, %v7003_v45 }
 0x4c2   : > { %v11590_v16 = vmul.f32 %v7078_v32, %v7030_v1  ;;  %v7049_v62 = vmul.f32 0.70710677, %v6995_v56  ;;  %v6998_v29 = vadd.f32 %v11565_v33, %v6997_v9  ;;  %v7033_v54 = vmul.f32 0.5, %v6995_v56 }
 0x4c3   : > { %7742 = verf.f32 %v7051_v6  ;;  %v7052_v43 = vmul.f32 0.70710677, %v7006_v42  ;;  %v7036_v7 = vmul.f32 0.5, %v7006_v42 }
 0x4c4   : > { %7744 = verf.f32 %v7049_v62  ;;  %v7050_v34 = vmul.f32 0.70710677, %v6998_v29  ;;  %v7034_v3 = vmul.f32 0.5, %v6998_v29 }
 0x4c5   : > { %7746 = verf.f32 %v7052_v43 }
 0x4c6   : > { %7748 = verf.f32 %v7050_v34 }
 0x4cd   : > { %v7743_v21 = vpop.eup %7742 }
 0x4ce   : > { %v7745_v10 = vpop.eup %7744  ;;  %v7083_v28 = vadd.f32 1.0, %v7743_v21 }
 0x4cf   : > { %v7747_v36 = vpop.eup %7746  ;;  %v7081_v40 = vadd.f32 1.0, %v7745_v10 }
 0x4d0   : > { %v7749_v58 = vpop.eup %7748  ;;  %v11595_v44 = vmul.f32 %v7083_v28, %v7035_v26  ;;  %v7084_v13 = vadd.f32 1.0, %v7747_v36 }
 0x4d1   : > { %v11597_v59 = vmul.f32 %v7081_v40, %v7033_v54  ;;  %v7082_v19 = vadd.f32 1.0, %v7749_v58 }
 0x4d2   : > { %v11599_v18 = vmul.f32 %v7084_v13, %v7036_v7 }
 0x4d3   : > { %v11601_v63 = vmul.f32 %v7082_v19, %v7034_v3 }
 0x51e   : > { %v7619_v53 = vpop.f32.mrb[28].mxu1 }
 0x51f   : > { %v7019_v23 = vadd.f32 %v7619_v53, %v11565_v33  ;;  %v7010_v27 = vpop.f32.mrb[29].mxu1 }
 0x520   : > { %v7011_v60 = vadd.f32 %v11565_v33, %v7010_v27  ;;  %v7620_v30 = vpop.f32.mrb[30].mxu1 }
 0x521   : > { %v7055_v31 = vmul.f32 0.70710677, %v7019_v23  ;;  %v7022_v17 = vadd.f32 %v7620_v30, %v11565_v33  ;;  %v7013_v37 = vpop.f32.mrb[31].mxu1  ;;  %v7039_v15 = vmul.f32 0.5, %v7019_v23 }
 0x522   : > { %v7053_v48 = vmul.f32 0.70710677, %v7011_v60  ;;  %v7014_v4 = vadd.f32 %v11565_v33, %v7013_v37  ;;  %v7037_v55 = vmul.f32 0.5, %v7011_v60 }
 0x523   : > { %7750 = verf.f32 %v7055_v31  ;;  %v7056_v22 = vmul.f32 0.70710677, %v7022_v17  ;;  %v7040_v20 = vmul.f32 0.5, %v7022_v17 }
 0x524   : > { %7752 = verf.f32 %v7053_v48  ;;  %v7054_v11 = vmul.f32 0.70710677, %v7014_v4  ;;  %v7038_v33 = vmul.f32 0.5, %v7014_v4 }
 0x525   : > { %7754 = verf.f32 %v7056_v22 }
 0x526   : > { %7756 = verf.f32 %v7054_v11 }
 0x52d   : > { %v7751_v2 = vpop.eup %7750  ;;  %7108 = sbr.rel (%p7464_p7) target bundleno = 1332 (0x534), region = 48 }
 0x52e   : > { %v7753_v61 = vpop.eup %7752  ;;  %v7087_v12 = vadd.f32 1.0, %v7751_v2 }
 0x52f   : > { %v7755_v38 = vpop.eup %7754  ;;  %v7085_v47 = vadd.f32 1.0, %v7753_v61 }
 0x530   : > { %v7757_v5 = vpop.eup %7756  ;;  %v11607_v0 = vmul.f32 %v7087_v12, %v7039_v15  ;;  %v7088_v8 = vadd.f32 1.0, %v7755_v38 }
 0x531   : > { %v11609_v41 = vmul.f32 %v7085_v47, %v7037_v55  ;;  %v7086_v52 = vadd.f32 1.0, %v7757_v5 }
 0x532   : > { %v11611_v1 = vmul.f32 %v7088_v8, %v7040_v20 }
 0x533   : > { %v11613_v32 = vmul.f32 %v7086_v52, %v7038_v33 }
 0x534 PF: > { %v7112_v45 = vmul.f32 %v11573_v57, %v11573_v57  ;;  %v7113_v51 = vmul.f32 %v11578_v35, %v11578_v35  ;;  %v7114_v56 = vmul.f32 %v11571_v24, %v11571_v24  ;;  %v7115_v25 = vmul.f32 %v11575_v49, %v11575_v49 }
 0x535   : > { %v7116_v6 = vmul.f32 %v11585_v46, %v11585_v46  ;;  %v7117_v42 = vmul.f32 %v11590_v16, %v11590_v16  ;;  %v7118_v9 = vmul.f32 %v11583_v14, %v11583_v14  ;;  %v7119_v10 = vmul.f32 %v11587_v39, %v11587_v39 }
 0x536   : > { %v7128_v62 = vsel %vm4767_vm10, %v7112_v45, 0.0  ;;  %v7129_v29 = vsel %vm4767_vm10, %v7113_v51, 0.0  ;;  %v7131_v43 = vsel %vm4767_vm10, %v7114_v56, 0.0  ;;  %v7133_v21 = vsel %vm4767_vm10, %v7115_v25, 0.0 }
 0x537   : > { %v7130_v34 = vadd.f32 %v7129_v29, %v7128_v62  ;;  %v7120_v26 = vmul.f32 %v11597_v59, %v11597_v59  ;;  %v7135_v36 = vsel %vm4767_vm10, %v7116_v6, 0.0  ;;  %v7137_v54 = vsel %vm4767_vm10, %v7117_v42, 0.0  ;;  %v7111_v42 = vld [vmem:[%s7894_s18] sm:$0x1] }
 0x538   : > { %v7139_v40 = vsel %vm4767_vm10, %v7118_v9, 0.0  ;;  %v7483_v58 = vpack.c.bf16 %v11573_v57, %v11573_v57  ;;  %vm7232_vm12 = vcmask 125952   ;;  %v7484_v13 = vpack.c.bf16 %v11578_v35, %v11578_v35 }
 0x539   : > { %v7132_v28 = vadd.f32 %v7131_v43, %v7130_v34  ;;  %v7485_v3 = vpack.c.bf16 %v11571_v24, %v11571_v24  ;;  %v7486_v19 = vpack.c.bf16 %v11575_v49, %v11575_v49  ;;  %v7487_v57 = vpack.c.bf16 %v11585_v46, %v11585_v46 }
 0x53a   : > { %7233 = vst.msk [vmem:[%s7902_s8] sm:$0xf] %vm7232_vm12, %v7483_v58  ;;  %v7488_v53 = vpack.c.bf16 %v11590_v16, %v11590_v16  ;;  %v7489_v23 = vpack.c.bf16 %v11583_v14, %v11583_v14  ;;  %7234 = vst.msk [vmem:[%s7902_s8 + $0x4] sm:$0xf] %vm7232_vm12, %v7484_v13  ;;  %v7490_v24 = vpack.c.bf16 %v11587_v39, %v11587_v39  ;;  %v7141_v17 = vsel %vm4767_vm10, %v7119_v10, 0.0 }
 0x53b   : > { %v7134_v7 = vadd.f32 %v7133_v21, %v7132_v28  ;;  %7235 = vst.msk [vmem:[%s7902_s8 + $0x8] sm:$0xf] %vm7232_vm12, %v7485_v3  ;;  %v7491_v49 = vpack.c.bf16 %v11597_v59, %v11597_v59  ;;  %v7492_v46 = vpack.c.bf16 %v11601_v63, %v11601_v63  ;;  %7236 = vst.msk [vmem:[%s7902_s8 + $0xc] sm:$0xf] %vm7232_vm12, %v7486_v19  ;;  %vm7166_vm13 = vcmask 122880  }
 0x53c   : > { %7237 = vst.msk [vmem:[%s7902_s8 + $0x10] sm:$0xf] %vm7232_vm12, %v7487_v57  ;;  %7238 = vst.msk [vmem:[%s7902_s8 + $0x14] sm:$0xf] %vm7232_vm12, %v7488_v53  ;;  %v7493_v14 = vpack.c.bf16 %v11595_v44, %v11595_v44  ;;  %v7494_v39 = vpack.c.bf16 %v11599_v18, %v11599_v18  ;;  %v7495_v16 = vpack.c.bf16 %v11609_v41, %v11609_v41 }
 0x53d   : > { %v7136_v35 = vadd.f32 %v7135_v36, %v7134_v7  ;;  %7239 = vst.msk [vmem:[%s7902_s8 + $0x18] sm:$0xf] %vm7232_vm12, %v7489_v23  ;;  %v7496_v59 = vpack.c.bf16 %v11613_v32, %v11613_v32  ;;  %7240 = vst.msk [vmem:[%s7902_s8 + $0x1c] sm:$0xf] %vm7232_vm12, %v7490_v24  ;;  %v7497_v60 = vpack.c.bf16 %v11607_v0, %v11607_v0 }
 0x53e   : > { %7241 = vst.msk [vmem:[%s7902_s8 + $0x20] sm:$0xf] %vm7232_vm12, %v7491_v49  ;;  %7242 = vst.msk [vmem:[%s7902_s8 + $0x24] sm:$0xf] %vm7232_vm12, %v7492_v46  ;;  %v7498_v30 = vpack.c.bf16 %v11611_v1, %v11611_v1  ;;  %v7121_v31 = vmul.f32 %v11601_v63, %v11601_v63  ;;  %v7122_v48 = vmul.f32 %v11595_v44, %v11595_v44  ;;  %v7143_v63 = vsel %vm4767_vm10, %v7120_v26, 0.0 }
 0x53f   : > { %v7138_v27 = vadd.f32 %v7137_v54, %v7136_v35  ;;  %7243 = vst.msk [vmem:[%s7902_s8 + $0x28] sm:$0xf] %vm7232_vm12, %v7493_v14  ;;  %7244 = vst.msk [vmem:[%s7902_s8 + $0x2c] sm:$0xf] %vm7232_vm12, %v7494_v39  ;;  %v7123_v22 = vmul.f32 %v11599_v18, %v11599_v18  ;;  %v7124_v61 = vmul.f32 %v11609_v41, %v11609_v41 }
 0x540   : > { %7245 = vst.msk [vmem:[%s7902_s8 + $0x30] sm:$0xf] %vm7232_vm12, %v7495_v16  ;;  %7246 = vst.msk [vmem:[%s7902_s8 + $0x34] sm:$0xf] %vm7232_vm12, %v7496_v59  ;;  %v7145_v11 = vsel %vm4767_vm10, %v7121_v31, 0.0  ;;  %v7147_v15 = vsel %vm4767_vm10, %v7122_v48, 0.0  ;;  %v7125_v38 = vmul.f32 %v11613_v32, %v11613_v32  ;;  %v7126_v47 = vmul.f32 %v11607_v0, %v11607_v0 }
 0x541   : > { %v7140_v37 = vadd.f32 %v7139_v40, %v7138_v27  ;;  %7247 = vst.msk [vmem:[%s7902_s8 + $0x38] sm:$0xf] %vm7232_vm12, %v7497_v60  ;;  %7248 = vst.msk [vmem:[%s7902_s8 + $0x3c] sm:$0xf] %vm7232_vm12, %v7498_v30  ;;  %v7149_v44 = vsel %vm4767_vm10, %v7123_v22, 0.0  ;;  %v7151_v18 = vsel %vm4767_vm10, %v7124_v61, 0.0  ;;  %v7127_v20 = vmul.f32 %v11611_v1, %v11611_v1 }
 0x542   : > { %v7153_v8 = vsel %vm4767_vm10, %v7125_v38, 0.0  ;;  %v7155_v33 = vsel %vm4767_vm10, %v7126_v47, 0.0 }
 0x543   : > { %v7142_v4 = vadd.f32 %v7141_v17, %v7140_v37  ;;  %v7157_v32 = vsel %vm4767_vm10, %v7127_v20, 0.0 }
 0x545   : > { %v7144_v2 = vadd.f32 %v7143_v63, %v7142_v4 }
 0x547   : > { %v7146_v12 = vadd.f32 %v7145_v11, %v7144_v2 }
 0x549   : > { %v7148_v55 = vadd.f32 %v7147_v15, %v7146_v12 }
 0x54b   : > { %v7150_v5 = vadd.f32 %v7149_v44, %v7148_v55 }
 0x54d   : > { %v7152_v41 = vadd.f32 %v7151_v18, %v7150_v5 }
 0x54f   : > { %v7154_v52 = vadd.f32 %v7153_v8, %v7152_v41 }
 0x551   : > { %v7156_v50 = vadd.f32 %v7155_v33, %v7154_v52 }
 0x553   : > { %v7158_v45 = vadd.f32 %v7157_v32, %v7156_v50 }
 0x555   : > { %v7159_v51 = vrot.slane %v7158_v45, 4 }
 0x557   : > { %v7160_v0 = vadd.f32 %v7159_v51, %v7158_v45 }
 0x559   : > { %v7161_v56 = vrot.slane %v7160_v0, 2 }
 0x55b   : > { %v7162_v25 = vadd.f32 %v7161_v56, %v7160_v0 }
 0x55d   : > { %v7163_v6 = vrot.slane %v7162_v25, 1 }
 0x55f   : > { %v7164_v9 = vadd.f32 %v7163_v6, %v7162_v25 }
 0x561   : > { %v7165_v1 = vadd.f32 %v7164_v9, %v7111_v42 }
 0x563   : > { %7167 = vst.msk [vmem:[%s7894_s18] sm:$0x1] %vm7166_vm13, %v7165_v1 }
 0x564 PF: > { %s18_s28 = sadd.s32 1, %s7796_s28   ;;  %s12997_s24 = smov %s7788_s26 }
 0x565   : > { %p15_p8 = scmp.ge.s32.totalorder %s18_s28, 6   ;;  %s12998_s25 = smov %s7792_s27 }
 0x566   : > { %s12999_s26 = smov %s13002_s29  ;;  %s13000_s27 = smov %s13006_s30 }
 0x567   :  { %17 = sbr.rel (!%p15_p8) target bundleno = 3 (0x3), region = 98 }

</bundles_post_ra>
